<compile_context>
chip_gen: v7x
topology: tpu7x:2x2x1
jax: 0.10.0
libtpu: 0.0.40
codegen_flags: <defaults>
</compile_context>

<pallas_src>
import functools

import jax
import jax.numpy as jnp
from jax.experimental import pallas as pl
from jax.experimental.pallas import tpu as pltpu


# Below this many output elements, pallas_call fixed overhead (launch + one
# pipeline step) dominates; XLA's fused sin/cos is strictly faster there.
_MIN_KERNEL_ELEMENTS = 100_000


def _pos_emb_kernel(pos_ref, inv_ref, phase_ref, out_ref):
    """Generic path.
    pos_ref:   [tile_t, 1]  f32 positions
    inv_ref:   [1, demb]    f32 = concat([inv_freq, inv_freq])
    phase_ref: [1, demb]    f32 = concat([0, pi/2])
    out_ref:   [tile_t, demb] out_dtype — ONE full-width lane-dense store."""
    ang = pos_ref[...] * inv_ref[...] + phase_ref[...]
    out_ref[...] = jnp.sin(ang).astype(out_ref.dtype)


def _pos_emb_arange_kernel(inv_ref, phase_ref, out_ref, *, tile_t):
    """Fast path for pos_seq == arange(T): positions generated in-kernel from a
    rank-1 (tile_t, 1) iota — no position DMA and no full-width iota."""
    base = (pl.program_id(0) * tile_t).astype(jnp.float32)
    row = base + jax.lax.broadcasted_iota(jnp.float32, (tile_t, 1), 0)
    ang = row * inv_ref[...] + phase_ref[...]
    out_ref[...] = jnp.sin(ang).astype(out_ref.dtype)


def _choose_tile_t(T, demb, itemsize=4, target_bytes=4 << 20, align=16):
    """Largest multiple-of-`align` row count with a ~<= 4 MiB output block,
    capped at 2048 rows, and capped near ceil(T/2) so the grid has >= 2 steps
    (needed for the 'parallel' axis to use both v7x TensorCores)."""
    rows = (target_bytes // max(1, demb * itemsize)) // align * align
    rows = max(align, min(rows, 2048))
    half_rows = -(-((T + 1) // 2) // align) * align      # round_up(ceil(T/2), align)
    if align <= half_rows < T:
        rows = min(rows, half_rows)
    return rows


def _reference_2d(pos_seq, inv_freq):
    sinusoid = (pos_seq.astype(jnp.float32)[:, None]
                * inv_freq.astype(jnp.float32)[None, :])
    return jnp.concatenate([jnp.sin(sinusoid), jnp.cos(sinusoid)], axis=1)


def positional_embedding(pos_seq, inv_freq, bsz=None, *,
                         assume_arange=False, tile_t=None,
                         out_dtype=jnp.float32):
    """pos_seq: [T], inv_freq: [demb//2]  ->  [1 or bsz, T, demb] out_dtype.

    Note: positions are handled in f32, so integer exactness is lost for
    T > 2^24 (irrelevant for speech-length sequences).
    `assume_arange=True` ignores the contents of pos_seq — only use it when
    pos_seq was constructed as arange(T)."""
    T = pos_seq.shape[0]
    half = inv_freq.shape[0]
    demb = 2 * half
    itemsize = jnp.dtype(out_dtype).itemsize

    if T * demb < _MIN_KERNEL_ELEMENTS:
        # Tiny shapes: skip the Pallas kernel entirely.
        pos_emb = _reference_2d(pos_seq, inv_freq).astype(out_dtype)
    else:
        if tile_t is None:
            tile_t = _choose_tile_t(T, demb, itemsize)
        grid = (pl.cdiv(T, tile_t),)   # partial last block is masked by Pallas

        inv_dup = jnp.concatenate([inv_freq, inv_freq]).reshape(1, demb)
        inv_dup = inv_dup.astype(jnp.float32)
        phase = jnp.concatenate(
            [jnp.zeros((half,), jnp.float32),
             jnp.full((half,), jnp.pi / 2, jnp.float32)]).reshape(1, demb)

        out_spec = pl.BlockSpec((tile_t, demb), lambda i: (i, 0))
        const_spec = pl.BlockSpec((1, demb), lambda i: (0, 0))  # DMA'd once, resident

        block_bytes = tile_t * demb * itemsize
        compiler_params = pltpu.CompilerParams(
            dimension_semantics=("parallel",),   # shard T tiles across TCs (v7x)
            vmem_limit_bytes=int(min(60 << 20, max(16 << 20, 4 * block_bytes))),
        )

        if assume_arange:
            pos_emb = pl.pallas_call(
                functools.partial(_pos_emb_arange_kernel, tile_t=tile_t),
                out_shape=jax.ShapeDtypeStruct((T, demb), out_dtype),
                grid=grid,
                in_specs=[const_spec, const_spec],
                out_specs=out_spec,
                compiler_params=compiler_params,
            )(inv_dup, phase)
        else:
            pos_2d = pos_seq.reshape(T, 1).astype(jnp.float32)
            pos_spec = pl.BlockSpec((tile_t, 1), lambda i: (i, 0))
            pos_emb = pl.pallas_call(
                _pos_emb_kernel,
                out_shape=jax.ShapeDtypeStruct((T, demb), out_dtype),
                grid=grid,
                in_specs=[pos_spec, const_spec, const_spec],
                out_specs=out_spec,
                compiler_params=compiler_params,
            )(pos_2d, inv_dup, phase)

    pos_emb = pos_emb[None, :, :]                      # [1, T, demb]
    if bsz is not None:
        # torch.expand is a zero-copy view; broadcast_to stays lazy under jit.
        # Materializing it costs bsz x the kernel's whole HBM write volume —
        # prefer consuming the [1, T, demb] result directly when possible.
        pos_emb = jnp.broadcast_to(pos_emb, (bsz, T, demb))
    return pos_emb


def make_inv_freq(demb):
    # inv_freq = 1 / 10000 ** (arange(0, demb, 2) / demb)
    return 1.0 / (10000.0 ** (jnp.arange(0.0, demb, 2.0) / demb))


def _reference(pos_seq, inv_freq, bsz=None):
    pos_emb = _reference_2d(pos_seq, inv_freq)[None]
    if bsz is not None:
        pos_emb = jnp.broadcast_to(pos_emb, (bsz,) + pos_emb.shape[1:])
    return pos_emb


if __name__ == "__main__":
    key = jax.random.PRNGKey(0)
    _ = jax.random.normal(key, ())  # determinism contract; positions themselves are deterministic

    demb = 384          # FastPitch default: half = 192 (the misaligned case the fused store fixes)
    bsz = 2
    # Ragged length (not a multiple of the tile) -> exercises cdiv grid + masked
    # partial last block.  300 * 384 = 115200 elements, above the Pallas threshold.
    seq_len = 300

    pos_seq = jnp.arange(seq_len, dtype=jnp.float32)
    inv_freq = make_inv_freq(demb)
    ref = _reference(pos_seq, inv_freq, bsz=bsz)

    # Tolerance note: the kernel computes cos via sin(x + pi/2); at angles ~300
    # the phase add rounds at ~1.5e-5 (half an f32 ulp of the argument), so we
    # test at 5e-4 rather than 1e-5.
    ATOL = 5e-4

    # Generic kernel path (arbitrary pos_seq supported), explicit tile to force
    # a 3-step grid with a 44-row partial last block.
    out = positional_embedding(pos_seq, inv_freq, bsz=bsz, tile_t=128)
    out = jax.block_until_ready(out)
    assert out.shape == (bsz, seq_len, demb), out.shape
    assert jnp.allclose(out, ref, atol=ATOL, rtol=ATOL), "generic kernel mismatch vs reference"

    # Fast path: positions generated in-kernel (no position DMA).
    out_fast = positional_embedding(pos_seq, inv_freq, bsz=bsz,
                                    assume_arange=True, tile_t=128)
    out_fast = jax.block_until_ready(out_fast)
    assert out_fast.shape == (bsz, seq_len, demb), out_fast.shape
    assert jnp.allclose(out_fast, ref, atol=ATOL, rtol=ATOL), "arange kernel mismatch vs reference"

    # Automatic tile chooser (>= 2 grid steps, cdiv masking).
    out_auto = jax.block_until_ready(positional_embedding(pos_seq, inv_freq))
    assert out_auto.shape == (1, seq_len, demb), out_auto.shape
    assert jnp.allclose(out_auto, ref[:1], atol=ATOL, rtol=ATOL), "auto-tile mismatch vs reference"

    # bf16 output path (compute in f32, cast at the store) — halves writeback bytes.
    out_bf16 = jax.block_until_ready(
        positional_embedding(pos_seq, inv_freq, out_dtype=jnp.bfloat16))
    assert out_bf16.dtype == jnp.bfloat16, out_bf16.dtype
    assert jnp.allclose(out_bf16.astype(jnp.float32), ref[:1], atol=1e-2, rtol=1e-2), \
        "bf16 kernel mismatch vs reference"

    # Tiny-shape fallback (below the Pallas threshold -> pure JAX path).
    small_pos = jnp.arange(8, dtype=jnp.float32)
    small_inv = make_inv_freq(32)
    small = jax.block_until_ready(positional_embedding(small_pos, small_inv, bsz=bsz))
    assert small.shape == (bsz, 8, 32), small.shape
    assert jnp.allclose(small, _reference(small_pos, small_inv, bsz=bsz), atol=1e-6, rtol=1e-6)

    print("KERNEL_OK")
</pallas_src>

<mosaic_0001>
module attributes {stable_mosaic.version = 11 : i64} {
  func.func @_pos_emb_kernel(%arg0: i32, %arg1: memref<128x1xf32, #tpu.memory_space<vmem>>, %arg2: memref<1x384xf32, #tpu.memory_space<vmem>>, %arg3: memref<1x384xf32, #tpu.memory_space<vmem>>, %arg4: memref<128x384xf32, #tpu.memory_space<vmem>>) attributes {dimension_semantics = [#tpu.dimension_semantics<parallel>], iteration_bounds = array<i64: 3>, scalar_prefetch = 0 : i64, scratch_operands = 0 : i64, tpu.core_type = #tpu.core_type<tc>, window_params = [{transform_indices = @transform_0, window_bounds = array<i64: 128, 1>}, {pipeline_mode = #tpu.pipeline_mode<synchronous>, transform_indices = @transform_1, window_bounds = array<i64: 1, 384>}, {pipeline_mode = #tpu.pipeline_mode<synchronous>, transform_indices = @transform_2, window_bounds = array<i64: 1, 384>}, {transform_indices = @transform_3, window_bounds = array<i64: 128, 384>}]} {
    %c0 = arith.constant 0 : index
    %c0_0 = arith.constant 0 : index
    %0 = vector.load %arg1[%c0, %c0_0] : memref<128x1xf32, #tpu.memory_space<vmem>>, vector<128x1xf32>
    %c0_1 = arith.constant 0 : index
    %c0_2 = arith.constant 0 : index
    %1 = vector.load %arg2[%c0_1, %c0_2] : memref<1x384xf32, #tpu.memory_space<vmem>>, vector<1x384xf32>
    %2 = vector.broadcast %0 : vector<128x1xf32> to vector<128x384xf32>
    %3 = vector.broadcast %1 : vector<1x384xf32> to vector<128x384xf32>
    %4 = arith.mulf %2, %3 : vector<128x384xf32>
    %c0_3 = arith.constant 0 : index
    %c0_4 = arith.constant 0 : index
    %5 = vector.load %arg3[%c0_3, %c0_4] : memref<1x384xf32, #tpu.memory_space<vmem>>, vector<1x384xf32>
    %6 = vector.broadcast %5 : vector<1x384xf32> to vector<128x384xf32>
    %7 = arith.addf %4, %6 : vector<128x384xf32>
    %8 = math.sin %7 : vector<128x384xf32>
    %c0_5 = arith.constant 0 : index
    %c0_6 = arith.constant 0 : index
    %9 = vector.load %arg4[%c0_5, %c0_6] : memref<128x384xf32, #tpu.memory_space<vmem>>, vector<128x384xf32>
    tpu.vector_store %arg4[%c0_5, %c0_6], %8 {strides = array<i32>} : memref<128x384xf32, #tpu.memory_space<vmem>>, vector<128x384xf32>,
    return
  }
  func.func @transform_0(%arg0: i32) -> (i32, i32) {
    %c0_i32 = arith.constant 0 : i32
    %c0_i32_0 = arith.constant 0 : i32
    return %arg0, %c0_i32 : i32, i32
  }
  func.func @transform_1(%arg0: i32) -> (i32, i32) {
    %c0_i32 = arith.constant 0 : i32
    %c0_i32_0 = arith.constant 0 : i32
    %c0_i32_1 = arith.constant 0 : i32
    return %c0_i32, %c0_i32_0 : i32, i32
  }
  func.func @transform_2(%arg0: i32) -> (i32, i32) {
    %c0_i32 = arith.constant 0 : i32
    %c0_i32_0 = arith.constant 0 : i32
    %c0_i32_1 = arith.constant 0 : i32
    return %c0_i32, %c0_i32_0 : i32, i32
  }
  func.func @transform_3(%arg0: i32) -> (i32, i32) {
    %c0_i32 = arith.constant 0 : i32
    %c0_i32_0 = arith.constant 0 : i32
    return %arg0, %c0_i32 : i32, i32
  }
}

</mosaic_0001>

<bundles_post_ra>
// kernel: tpu_custom_call.1
= control target key start
LH: loop header
LB: loop body
LE: loop exit
PB: predicated region body
PF: predicated region fallthrough
CT: control target
= control target key end

     0   :  { %8 = vsyncpa [#allocation3], 0  ;;  %s10617_s0 = inlined_call_operand.vmem [shape: f32[300,1], index: 0, kind: input, shape index: {}]   ;;  %s10618_s1 = inlined_call_operand.vmem [shape: f32[1,384], index: 1, kind: input, shape index: {}]   ;;  %s10619_s2 = inlined_call_operand.vmem [shape: f32[1,384], index: 2, kind: input, shape index: {}]   ;;  %s10620_s3 = inlined_call_operand.hbm [shape: f32[300,384], index: 3, kind: output, shape index: {}]  }
   0x1   :  { %10 = vsyncpa [#allocation3 + $0x1], 0  ;;  %s6283_s12 = smov 0   ;;  %s6285_s13 = smov 0  }
   0x2   :  { %s6287_s14 = smov 0   ;;  %s6289_s15 = smov 0  }
   0x3 LB: > { %s6304_s16 = sadd.s32 4294967295, %s6251_s15   ;;  %s5547_s17 = sadd.s32 4294967294, %s6251_s15   ;;  %s6251_s15 = sphi %s6289_s15, %s10825_s15   ;;  %s6247_s14 = sphi %s6287_s14, %s10824_s14   ;;  %s6243_s13 = sphi %s6285_s13, %s10823_s13   ;;  %s6239_s12 = sphi %s6283_s12, %s10822_s12  }
   0x4   : > { %s6308_s18 = sadd.s32 1, %s6251_s15   ;;  %s91_s19 = sadd.s32 1, %s6247_s14 }
   0x5   : > { %s88_s20 = ssub.s32 %s6251_s15, %s6308_s18  ;;  %p101_p0 = scmp.ne.s32.totalorder %s6247_s14, %s6243_s13 }
   0x6   : > { %p89_p1 = scmp.eq.s32.totalorder %s88_s20, 0  ;;  %p102_p2 = scmp.eq.s32.totalorder %s6304_s16, 2 }
   0x7   : > { %p107_p3 = scmp.ne.s32.totalorder %s6243_s13, %s6239_s12  ;;  %p108_p4 = scmp.eq.s32.totalorder %s5547_s17, 2 }
   0x8   : > { %s6319_s21 = scalar_select %p89_p1, %s6247_s14, %s91_s19  }
   0x9   : > { %p6321_p5 = por %p102_p2, %p101_p0  ;;  %p6325_p6 = por %p108_p4, %p107_p3 }
   0xa   : > { %p5550_p7 = scmp.ge.s32.totalorder %s6251_s15, 1  ;;  %p149_p8 = scmp.lt.s32.totalorder %s6251_s15, 4 }
   0xc   : > { %p150_p9 = pnand %p5550_p7, %p149_p8 }
   0xe   : > { %153 = sbr.rel (%p150_p9) target bundleno = 1426 (0x592), region = 32 }
  0x15   : > { %s6332_s24 = sshll.u32 %s6304_s16, 4  ;;  %v6253_v0 = vmov 0   ;;  %v295_v17 = vlaneseq  ;;  %v213_v20 = vld [vmem:[%s10618_s1] sm:$0x7]  ;;  %s174_s7 = sand.u32 1, %s6243_s13  }
  0x16   : > { %5996 = vset.pattern.permute.xlu1 %v6253_v0  ;;  %5995 = vset.pattern.permute.xlu0 %v6253_v0  ;;  %p182_p10 = scmp.lt.s32.totalorder %s6332_s24, 37  ;;  %v358_v23 = vld [vmem:[%s10619_s2] sm:$0x7]  ;;  %s6744_s8 = smul.u32 384, %s174_s7 }
  0x17   : > { %v296_v18 = vshrl.u32 %v295_v17, 7  ;;  %s10556_s10 = scalar_lea.sflag [#allocation3], %s174_s7  ;;  %s5472_s11 = ssub.s32 (%p6321_p5), 38, %s6332_s24 }
  0x18   : > { %s183_s25 = scalar_select %p182_p10, %s6332_s24, 37 }
  0x19   : > { %v297_v19 = vsub.s32 0, %v296_v18  ;;  %v301_v21 = vsub.s32 1, %v296_v18  ;;  %v305_v22 = vsub.s32 2, %v296_v18  ;;  %s6771_s9 = scalar_lea.vmem [#allocation2], %s6744_s8  ;;  %p5473_p11 = scmp.lt.s32.totalorder (%p6321_p5), %s5472_s11, 16 }
  0x1a   : > { %s5552_s26 = sshll.u32 %s183_s25, 3 }
  0x1b   : > { %s185_s29 = scalar_lea.vmem %s10617_s0, %s5552_s26  ;;  %v6345_v24 = vrot.slane %v213_v20, %v297_v19  ;;  %v6347_v25 = vrot.slane %v213_v20, %v301_v21  ;;  %v6349_v26 = vrot.slane %v213_v20, %v305_v22  ;;  %v6351_v27 = vrot.slane %v358_v23, %v297_v19 }
  0x1c   : > { %v199_v1 = vld [vmem:[%s185_s29 + $0x10] sm:$0xff]  ;;  %v197_v2 = vld [vmem:[%s185_s29] sm:$0xff]  ;;  %v200_v3 = vld [vmem:[%s185_s29 + $0x18] sm:$0xff]  ;;  %v6353_v30 = vrot.slane %v358_v23, %v301_v21  ;;  %v6355_v31 = vrot.slane %v358_v23, %v305_v22 }
  0x1d   : > { %226 = vperm.xlu1 %5996, %v199_v1   ;;  %216 = vperm.xlu0 %5995, %v197_v2   ;;  %v198_v4 = vld [vmem:[%s185_s29 + $0x8] sm:$0xff]  ;;  %v201_v6 = vld [vmem:[%s185_s29 + $0x20] sm:$0xff]  ;;  %v204_v7 = vld [vmem:[%s185_s29 + $0x38] sm:$0xff] }
  0x1e   : > { %v202_v5 = vld [vmem:[%s185_s29 + $0x28] sm:$0xff]  ;;  %v203_v8 = vld [vmem:[%s185_s29 + $0x30] sm:$0xff]  ;;  %v205_v10 = vld [vmem:[%s185_s29 + $0x40] sm:$0xff] }
  0x1f   : > { %v206_v9 = vld [vmem:[%s185_s29 + $0x48] sm:$0xff]  ;;  %v208_v11 = vld [vmem:[%s185_s29 + $0x58] sm:$0xff]  ;;  %v207_v12 = vld [vmem:[%s185_s29 + $0x50] sm:$0xff] }
  0x20   : > { %v210_v13 = vld [vmem:[%s185_s29 + $0x68] sm:$0xff]  ;;  %v209_v14 = vld [vmem:[%s185_s29 + $0x60] sm:$0xff]  ;;  %v212_v15 = vld [vmem:[%s185_s29 + $0x78] sm:$0xff] }
  0x21   : > { %231 = vperm.xlu1 %5996, %v200_v3   ;;  %221 = vperm.xlu0 %5995, %v198_v4   ;;  %v211_v16 = vld [vmem:[%s185_s29 + $0x70] sm:$0xff] }
  0x25   : > { %241 = vperm.xlu1 %5996, %v202_v5   ;;  %236 = vperm.xlu0 %5995, %v201_v6  }
  0x29   : > { %251 = vperm.xlu1 %5996, %v204_v7   ;;  %246 = vperm.xlu0 %5995, %v203_v8  }
  0x2d   : > { %261 = vperm.xlu1 %5996, %v206_v9   ;;  %256 = vperm.xlu0 %5995, %v205_v10  }
  0x31   : > { %271 = vperm.xlu1 %5996, %v208_v11   ;;  %266 = vperm.xlu0 %5995, %v207_v12  }
  0x35   : > { %281 = vperm.xlu1 %5996, %v210_v13   ;;  %276 = vperm.xlu0 %5995, %v209_v14  }
  0x39   : > { %291 = vperm.xlu1 %5996, %v212_v15   ;;  %286 = vperm.xlu0 %5995, %v211_v16  }
  0x9c   : > { %v227_v28 = vpop.permute.xlu1 %226  ;;  %v217_v29 = vpop.permute.xlu0 %216 }
  0x9d   : > { %v310_v32 = vmul.f32 %v6345_v24, %v217_v29  ;;  %v316_v33 = vmul.f32 %v6345_v24, %v227_v28  ;;  %v317_v34 = vmul.f32 %v6347_v25, %v227_v28  ;;  %v318_v35 = vmul.f32 %v6349_v26, %v227_v28 }
  0x9e   : > { %v311_v6 = vmul.f32 %v6347_v25, %v217_v29  ;;  %v6443_v28 = vmul.f32 %v6349_v26, %v217_v29 }
  0x9f   : > { %v6362_v36 = vadd.f32 %v6351_v27, %v316_v33  ;;  %v6365_v39 = vadd.f32 %v6351_v27, %v310_v32  ;;  %v6368_v40 = vadd.f32 %v6353_v30, %v317_v34  ;;  %v6371_v41 = vadd.f32 %v6355_v31, %v318_v35 }
  0xa0   : > { %v232_v37 = vpop.permute.xlu1 %231  ;;  %v222_v38 = vpop.permute.xlu0 %221 }
  0xa1   : > { %v313_v42 = vmul.f32 %v6345_v24, %v222_v38  ;;  %v314_v43 = vmul.f32 %v6347_v25, %v222_v38  ;;  %v315_v44 = vmul.f32 %v6349_v26, %v222_v38  ;;  %v319_v45 = vmul.f32 %v6345_v24, %v232_v37 }
  0xa2   : > { %v320_v46 = vmul.f32 %v6347_v25, %v232_v37  ;;  %v321_v47 = vmul.f32 %v6349_v26, %v232_v37  ;;  %v426_v56 = vand.u32 2139095040, %v6365_v39  ;;  %v10621_v16 = vand.u32 2147483647, %v6365_v39 }
  0xa3   : > { %v6380_v48 = vadd.f32 %v6351_v27, %v313_v42  ;;  %v6383_v49 = vadd.f32 %v6353_v30, %v314_v43  ;;  %v6386_v50 = vadd.f32 %v6355_v31, %v315_v44  ;;  %v6389_v51 = vadd.f32 %v6351_v27, %v319_v45 }
  0xa4   : > { %v242_v52 = vpop.permute.xlu1 %241  ;;  %v237_v53 = vpop.permute.xlu0 %236  ;;  %v6392_v54 = vadd.f32 %v6353_v30, %v320_v46  ;;  %v6395_v55 = vadd.f32 %v6355_v31, %v321_v47  ;;  %v427_v63 = vshrl.u32 %v426_v56, 23  ;;  %v6459_v43 = vand.u32 8388607, %v10621_v16 }
  0xa5   : > { %v322_v57 = vmul.f32 %v6345_v24, %v237_v53  ;;  %v323_v58 = vmul.f32 %v6347_v25, %v237_v53  ;;  %v324_v59 = vmul.f32 %v6349_v26, %v237_v53  ;;  %v325_v60 = vmul.f32 %v6345_v24, %v242_v52 }
  0xa6   : > { %v326_v61 = vmul.f32 %v6347_v25, %v242_v52  ;;  %v327_v62 = vmul.f32 %v6349_v26, %v242_v52  ;;  %v5553_v9 = vadd.s32 4294967169, %v427_v63  ;;  %vm425_vm12 = vcmp.lt.s32.totalorder %v6365_v39, 0 }
  0xa7   : > { %v6405_v0 = vadd.f32 %v6351_v27, %v322_v57  ;;  %v6408_v1 = vadd.f32 %v6353_v30, %v323_v58  ;;  %v6411_v2 = vadd.f32 %v6355_v31, %v324_v59  ;;  %v6414_v3 = vadd.f32 %v6351_v27, %v325_v60 }
  0xa8   : > { %v252_v4 = vpop.permute.xlu1 %251  ;;  %v247_v5 = vpop.permute.xlu0 %246  ;;  %v6418_v7 = vadd.f32 %v6353_v30, %v326_v61  ;;  %v6421_v8 = vadd.f32 %v6355_v31, %v327_v62  ;;  %v433_v17 = vadd.s32 1, %v5553_v9  ;;  %v6474_v57 = vadd.f32 %v6353_v30, %v311_v6 }
  0xa9   : > { %v328_v10 = vmul.f32 %v6345_v24, %v247_v5  ;;  %v329_v11 = vmul.f32 %v6347_v25, %v247_v5  ;;  %v330_v12 = vmul.f32 %v6349_v26, %v247_v5  ;;  %v331_v13 = vmul.f32 %v6345_v24, %v252_v4 }
  0xaa   : > { %v332_v14 = vmul.f32 %v6347_v25, %v252_v4  ;;  %v333_v15 = vmul.f32 %v6349_v26, %v252_v4  ;;  %vm434_vm0 = vcmp.gt.s32.totalorder %v433_v17, 0  ;;  %v431_v9 = vor.u32 8388608, %v6459_v43 }
  0xab   : > { %v6431_v18 = vadd.f32 %v6351_v27, %v328_v10  ;;  %v6434_v19 = vadd.f32 %v6353_v30, %v329_v11  ;;  %v6437_v20 = vadd.f32 %v6355_v31, %v330_v12  ;;  %v6440_v21 = vadd.f32 %v6351_v27, %v331_v13 }
  0xac   : > { %v262_v22 = vpop.permute.xlu1 %261  ;;  %v257_v23 = vpop.permute.xlu0 %256  ;;  %v6446_v32 = vadd.f32 %v6353_v30, %v332_v14  ;;  %v6449_v33 = vadd.f32 %v6355_v31, %v333_v15  ;;  %v435_v44 = vsel %vm434_vm0, %v433_v17, 0 }
  0xad   : > { %10663 = vst [vmem:[#allocation5_spill] sm:$0xff] %v6440_v21  ;;  %v334_v34 = vmul.f32 %v6345_v24, %v257_v23  ;;  %v335_v35 = vmul.f32 %v6347_v25, %v257_v23  ;;  %v336_v37 = vmul.f32 %v6349_v26, %v257_v23  ;;  %v337_v38 = vmul.f32 %v6345_v24, %v262_v22 }
  0xae   : > { %10664 = vst [vmem:[#allocation6_spill] sm:$0xff] %v6446_v32  ;;  %10665 = vst [vmem:[#allocation7_spill] sm:$0xff] %v6449_v33  ;;  %v338_v42 = vmul.f32 %v6347_v25, %v262_v22  ;;  %v339_v29 = vmul.f32 %v6349_v26, %v262_v22  ;;  %v437_v60 = vand.u32 31, %v435_v44 }
  0xaf   : > { %v6462_v45 = vadd.f32 %v6351_v27, %v334_v34  ;;  %v6465_v46 = vadd.f32 %v6353_v30, %v335_v35  ;;  %v6468_v47 = vadd.f32 %v6355_v31, %v336_v37  ;;  %v6471_v52 = vadd.f32 %v6351_v27, %v337_v38 }
  0xb0   : > { %v272_v53 = vpop.permute.xlu1 %271  ;;  %v267_v56 = vpop.permute.xlu0 %266  ;;  %v6477_v58 = vadd.f32 %v6353_v30, %v338_v42  ;;  %v6480_v59 = vadd.f32 %v6355_v31, %v339_v29  ;;  %v438_v10 = vsub.s32 32, %v437_v60  ;;  %v10622_v34 = vmov 683565275  }
  0xb1   : > { %10666 = vst [vmem:[#allocation8_spill] sm:$0xff] %v6462_v45  ;;  %10667 = vst [vmem:[#allocation9_spill] sm:$0xff] %v6465_v46  ;;  %v340_v61 = vmul.f32 %v6345_v24, %v267_v56  ;;  %v341_v62 = vmul.f32 %v6347_v25, %v267_v56  ;;  %v342_v63 = vmul.f32 %v6349_v26, %v267_v56  ;;  %v10624_v37 = vmov 2475754826  }
  0xb2   : > { %10668 = vst [vmem:[#allocation10_spill] sm:$0xff] %v6468_v47  ;;  %10669 = vst [vmem:[#allocation11_spill] sm:$0xff] %v6471_v52  ;;  %v343_v4 = vmul.f32 %v6345_v24, %v272_v53  ;;  %v344_v5 = vmul.f32 %v6347_v25, %v272_v53  ;;  %v345_v6 = vmul.f32 %v6349_v26, %v272_v53 }
  0xb3   : > { %10670 = vst [vmem:[#allocation12_spill] sm:$0xff] %v6477_v58  ;;  %10671 = vst [vmem:[#allocation13_spill] sm:$0xff] %v6480_v59  ;;  %v6490_v11 = vadd.f32 %v6351_v27, %v340_v61  ;;  %v6493_v12 = vadd.f32 %v6353_v30, %v341_v62  ;;  %v6496_v13 = vadd.f32 %v6355_v31, %v342_v63  ;;  %v6515_v62 = vshrl.u32 %v435_v44, 5 }
  0xb4   : > { %v6499_v14 = vadd.f32 %v6351_v27, %v343_v4  ;;  %v282_v15 = vpop.permute.xlu1 %281  ;;  %v277_v17 = vpop.permute.xlu0 %276  ;;  %v6502_v22 = vadd.f32 %v6353_v30, %v344_v5  ;;  %v6505_v23 = vadd.f32 %v6355_v31, %v345_v6  ;;  %v440_v35 = vshll.u32 %v10622_v34, %v437_v60 }
  0xb5   : > { %10672 = vst [vmem:[#allocation14_spill] sm:$0xff] %v6490_v11  ;;  %10673 = vst [vmem:[#allocation15_spill] sm:$0xff] %v6493_v12  ;;  %v441_v38 = vshrl.u32 %v10624_v37, %v438_v10  ;;  %v346_v42 = vmul.f32 %v6345_v24, %v277_v17  ;;  %v347_v29 = vmul.f32 %v6347_v25, %v277_v17  ;;  %vm455_vm1 = vcmp.lt.s32.totalorder %v6515_v62, 1 }
  0xb6   : > { %10674 = vst [vmem:[#allocation16_spill] sm:$0xff] %v6496_v13  ;;  %10675 = vst [vmem:[#allocation17_spill] sm:$0xff] %v6499_v14  ;;  %v348_v43 = vmul.f32 %v6349_v26, %v277_v17  ;;  %v349_v53 = vmul.f32 %v6345_v24, %v282_v15  ;;  %v350_v56 = vmul.f32 %v6347_v25, %v282_v15  ;;  %vm458_vm2 = vcmp.lt.s32.totalorder %v6515_v62, 4 }
  0xb7   : > { %10676 = vst [vmem:[#allocation18_spill] sm:$0xff] %v6502_v22  ;;  %10677 = vst [vmem:[#allocation19_spill] sm:$0xff] %v6505_v23  ;;  %v351_v61 = vmul.f32 %v6349_v26, %v282_v15  ;;  %v442_v63 = vor.u32 %v441_v38, %v440_v35  ;;  %v6518_v4 = vadd.f32 %v6351_v27, %v346_v42  ;;  %v10684_v15 = vmov 2475754826  }
  0xb8   : > { %v6521_v5 = vadd.f32 %v6353_v30, %v347_v29  ;;  %v6524_v6 = vadd.f32 %v6355_v31, %v348_v43  ;;  %v6527_v17 = vadd.f32 %v6351_v27, %v349_v53  ;;  %v292_v16 = vpop.permute.xlu1 %291  ;;  %v287_v34 = vpop.permute.xlu0 %286  ;;  %v6530_v37 = vadd.f32 %v6353_v30, %v350_v56 }
  0xb9   : > { %10678 = vst [vmem:[#allocation20_spill] sm:$0xff] %v6518_v4  ;;  %v6533_v44 = vadd.f32 %v6355_v31, %v351_v61  ;;  %v443_v35 = vshll.u32 %v10684_v15, %v437_v60  ;;  %v10633_v38 = vmov 2131351028   ;;  %v352_v29 = vmul.f32 %v6345_v24, %v287_v34 }
  0xba   : > { %10679 = vst [vmem:[#allocation21_spill] sm:$0xff] %v6521_v5  ;;  %10680 = vst [vmem:[#allocation22_spill] sm:$0xff] %v6524_v6  ;;  %v444_v42 = vshrl.u32 %v10633_v38, %v438_v10  ;;  %v353_v43 = vmul.f32 %v6347_v25, %v287_v34  ;;  %v354_v53 = vmul.f32 %v6349_v26, %v287_v34  ;;  %vm457_vm3 = vcmp.lt.s32.totalorder %v6515_v62, 3 }
  0xbb   : > { %10681 = vst [vmem:[#allocation23_spill] sm:$0xff] %v6527_v17  ;;  %10682 = vst [vmem:[#allocation24_spill] sm:$0xff] %v6530_v37  ;;  %v355_v17 = vmul.f32 %v6345_v24, %v292_v16  ;;  %v356_v6 = vmul.f32 %v6347_v25, %v292_v16  ;;  %v357_v56 = vmul.f32 %v6349_v26, %v292_v16  ;;  %vm456_vm4 = vcmp.lt.s32.totalorder %v6515_v62, 2 }
  0xbc   : > { %10683 = vst [vmem:[#allocation25_spill] sm:$0xff] %v6533_v44  ;;  %v446_v61 = vshll.u32 %v10633_v38, %v437_v60  ;;  %v10641_v44 = vmov 2102212464   ;;  %v6546_v5 = vadd.f32 %v6351_v27, %v352_v29  ;;  %v6549_v4 = vadd.f32 %v6353_v30, %v353_v43 }
  0xbd   : > { %v447_v37 = vshrl.u32 %v10641_v44, %v438_v10  ;;  %v6552_v23 = vadd.f32 %v6355_v31, %v354_v53  ;;  %v6555_v24 = vadd.f32 %v6351_v27, %v355_v17  ;;  %v6558_v25 = vadd.f32 %v6353_v30, %v356_v6 }
  0xbe   : > { %10685 = vst [vmem:[#allocation26_spill] sm:$0xff] %v6546_v5  ;;  %10686 = vst [vmem:[#allocation27_spill] sm:$0xff] %v6549_v4  ;;  %v6561_v26 = vadd.f32 %v6355_v31, %v357_v56  ;;  %v445_v16 = vor.u32 %v444_v42, %v443_v35  ;;  %v449_v29 = vshll.u32 %v10641_v44, %v437_v60  ;;  %v10639_v38 = vmov 920167782  }
  0xbf   : > { %10687 = vst [vmem:[#allocation28_spill] sm:$0xff] %v6552_v23  ;;  %10688 = vst [vmem:[#allocation29_spill] sm:$0xff] %v6555_v24  ;;  %v448_v34 = vor.u32 %v447_v37, %v446_v61  ;;  %v450_v43 = vshrl.u32 %v10639_v38, %v438_v10  ;;  %v452_v4 = vshll.u32 %v10639_v38, %v437_v60  ;;  %v10637_v53 = vmov 1326507024  }
  0xc0   : > { %10689 = vst [vmem:[#allocation30_spill] sm:$0xff] %v6558_v25  ;;  %10690 = vst [vmem:[#allocation31_spill] sm:$0xff] %v6561_v26  ;;  %v453_v23 = vshrl.u32 %v10637_v53, %v438_v10  ;;  %v6569_v27 = vadd.f32 %v6355_v31, %v6443_v28  ;;  %v471_v30 = vshll.u32 %v431_v9, 8  ;;  %v10691_v37 = vmov 683565275  }
  0xc1   : > { %v451_v17 = vor.u32 %v450_v43, %v449_v29  ;;  %v439_v42 = vshrl.u32 %v10691_v37, %v438_v10  ;;  %v460_v56 = vsel %vm458_vm2, %v448_v34, 2102212464  ;;  %v463_v60 = vsel %vm455_vm1, %v442_v63, %v445_v16 }
  0xc2   : > { %v454_v35 = vor.u32 %v453_v23, %v452_v4  ;;  %v467_v61 = vsel %vm455_vm1, %v445_v16, %v448_v34  ;;  %v530_v31 = vand.u32 2139095040, %v6474_v57  ;;  %v461_v4 = vsel %vm457_vm3, %v445_v16, %v460_v56 }
  0xc3   : > { %v464_v53 = vsel %vm458_vm2, %v451_v17, 920167782  ;;  %v459_v28 = vsel %vm455_vm1, %v439_v42, %v442_v63  ;;  %v634_v5 = vand.u32 2139095040, %v6569_v27  ;;  %v10692_v63 = vand.u32 2147483647, %v6474_v57 }
  0xc4   : > { %v468_v38 = vsel %vm458_vm2, %v454_v35, 1326507024  ;;  %v465_v9 = vsel %vm457_vm3, %v448_v34, %v464_v53  ;;  %v531_v44 = vshrl.u32 %v530_v31, 23  ;;  %v462_v35 = vsel %vm456_vm4, %v459_v28, %v461_v4 }
  0xc5   : > { %v469_v23 = vsel %vm457_vm3, %v451_v17, %v468_v38  ;;  %v466_v29 = vsel %vm456_vm4, %v463_v60, %v465_v9  ;;  %v534_v38 = vand.u32 8388607, %v10692_v63  ;;  %v478_v16 = vmul.u32 %v471_v30, %v462_v35 }
  0xc6   : > { %v470_v43 = vsel %vm456_vm4, %v467_v61, %v469_v23  ;;  %v6581_v26 = vmul.u32.u64.low %v471_v30, %v466_v29  ;;  %v6582_v25 = vmul.u32.u64.high %v471_v30, %v466_v29, %v6581_v26  ;;  %v5557_v24 = vadd.s32 4294967169, %v531_v44 }
  0xc7   : > { %v6578_v6 = vmul.u32.u64.low %v471_v30, %v470_v43  ;;  %v6579_v10 = vmul.u32.u64.high %v471_v30, %v470_v43, %v6578_v6  ;;  %v635_v34 = vshrl.u32 %v634_v5, 23  ;;  %v535_v42 = vor.u32 8388608, %v534_v38 }
  0xc8   : > { %v537_v22 = vadd.s32 1, %v5557_v24  ;;  %v481_v62 = vadd.s32 1, %v6582_v25  ;;  %v10693_v23 = vmov 2131351028   ;;  %v10695_v35 = vmov 920167782  }
  0xc9   : > { %vm480_vm5 = vc.u32 %v6579_v10, %v6581_v26  ;;  %v5561_v61 = vadd.s32 4294967169, %v635_v34  ;;  %v10696_v38 = vmov 1326507024   ;;  %v575_v24 = vshll.u32 %v535_v42, 8 }
  0xca   : > { %vm538_vm6 = vcmp.gt.s32.totalorder %v537_v22, 0  ;;  %v482_v53 = vsel %vm480_vm5, %v481_v62, %v6582_v25  ;;  %v10694_v25 = vmov 2102212464   ;;  %v10697_v12 = vand.u32 2147483647, %v6569_v27 }
  0xcb   : > { %v539_v6 = vsel %vm538_vm6, %v537_v22, 0  ;;  %v483_v17 = vadd.s32 %v482_v53, %v478_v16  ;;  %v641_v58 = vadd.s32 1, %v5561_v61  ;;  %vm529_vm6 = vcmp.lt.s32.totalorder %v6474_v57, 0 }
  0xcc   : > { %v541_v44 = vand.u32 31, %v539_v6  ;;  %v540_v31 = vshrl.u32 %v539_v6, 5  ;;  %v6605_v11 = vand.u32 8388607, %v10697_v12 }
  0xcd   : > { %v484_v56 = vadd.s32 536870912, %v483_v17  ;;  %vm642_vm11 = vcmp.gt.s32.totalorder %v641_v58, 0 }
  0xce   : > { %v542_v60 = vsub.s32 32, %v541_v44  ;;  %v544_v28 = vshll.u32 %v10691_v37, %v541_v44  ;;  %v547_v9 = vshll.u32 %v10684_v15, %v541_v44  ;;  %v550_v30 = vshll.u32 %v10693_v23, %v541_v44 }
  0xcf   : > { %v485_v4 = vshrl.u32 %v484_v56, 30  ;;  %v553_v29 = vshll.u32 %v10694_v25, %v541_v44  ;;  %v556_v63 = vshll.u32 %v10695_v35, %v541_v44  ;;  %vm559_vm7 = vcmp.lt.s32.totalorder %v540_v31, 1 }
  0xd0   : > { %v545_v5 = vshrl.u32 %v10684_v15, %v542_v60  ;;  %v548_v22 = vshrl.u32 %v10693_v23, %v542_v60  ;;  %v551_v43 = vshrl.u32 %v10694_v25, %v542_v60  ;;  %v554_v62 = vshrl.u32 %v10695_v35, %v542_v60 }
  0xd1   : > { %v557_v16 = vshrl.u32 %v10696_v38, %v542_v60  ;;  %v486_v34 = vshll.u32 %v485_v4, 30  ;;  %vm562_vm8 = vcmp.lt.s32.totalorder %v540_v31, 4  ;;  %vm561_vm9 = vcmp.lt.s32.totalorder %v540_v31, 3 }
  0xd2   : > { %v546_v53 = vor.u32 %v545_v5, %v544_v28  ;;  %v549_v6 = vor.u32 %v548_v22, %v547_v9  ;;  %v552_v14 = vor.u32 %v551_v43, %v550_v30  ;;  %v555_v56 = vor.u32 %v554_v62, %v553_v29 }
  0xd3   : > { %v558_v13 = vor.u32 %v557_v16, %v556_v63  ;;  %v6607_v59 = vsub.s32 %v483_v17, %v486_v34  ;;  %v543_v42 = vshrl.u32 %v10691_v37, %v542_v60  ;;  %vm560_vm10 = vcmp.lt.s32.totalorder %v540_v31, 2 }
  0xd4   : > { %v564_v44 = vsel %vm562_vm8, %v552_v14, 2102212464  ;;  %v567_v52 = vsel %vm559_vm7, %v546_v53, %v549_v6  ;;  %v568_v47 = vsel %vm562_vm8, %v555_v56, 920167782  ;;  %v509_v30 = vsub.s32 4, %v485_v4 }
  0xd5   : > { %v489_v28 = vsub.s32 0, %v6607_v59  ;;  %v569_v9 = vsel %vm561_vm9, %v552_v14, %v568_v47  ;;  %v571_v17 = vsel %vm559_vm7, %v549_v6, %v552_v14  ;;  %v572_v5 = vsel %vm562_vm8, %v558_v13, 1326507024 }
  0xd6   : > { %v570_v12 = vsel %vm560_vm10, %v567_v52, %v569_v9  ;;  %v563_v61 = vsel %vm559_vm7, %v543_v42, %v546_v53  ;;  %v565_v29 = vsel %vm561_vm9, %v549_v6, %v564_v44  ;;  %v573_v43 = vsel %vm561_vm9, %v555_v56, %v572_v5 }
  0xd7   : > { %v5554_v22 = vmin.u32 %v489_v28, %v6607_v59  ;;  %v574_v62 = vsel %vm560_vm10, %v571_v17, %v573_v43  ;;  %v6617_v63 = vmul.u32.u64.low %v575_v24, %v570_v12  ;;  %v6618_v16 = vmul.u32.u64.high %v575_v24, %v570_v12, %v6617_v63 }
  0xd8   : > { %v738_v52 = vand.u32 2139095040, %v6380_v48  ;;  %v510_v13 = vsel %vm425_vm12, %v509_v30, %v485_v4  ;;  %v6625_v14 = vmul.u32.u64.low %v575_v24, %v574_v62  ;;  %v6626_v60 = vmul.u32.u64.high %v575_v24, %v574_v62, %v6625_v14 }
  0xd9   : > { %v491_v47 = vclz %v5554_v22  ;;  %v643_v34 = vsel %vm642_vm11, %v641_v58, 0  ;;  %v10698_v53 = vand.u32 2147483647, %v6365_v39  ;;  %v566_v44 = vsel %vm560_vm10, %v563_v61, %v565_v29 }
  0xda   : > { %v645_v28 = vand.u32 31, %v643_v34  ;;  %v479_v42 = vadd.s32 %v6581_v26, %v6579_v10  ;;  %v585_v9 = vadd.s32 1, %v6618_v16  ;;  %v639_v4 = vor.u32 8388608, %v6605_v11 }
  0xdb   : > { %vm6630_vm13 = vcmp.le.f32.partialorder %v10698_v53, 0.7853982  ;;  %v5555_v56 = vadd.s32 4294967294, %v491_v47  ;;  %v739_v17 = vshrl.u32 %v738_v52, 23  ;;  %v582_v22 = vmul.u32 %v575_v24, %v566_v44 }
  0xdc   : > { %v512_v58 = vsel %vm6630_vm13, 0, %v510_v13  ;;  %v646_v12 = vsub.s32 32, %v645_v28  ;;  %vm584_vm15 = vc.u32 %v6626_v60, %v6617_v63  ;;  %v6644_v31 = vshrl.u32 %v643_v34, 5 }
  0xdd   : > { %vm5556_vm14 = vcmp.lt.s32.totalorder %v5555_v56, 0  ;;  %v586_v61 = vsel %vm584_vm15, %v585_v9, %v6618_v16  ;;  %v648_v11 = vshll.u32 %v10691_v37, %v645_v28  ;;  %v651_v62 = vshll.u32 %v10684_v15, %v645_v28 }
  0xde   : > { %v494_v5 = vsel %vm5556_vm14, 0, %v5555_v56  ;;  %v587_v29 = vadd.s32 %v586_v61, %v582_v22  ;;  %v649_v43 = vshrl.u32 %v10684_v15, %v646_v12  ;;  %v652_v47 = vshrl.u32 %v10693_v23, %v646_v12 }
  0xdf   : > { %v495_v26 = vsub.s32 32, %v494_v5  ;;  %v499_v10 = vsub.s32 4294967266, %v494_v5  ;;  %v496_v24 = vshll.u32 %v6607_v59, %v494_v5  ;;  %v655_v14 = vshrl.u32 %v10694_v25, %v646_v12 }
  0xe0   : > { %v588_v34 = vadd.s32 536870912, %v587_v29  ;;  %v654_v53 = vshll.u32 %v10693_v23, %v645_v28  ;;  %v657_v16 = vshll.u32 %v10694_v25, %v645_v28  ;;  %v658_v56 = vshrl.u32 %v10695_v35, %v646_v12 }
  0xe1   : > { %v497_v52 = vshrl.u32 %v479_v42, %v495_v26  ;;  %v500_v13 = vadd.s32 127, %v499_v10  ;;  %v650_v22 = vor.u32 %v649_v43, %v648_v11  ;;  %v653_v61 = vor.u32 %v652_v47, %v651_v62 }
  0xe2   : > { %v6656_v30 = vshrl.u32 %v588_v34, 30  ;;  %v659_v46 = vor.u32 %v658_v56, %v657_v16  ;;  %v661_v59 = vshrl.u32 %v10696_v38, %v646_v12  ;;  %v5565_v42 = vadd.s32 4294967169, %v739_v17 }
  0xe3   : > { %v498_v44 = vor.u32 %v497_v52, %v496_v24  ;;  %v501_v9 = vshll.u32 %v500_v13, 23  ;;  %v656_v26 = vor.u32 %v655_v14, %v654_v53  ;;  %v660_v10 = vshll.u32 %v10695_v35, %v645_v28 }
  0xe4   : > { %v6660_v45 = vshll.u32 %v639_v4, 8  ;;  %v516_v32 = vadd.s32 3, %v512_v58  ;;  %v590_v21 = vshll.u32 %v6656_v30, 30  ;;  %vm663_vm0 = vcmp.lt.s32.totalorder %v6644_v31, 1 }
  0xe5   : > { %v502_v5 = vor.u32 4788187, %v501_v9  ;;  %v505_v33 = vcvt.s32.f32 %v498_v44  ;;  %v662_v43 = vor.u32 %v661_v59, %v660_v10  ;;  %vm666_vm1 = vcmp.lt.s32.totalorder %v6644_v31, 4 }
  0xe6   : > { %v671_v62 = vsel %vm663_vm0, %v650_v22, %v653_v61  ;;  %v6667_v17 = vsub.s32 %v587_v29, %v590_v21  ;;  %vm665_vm2 = vcmp.lt.s32.totalorder %v6644_v31, 3  ;;  %v672_v28 = vsel %vm666_vm1, %v659_v46, 920167782 }
  0xe7   : > { %v503_v11 = vand.u32 2147483647, %v502_v5  ;;  %v745_v4 = vadd.s32 1, %v5565_v42  ;;  %vm664_vm3 = vcmp.lt.s32.totalorder %v6644_v31, 2  ;;  %v668_v58 = vsel %vm666_vm1, %v656_v26, 2102212464 }
  0xe8   : > { %v673_v24 = vsel %vm665_vm2, %v656_v26, %v672_v28  ;;  %v593_v52 = vsub.s32 0, %v6667_v17  ;;  %v647_v13 = vshrl.u32 %v10691_v37, %v646_v12  ;;  %v675_v21 = vsel %vm663_vm0, %v653_v61, %v656_v26 }
  0xe9   : > { %v506_v47 = vmul.f32 %v505_v33, %v503_v11  ;;  %v674_v14 = vsel %vm664_vm3, %v671_v62, %v673_v24  ;;  %v676_v34 = vsel %vm666_vm1, %v662_v43, 1326507024  ;;  %v669_v12 = vsel %vm665_vm2, %v653_v61, %v668_v58 }
  0xea   : > { %v6680_v33 = vmul.u32.u64.low %v6660_v45, %v674_v14  ;;  %v6681_v53 = vmul.u32.u64.high %v6660_v45, %v674_v14, %v6680_v33  ;;  %v5558_v16 = vmin.u32 %v593_v52, %v6667_v17  ;;  %v667_v56 = vsel %vm663_vm0, %v647_v13, %v650_v22 }
  0xeb   : > { %v507_v29 = vxor.u32 2147483648, %v506_v47  ;;  %v677_v44 = vsel %vm665_vm2, %v659_v46, %v676_v34  ;;  %v10701_v42 = vand.u32 2147483647, %v6380_v48  ;;  %vm746_vm4 = vcmp.gt.s32.totalorder %v745_v4, 0 }
  0xec   : > { %v678_v59 = vsel %vm664_vm3, %v675_v21, %v677_v44  ;;  %v6700_v26 = vand.u32 3, %v516_v32  ;;  %v595_v61 = vclz %v5558_v16  ;;  %v613_v10 = vsub.s32 4, %v6656_v30 }
  0xed   : > { %v508_v9 = vsel %vm425_vm12, %v507_v29, %v506_v47  ;;  %v742_v5 = vand.u32 8388607, %v10701_v42  ;;  %v670_v46 = vsel %vm664_vm3, %v667_v56, %v669_v12  ;;  %v689_v28 = vadd.s32 1, %v6681_v53 }
  0xee   : > { %v511_v22 = vsel %vm6630_vm13, %v6365_v39, %v508_v9  ;;  %v6706_v11 = vmul.u32.u64.low %v6660_v45, %v678_v59  ;;  %v6707_v43 = vmul.u32.u64.high %v6660_v45, %v678_v59, %v6706_v11  ;;  %v5559_v62 = vadd.s32 4294967294, %v595_v61 }
  0xef   : > { %5997 = vcosq.f32 %v511_v22  ;;  %v747_v47 = vsel %vm746_vm4, %v745_v4, 0  ;;  %v743_v6 = vor.u32 8388608, %v742_v5  ;;  %v10702_v32 = vand.u32 2147483647, %v6474_v57 }
  0xf0   : > { %5999 = vsinq.f32 %v511_v22  ;;  %v749_v58 = vand.u32 31, %v747_v47  ;;  %v583_v31 = vadd.s32 %v6617_v63, %v6626_v60  ;;  %vm5560_vm7 = vcmp.lt.s32.totalorder %v5559_v62, 0 }
  0xf1   : > { %vm6712_vm5 = vcmp.le.f32.partialorder %v10702_v32, 0.7853982  ;;  %v598_v52 = vsel %vm5560_vm7, 0, %v5559_v62  ;;  %v686_v13 = vmul.u32 %v6660_v45, %v670_v46  ;;  %vm688_vm8 = vc.u32 %v6707_v43, %v6680_v33 }
  0xf2   : > { %v750_v4 = vsub.s32 32, %v749_v58  ;;  %vm519_vm9 = vcmp.eq.s32.totalorder %v6700_v26, 0  ;;  %v599_v14 = vsub.s32 32, %v598_v52  ;;  %v603_v21 = vsub.s32 4294967266, %v598_v52 }
  0xf3   : > { %v614_v29 = vsel %vm529_vm6, %v613_v10, %v6656_v30  ;;  %v690_v34 = vsel %vm688_vm8, %v689_v28, %v6681_v53  ;;  %vm518_vm10 = vcmp.lt.s32.totalorder %v6700_v26, 2  ;;  %vm522_vm11 = vcmp.eq.s32.totalorder %v6700_v26, 2 }
  0xf4   : > { %v691_v63 = vadd.s32 %v690_v34, %v686_v13  ;;  %v753_v45 = vshrl.u32 %v10684_v15, %v750_v4  ;;  %v6730_v60 = vshll.u32 %v743_v6, 8  ;;  %vm515_vm12 = vweird.f32 %v6365_v39 }
  0xf5   : > { %v600_v16 = vshll.u32 %v6667_v17, %v598_v52  ;;  %v601_v56 = vshrl.u32 %v583_v31, %v599_v14  ;;  %v604_v12 = vadd.s32 127, %v603_v21  ;;  %v756_v30 = vshrl.u32 %v10693_v23, %v750_v4 }
  0xf6   : > { %v616_v53 = vsel %vm6712_vm5, 0, %v614_v29  ;;  %v692_v44 = vadd.s32 536870912, %v691_v63  ;;  %v752_v9 = vshll.u32 %v10691_v37, %v749_v58  ;;  %v839_v59 = vand.u32 2147483647, %v6383_v49 }
  0xf7   : > { %v602_v42 = vor.u32 %v601_v56, %v600_v16  ;;  %v605_v5 = vshll.u32 %v604_v12, 23  ;;  %v755_v22 = vshll.u32 %v10684_v15, %v749_v58  ;;  %v759_v61 = vshrl.u32 %v10694_v25, %v750_v4 }
  0xf8   : > { %v693_v17 = vshrl.u32 %v692_v44, 30  ;;  %v748_v46 = vshrl.u32 %v747_v47, 5  ;;  %v754_v11 = vor.u32 %v753_v45, %v752_v9  ;;  %v762_v62 = vshrl.u32 %v10695_v35, %v750_v4 }
  0xf9   : > { %v5998_v10 = vpop.eup %5997  ;;  %v606_v32 = vor.u32 4788187, %v605_v5  ;;  %v757_v31 = vor.u32 %v756_v30, %v755_v22  ;;  %v758_v52 = vshll.u32 %v10693_v23, %v749_v58  ;;  %v761_v21 = vshll.u32 %v10694_v25, %v749_v58 }
  0xfa   : > { %v6000_v28 = vpop.eup %5999  ;;  %v523_v6 = vxor.u32 2147483648, %v5998_v10  ;;  %v694_v14 = vshll.u32 %v693_v17, 30  ;;  %v765_v29 = vshrl.u32 %v10696_v38, %v750_v4  ;;  %v609_v47 = vcvt.s32.f32 %v602_v42 }
  0xfb   : > { %v520_v13 = vxor.u32 2147483648, %v6000_v28  ;;  %v607_v16 = vand.u32 2147483647, %v606_v32  ;;  %vm633_vm13 = vcmp.lt.s32.totalorder %v6569_v27, 0  ;;  %v760_v45 = vor.u32 %v759_v61, %v758_v52 }
  0xfc   : > { %v524_v34 = vsel %vm522_vm11, %v523_v6, %v6000_v28  ;;  %v6755_v12 = vsub.s32 %v691_v63, %v694_v14  ;;  %v763_v30 = vor.u32 %v762_v62, %v761_v21  ;;  %v764_v44 = vshll.u32 %v10695_v35, %v749_v58 }
  0xfd   : > { %v521_v56 = vsel %vm519_vm9, %v5998_v10, %v520_v13  ;;  %v610_v5 = vmul.f32 %v609_v47, %v607_v16  ;;  %v620_v22 = vadd.s32 3, %v616_v53  ;;  %v751_v28 = vshrl.u32 %v10691_v37, %v750_v4 }
  0xfe   : > { %v525_v9 = vsel %vm518_vm10, %v521_v56, %v524_v34  ;;  %v697_v61 = vsub.s32 0, %v6755_v12  ;;  %v717_v6 = vsub.s32 4, %v693_v17  ;;  %v766_v10 = vor.u32 %v765_v29, %v764_v44 }
  0xff   : > { %v526_v42 = vsel %vm515_vm12, nan, %v525_v9  ;;  %v611_v63 = vxor.u32 2147483648, %v610_v5  ;;  %v10705_v32 = vand.u32 2147483647, %v6569_v27  ;;  %vm767_vm15 = vcmp.lt.s32.totalorder %v748_v46, 1 }
 0x100   : > { %vm769_vm0 = vcmp.lt.s32.totalorder %v748_v46, 3  ;;  %vm770_vm1 = vcmp.lt.s32.totalorder %v748_v46, 4  ;;  %5415 = vst [vmem:[%s6771_s9] sm:$0xff] %v526_v42  ;;  %v5562_v39 = vmin.u32 %v697_v61, %v6755_v12  ;;  %v775_v58 = vsel %vm767_vm15, %v754_v11, %v757_v31 }
 0x101   : > { %vm6766_vm14 = vcmp.le.f32.partialorder %v10705_v32, 0.7853982  ;;  %v772_v26 = vsel %vm770_vm1, %v760_v45, 2102212464  ;;  %v776_v4 = vsel %vm770_vm1, %v763_v30, 920167782  ;;  %v612_v53 = vsel %vm529_vm6, %v611_v63, %v610_v5 }
 0x102   : > { %vm768_vm2 = vcmp.lt.s32.totalorder %v748_v46, 2  ;;  %v777_v52 = vsel %vm769_vm0, %v760_v45, %v776_v4  ;;  %v842_v13 = vand.u32 2139095040, %v6383_v49  ;;  %v615_v14 = vsel %vm6712_vm5, %v6474_v57, %v612_v53 }
 0x103   : > { %v699_v21 = vclz %v5562_v39  ;;  %v771_v29 = vsel %vm767_vm15, %v751_v28, %v754_v11  ;;  %v779_v34 = vsel %vm767_vm15, %v757_v31, %v760_v45  ;;  %6001 = vcosq.f32 %v615_v14 }
 0x104   : > { %v773_v16 = vsel %vm769_vm0, %v757_v31, %v772_v26  ;;  %v778_v47 = vsel %vm768_vm2, %v775_v58, %v777_v52  ;;  %v780_v56 = vsel %vm770_vm1, %v766_v10, 1326507024  ;;  %6003 = vsinq.f32 %v615_v14 }
 0x105   : > { %v5563_v44 = vadd.s32 4294967294, %v699_v21  ;;  %v718_v9 = vsel %vm633_vm13, %v717_v6, %v693_v17  ;;  %v781_v24 = vsel %vm769_vm0, %v763_v30, %v780_v56  ;;  %v843_v45 = vshrl.u32 %v842_v13, 23 }
 0x106   : > { %v782_v5 = vsel %vm768_vm2, %v779_v34, %v781_v24  ;;  %v6795_v11 = vmul.u32.u64.low %v6730_v60, %v778_v47  ;;  %v6796_v28 = vmul.u32.u64.high %v6730_v60, %v778_v47, %v6795_v11  ;;  %v774_v31 = vsel %vm768_vm2, %v771_v29, %v773_v16 }
 0x107   : > { %vm5564_vm3 = vcmp.lt.s32.totalorder %v5563_v44, 0  ;;  %v6801_v42 = vmul.u32.u64.low %v6730_v60, %v782_v5  ;;  %v6802_v61 = vmul.u32.u64.high %v6730_v60, %v782_v5, %v6801_v42  ;;  %v621_v10 = vand.u32 3, %v620_v22 }
 0x108   : > { %v702_v63 = vsel %vm5564_vm3, 0, %v5563_v44  ;;  %v5569_v17 = vadd.s32 4294967169, %v843_v45  ;;  %v846_v30 = vand.u32 8388607, %v839_v59  ;;  %v687_v6 = vadd.s32 %v6680_v33, %v6707_v43 }
 0x109   : > { %v703_v32 = vsub.s32 32, %v702_v63  ;;  %v707_v39 = vsub.s32 4294967266, %v702_v63  ;;  %v720_v26 = vsel %vm6766_vm14, 0, %v718_v9  ;;  %v790_v46 = vmul.u32 %v6730_v60, %v774_v31 }
 0x10a   : > { %v793_v58 = vadd.s32 1, %v6796_v28  ;;  %v849_v4 = vadd.s32 1, %v5569_v17  ;;  %v946_v22 = vand.u32 2139095040, %v6386_v50  ;;  %v704_v53 = vshll.u32 %v6755_v12, %v702_v63 }
 0x10b   : > { %v705_v52 = vshrl.u32 %v687_v6, %v703_v32  ;;  %v708_v13 = vadd.s32 127, %v707_v39  ;;  %vm792_vm4 = vc.u32 %v6802_v61, %v6795_v11  ;;  %vm619_vm5 = vweird.f32 %v6474_v57 }
 0x10c   : > { %vm622_vm6 = vcmp.lt.s32.totalorder %v621_v10, 2  ;;  %v794_v33 = vsel %vm792_vm4, %v793_v58, %v6796_v28  ;;  %vm850_vm7 = vcmp.gt.s32.totalorder %v849_v4, 0  ;;  %vm623_vm8 = vcmp.eq.s32.totalorder %v621_v10, 0 }
 0x10d   : > { %v706_v43 = vor.u32 %v705_v52, %v704_v53  ;;  %v709_v60 = vshll.u32 %v708_v13, 23  ;;  %v795_v14 = vadd.s32 %v794_v33, %v790_v46  ;;  %v851_v21 = vsel %vm850_vm7, %v849_v4, 0  ;;  %v6002_v29 = vpop.eup %6001 }
 0x10e   : > { %v724_v34 = vadd.s32 3, %v720_v26  ;;  %v847_v16 = vor.u32 8388608, %v846_v30  ;;  %v853_v12 = vand.u32 31, %v851_v21  ;;  %v6004_v47 = vpop.eup %6003  ;;  %v627_v56 = vxor.u32 2147483648, %v6002_v29 }
 0x10f   : > { %v710_v44 = vor.u32 4788187, %v709_v60  ;;  %v796_v9 = vadd.s32 536870912, %v795_v14  ;;  %v947_v24 = vshrl.u32 %v946_v22, 23  ;;  %v624_v5 = vxor.u32 2147483648, %v6004_v47 }
 0x110   : > { %vm626_vm9 = vcmp.eq.s32.totalorder %v621_v10, 2  ;;  %v854_v45 = vsub.s32 32, %v853_v12  ;;  %v943_v28 = vand.u32 2147483647, %v6386_v50  ;;  %v713_v63 = vcvt.s32.f32 %v706_v43 }
 0x111   : > { %v628_v31 = vsel %vm626_vm9, %v627_v56, %v6004_v47  ;;  %v711_v42 = vand.u32 2147483647, %v710_v44  ;;  %v6819_v17 = vshrl.u32 %v796_v9, 30  ;;  %v625_v6 = vsel %vm623_vm8, %v6002_v29, %v624_v5 }
 0x112   : > { %v6822_v30 = vand.u32 3, %v724_v34  ;;  %v857_v32 = vshrl.u32 %v10684_v15, %v854_v45  ;;  %v6825_v39 = vshll.u32 %v847_v16, 8  ;;  %v629_v26 = vsel %vm622_vm6, %v625_v6, %v628_v31 }
 0x113   : > { %v714_v46 = vmul.f32 %v713_v63, %v711_v42  ;;  %v798_v58 = vshll.u32 %v6819_v17, 30  ;;  %v5573_v4 = vadd.s32 4294967169, %v947_v24  ;;  %v630_v22 = vsel %vm619_vm5, nan, %v629_v26 }
 0x114   : > { %v856_v53 = vshll.u32 %v10691_v37, %v853_v12  ;;  %v860_v52 = vshrl.u32 %v10693_v23, %v854_v45  ;;  %v863_v13 = vshrl.u32 %v10694_v25, %v854_v45  ;;  %v852_v60 = vshrl.u32 %v851_v21, 5  ;;  %5416 = vst [vmem:[%s6771_s9 + $0x8] sm:$0xff] %v630_v22 }
 0x115   : > { %v715_v33 = vxor.u32 2147483648, %v714_v46  ;;  %v6834_v43 = vsub.s32 %v795_v14, %v798_v58  ;;  %v859_v10 = vshll.u32 %v10684_v15, %v853_v12  ;;  %v862_v34 = vshll.u32 %v10693_v23, %v853_v12 }
 0x116   : > { %v858_v29 = vor.u32 %v857_v32, %v856_v53  ;;  %v865_v16 = vshll.u32 %v10694_v25, %v853_v12  ;;  %v866_v57 = vshrl.u32 %v10695_v35, %v854_v45  ;;  %v868_v44 = vshll.u32 %v10695_v35, %v853_v12 }
 0x117   : > { %v716_v47 = vsel %vm633_vm13, %v715_v33, %v714_v46  ;;  %v801_v56 = vsub.s32 0, %v6834_v43  ;;  %v869_v14 = vshrl.u32 %v10696_v38, %v854_v45  ;;  %v861_v9 = vor.u32 %v860_v52, %v859_v10 }
 0x118   : > { %v719_v21 = vsel %vm6766_vm14, %v6569_v27, %v716_v47  ;;  %v864_v24 = vor.u32 %v863_v13, %v862_v34  ;;  %v867_v5 = vor.u32 %v866_v57, %v865_v16  ;;  %vm737_vm10 = vcmp.lt.s32.totalorder %v6380_v48, 0 }
 0x119   : > { %6005 = vcosq.f32 %v719_v21  ;;  %v5566_v31 = vmin.u32 %v801_v56, %v6834_v43  ;;  %v870_v42 = vor.u32 %v869_v14, %v868_v44  ;;  %v953_v63 = vadd.s32 1, %v5573_v4 }
 0x11a   : > { %6007 = vsinq.f32 %v719_v21  ;;  %v821_v6 = vsub.s32 4, %v6819_v17  ;;  %v855_v12 = vshrl.u32 %v10691_v37, %v854_v45  ;;  %vm871_vm11 = vcmp.lt.s32.totalorder %v852_v60, 1 }
 0x11b   : > { %v803_v32 = vclz %v5566_v31  ;;  %vm872_vm12 = vcmp.lt.s32.totalorder %v852_v60, 2  ;;  %vm873_vm13 = vcmp.lt.s32.totalorder %v852_v60, 3  ;;  %vm874_vm14 = vcmp.lt.s32.totalorder %v852_v60, 4 }
 0x11c   : > { %v876_v62 = vsel %vm874_vm14, %v864_v24, 2102212464  ;;  %v879_v26 = vsel %vm871_vm11, %v858_v29, %v861_v9  ;;  %v880_v46 = vsel %vm874_vm14, %v867_v5, 920167782  ;;  %v883_v58 = vsel %vm871_vm11, %v861_v9, %v864_v24 }
 0x11d   : > { %v5567_v22 = vadd.s32 4294967294, %v803_v32  ;;  %v875_v53 = vsel %vm871_vm11, %v855_v12, %v858_v29  ;;  %v881_v52 = vsel %vm873_vm13, %v864_v24, %v880_v46  ;;  %v884_v13 = vsel %vm874_vm14, %v870_v42, 1326507024 }
 0x11e   : > { %v10708_v4 = vand.u32 2147483647, %v6380_v48  ;;  %v877_v45 = vsel %vm873_vm13, %v861_v9, %v876_v62  ;;  %v882_v10 = vsel %vm872_vm12, %v879_v26, %v881_v52  ;;  %v885_v34 = vsel %vm873_vm13, %v867_v5, %v884_v13 }
 0x11f   : > { %vm954_vm0 = vcmp.gt.s32.totalorder %v953_v63, 0  ;;  %vm726_vm1 = vcmp.lt.s32.totalorder %v6822_v30, 2  ;;  %vm5568_vm2 = vcmp.lt.s32.totalorder %v5567_v22, 0  ;;  %v886_v16 = vsel %vm872_vm12, %v883_v58, %v885_v34 }
 0x120   : > { %vm6855_vm15 = vcmp.le.f32.partialorder %v10708_v4, 0.7853982  ;;  %v6863_v29 = vmul.u32.u64.low %v6825_v39, %v882_v10  ;;  %v6864_v57 = vmul.u32.u64.high %v6825_v39, %v882_v10, %v6863_v29  ;;  %vm723_vm3 = vweird.f32 %v6569_v27 }
 0x121   : > { %v791_v47 = vadd.s32 %v6795_v11, %v6802_v61  ;;  %v806_v56 = vsel %vm5568_vm2, 0, %v5567_v22  ;;  %v6871_v44 = vmul.u32.u64.low %v6825_v39, %v886_v16  ;;  %v6872_v14 = vmul.u32.u64.high %v6825_v39, %v886_v16, %v6871_v44 }
 0x122   : > { %v807_v21 = vsub.s32 32, %v806_v56  ;;  %v811_v9 = vsub.s32 4294967266, %v806_v56  ;;  %v878_v24 = vsel %vm872_vm12, %v875_v53, %v877_v45  ;;  %v955_v5 = vsel %vm954_vm0, %v953_v63, 0 }
 0x123   : > { %vm730_vm4 = vcmp.eq.s32.totalorder %v6822_v30, 2  ;;  %v822_v31 = vsel %vm737_vm10, %v821_v6, %v6819_v17  ;;  %v950_v42 = vand.u32 8388607, %v943_v28  ;;  %v957_v11 = vand.u32 31, %v955_v5  ;;  %v6006_v61 = vpop.eup %6005 }
 0x124   : > { %v808_v12 = vshll.u32 %v6834_v43, %v806_v56  ;;  %v809_v32 = vshrl.u32 %v791_v47, %v807_v21  ;;  %v812_v62 = vadd.s32 127, %v811_v9  ;;  %v897_v26 = vadd.s32 1, %v6864_v57  ;;  %v6008_v60 = vpop.eup %6007 }
 0x125   : > { %v731_v46 = vxor.u32 2147483648, %v6006_v61  ;;  %v894_v63 = vmul.u32 %v6825_v39, %v878_v24  ;;  %vm896_vm5 = vc.u32 %v6872_v14, %v6863_v29  ;;  %v958_v58 = vsub.s32 32, %v957_v11 }
 0x126   : > { %v728_v17 = vxor.u32 2147483648, %v6008_v60  ;;  %v810_v6 = vor.u32 %v809_v32, %v808_v12  ;;  %v813_v22 = vshll.u32 %v812_v62, 23  ;;  %v898_v53 = vsel %vm896_vm5, %v897_v26, %v6864_v57 }
 0x127   : > { %vm727_vm6 = vcmp.eq.s32.totalorder %v6822_v30, 0  ;;  %v732_v43 = vsel %vm730_vm4, %v731_v46, %v6008_v60  ;;  %v899_v52 = vadd.s32 %v898_v53, %v894_v63  ;;  %v951_v13 = vor.u32 8388608, %v950_v42 }
 0x128   : > { %v729_v4 = vsel %vm727_vm6, %v6006_v61, %v728_v17  ;;  %v814_v45 = vor.u32 4788187, %v813_v22  ;;  %v824_v39 = vsel %vm6855_vm15, 0, %v822_v31  ;;  %v6892_v10 = vshrl.u32 %v955_v5, 5 }
 0x129   : > { %v733_v34 = vsel %vm726_vm1, %v729_v4, %v732_v43  ;;  %v900_v16 = vadd.s32 536870912, %v899_v52  ;;  %v961_v57 = vshrl.u32 %v10684_v15, %v958_v58  ;;  %v964_v47 = vshrl.u32 %v10693_v23, %v958_v58 }
 0x12a   : > { %v734_v56 = vsel %vm723_vm3, nan, %v733_v34  ;;  %v815_v44 = vand.u32 2147483647, %v814_v45  ;;  %v817_v21 = vcvt.s32.f32 %v810_v6  ;;  %v960_v9 = vshll.u32 %v10691_v37, %v957_v11 }
 0x12b   : > { %v901_v24 = vshrl.u32 %v900_v16, 30  ;;  %v963_v31 = vshll.u32 %v10684_v15, %v957_v11  ;;  %v966_v5 = vshll.u32 %v10693_v23, %v957_v11  ;;  %v967_v30 = vshrl.u32 %v10694_v25, %v958_v58  ;;  %5417 = vst [vmem:[%s6771_s9 + $0x10] sm:$0xff] %v734_v56 }
 0x12c   : > { %v818_v42 = vmul.f32 %v817_v21, %v815_v44  ;;  %v969_v61 = vshll.u32 %v10694_v25, %v957_v11  ;;  %v970_v12 = vshrl.u32 %v10695_v35, %v958_v58  ;;  %v973_v27 = vshrl.u32 %v10696_v38, %v958_v58 }
 0x12d   : > { %v902_v32 = vshll.u32 %v901_v24, 30  ;;  %v962_v62 = vor.u32 %v961_v57, %v960_v9  ;;  %v965_v26 = vor.u32 %v964_v47, %v963_v31  ;;  %v968_v46 = vor.u32 %v967_v30, %v966_v5 }
 0x12e   : > { %v819_v60 = vxor.u32 2147483648, %v818_v42  ;;  %v971_v63 = vor.u32 %v970_v12, %v969_v61  ;;  %v972_v17 = vshll.u32 %v10695_v35, %v957_v11  ;;  %v828_v6 = vadd.s32 3, %v824_v39 }
 0x12f   : > { %v6909_v22 = vsub.s32 %v899_v52, %v902_v32  ;;  %v959_v53 = vshrl.u32 %v10691_v37, %v958_v58  ;;  %v6912_v43 = vshll.u32 %v951_v13, 8  ;;  %v925_v45 = vsub.s32 4, %v901_v24 }
 0x130   : > { %v820_v4 = vsel %vm737_vm10, %v819_v60, %v818_v42  ;;  %v974_v34 = vor.u32 %v973_v27, %v972_v17  ;;  %vm975_vm7 = vcmp.lt.s32.totalorder %v6892_v10, 1  ;;  %vm977_vm8 = vcmp.lt.s32.totalorder %v6892_v10, 3 }
 0x131   : > { %v823_v16 = vsel %vm6855_vm15, %v6380_v48, %v820_v4  ;;  %v905_v11 = vsub.s32 0, %v6909_v22  ;;  %vm978_vm9 = vcmp.lt.s32.totalorder %v6892_v10, 4  ;;  %v983_v52 = vsel %vm975_vm7, %v962_v62, %v965_v26 }
 0x132   : > { %6009 = vcosq.f32 %v823_v16  ;;  %v980_v58 = vsel %vm978_vm9, %v968_v46, 2102212464  ;;  %v984_v13 = vsel %vm978_vm9, %v971_v63, 920167782  ;;  %vm976_vm10 = vcmp.lt.s32.totalorder %v6892_v10, 2 }
 0x133   : > { %6011 = vsinq.f32 %v823_v16  ;;  %v5570_v39 = vmin.u32 %v905_v11, %v6909_v22  ;;  %v985_v33 = vsel %vm977_vm8, %v968_v46, %v984_v13  ;;  %v829_v57 = vand.u32 3, %v828_v6 }
 0x134   : > { %v986_v47 = vsel %vm976_vm10, %v983_v52, %v985_v33  ;;  %v987_v56 = vsel %vm975_vm7, %v965_v26, %v968_v46  ;;  %v988_v44 = vsel %vm978_vm9, %v974_v34, 1326507024  ;;  %vm841_vm11 = vcmp.lt.s32.totalorder %v6383_v49, 0 }
 0x135   : > { %v907_v21 = vclz %v5570_v39  ;;  %v979_v9 = vsel %vm975_vm7, %v959_v53, %v962_v62  ;;  %v981_v31 = vsel %vm977_vm8, %v965_v26, %v980_v58  ;;  %vm6940_vm12 = vcmp.le.f32.partialorder %v839_v59, 0.7853982 }
 0x136   : > { %v989_v30 = vsel %vm977_vm8, %v971_v63, %v988_v44  ;;  %v6947_v42 = vmul.u32.u64.low %v6912_v43, %v986_v47  ;;  %v6948_v61 = vmul.u32.u64.high %v6912_v43, %v986_v47, %v6947_v42  ;;  %v926_v27 = vsel %vm841_vm11, %v925_v45, %v901_v24 }
 0x137   : > { %v5571_v12 = vadd.s32 4294967294, %v907_v21  ;;  %v990_v32 = vsel %vm976_vm10, %v987_v56, %v989_v30  ;;  %v1050_v59 = vand.u32 2139095040, %v6362_v36  ;;  %vm830_vm13 = vcmp.lt.s32.totalorder %v829_v57, 2 }
 0x138   : > { %v982_v62 = vsel %vm976_vm10, %v979_v9, %v981_v31  ;;  %v6959_v26 = vmul.u32.u64.low %v6912_v43, %v990_v32  ;;  %v6960_v60 = vmul.u32.u64.high %v6912_v43, %v990_v32, %v6959_v26  ;;  %v1047_v46 = vand.u32 2147483647, %v6362_v36 }
 0x139   : > { %vm827_vm14 = vweird.f32 %v6380_v48  ;;  %vm831_vm15 = vcmp.eq.s32.totalorder %v829_v57, 0  ;;  %v895_v24 = vadd.s32 %v6863_v29, %v6872_v14  ;;  %vm5572_vm0 = vcmp.lt.s32.totalorder %v5571_v12, 0 }
 0x13a   : > { %v1051_v63 = vshrl.u32 %v1050_v59, 23  ;;  %v910_v17 = vsel %vm5572_vm0, 0, %v5571_v12  ;;  %v928_v6 = vsel %vm6940_vm12, 0, %v926_v27  ;;  %v1001_v10 = vadd.s32 1, %v6948_v61 }
 0x13b   : > { %v1154_v53 = vand.u32 2139095040, %v6368_v40  ;;  %v911_v4 = vsub.s32 32, %v910_v17  ;;  %v915_v45 = vsub.s32 4294967266, %v910_v17  ;;  %v998_v34 = vmul.u32 %v6912_v43, %v982_v62 }
 0x13c   : > { %v5577_v16 = vadd.s32 4294967169, %v1051_v63  ;;  %v6010_v11 = vpop.eup %6009  ;;  %v912_v58 = vshll.u32 %v6909_v22, %v910_v17  ;;  %vm1000_vm1 = vc.u32 %v6960_v60, %v6947_v42  ;;  %v1054_v29 = vand.u32 8388607, %v1047_v46 }
 0x13d   : > { %v1155_v14 = vshrl.u32 %v1154_v53, 23  ;;  %v6012_v52 = vpop.eup %6011  ;;  %v835_v13 = vxor.u32 2147483648, %v6010_v11  ;;  %v913_v39 = vshrl.u32 %v895_v24, %v911_v4  ;;  %v916_v33 = vadd.s32 127, %v915_v45 }
 0x13e   : > { %v1002_v47 = vsel %vm1000_vm1, %v1001_v10, %v6948_v61  ;;  %v832_v56 = vxor.u32 2147483648, %v6012_v52  ;;  %vm834_vm2 = vcmp.eq.s32.totalorder %v829_v57, 2  ;;  %v1057_v44 = vadd.s32 1, %v5577_v16 }
 0x13f   : > { %v1003_v43 = vadd.s32 %v1002_v47, %v998_v34  ;;  %v836_v21 = vsel %vm834_vm2, %v835_v13, %v6012_v52  ;;  %v914_v9 = vor.u32 %v913_v39, %v912_v58  ;;  %v917_v22 = vshll.u32 %v916_v33, 23 }
 0x140   : > { %v932_v31 = vadd.s32 3, %v928_v6  ;;  %v833_v30 = vsel %vm831_vm15, %v6010_v11, %v832_v56  ;;  %v1055_v27 = vor.u32 8388608, %v1054_v29  ;;  %vm1058_vm3 = vcmp.gt.s32.totalorder %v1057_v44, 0 }
 0x141   : > { %v1004_v12 = vadd.s32 536870912, %v1003_v43  ;;  %v837_v32 = vsel %vm830_vm13, %v833_v30, %v836_v21  ;;  %v918_v59 = vor.u32 4788187, %v917_v22  ;;  %v1059_v62 = vsel %vm1058_vm3, %v1057_v44, 0 }
 0x142   : > { %v5581_v26 = vadd.s32 4294967169, %v1155_v14  ;;  %v838_v61 = vsel %vm827_vm14, nan, %v837_v32  ;;  %vm945_vm4 = vcmp.lt.s32.totalorder %v6386_v50, 0  ;;  %v1061_v63 = vand.u32 31, %v1059_v62 }
 0x143   : > { %v1005_v24 = vshrl.u32 %v1004_v12, 30  ;;  %v919_v17 = vand.u32 2147483647, %v918_v59  ;;  %v921_v6 = vcvt.s32.f32 %v914_v9  ;;  %v6982_v10 = vand.u32 3, %v932_v31  ;;  %5418 = vst [vmem:[%s6771_s9 + $0x18] sm:$0xff] %v838_v61 }
 0x144   : > { %vm6986_vm5 = vcmp.le.f32.partialorder %v943_v28, 0.7853982  ;;  %v1062_v45 = vsub.s32 32, %v1061_v63  ;;  %v1151_v48 = vand.u32 2147483647, %v6368_v40  ;;  %v999_v16 = vadd.s32 %v6947_v42, %v6960_v60 }
 0x145   : > { %v1006_v57 = vshll.u32 %v1005_v24, 30  ;;  %v1029_v4 = vsub.s32 4, %v1005_v24  ;;  %v922_v34 = vmul.f32 %v921_v6, %v919_v17  ;;  %v6994_v11 = vshll.u32 %v1055_v27, 8 }
 0x146   : > { %v1161_v58 = vadd.s32 1, %v5581_v26  ;;  %v7000_v14 = vshrl.u32 %v1059_v62, 5  ;;  %v1065_v52 = vshrl.u32 %v10684_v15, %v1062_v45  ;;  %v1064_v39 = vshll.u32 %v10691_v37, %v1061_v63 }
 0x147   : > { %v6996_v29 = vsub.s32 %v1003_v43, %v1006_v57  ;;  %v1030_v28 = vsel %vm945_vm4, %v1029_v4, %v1005_v24  ;;  %v923_v13 = vxor.u32 2147483648, %v922_v34  ;;  %v1068_v33 = vshrl.u32 %v10693_v23, %v1062_v45 }
 0x148   : > { %v1071_v47 = vshrl.u32 %v10694_v25, %v1062_v45  ;;  %v1067_v60 = vshll.u32 %v10684_v15, %v1061_v63  ;;  %v1070_v56 = vshll.u32 %v10693_v23, %v1061_v63  ;;  %v1074_v43 = vshrl.u32 %v10695_v35, %v1062_v45 }
 0x149   : > { %v1009_v42 = vsub.s32 0, %v6996_v29  ;;  %v924_v44 = vsel %vm841_vm11, %v923_v13, %v922_v34  ;;  %v1032_v21 = vsel %vm6986_vm5, 0, %v1030_v28  ;;  %v1066_v9 = vor.u32 %v1065_v52, %v1064_v39 }
 0x14a   : > { %v1073_v22 = vshll.u32 %v10694_v25, %v1061_v63  ;;  %v927_v31 = vsel %vm6940_vm12, %v6383_v49, %v924_v44  ;;  %v1069_v12 = vor.u32 %v1068_v33, %v1067_v60  ;;  %v1072_v27 = vor.u32 %v1071_v47, %v1070_v56 }
 0x14b   : > { %v5574_v30 = vmin.u32 %v1009_v42, %v6996_v29  ;;  %6013 = vcosq.f32 %v927_v31  ;;  %v1076_v59 = vshll.u32 %v10695_v35, %v1061_v63  ;;  %v1077_v62 = vshrl.u32 %v10696_v38, %v1062_v45 }
 0x14c   : > { %v1075_v32 = vor.u32 %v1074_v43, %v1073_v22  ;;  %6015 = vsinq.f32 %v927_v31  ;;  %v7023_v61 = vand.u32 8388607, %v1151_v48  ;;  %vm1162_vm6 = vcmp.gt.s32.totalorder %v1161_v58, 0 }
 0x14d   : > { %v1011_v26 = vclz %v5574_v30  ;;  %v1036_v24 = vadd.s32 3, %v1032_v21  ;;  %v1063_v5 = vshrl.u32 %v10691_v37, %v1062_v45  ;;  %v1078_v17 = vor.u32 %v1077_v62, %v1076_v59 }
 0x14e   : > { %vm1079_vm7 = vcmp.lt.s32.totalorder %v7000_v14, 1  ;;  %vm1081_vm8 = vcmp.lt.s32.totalorder %v7000_v14, 3  ;;  %vm1082_vm9 = vcmp.lt.s32.totalorder %v7000_v14, 4  ;;  %vm1080_vm11 = vcmp.lt.s32.totalorder %v7000_v14, 2 }
 0x14f   : > { %v5575_v6 = vadd.s32 4294967294, %v1011_v26  ;;  %v1087_v63 = vsel %vm1079_vm7, %v1066_v9, %v1069_v12  ;;  %v1084_v57 = vsel %vm1082_vm9, %v1072_v27, 2102212464  ;;  %v1088_v4 = vsel %vm1082_vm9, %v1075_v32, 920167782 }
 0x150   : > { %v1091_v34 = vsel %vm1079_vm7, %v1069_v12, %v1072_v27  ;;  %v1092_v28 = vsel %vm1082_vm9, %v1078_v17, 1326507024  ;;  %v1089_v52 = vsel %vm1081_vm8, %v1072_v27, %v1088_v4  ;;  %v1083_v39 = vsel %vm1079_vm7, %v1063_v5, %v1066_v9 }
 0x151   : > { %vm5576_vm10 = vcmp.lt.s32.totalorder %v5575_v6, 0  ;;  %v1093_v45 = vsel %vm1081_vm8, %v1075_v32, %v1092_v28  ;;  %v1090_v33 = vsel %vm1080_vm11, %v1087_v63, %v1089_v52  ;;  %vm931_vm12 = vweird.f32 %v6383_v49 }
 0x152   : > { %v1014_v13 = vsel %vm5576_vm10, 0, %v5575_v6  ;;  %v1094_v47 = vsel %vm1080_vm11, %v1091_v34, %v1093_v45  ;;  %v1085_v56 = vsel %vm1081_vm8, %v1069_v12, %v1084_v57  ;;  %v1163_v43 = vsel %vm1162_vm6, %v1161_v58, 0 }
 0x153   : > { %v1015_v42 = vsub.s32 32, %v1014_v13  ;;  %v1019_v60 = vsub.s32 4294967266, %v1014_v13  ;;  %v7043_v44 = vmul.u32.u64.low %v6994_v11, %v1094_v47  ;;  %v7044_v21 = vmul.u32.u64.high %v6994_v11, %v1094_v47, %v7043_v44 }
 0x154   : > { %v7047_v9 = vmul.u32.u64.low %v6994_v11, %v1090_v33  ;;  %v7048_v22 = vmul.u32.u64.high %v6994_v11, %v1090_v33, %v7047_v9  ;;  %v1016_v31 = vshll.u32 %v6996_v29, %v1014_v13  ;;  %v1165_v32 = vand.u32 31, %v1163_v43 }
 0x155   : > { %v1017_v30 = vshrl.u32 %v999_v16, %v1015_v42  ;;  %v1020_v27 = vadd.s32 127, %v1019_v60  ;;  %v6014_v59 = vpop.eup %6013  ;;  %vm934_vm13 = vcmp.lt.s32.totalorder %v6982_v10, 2  ;;  %vm935_vm14 = vcmp.eq.s32.totalorder %v6982_v10, 0 }
 0x156   : > { %vm938_vm15 = vcmp.eq.s32.totalorder %v6982_v10, 2  ;;  %v1086_v58 = vsel %vm1080_vm11, %v1083_v39, %v1085_v56  ;;  %v6016_v12 = vpop.eup %6015  ;;  %v939_v62 = vxor.u32 2147483648, %v6014_v59  ;;  %v1166_v17 = vsub.s32 32, %v1165_v32 }
 0x157   : > { %v1018_v26 = vor.u32 %v1017_v30, %v1016_v31  ;;  %v1021_v5 = vshll.u32 %v1020_v27, 23  ;;  %v936_v6 = vxor.u32 2147483648, %v6016_v12  ;;  %vm1104_vm0 = vc.u32 %v7044_v21, %v7047_v9 }
 0x158   : > { %v1105_v16 = vadd.s32 1, %v7048_v22  ;;  %v1159_v29 = vor.u32 8388608, %v7023_v61  ;;  %v940_v63 = vsel %vm938_vm15, %v939_v62, %v6016_v12  ;;  %v7061_v4 = vand.u32 3, %v1036_v24 }
 0x159   : > { %v1022_v57 = vor.u32 4788187, %v1021_v5  ;;  %v1102_v14 = vmul.u32 %v6994_v11, %v1086_v58  ;;  %v937_v34 = vsel %vm935_vm14, %v6014_v59, %v936_v6  ;;  %v1025_v28 = vcvt.s32.f32 %v1018_v26 }
 0x15a   : > { %v1106_v52 = vsel %vm1104_vm0, %v1105_v16, %v7048_v22  ;;  %v1164_v45 = vshrl.u32 %v1163_v43, 5  ;;  %v941_v13 = vsel %vm934_vm13, %v937_v34, %v940_v63  ;;  %v1169_v61 = vshrl.u32 %v10684_v15, %v1166_v17 }
 0x15b   : > { %v1023_v39 = vand.u32 2147483647, %v1022_v57  ;;  %v1107_v33 = vadd.s32 %v1106_v52, %v1102_v14  ;;  %v942_v24 = vsel %vm931_vm12, nan, %v941_v13  ;;  %v1168_v11 = vshll.u32 %v10691_v37, %v1165_v32 }
 0x15c   : > { %v1172_v47 = vshrl.u32 %v10693_v23, %v1166_v17  ;;  %v7074_v42 = vshll.u32 %v1159_v29, 8  ;;  %vm1049_vm1 = vcmp.lt.s32.totalorder %v6362_v36, 0  ;;  %v1171_v10 = vshll.u32 %v10684_v15, %v1165_v32  ;;  %5419 = vst [vmem:[%s6771_s9 + $0x20] sm:$0xff] %v942_v24 }
 0x15d   : > { %v1026_v60 = vmul.f32 %v1025_v28, %v1023_v39  ;;  %v1108_v56 = vadd.s32 536870912, %v1107_v33  ;;  %v1175_v43 = vshrl.u32 %v10694_v25, %v1166_v17  ;;  %v1174_v44 = vshll.u32 %v10693_v23, %v1165_v32 }
 0x15e   : > { %v1177_v49 = vshll.u32 %v10694_v25, %v1165_v32  ;;  %v1178_v22 = vshrl.u32 %v10695_v35, %v1166_v17  ;;  %v1181_v31 = vshrl.u32 %v10696_v38, %v1166_v17  ;;  %v1170_v59 = vor.u32 %v1169_v61, %v1168_v11 }
 0x15f   : > { %v1027_v30 = vxor.u32 2147483648, %v1026_v60  ;;  %v1109_v27 = vshrl.u32 %v1108_v56, 30  ;;  %v1173_v58 = vor.u32 %v1172_v47, %v1171_v10  ;;  %v1176_v12 = vor.u32 %v1175_v43, %v1174_v44 }
 0x160   : > { %v1179_v62 = vor.u32 %v1178_v22, %v1177_v49  ;;  %v1180_v26 = vshll.u32 %v10695_v35, %v1165_v32  ;;  %v1255_v5 = vand.u32 2147483647, %v6371_v41  ;;  %v1167_v29 = vshrl.u32 %v10691_v37, %v1166_v17 }
 0x161   : > { %v1028_v6 = vsel %vm945_vm4, %v1027_v30, %v1026_v60  ;;  %v1110_v16 = vshll.u32 %v1109_v27, 30  ;;  %v1258_v63 = vand.u32 2139095040, %v6371_v41  ;;  %v1133_v14 = vsub.s32 4, %v1109_v27 }
 0x162   : > { %v1031_v57 = vsel %vm6986_vm5, %v6386_v50, %v1028_v6  ;;  %v1182_v34 = vor.u32 %v1181_v31, %v1180_v26  ;;  %vm1183_vm2 = vcmp.lt.s32.totalorder %v1164_v45, 1  ;;  %vm1186_vm3 = vcmp.lt.s32.totalorder %v1164_v45, 4 }
 0x163   : > { %6017 = vcosq.f32 %v1031_v57  ;;  %v7093_v28 = vsub.s32 %v1107_v33, %v1110_v16  ;;  %v1191_v32 = vsel %vm1183_vm2, %v1170_v59, %v1173_v58  ;;  %vm1185_vm6 = vcmp.lt.s32.totalorder %v1164_v45, 3 }
 0x164   : > { %6019 = vsinq.f32 %v1031_v57  ;;  %v1188_v52 = vsel %vm1186_vm3, %v1176_v12, 2102212464  ;;  %v1192_v13 = vsel %vm1186_vm3, %v1179_v62, 920167782  ;;  %vm1184_vm4 = vcmp.lt.s32.totalorder %v1164_v45, 2 }
 0x165   : > { %v1113_v17 = vsub.s32 0, %v7093_v28  ;;  %v1193_v39 = vsel %vm1185_vm6, %v1176_v12, %v1192_v13  ;;  %v1195_v61 = vsel %vm1183_vm2, %v1173_v58, %v1176_v12  ;;  %v1134_v53 = vsel %vm1049_vm1, %v1133_v14, %v1109_v27 }
 0x166   : > { %v1187_v24 = vsel %vm1183_vm2, %v1167_v29, %v1170_v59  ;;  %v1194_v11 = vsel %vm1184_vm4, %v1191_v32, %v1193_v39  ;;  %v1196_v47 = vsel %vm1186_vm3, %v1182_v34, 1326507024  ;;  %v1189_v60 = vsel %vm1185_vm6, %v1173_v58, %v1188_v52 }
 0x167   : > { %v5578_v33 = vmin.u32 %v1113_v17, %v7093_v28  ;;  %v1197_v56 = vsel %vm1185_vm6, %v1179_v62, %v1196_v47  ;;  %v1259_v10 = vshrl.u32 %v1258_v63, 23  ;;  %vm7102_vm5 = vcmp.le.f32.partialorder %v1047_v46, 0.7853982 }
 0x168   : > { %v1198_v44 = vsel %vm1184_vm4, %v1195_v61, %v1197_v56  ;;  %v7108_v49 = vmul.u32.u64.low %v7074_v42, %v1194_v11  ;;  %v7109_v22 = vmul.u32.u64.high %v7074_v42, %v1194_v11, %v7108_v49  ;;  %v1136_v30 = vsel %vm7102_vm5, 0, %v1134_v53 }
 0x169   : > { %v1115_v31 = vclz %v5578_v33  ;;  %v1190_v27 = vsel %vm1184_vm4, %v1187_v24, %v1189_v60  ;;  %v7115_v59 = vmul.u32.u64.low %v7074_v42, %v1198_v44  ;;  %v7116_v58 = vmul.u32.u64.high %v7074_v42, %v1198_v44, %v7115_v59 }
 0x16a   : > { %v5585_v46 = vadd.s32 4294967169, %v1259_v10  ;;  %vm1035_vm7 = vweird.f32 %v6386_v50  ;;  %vm1038_vm8 = vcmp.lt.s32.totalorder %v7061_v4, 2  ;;  %v1262_v62 = vand.u32 8388607, %v1255_v5 }
 0x16b   : > { %v5579_v12 = vadd.s32 4294967294, %v1115_v31  ;;  %vm1039_vm9 = vcmp.eq.s32.totalorder %v7061_v4, 0  ;;  %vm1042_vm10 = vcmp.eq.s32.totalorder %v7061_v4, 2  ;;  %v1209_v45 = vadd.s32 1, %v7109_v22 }
 0x16c   : > { %v1265_v26 = vadd.s32 1, %v5585_v46  ;;  %v1103_v16 = vadd.s32 %v7047_v9, %v7044_v21  ;;  %v1140_v29 = vadd.s32 3, %v1136_v30  ;;  %v1206_v63 = vmul.u32 %v7074_v42, %v1190_v27 }
 0x16d   : > { %v6018_v6 = vpop.eup %6017  ;;  %vm5580_vm11 = vcmp.lt.s32.totalorder %v5579_v12, 0  ;;  %vm1208_vm12 = vc.u32 %v7116_v58, %v7108_v49  ;;  %v1362_v32 = vand.u32 2139095040, %v6389_v51  ;;  %v1263_v39 = vor.u32 8388608, %v1262_v62 }
 0x16e   : > { %v6020_v57 = vpop.eup %6019  ;;  %v1043_v14 = vxor.u32 2147483648, %v6018_v6  ;;  %v1118_v34 = vsel %vm5580_vm11, 0, %v5579_v12  ;;  %v1210_v9 = vsel %vm1208_vm12, %v1209_v45, %v7109_v22  ;;  %vm1266_vm13 = vcmp.gt.s32.totalorder %v1265_v26, 0 }
 0x16f   : > { %v1040_v52 = vxor.u32 2147483648, %v6020_v57  ;;  %v1119_v13 = vsub.s32 32, %v1118_v34  ;;  %v1123_v17 = vsub.s32 4294967266, %v1118_v34  ;;  %v1120_v21 = vshll.u32 %v7093_v28, %v1118_v34 }
 0x170   : > { %v1044_v61 = vsel %vm1042_vm10, %v1043_v14, %v6020_v57  ;;  %v1211_v11 = vadd.s32 %v1210_v9, %v1206_v63  ;;  %v1267_v33 = vsel %vm1266_vm13, %v1265_v26, 0  ;;  %v1359_v60 = vand.u32 2147483647, %v6389_v51 }
 0x171   : > { %v1041_v42 = vsel %vm1039_vm9, %v6018_v6, %v1040_v52  ;;  %v1121_v53 = vshrl.u32 %v1103_v16, %v1119_v13  ;;  %v1124_v24 = vadd.s32 127, %v1123_v17  ;;  %v1363_v56 = vshrl.u32 %v1362_v32, 23 }
 0x172   : > { %v1045_v47 = vsel %vm1038_vm8, %v1041_v42, %v1044_v61  ;;  %v1212_v22 = vadd.s32 536870912, %v1211_v11  ;;  %v1269_v31 = vand.u32 31, %v1267_v33  ;;  %v7142_v27 = vand.u32 3, %v1140_v29 }
 0x173   : > { %v1046_v28 = vsel %vm1035_vm7, nan, %v1045_v47  ;;  %v1122_v10 = vor.u32 %v1121_v53, %v1120_v21  ;;  %v1125_v44 = vshll.u32 %v1124_v24, 23  ;;  %vm1153_vm14 = vcmp.lt.s32.totalorder %v6368_v40, 0 }
 0x174   : > { %5420 = vst [vmem:[%s6771_s9 + $0x28] sm:$0xff] %v1046_v28  ;;  %v1213_v59 = vshrl.u32 %v1212_v22, 30  ;;  %v1270_v4 = vsub.s32 32, %v1269_v31  ;;  %v7145_v46 = vshll.u32 %v1263_v39, 8  ;;  %v5589_v12 = vadd.s32 4294967169, %v1363_v56 }
 0x175   : > { %v1126_v30 = vor.u32 4788187, %v1125_v44  ;;  %v7149_v62 = vand.u32 8388607, %v1359_v60  ;;  %v1129_v45 = vcvt.s32.f32 %v1122_v10  ;;  %v7152_v26 = vadd.s32 %v7108_v49, %v7116_v58 }
 0x176   : > { %v1214_v6 = vshll.u32 %v1213_v59, 30  ;;  %v1268_v16 = vshrl.u32 %v1267_v33, 5  ;;  %v1273_v29 = vshrl.u32 %v10684_v15, %v1270_v4  ;;  %v1276_v63 = vshrl.u32 %v10693_v23, %v1270_v4 }
 0x177   : > { %v1127_v50 = vand.u32 2147483647, %v1126_v30  ;;  %v1279_v57 = vshrl.u32 %v10694_v25, %v1270_v4  ;;  %v1272_v32 = vshll.u32 %v10691_v37, %v1269_v31  ;;  %v1282_v52 = vshrl.u32 %v10695_v35, %v1270_v4 }
 0x178   : > { %v7157_v34 = vsub.s32 %v1211_v11, %v1214_v6  ;;  %vm7163_vm15 = vcmp.le.f32.partialorder %v1151_v48, 0.7853982  ;;  %v1237_v58 = vsub.s32 4, %v1213_v59  ;;  %v1275_v13 = vshll.u32 %v10684_v15, %v1269_v31 }
 0x179   : > { %v1130_v14 = vmul.f32 %v1129_v45, %v1127_v50  ;;  %v1278_v17 = vshll.u32 %v10693_v23, %v1269_v31  ;;  %v1369_v39 = vadd.s32 1, %v5589_v12  ;;  %v1274_v9 = vor.u32 %v1273_v29, %v1272_v32 }
 0x17a   : > { %v1217_v21 = vsub.s32 0, %v7157_v34  ;;  %v1281_v42 = vshll.u32 %v10694_v25, %v1269_v31  ;;  %v1277_v53 = vor.u32 %v1276_v63, %v1275_v13  ;;  %v1284_v11 = vshll.u32 %v10695_v35, %v1269_v31 }
 0x17b   : > { %v1131_v61 = vxor.u32 2147483648, %v1130_v14  ;;  %v1280_v24 = vor.u32 %v1279_v57, %v1278_v17  ;;  %v1285_v48 = vshrl.u32 %v10696_v38, %v1270_v4  ;;  %v1271_v56 = vshrl.u32 %v10691_v37, %v1270_v4 }
 0x17c   : > { %v5582_v33 = vmin.u32 %v1217_v21, %v7157_v34  ;;  %v1283_v28 = vor.u32 %v1282_v52, %v1281_v42  ;;  %v1238_v44 = vsel %vm1153_vm14, %v1237_v58, %v1213_v59  ;;  %vm1287_vm0 = vcmp.lt.s32.totalorder %v1268_v16, 1 }
 0x17d   : > { %v1132_v47 = vsel %vm1049_vm1, %v1131_v61, %v1130_v14  ;;  %v1286_v22 = vor.u32 %v1285_v48, %v1284_v11  ;;  %vm1288_vm2 = vcmp.lt.s32.totalorder %v1268_v16, 2  ;;  %vm1290_vm3 = vcmp.lt.s32.totalorder %v1268_v16, 4 }
 0x17e   : > { %v1135_v10 = vsel %vm7102_vm5, %v6362_v36, %v1132_v47  ;;  %v1219_v31 = vclz %v5582_v33  ;;  %vm1289_vm1 = vcmp.lt.s32.totalorder %v1268_v16, 3  ;;  %v1292_v30 = vsel %vm1290_vm3, %v1280_v24, 2102212464 }
 0x17f   : > { %6021 = vcosq.f32 %v1135_v10  ;;  %v1295_v12 = vsel %vm1287_vm0, %v1274_v9, %v1277_v53  ;;  %v1291_v4 = vsel %vm1287_vm0, %v1271_v56, %v1274_v9  ;;  %v1296_v45 = vsel %vm1290_vm3, %v1283_v28, 920167782 }
 0x180   : > { %6023 = vsinq.f32 %v1135_v10  ;;  %v5583_v50 = vadd.s32 4294967294, %v1219_v31  ;;  %v1299_v6 = vsel %vm1287_vm0, %v1277_v53, %v1280_v24  ;;  %v1293_v29 = vsel %vm1289_vm1, %v1277_v53, %v1292_v30 }
 0x181   : > { %v1297_v43 = vsel %vm1289_vm1, %v1280_v24, %v1296_v45  ;;  %v1300_v63 = vsel %vm1290_vm3, %v1286_v22, 1326507024  ;;  %vm1370_vm6 = vcmp.gt.s32.totalorder %v1369_v39, 0  ;;  %v1240_v59 = vsel %vm7163_vm15, 0, %v1238_v44 }
 0x182   : > { %vm5584_vm4 = vcmp.lt.s32.totalorder %v5583_v50, 0  ;;  %v1298_v57 = vsel %vm1288_vm2, %v1295_v12, %v1297_v43  ;;  %v1301_v14 = vsel %vm1289_vm1, %v1283_v28, %v1300_v63  ;;  %vm1143_vm5 = vcmp.eq.s32.totalorder %v7142_v27, 0 }
 0x183   : > { %v1222_v32 = vsel %vm5584_vm4, 0, %v5583_v50  ;;  %v1302_v52 = vsel %vm1288_vm2, %v1299_v6, %v1301_v14  ;;  %v7188_v58 = vmul.u32.u64.low %v7145_v46, %v1298_v57  ;;  %v7189_v13 = vmul.u32.u64.high %v7145_v46, %v1298_v57, %v7188_v58 }
 0x184   : > { %vm1142_vm7 = vcmp.lt.s32.totalorder %v7142_v27, 2  ;;  %v1223_v17 = vsub.s32 32, %v1222_v32  ;;  %v1227_v61 = vsub.s32 4294967266, %v1222_v32  ;;  %v1294_v21 = vsel %vm1288_vm2, %v1291_v4, %v1293_v29 }
 0x185   : > { %v1371_v9 = vsel %vm1370_vm6, %v1369_v39, 0  ;;  %vm1139_vm8 = vweird.f32 %v6362_v36  ;;  %vm1146_vm9 = vcmp.eq.s32.totalorder %v7142_v27, 2  ;;  %v1224_v11 = vshll.u32 %v7157_v34, %v1222_v32 }
 0x186   : > { %v7197_v42 = vmul.u32.u64.low %v7145_v46, %v1302_v52  ;;  %v7198_v53 = vmul.u32.u64.high %v7145_v46, %v1302_v52, %v7197_v42  ;;  %v1373_v24 = vand.u32 31, %v1371_v9  ;;  %v1225_v48 = vshrl.u32 %v7152_v26, %v1223_v17 }
 0x187   : > { %v1228_v47 = vadd.s32 127, %v1227_v61  ;;  %v1367_v33 = vor.u32 8388608, %v7149_v62  ;;  %v1244_v56 = vadd.s32 3, %v1240_v59  ;;  %v1310_v16 = vmul.u32 %v7145_v46, %v1294_v21 }
 0x188   : > { %v1313_v39 = vadd.s32 1, %v7189_v13  ;;  %v1374_v28 = vsub.s32 32, %v1373_v24  ;;  %v1226_v44 = vor.u32 %v1225_v48, %v1224_v11  ;;  %v7205_v31 = vshrl.u32 %v1371_v9, 5 }
 0x189   : > { %v6022_v10 = vpop.eup %6021  ;;  %v1229_v22 = vshll.u32 %v1228_v47, 23  ;;  %v1376_v30 = vshll.u32 %v10691_v37, %v1373_v24  ;;  %vm1312_vm10 = vc.u32 %v7198_v53, %v7188_v58  ;;  %v1379_v62 = vshll.u32 %v10684_v15, %v1373_v24 }
 0x18a   : > { %v6024_v12 = vpop.eup %6023  ;;  %v1147_v34 = vxor.u32 2147483648, %v6022_v10  ;;  %v1385_v26 = vshll.u32 %v10694_v25, %v1373_v24  ;;  %v1233_v4 = vcvt.s32.f32 %v1226_v44  ;;  %v1314_v45 = vsel %vm1312_vm10, %v1313_v39, %v7189_v13 }
 0x18b   : > { %v1144_v46 = vxor.u32 2147483648, %v6024_v12  ;;  %v1230_v50 = vor.u32 4788187, %v1229_v22  ;;  %v1315_v29 = vadd.s32 %v1314_v45, %v1310_v16  ;;  %v1377_v43 = vshrl.u32 %v10684_v15, %v1374_v28 }
 0x18c   : > { %v1148_v6 = vsel %vm1146_vm9, %v1147_v34, %v6024_v12  ;;  %v1380_v63 = vshrl.u32 %v10693_v23, %v1374_v28  ;;  %vm1257_vm11 = vcmp.lt.s32.totalorder %v6371_v41, 0  ;;  %v1383_v14 = vshrl.u32 %v10694_v25, %v1374_v28 }
 0x18d   : > { %v1145_v59 = vsel %vm1143_vm5, %v6022_v10, %v1144_v46  ;;  %v1231_v57 = vand.u32 2147483647, %v1230_v50  ;;  %v1386_v32 = vshrl.u32 %v10695_v35, %v1374_v28  ;;  %v1316_v13 = vadd.s32 536870912, %v1315_v29 }
 0x18e   : > { %v1149_v52 = vsel %vm1142_vm7, %v1145_v59, %v1148_v6  ;;  %v1378_v17 = vor.u32 %v1377_v43, %v1376_v30  ;;  %v1382_v61 = vshll.u32 %v10693_v23, %v1373_v24  ;;  %v1381_v42 = vor.u32 %v1380_v63, %v1379_v62 }
 0x18f   : > { %v1150_v21 = vsel %vm1139_vm8, nan, %v1149_v52  ;;  %v1234_v9 = vmul.f32 %v1233_v4, %v1231_v57  ;;  %v1387_v11 = vor.u32 %v1386_v32, %v1385_v26  ;;  %v1317_v48 = vshrl.u32 %v1316_v13, 30 }
 0x190   : > { %v1389_v47 = vshrl.u32 %v10696_v38, %v1374_v28  ;;  %v7228_v16 = vshll.u32 %v1367_v33, 8  ;;  %v1463_v39 = vand.u32 2147483647, %v6392_v54  ;;  %5421 = vst [vmem:[%s6771_s9 + $0x30] sm:$0xff] %v1150_v21  ;;  %v7232_v10 = vand.u32 3, %v1244_v56 }
 0x191   : > { %v1235_v27 = vxor.u32 2147483648, %v1234_v9  ;;  %v1384_v44 = vor.u32 %v1383_v14, %v1382_v61  ;;  %v1388_v22 = vshll.u32 %v10695_v35, %v1373_v24  ;;  %v1318_v30 = vshll.u32 %v1317_v48, 30 }
 0x192   : > { %v1341_v36 = vsub.s32 4, %v1317_v48  ;;  %vm1391_vm12 = vcmp.lt.s32.totalorder %v7205_v31, 1  ;;  %vm1394_vm13 = vcmp.lt.s32.totalorder %v7205_v31, 4  ;;  %v1375_v26 = vshrl.u32 %v10691_v37, %v1374_v28 }
 0x193   : > { %v1236_v12 = vsel %vm1153_vm14, %v1235_v27, %v1234_v9  ;;  %v1390_v33 = vor.u32 %v1389_v47, %v1388_v22  ;;  %v1399_v34 = vsel %vm1391_vm12, %v1378_v17, %v1381_v42  ;;  %v1400_v56 = vsel %vm1394_vm13, %v1387_v11, 920167782 }
 0x194   : > { %v1239_v24 = vsel %vm7163_vm15, %v6368_v40, %v1236_v12  ;;  %v7246_v62 = vsub.s32 %v1315_v29, %v1318_v30  ;;  %vm1393_vm0 = vcmp.lt.s32.totalorder %v7205_v31, 3  ;;  %vm1392_vm14 = vcmp.lt.s32.totalorder %v7205_v31, 2 }
 0x195   : > { %6025 = vcosq.f32 %v1239_v24  ;;  %v1396_v46 = vsel %vm1394_vm13, %v1384_v44, 2102212464  ;;  %v1401_v50 = vsel %vm1393_vm0, %v1384_v44, %v1400_v56  ;;  %v1342_v49 = vsel %vm1257_vm11, %v1341_v36, %v1317_v48 }
 0x196   : > { %6027 = vsinq.f32 %v1239_v24  ;;  %v1321_v4 = vsub.s32 0, %v7246_v62  ;;  %v1402_v45 = vsel %vm1392_vm14, %v1399_v34, %v1401_v50  ;;  %v1403_v28 = vsel %vm1391_vm12, %v1381_v42, %v1384_v44 }
 0x197   : > { %v1404_v6 = vsel %vm1394_vm13, %v1390_v33, 1326507024  ;;  %v7263_v29 = vmul.u32.u64.low %v7228_v16, %v1402_v45  ;;  %v7264_v43 = vmul.u32.u64.high %v7228_v16, %v1402_v45, %v7263_v29  ;;  %v1395_v59 = vsel %vm1391_vm12, %v1375_v26, %v1378_v17 }
 0x198   : > { %v5586_v63 = vmin.u32 %v1321_v4, %v7246_v62  ;;  %v1397_v57 = vsel %vm1393_vm0, %v1381_v42, %v1396_v46  ;;  %v1405_v14 = vsel %vm1393_vm0, %v1387_v11, %v1404_v6  ;;  %vm7272_vm15 = vcmp.le.f32.partialorder %v1255_v5, 0.7853982 }
 0x199   : > { %v1406_v52 = vsel %vm1392_vm14, %v1403_v28, %v1405_v14  ;;  %v1466_v13 = vand.u32 2139095040, %v6392_v54  ;;  %v1344_v21 = vsel %vm7272_vm15, 0, %v1342_v49  ;;  %v1398_v17 = vsel %vm1392_vm14, %v1395_v59, %v1397_v57 }
 0x19a   : > { %v1323_v61 = vclz %v5586_v63  ;;  %v7284_v9 = vmul.u32.u64.low %v7228_v16, %v1406_v52  ;;  %v7285_v42 = vmul.u32.u64.high %v7228_v16, %v1406_v52, %v7284_v9  ;;  %vm1243_vm2 = vweird.f32 %v6368_v40 }
 0x19b   : > { %v1467_v5 = vshrl.u32 %v1466_v13, 23  ;;  %vm1246_vm3 = vcmp.lt.s32.totalorder %v7232_v10, 2  ;;  %v1470_v48 = vand.u32 8388607, %v1463_v39  ;;  %vm1247_vm1 = vcmp.eq.s32.totalorder %v7232_v10, 0 }
 0x19c   : > { %v5587_v11 = vadd.s32 4294967294, %v1323_v61  ;;  %vm1250_vm6 = vcmp.eq.s32.totalorder %v7232_v10, 2  ;;  %v1417_v31 = vadd.s32 1, %v7264_v43  ;;  %v1311_v27 = vadd.s32 %v7188_v58, %v7198_v53 }
 0x19d   : > { %v5593_v47 = vadd.s32 4294967169, %v1467_v5  ;;  %v1348_v44 = vadd.s32 3, %v1344_v21  ;;  %v1414_v22 = vmul.u32 %v7228_v16, %v1398_v17  ;;  %vm1416_vm5 = vc.u32 %v7285_v42, %v7263_v29 }
 0x19e   : > { %vm5588_vm4 = vcmp.lt.s32.totalorder %v5587_v11, 0  ;;  %v1570_v33 = vand.u32 2139095040, %v6395_v55  ;;  %v1471_v46 = vor.u32 8388608, %v1470_v48  ;;  %v1418_v53 = vsel %vm1416_vm5, %v1417_v31, %v7264_v43 }
 0x19f   : > { %v6026_v30 = vpop.eup %6025  ;;  %v1326_v36 = vsel %vm5588_vm4, 0, %v5587_v11  ;;  %v1473_v12 = vadd.s32 1, %v5593_v47  ;;  %v1419_v45 = vadd.s32 %v1418_v53, %v1414_v22  ;;  %v1567_v63 = vand.u32 2147483647, %v6395_v55 }
 0x1a0   : > { %v6028_v34 = vpop.eup %6027  ;;  %v1251_v56 = vxor.u32 2147483648, %v6026_v30  ;;  %v1327_v24 = vsub.s32 32, %v1326_v36  ;;  %v1331_v26 = vsub.s32 4294967266, %v1326_v36  ;;  %v1328_v58 = vshll.u32 %v7246_v62, %v1326_v36 }
 0x1a1   : > { %v1248_v50 = vxor.u32 2147483648, %v6028_v34  ;;  %vm1474_vm7 = vcmp.gt.s32.totalorder %v1473_v12, 0  ;;  %v1571_v59 = vshrl.u32 %v1570_v33, 23  ;;  %v1420_v14 = vadd.s32 536870912, %v1419_v45 }
 0x1a2   : > { %v1252_v16 = vsel %vm1250_vm6, %v1251_v56, %v6028_v34  ;;  %v1329_v4 = vshrl.u32 %v1311_v27, %v1327_v24  ;;  %v1332_v49 = vadd.s32 127, %v1331_v26  ;;  %v1475_v6 = vsel %vm1474_vm7, %v1473_v12, 0 }
 0x1a3   : > { %v1249_v28 = vsel %vm1247_vm1, %v6026_v30, %v1248_v50  ;;  %v1477_v13 = vand.u32 31, %v1475_v6  ;;  %v7311_v21 = vand.u32 3, %v1348_v44  ;;  %vm1361_vm8 = vcmp.lt.s32.totalorder %v6389_v51, 0 }
 0x1a4   : > { %v1253_v62 = vsel %vm1246_vm3, %v1249_v28, %v1252_v16  ;;  %v1330_v57 = vor.u32 %v1329_v4, %v1328_v58  ;;  %v1333_v43 = vshll.u32 %v1332_v49, 23  ;;  %v1421_v17 = vshrl.u32 %v1420_v14, 30 }
 0x1a5   : > { %v1254_v52 = vsel %vm1243_vm2, nan, %v1253_v62  ;;  %v1478_v9 = vsub.s32 32, %v1477_v13  ;;  %v7315_v5 = vshll.u32 %v1471_v46, 8  ;;  %v5597_v11 = vadd.s32 4294967169, %v1571_v59 }
 0x1a6   : > { %v1334_v61 = vor.u32 4788187, %v1333_v43  ;;  %5422 = vst [vmem:[%s6771_s9 + $0x38] sm:$0xff] %v1254_v52  ;;  %v7319_v10 = vand.u32 8388607, %v1567_v63  ;;  %v1337_v31 = vcvt.s32.f32 %v1330_v57  ;;  %v7323_v40 = vadd.s32 %v7263_v29, %v7285_v42 }
 0x1a7   : > { %v1422_v47 = vshll.u32 %v1421_v17, 30  ;;  %v1476_v27 = vshrl.u32 %v1475_v6, 5  ;;  %v1481_v44 = vshrl.u32 %v10684_v15, %v1478_v9  ;;  %v1484_v22 = vshrl.u32 %v10693_v23, %v1478_v9 }
 0x1a8   : > { %v1335_v48 = vand.u32 2147483647, %v1334_v61  ;;  %v1487_v30 = vshrl.u32 %v10694_v25, %v1478_v9  ;;  %v1480_v33 = vshll.u32 %v10691_v37, %v1477_v13  ;;  %v1490_v34 = vshrl.u32 %v10695_v35, %v1478_v9 }
 0x1a9   : > { %v7328_v12 = vsub.s32 %v1419_v45, %v1422_v47  ;;  %vm7334_vm9 = vcmp.le.f32.partialorder %v1359_v60, 0.7853982  ;;  %v1445_v42 = vsub.s32 4, %v1421_v17  ;;  %v1483_v56 = vshll.u32 %v10684_v15, %v1477_v13 }
 0x1aa   : > { %v1338_v36 = vmul.f32 %v1337_v31, %v1335_v48  ;;  %v1486_v24 = vshll.u32 %v10693_v23, %v1477_v13  ;;  %v1577_v26 = vadd.s32 1, %v5597_v11  ;;  %v1482_v58 = vor.u32 %v1481_v44, %v1480_v33 }
 0x1ab   : > { %v1425_v50 = vsub.s32 0, %v7328_v12  ;;  %v1489_v53 = vshll.u32 %v10694_v25, %v1477_v13  ;;  %v1485_v16 = vor.u32 %v1484_v22, %v1483_v56  ;;  %v1492_v49 = vshll.u32 %v10695_v35, %v1477_v13 }
 0x1ac   : > { %v1339_v46 = vxor.u32 2147483648, %v1338_v36  ;;  %v1488_v4 = vor.u32 %v1487_v30, %v1486_v24  ;;  %v1493_v60 = vshrl.u32 %v10696_v38, %v1478_v9  ;;  %v1479_v6 = vshrl.u32 %v10691_v37, %v1478_v9 }
 0x1ad   : > { %v5590_v28 = vmin.u32 %v1425_v50, %v7328_v12  ;;  %v1491_v59 = vor.u32 %v1490_v34, %v1489_v53  ;;  %v1446_v57 = vsel %vm1361_vm8, %v1445_v42, %v1421_v17  ;;  %vm1495_vm10 = vcmp.lt.s32.totalorder %v1476_v27, 1 }
 0x1ae   : > { %v1340_v45 = vsel %vm1257_vm11, %v1339_v46, %v1338_v36  ;;  %v1494_v43 = vor.u32 %v1493_v60, %v1492_v49  ;;  %vm1496_vm12 = vcmp.lt.s32.totalorder %v1476_v27, 2  ;;  %vm1498_vm13 = vcmp.lt.s32.totalorder %v1476_v27, 4 }
 0x1af   : > { %v1343_v62 = vsel %vm7272_vm15, %v6371_v41, %v1340_v45  ;;  %v1427_v14 = vclz %v5590_v28  ;;  %vm1497_vm11 = vcmp.lt.s32.totalorder %v1476_v27, 3  ;;  %v1500_v52 = vsel %vm1498_vm13, %v1488_v4, 2102212464 }
 0x1b0   : > { %6029 = vcosq.f32 %v1343_v62  ;;  %v1503_v13 = vsel %vm1495_vm10, %v1482_v58, %v1485_v16  ;;  %v1499_v9 = vsel %vm1495_vm10, %v1479_v6, %v1482_v58  ;;  %v1504_v11 = vsel %vm1498_vm13, %v1491_v59, 920167782 }
 0x1b1   : > { %6031 = vsinq.f32 %v1343_v62  ;;  %v5591_v61 = vadd.s32 4294967294, %v1427_v14  ;;  %v1507_v48 = vsel %vm1495_vm10, %v1485_v16, %v1488_v4  ;;  %v1501_v31 = vsel %vm1497_vm11, %v1485_v16, %v1500_v52 }
 0x1b2   : > { %v1505_v32 = vsel %vm1497_vm11, %v1488_v4, %v1504_v11  ;;  %v1508_v47 = vsel %vm1498_vm13, %v1494_v43, 1326507024  ;;  %vm1578_vm0 = vcmp.gt.s32.totalorder %v1577_v26, 0  ;;  %v1448_v17 = vsel %vm7334_vm9, 0, %v1446_v57 }
 0x1b3   : > { %vm5592_vm14 = vcmp.lt.s32.totalorder %v5591_v61, 0  ;;  %v1506_v44 = vsel %vm1496_vm12, %v1503_v13, %v1505_v32  ;;  %v1509_v22 = vsel %vm1497_vm11, %v1491_v59, %v1508_v47  ;;  %vm1351_vm15 = vcmp.eq.s32.totalorder %v7311_v21, 0 }
 0x1b4   : > { %v1430_v30 = vsel %vm5592_vm14, 0, %v5591_v61  ;;  %v1510_v36 = vsel %vm1496_vm12, %v1507_v48, %v1509_v22  ;;  %v7359_v33 = vmul.u32.u64.low %v7315_v5, %v1506_v44  ;;  %v7360_v34 = vmul.u32.u64.high %v7315_v5, %v1506_v44, %v7359_v33 }
 0x1b5   : > { %vm1350_vm2 = vcmp.lt.s32.totalorder %v7311_v21, 2  ;;  %v1431_v42 = vsub.s32 32, %v1430_v30  ;;  %v1435_v56 = vsub.s32 4294967266, %v1430_v30  ;;  %v1502_v24 = vsel %vm1496_vm12, %v1499_v9, %v1501_v31 }
 0x1b6   : > { %v1579_v46 = vsel %vm1578_vm0, %v1577_v26, 0  ;;  %vm1347_vm3 = vweird.f32 %v6371_v41  ;;  %vm1354_vm1 = vcmp.eq.s32.totalorder %v7311_v21, 2  ;;  %v1432_v16 = vshll.u32 %v7328_v12, %v1430_v30 }
 0x1b7   : > { %v7368_v50 = vmul.u32.u64.low %v7315_v5, %v1510_v36  ;;  %v7369_v58 = vmul.u32.u64.high %v7315_v5, %v1510_v36, %v7368_v50  ;;  %v1581_v53 = vand.u32 31, %v1579_v46  ;;  %v1433_v4 = vshrl.u32 %v7323_v40, %v1431_v42 }
 0x1b8   : > { %v1436_v49 = vadd.s32 127, %v1435_v56  ;;  %v1575_v60 = vor.u32 8388608, %v7319_v10  ;;  %v1452_v45 = vadd.s32 3, %v1448_v17  ;;  %v1518_v27 = vmul.u32 %v7315_v5, %v1502_v24 }
 0x1b9   : > { %v1521_v26 = vadd.s32 1, %v7360_v34  ;;  %v1582_v28 = vsub.s32 32, %v1581_v53  ;;  %v1434_v59 = vor.u32 %v1433_v4, %v1432_v16  ;;  %v7376_v57 = vshrl.u32 %v1579_v46, 5 }
 0x1ba   : > { %v6030_v6 = vpop.eup %6029  ;;  %v1437_v62 = vshll.u32 %v1436_v49, 23  ;;  %v1584_v43 = vshll.u32 %v10691_v37, %v1581_v53  ;;  %vm1520_vm6 = vc.u32 %v7369_v58, %v7359_v33  ;;  %v1587_v10 = vshll.u32 %v10684_v15, %v1581_v53 }
 0x1bb   : > { %v6032_v14 = vpop.eup %6031  ;;  %v1355_v12 = vxor.u32 2147483648, %v6030_v6  ;;  %v1593_v40 = vshll.u32 %v10694_v25, %v1581_v53  ;;  %v1441_v13 = vcvt.s32.f32 %v1434_v59  ;;  %v1522_v61 = vsel %vm1520_vm6, %v1521_v26, %v7360_v34 }
 0x1bc   : > { %v1352_v5 = vxor.u32 2147483648, %v6032_v14  ;;  %v1438_v52 = vor.u32 4788187, %v1437_v62  ;;  %v1523_v11 = vadd.s32 %v1522_v61, %v1518_v27  ;;  %v1585_v48 = vshrl.u32 %v10684_v15, %v1582_v28 }
 0x1bd   : > { %v1356_v9 = vsel %vm1354_vm1, %v1355_v12, %v6032_v14  ;;  %v1588_v31 = vshrl.u32 %v10693_v23, %v1582_v28  ;;  %vm1465_vm4 = vcmp.lt.s32.totalorder %v6392_v54, 0  ;;  %v1591_v17 = vshrl.u32 %v10694_v25, %v1582_v28 }
 0x1be   : > { %v1353_v32 = vsel %vm1351_vm15, %v6030_v6, %v1352_v5  ;;  %v1439_v47 = vand.u32 2147483647, %v1438_v52  ;;  %v1594_v44 = vshrl.u32 %v10695_v35, %v1582_v28  ;;  %v1524_v30 = vadd.s32 536870912, %v1523_v11 }
 0x1bf   : > { %v1357_v22 = vsel %vm1350_vm2, %v1353_v32, %v1356_v9  ;;  %v1586_v36 = vor.u32 %v1585_v48, %v1584_v43  ;;  %v1590_v34 = vshll.u32 %v10693_v23, %v1581_v53  ;;  %v1589_v24 = vor.u32 %v1588_v31, %v1587_v10 }
 0x1c0   : > { %v1358_v42 = vsel %vm1347_vm3, nan, %v1357_v22  ;;  %v1442_v56 = vmul.f32 %v1441_v13, %v1439_v47  ;;  %v1595_v46 = vor.u32 %v1594_v44, %v1593_v40  ;;  %v1525_v50 = vshrl.u32 %v1524_v30, 30 }
 0x1c1   : > { %v1597_v16 = vshrl.u32 %v10696_v38, %v1582_v28  ;;  %v7399_v4 = vshll.u32 %v1575_v60, 8  ;;  %v1671_v49 = vand.u32 2147483647, %v6405_v0  ;;  %5423 = vst [vmem:[%s6771_s9 + $0x40] sm:$0xff] %v1358_v42  ;;  %v7403_v27 = vand.u32 3, %v1452_v45 }
 0x1c2   : > { %v1443_v21 = vxor.u32 2147483648, %v1442_v56  ;;  %v1592_v26 = vor.u32 %v1591_v17, %v1590_v34  ;;  %v1596_v6 = vshll.u32 %v10695_v35, %v1581_v53  ;;  %v1526_v59 = vshll.u32 %v1525_v50, 30 }
 0x1c3   : > { %v1549_v41 = vsub.s32 4, %v1525_v50  ;;  %vm1599_vm5 = vcmp.lt.s32.totalorder %v7376_v57, 1  ;;  %vm1602_vm7 = vcmp.lt.s32.totalorder %v7376_v57, 4  ;;  %v1583_v12 = vshrl.u32 %v10691_v37, %v1582_v28 }
 0x1c4   : > { %v1444_v62 = vsel %vm1361_vm8, %v1443_v21, %v1442_v56  ;;  %v1598_v60 = vor.u32 %v1597_v16, %v1596_v6  ;;  %v1607_v43 = vsel %vm1599_vm5, %v1586_v36, %v1589_v24  ;;  %v1608_v45 = vsel %vm1602_vm7, %v1595_v46, 920167782 }
 0x1c5   : > { %v1447_v53 = vsel %vm7334_vm9, %v6389_v51, %v1444_v62  ;;  %v7417_v14 = vsub.s32 %v1523_v11, %v1526_v59  ;;  %vm1601_vm10 = vcmp.lt.s32.totalorder %v7376_v57, 3  ;;  %vm1600_vm8 = vcmp.lt.s32.totalorder %v7376_v57, 2 }
 0x1c6   : > { %6033 = vcosq.f32 %v1447_v53  ;;  %v1604_v10 = vsel %vm1602_vm7, %v1592_v26, 2102212464  ;;  %v1609_v40 = vsel %vm1601_vm10, %v1592_v26, %v1608_v45  ;;  %v1550_v29 = vsel %vm1465_vm4, %v1549_v41, %v1525_v50 }
 0x1c7   : > { %6035 = vsinq.f32 %v1447_v53  ;;  %v1529_v5 = vsub.s32 0, %v7417_v14  ;;  %v1610_v52 = vsel %vm1600_vm8, %v1607_v43, %v1609_v40  ;;  %v1611_v28 = vsel %vm1599_vm5, %v1589_v24, %v1592_v26 }
 0x1c8   : > { %v1612_v13 = vsel %vm1602_vm7, %v1598_v60, 1326507024  ;;  %v7434_v61 = vmul.u32.u64.low %v7399_v4, %v1610_v52  ;;  %v7435_v9 = vmul.u32.u64.high %v7399_v4, %v1610_v52, %v7434_v61  ;;  %v1603_v48 = vsel %vm1599_vm5, %v1583_v12, %v1586_v36 }
 0x1c9   : > { %v5594_v11 = vmin.u32 %v1529_v5, %v7417_v14  ;;  %v1605_v31 = vsel %vm1601_vm10, %v1589_v24, %v1604_v10  ;;  %v1613_v32 = vsel %vm1601_vm10, %v1595_v46, %v1612_v13  ;;  %vm7443_vm9 = vcmp.le.f32.partialorder %v1463_v39, 0.7853982 }
 0x1ca   : > { %v1614_v17 = vsel %vm1600_vm8, %v1611_v28, %v1613_v32  ;;  %v1674_v44 = vand.u32 2139095040, %v6405_v0  ;;  %v1552_v30 = vsel %vm7443_vm9, 0, %v1550_v29  ;;  %v1606_v36 = vsel %vm1600_vm8, %v1603_v48, %v1605_v31 }
 0x1cb   : > { %v1531_v22 = vclz %v5594_v11  ;;  %v7455_v34 = vmul.u32.u64.low %v7399_v4, %v1614_v17  ;;  %v7456_v42 = vmul.u32.u64.high %v7399_v4, %v1614_v17, %v7455_v34  ;;  %vm1451_vm12 = vweird.f32 %v6389_v51 }
 0x1cc   : > { %v1675_v39 = vshrl.u32 %v1674_v44, 23  ;;  %vm1454_vm13 = vcmp.lt.s32.totalorder %v7403_v27, 2  ;;  %v1678_v24 = vand.u32 8388607, %v1671_v49  ;;  %vm1455_vm11 = vcmp.eq.s32.totalorder %v7403_v27, 0 }
 0x1cd   : > { %v5595_v56 = vadd.s32 4294967294, %v1531_v22  ;;  %vm1458_vm0 = vcmp.eq.s32.totalorder %v7403_v27, 2  ;;  %v1625_v57 = vadd.s32 1, %v7435_v9  ;;  %v1519_v50 = vadd.s32 %v7359_v33, %v7369_v58 }
 0x1ce   : > { %v5601_v46 = vadd.s32 4294967169, %v1675_v39  ;;  %v1556_v16 = vadd.s32 3, %v1552_v30  ;;  %v1622_v21 = vmul.u32 %v7399_v4, %v1606_v36  ;;  %vm1624_vm15 = vc.u32 %v7456_v42, %v7434_v61 }
 0x1cf   : > { %vm5596_vm14 = vcmp.lt.s32.totalorder %v5595_v56, 0  ;;  %v1778_v41 = vand.u32 2139095040, %v6408_v1  ;;  %v1679_v53 = vor.u32 8388608, %v1678_v24  ;;  %v1626_v58 = vsel %vm1624_vm15, %v1625_v57, %v7435_v9 }
 0x1d0   : > { %v6034_v26 = vpop.eup %6033  ;;  %v1534_v6 = vsel %vm5596_vm14, 0, %v5595_v56  ;;  %v1681_v59 = vadd.s32 1, %v5601_v46  ;;  %v1627_v5 = vadd.s32 %v1626_v58, %v1622_v21  ;;  %v1775_v28 = vand.u32 2147483647, %v6408_v1 }
 0x1d1   : > { %v6036_v62 = vpop.eup %6035  ;;  %v1459_v60 = vxor.u32 2147483648, %v6034_v26  ;;  %v1535_v43 = vsub.s32 32, %v1534_v6  ;;  %v1539_v45 = vsub.s32 4294967266, %v1534_v6  ;;  %v1536_v33 = vshll.u32 %v7417_v14, %v1534_v6 }
 0x1d2   : > { %v1456_v12 = vxor.u32 2147483648, %v6036_v62  ;;  %vm1682_vm2 = vcmp.gt.s32.totalorder %v1681_v59, 0  ;;  %v1779_v13 = vshrl.u32 %v1778_v41, 23  ;;  %v1628_v48 = vadd.s32 536870912, %v1627_v5 }
 0x1d3   : > { %v1460_v4 = vsel %vm1458_vm0, %v1459_v60, %v6036_v62  ;;  %v1537_v10 = vshrl.u32 %v1519_v50, %v1535_v43  ;;  %v1540_v40 = vadd.s32 127, %v1539_v45  ;;  %v1683_v52 = vsel %vm1682_vm2, %v1681_v59, 0 }
 0x1d4   : > { %v1457_v29 = vsel %vm1455_vm11, %v6034_v26, %v1456_v12  ;;  %v1685_v32 = vand.u32 31, %v1683_v52  ;;  %v7482_v44 = vand.u32 3, %v1556_v16  ;;  %vm1569_vm3 = vcmp.lt.s32.totalorder %v6395_v55, 0 }
 0x1d5   : > { %v1461_v14 = vsel %vm1454_vm13, %v1457_v29, %v1460_v4  ;;  %v1538_v11 = vor.u32 %v1537_v10, %v1536_v33  ;;  %v1541_v9 = vshll.u32 %v1540_v40, 23  ;;  %v1629_v22 = vshrl.u32 %v1628_v48, 30 }
 0x1d6   : > { %v1462_v31 = vsel %vm1451_vm12, nan, %v1461_v14  ;;  %v1686_v30 = vsub.s32 32, %v1685_v32  ;;  %v7486_v36 = vshll.u32 %v1679_v53, 8  ;;  %v5605_v34 = vadd.s32 4294967169, %v1779_v13 }
 0x1d7   : > { %v1542_v17 = vor.u32 4788187, %v1541_v9  ;;  %5424 = vst [vmem:[%s6771_s9 + $0x48] sm:$0xff] %v1462_v31  ;;  %v7490_v27 = vand.u32 8388607, %v1775_v28  ;;  %v1545_v56 = vcvt.s32.f32 %v1538_v11  ;;  %v7494_v51 = vadd.s32 %v7434_v61, %v7456_v42 }
 0x1d8   : > { %v1630_v24 = vshll.u32 %v1629_v22, 30  ;;  %v1684_v57 = vshrl.u32 %v1683_v52, 5  ;;  %v1689_v46 = vshrl.u32 %v10684_v15, %v1686_v30  ;;  %v1692_v50 = vshrl.u32 %v10693_v23, %v1686_v30 }
 0x1d9   : > { %v1543_v39 = vand.u32 2147483647, %v1542_v17  ;;  %v1695_v16 = vshrl.u32 %v10694_v25, %v1686_v30  ;;  %v1688_v6 = vshll.u32 %v10691_v37, %v1685_v32  ;;  %v1698_v59 = vshrl.u32 %v10695_v35, %v1686_v30 }
 0x1da   : > { %v7499_v26 = vsub.s32 %v1627_v5, %v1630_v24  ;;  %vm7505_vm1 = vcmp.le.f32.partialorder %v1567_v63, 0.7853982  ;;  %v1653_v42 = vsub.s32 4, %v1629_v22  ;;  %v1691_v41 = vshll.u32 %v10684_v15, %v1685_v32 }
 0x1db   : > { %v1546_v21 = vmul.f32 %v1545_v56, %v1543_v39  ;;  %v1694_v62 = vshll.u32 %v10693_v23, %v1685_v32  ;;  %v1785_v60 = vadd.s32 1, %v5605_v34  ;;  %v1690_v53 = vor.u32 %v1689_v46, %v1688_v6 }
 0x1dc   : > { %v1633_v45 = vsub.s32 0, %v7499_v26  ;;  %v1697_v12 = vshll.u32 %v10694_v25, %v1685_v32  ;;  %v1693_v33 = vor.u32 %v1692_v50, %v1691_v41  ;;  %v1700_v4 = vshll.u32 %v10695_v35, %v1685_v32 }
 0x1dd   : > { %v1547_v43 = vxor.u32 2147483648, %v1546_v21  ;;  %v1696_v58 = vor.u32 %v1695_v16, %v1694_v62  ;;  %v1701_v63 = vshrl.u32 %v10696_v38, %v1686_v30  ;;  %v1687_v5 = vshrl.u32 %v10691_v37, %v1686_v30 }
 0x1de   : > { %v5598_v40 = vmin.u32 %v1633_v45, %v7499_v26  ;;  %v1699_v29 = vor.u32 %v1698_v59, %v1697_v12  ;;  %v1654_v13 = vsel %vm1569_vm3, %v1653_v42, %v1629_v22  ;;  %vm1703_vm6 = vcmp.lt.s32.totalorder %v1684_v57, 1 }
 0x1df   : > { %v1548_v10 = vsel %vm1465_vm4, %v1547_v43, %v1546_v21  ;;  %v1702_v14 = vor.u32 %v1701_v63, %v1700_v4  ;;  %vm1704_vm5 = vcmp.lt.s32.totalorder %v1684_v57, 2  ;;  %vm1706_vm7 = vcmp.lt.s32.totalorder %v1684_v57, 4 }
 0x1e0   : > { %v1551_v52 = vsel %vm7443_vm9, %v6392_v54, %v1548_v10  ;;  %v1635_v11 = vclz %v5598_v40  ;;  %vm1705_vm4 = vcmp.lt.s32.totalorder %v1684_v57, 3  ;;  %v1708_v9 = vsel %vm1706_vm7, %v1696_v58, 2102212464 }
 0x1e1   : > { %6037 = vcosq.f32 %v1551_v52  ;;  %v1711_v48 = vsel %vm1703_vm6, %v1690_v53, %v1693_v33  ;;  %v1707_v32 = vsel %vm1703_vm6, %v1687_v5, %v1690_v53  ;;  %v1712_v17 = vsel %vm1706_vm7, %v1699_v29, 920167782 }
 0x1e2   : > { %6039 = vsinq.f32 %v1551_v52  ;;  %v5599_v31 = vadd.s32 4294967294, %v1635_v11  ;;  %v1715_v30 = vsel %vm1703_vm6, %v1693_v33, %v1696_v58  ;;  %v1709_v34 = vsel %vm1705_vm4, %v1693_v33, %v1708_v9 }
 0x1e3   : > { %v1713_v47 = vsel %vm1705_vm4, %v1696_v58, %v1712_v17  ;;  %v1716_v39 = vsel %vm1706_vm7, %v1702_v14, 1326507024  ;;  %vm1786_vm10 = vcmp.gt.s32.totalorder %v1785_v60, 0  ;;  %v1656_v22 = vsel %vm7505_vm1, 0, %v1654_v13 }
 0x1e4   : > { %vm5600_vm8 = vcmp.lt.s32.totalorder %v5599_v31, 0  ;;  %v1714_v56 = vsel %vm1704_vm5, %v1711_v48, %v1713_v47  ;;  %v1717_v24 = vsel %vm1705_vm4, %v1699_v29, %v1716_v39  ;;  %vm1559_vm9 = vcmp.eq.s32.totalorder %v7482_v44, 0 }
 0x1e5   : > { %v1638_v46 = vsel %vm5600_vm8, 0, %v5599_v31  ;;  %v1718_v50 = vsel %vm1704_vm5, %v1715_v30, %v1717_v24  ;;  %v7530_v16 = vmul.u32.u64.low %v7486_v36, %v1714_v56  ;;  %v7531_v21 = vmul.u32.u64.high %v7486_v36, %v1714_v56, %v7530_v16 }
 0x1e6   : > { %vm1558_vm12 = vcmp.lt.s32.totalorder %v7482_v44, 2  ;;  %v1639_v6 = vsub.s32 32, %v1638_v46  ;;  %v1643_v59 = vsub.s32 4294967266, %v1638_v46  ;;  %v1710_v42 = vsel %vm1704_vm5, %v1707_v32, %v1709_v34 }
 0x1e7   : > { %v1787_v41 = vsel %vm1786_vm10, %v1785_v60, 0  ;;  %vm1555_vm13 = vweird.f32 %v6392_v54  ;;  %vm1562_vm11 = vcmp.eq.s32.totalorder %v7482_v44, 2  ;;  %v1640_v53 = vshll.u32 %v7499_v26, %v1638_v46 }
 0x1e8   : > { %v7539_v62 = vmul.u32.u64.low %v7486_v36, %v1718_v50  ;;  %v7540_v43 = vmul.u32.u64.high %v7486_v36, %v1718_v50, %v7539_v62  ;;  %v1789_v45 = vand.u32 31, %v1787_v41  ;;  %v1641_v12 = vshrl.u32 %v7494_v51, %v1639_v6 }
 0x1e9   : > { %v1644_v33 = vadd.s32 127, %v1643_v59  ;;  %v1783_v58 = vor.u32 8388608, %v7490_v27  ;;  %v1660_v4 = vadd.s32 3, %v1656_v22  ;;  %v1726_v57 = vmul.u32 %v7486_v36, %v1710_v42 }
 0x1ea   : > { %v1729_v60 = vadd.s32 1, %v7531_v21  ;;  %v1790_v63 = vsub.s32 32, %v1789_v45  ;;  %v1642_v40 = vor.u32 %v1641_v12, %v1640_v53  ;;  %v7547_v29 = vshrl.u32 %v1787_v41, 5 }
 0x1eb   : > { %v6038_v10 = vpop.eup %6037  ;;  %v1645_v5 = vshll.u32 %v1644_v33, 23  ;;  %v1792_v52 = vshll.u32 %v10691_v37, %v1789_v45  ;;  %vm1728_vm0 = vc.u32 %v7540_v43, %v7530_v16  ;;  %v1795_v27 = vshll.u32 %v10684_v15, %v1789_v45 }
 0x1ec   : > { %v6040_v13 = vpop.eup %6039  ;;  %v1563_v26 = vxor.u32 2147483648, %v6038_v10  ;;  %v1801_v51 = vshll.u32 %v10694_v25, %v1789_v45  ;;  %v1649_v11 = vcvt.s32.f32 %v1642_v40  ;;  %v1730_v9 = vsel %vm1728_vm0, %v1729_v60, %v7531_v21 }
 0x1ed   : > { %v1560_v36 = vxor.u32 2147483648, %v6040_v13  ;;  %v1646_v14 = vor.u32 4788187, %v1645_v5  ;;  %v1731_v31 = vadd.s32 %v1730_v9, %v1726_v57  ;;  %v1793_v32 = vshrl.u32 %v10684_v15, %v1790_v63 }
 0x1ee   : > { %v1564_v48 = vsel %vm1562_vm11, %v1563_v26, %v6040_v13  ;;  %v1796_v17 = vshrl.u32 %v10693_v23, %v1790_v63  ;;  %vm1673_vm14 = vcmp.lt.s32.totalorder %v6405_v0, 0  ;;  %v1799_v47 = vshrl.u32 %v10694_v25, %v1790_v63 }
 0x1ef   : > { %v1561_v30 = vsel %vm1559_vm9, %v6038_v10, %v1560_v36  ;;  %v1647_v34 = vand.u32 2147483647, %v1646_v14  ;;  %v1802_v39 = vshrl.u32 %v10695_v35, %v1790_v63  ;;  %v1732_v56 = vadd.s32 536870912, %v1731_v31 }
 0x1f0   : > { %v1565_v22 = vsel %vm1558_vm12, %v1561_v30, %v1564_v48  ;;  %v1794_v24 = vor.u32 %v1793_v32, %v1792_v52  ;;  %v1798_v46 = vshll.u32 %v10693_v23, %v1789_v45  ;;  %v1797_v6 = vor.u32 %v1796_v17, %v1795_v27 }
 0x1f1   : > { %v1566_v50 = vsel %vm1555_vm13, nan, %v1565_v22  ;;  %v1650_v21 = vmul.f32 %v1649_v11, %v1647_v34  ;;  %v1803_v59 = vor.u32 %v1802_v39, %v1801_v51  ;;  %v1733_v42 = vshrl.u32 %v1732_v56, 30 }
 0x1f2   : > { %v1805_v41 = vshrl.u32 %v10696_v38, %v1790_v63  ;;  %v7570_v62 = vshll.u32 %v1783_v58, 8  ;;  %v1879_v53 = vand.u32 2147483647, %v6411_v2  ;;  %5425 = vst [vmem:[%s6771_s9 + $0x50] sm:$0xff] %v1566_v50  ;;  %v7574_v12 = vand.u32 3, %v1660_v4 }
 0x1f3   : > { %v1651_v44 = vxor.u32 2147483648, %v1650_v21  ;;  %v1800_v33 = vor.u32 %v1799_v47, %v1798_v46  ;;  %v1804_v57 = vshll.u32 %v10695_v35, %v1789_v45  ;;  %v1734_v60 = vshll.u32 %v1733_v42, 30 }
 0x1f4   : > { %v1757_v54 = vsub.s32 4, %v1733_v42  ;;  %vm1807_vm15 = vcmp.lt.s32.totalorder %v7547_v29, 1  ;;  %vm1810_vm2 = vcmp.lt.s32.totalorder %v7547_v29, 4  ;;  %v1791_v52 = vshrl.u32 %v10691_v37, %v1790_v63 }
 0x1f5   : > { %v1652_v10 = vsel %vm1569_vm3, %v1651_v44, %v1650_v21  ;;  %v1806_v58 = vor.u32 %v1805_v41, %v1804_v57  ;;  %v1815_v40 = vsel %vm1807_vm15, %v1794_v24, %v1797_v6  ;;  %v1816_v4 = vsel %vm1810_vm2, %v1803_v59, 920167782 }
 0x1f6   : > { %v1655_v45 = vsel %vm7505_vm1, %v6395_v55, %v1652_v10  ;;  %v7588_v5 = vsub.s32 %v1731_v31, %v1734_v60  ;;  %vm1809_vm6 = vcmp.lt.s32.totalorder %v7547_v29, 3  ;;  %vm1808_vm3 = vcmp.lt.s32.totalorder %v7547_v29, 2 }
 0x1f7   : > { %6041 = vcosq.f32 %v1655_v45  ;;  %v1812_v13 = vsel %vm1810_vm2, %v1800_v33, 2102212464  ;;  %v1817_v26 = vsel %vm1809_vm6, %v1800_v33, %v1816_v4  ;;  %v1758_v61 = vsel %vm1673_vm14, %v1757_v54, %v1733_v42 }
 0x1f8   : > { %6043 = vsinq.f32 %v1655_v45  ;;  %v1737_v27 = vsub.s32 0, %v7588_v5  ;;  %v1818_v51 = vsel %vm1808_vm3, %v1815_v40, %v1817_v26  ;;  %v1819_v63 = vsel %vm1807_vm15, %v1797_v6, %v1800_v33 }
 0x1f9   : > { %v1820_v36 = vsel %vm1810_vm2, %v1806_v58, 1326507024  ;;  %v7605_v14 = vmul.u32.u64.low %v7570_v62, %v1818_v51  ;;  %v7606_v11 = vmul.u32.u64.high %v7570_v62, %v1818_v51, %v7605_v14  ;;  %v1811_v48 = vsel %vm1807_vm15, %v1791_v52, %v1794_v24 }
 0x1fa   : > { %v5602_v9 = vmin.u32 %v1737_v27, %v7588_v5  ;;  %v1813_v31 = vsel %vm1809_vm6, %v1797_v6, %v1812_v13  ;;  %v1821_v32 = vsel %vm1809_vm6, %v1803_v59, %v1820_v36  ;;  %vm7614_vm1 = vcmp.le.f32.partialorder %v1671_v49, 0.7853982 }
 0x1fb   : > { %v1822_v30 = vsel %vm1808_vm3, %v1819_v63, %v1821_v32  ;;  %v1882_v34 = vand.u32 2139095040, %v6411_v2  ;;  %v1760_v39 = vsel %vm7614_vm1, 0, %v1758_v61  ;;  %v1814_v22 = vsel %vm1808_vm3, %v1811_v48, %v1813_v31 }
 0x1fc   : > { %v1739_v47 = vclz %v5602_v9  ;;  %v7626_v56 = vmul.u32.u64.low %v7570_v62, %v1822_v30  ;;  %v7627_v24 = vmul.u32.u64.high %v7570_v62, %v1822_v30, %v7626_v56  ;;  %vm1659_vm5 = vweird.f32 %v6395_v55 }
 0x1fd   : > { %v1883_v49 = vshrl.u32 %v1882_v34, 23  ;;  %vm1662_vm7 = vcmp.lt.s32.totalorder %v7574_v12, 2  ;;  %v1886_v50 = vand.u32 8388607, %v1879_v53  ;;  %vm1663_vm4 = vcmp.eq.s32.totalorder %v7574_v12, 0 }
 0x1fe   : > { %v5603_v46 = vadd.s32 4294967294, %v1739_v47  ;;  %vm1666_vm10 = vcmp.eq.s32.totalorder %v7574_v12, 2  ;;  %v1833_v29 = vadd.s32 1, %v7606_v11  ;;  %v1727_v6 = vadd.s32 %v7530_v16, %v7540_v43 }
 0x1ff   : > { %v5609_v21 = vadd.s32 4294967169, %v1883_v49  ;;  %v1764_v59 = vadd.s32 3, %v1760_v39  ;;  %v1830_v42 = vmul.u32 %v7570_v62, %v1814_v22  ;;  %vm1832_vm9 = vc.u32 %v7627_v24, %v7605_v14 }
 0x200   : > { %vm5604_vm8 = vcmp.lt.s32.totalorder %v5603_v46, 0  ;;  %v1986_v57 = vand.u32 2139095040, %v6414_v3  ;;  %v1887_v40 = vor.u32 8388608, %v1886_v50  ;;  %v1834_v43 = vsel %vm1832_vm9, %v1833_v29, %v7606_v11 }
 0x201   : > { %v6042_v41 = vpop.eup %6041  ;;  %v1742_v44 = vsel %vm5604_vm8, 0, %v5603_v46  ;;  %v1889_v33 = vadd.s32 1, %v5609_v21  ;;  %v1835_v13 = vadd.s32 %v1834_v43, %v1830_v42  ;;  %v1983_v61 = vand.u32 2147483647, %v6414_v3 }
 0x202   : > { %v6044_v60 = vpop.eup %6043  ;;  %v1667_v54 = vxor.u32 2147483648, %v6042_v41  ;;  %v1743_v10 = vsub.s32 32, %v1742_v44  ;;  %v1747_v58 = vsub.s32 4294967266, %v1742_v44  ;;  %v1744_v16 = vshll.u32 %v7588_v5, %v1742_v44 }
 0x203   : > { %v1664_v4 = vxor.u32 2147483648, %v6044_v60  ;;  %vm1890_vm12 = vcmp.gt.s32.totalorder %v1889_v33, 0  ;;  %v1987_v51 = vshrl.u32 %v1986_v57, 23  ;;  %v1836_v11 = vadd.s32 536870912, %v1835_v13 }
 0x204   : > { %v1668_v62 = vsel %vm1666_vm10, %v1667_v54, %v6044_v60  ;;  %v1745_v45 = vshrl.u32 %v1727_v6, %v1743_v10  ;;  %v1748_v52 = vadd.s32 127, %v1747_v58  ;;  %v1891_v27 = vsel %vm1890_vm12, %v1889_v33, 0 }
 0x205   : > { %v1665_v26 = vsel %vm1663_vm4, %v6042_v41, %v1664_v4  ;;  %v1893_v48 = vand.u32 31, %v1891_v27  ;;  %v7653_v32 = vand.u32 3, %v1764_v59  ;;  %vm1777_vm13 = vcmp.lt.s32.totalorder %v6408_v1, 0 }
 0x206   : > { %v1669_v5 = vsel %vm1662_vm7, %v1665_v26, %v1668_v62  ;;  %v1746_v63 = vor.u32 %v1745_v45, %v1744_v16  ;;  %v1749_v36 = vshll.u32 %v1748_v52, 23  ;;  %v1837_v30 = vshrl.u32 %v1836_v11, 30 }
 0x207   : > { %v1670_v9 = vsel %vm1659_vm5, nan, %v1669_v5  ;;  %v1894_v34 = vsub.s32 32, %v1893_v48  ;;  %v7657_v47 = vshll.u32 %v1887_v40, 8  ;;  %v5613_v39 = vadd.s32 4294967169, %v1987_v51 }
 0x208   : > { %v1750_v31 = vor.u32 4788187, %v1749_v36  ;;  %5426 = vst [vmem:[%s6771_s9 + $0x58] sm:$0xff] %v1670_v9  ;;  %v7661_v12 = vand.u32 8388607, %v1983_v61  ;;  %v1753_v56 = vcvt.s32.f32 %v1746_v63  ;;  %v7665_v55 = vadd.s32 %v7605_v14, %v7627_v24 }
 0x209   : > { %v1838_v49 = vshll.u32 %v1837_v30, 30  ;;  %v1892_v46 = vshrl.u32 %v1891_v27, 5  ;;  %v1897_v50 = vshrl.u32 %v10684_v15, %v1894_v34  ;;  %v1900_v29 = vshrl.u32 %v10693_v23, %v1894_v34 }
 0x20a   : > { %v1751_v22 = vand.u32 2147483647, %v1750_v31  ;;  %v1903_v21 = vshrl.u32 %v10694_v25, %v1894_v34  ;;  %v1896_v42 = vshll.u32 %v10691_v37, %v1893_v48  ;;  %v1906_v41 = vshrl.u32 %v10695_v35, %v1894_v34 }
 0x20b   : > { %v7670_v59 = vsub.s32 %v1835_v13, %v1838_v49  ;;  %vm7676_vm11 = vcmp.le.f32.partialorder %v1775_v28, 0.7853982  ;;  %v1861_v24 = vsub.s32 4, %v1837_v30  ;;  %v1899_v44 = vshll.u32 %v10684_v15, %v1893_v48 }
 0x20c   : > { %v1754_v6 = vmul.f32 %v1753_v56, %v1751_v22  ;;  %v1902_v33 = vshll.u32 %v10693_v23, %v1893_v48  ;;  %v1993_v57 = vadd.s32 1, %v5613_v39  ;;  %v1898_v10 = vor.u32 %v1897_v50, %v1896_v42 }
 0x20d   : > { %v1841_v54 = vsub.s32 0, %v7670_v59  ;;  %v1905_v58 = vshll.u32 %v10694_v25, %v1893_v48  ;;  %v1901_v40 = vor.u32 %v1900_v29, %v1899_v44  ;;  %v1908_v16 = vshll.u32 %v10695_v35, %v1893_v48 }
 0x20e   : > { %v1755_v60 = vxor.u32 2147483648, %v1754_v6  ;;  %v1904_v4 = vor.u32 %v1903_v21, %v1902_v33  ;;  %v1909_v28 = vshrl.u32 %v10696_v38, %v1894_v34  ;;  %v1895_v45 = vshrl.u32 %v10691_v37, %v1894_v34 }
 0x20f   : > { %v5606_v62 = vmin.u32 %v1841_v54, %v7670_v59  ;;  %v1907_v52 = vor.u32 %v1906_v41, %v1905_v58  ;;  %v1862_v26 = vsel %vm1777_vm13, %v1861_v24, %v1837_v30  ;;  %vm1911_vm0 = vcmp.lt.s32.totalorder %v1892_v46, 1 }
 0x210   : > { %v1756_v43 = vsel %vm1673_vm14, %v1755_v60, %v1754_v6  ;;  %v1910_v27 = vor.u32 %v1909_v28, %v1908_v16  ;;  %vm1912_vm15 = vcmp.lt.s32.totalorder %v1892_v46, 2  ;;  %vm1914_vm2 = vcmp.lt.s32.totalorder %v1892_v46, 4 }
 0x211   : > { %v1759_v13 = vsel %vm7614_vm1, %v6405_v0, %v1756_v43  ;;  %v1843_v51 = vclz %v5606_v62  ;;  %vm1913_vm14 = vcmp.lt.s32.totalorder %v1892_v46, 3  ;;  %v1916_v5 = vsel %vm1914_vm2, %v1904_v4, 2102212464 }
 0x212   : > { %6045 = vcosq.f32 %v1759_v13  ;;  %v1919_v63 = vsel %vm1911_vm0, %v1898_v10, %v1901_v40  ;;  %v1915_v11 = vsel %vm1911_vm0, %v1895_v45, %v1898_v10  ;;  %v1920_v9 = vsel %vm1914_vm2, %v1907_v52, 920167782 }
 0x213   : > { %6047 = vsinq.f32 %v1759_v13  ;;  %v5607_v36 = vadd.s32 4294967294, %v1843_v51  ;;  %v1923_v48 = vsel %vm1911_vm0, %v1901_v40, %v1904_v4  ;;  %v1917_v31 = vsel %vm1913_vm14, %v1901_v40, %v1916_v5 }
 0x214   : > { %v1921_v17 = vsel %vm1913_vm14, %v1904_v4, %v1920_v9  ;;  %v1924_v34 = vsel %vm1914_vm2, %v1910_v27, 1326507024  ;;  %vm1994_vm6 = vcmp.gt.s32.totalorder %v1993_v57, 0  ;;  %v1864_v30 = vsel %vm7676_vm11, 0, %v1862_v26 }
 0x215   : > { %vm5608_vm3 = vcmp.lt.s32.totalorder %v5607_v36, 0  ;;  %v1922_v39 = vsel %vm1912_vm15, %v1919_v63, %v1921_v17  ;;  %v1925_v22 = vsel %vm1913_vm14, %v1907_v52, %v1924_v34  ;;  %vm1767_vm1 = vcmp.eq.s32.totalorder %v7653_v32, 0 }
 0x216   : > { %v1846_v56 = vsel %vm5608_vm3, 0, %v5607_v36  ;;  %v1926_v49 = vsel %vm1912_vm15, %v1923_v48, %v1925_v22  ;;  %v7701_v50 = vmul.u32.u64.low %v7657_v47, %v1922_v39  ;;  %v7702_v29 = vmul.u32.u64.high %v7657_v47, %v1922_v39, %v7701_v50 }
 0x217   : > { %vm1766_vm5 = vcmp.lt.s32.totalorder %v7653_v32, 2  ;;  %v1847_v21 = vsub.s32 32, %v1846_v56  ;;  %v1851_v6 = vsub.s32 4294967266, %v1846_v56  ;;  %v1918_v42 = vsel %vm1912_vm15, %v1915_v11, %v1917_v31 }
 0x218   : > { %v1995_v41 = vsel %vm1994_vm6, %v1993_v57, 0  ;;  %vm1763_vm7 = vweird.f32 %v6405_v0  ;;  %vm1770_vm4 = vcmp.eq.s32.totalorder %v7653_v32, 2  ;;  %v1848_v60 = vshll.u32 %v7670_v59, %v1846_v56 }
 0x219   : > { %v7710_v24 = vmul.u32.u64.low %v7657_v47, %v1926_v49  ;;  %v7711_v44 = vmul.u32.u64.high %v7657_v47, %v1926_v49, %v7710_v24  ;;  %v1997_v33 = vand.u32 31, %v1995_v41  ;;  %v1849_v54 = vshrl.u32 %v7665_v55, %v1847_v21 }
 0x21a   : > { %v1852_v10 = vadd.s32 127, %v1851_v6  ;;  %v1991_v58 = vor.u32 8388608, %v7661_v12  ;;  %v1868_v40 = vadd.s32 3, %v1864_v30  ;;  %v1934_v46 = vmul.u32 %v7657_v47, %v1918_v42 }
 0x21b   : > { %v1937_v57 = vadd.s32 1, %v7702_v29  ;;  %v1998_v4 = vsub.s32 32, %v1997_v33  ;;  %v1850_v28 = vor.u32 %v1849_v54, %v1848_v60  ;;  %v7718_v62 = vshrl.u32 %v1995_v41, 5 }
 0x21c   : > { %v6046_v16 = vpop.eup %6045  ;;  %v1853_v43 = vshll.u32 %v1852_v10, 23  ;;  %v2000_v45 = vshll.u32 %v10691_v37, %v1997_v33  ;;  %vm1936_vm10 = vc.u32 %v7711_v44, %v7701_v50  ;;  %v2003_v12 = vshll.u32 %v10684_v15, %v1997_v33 }
 0x21d   : > { %v6048_v52 = vpop.eup %6047  ;;  %v1771_v59 = vxor.u32 2147483648, %v6046_v16  ;;  %v2009_v55 = vshll.u32 %v10694_v25, %v1997_v33  ;;  %v1857_v26 = vcvt.s32.f32 %v1850_v28  ;;  %v1938_v27 = vsel %vm1936_vm10, %v1937_v57, %v7702_v29 }
 0x21e   : > { %v1768_v47 = vxor.u32 2147483648, %v6048_v52  ;;  %v1854_v13 = vor.u32 4788187, %v1853_v43  ;;  %v1939_v5 = vadd.s32 %v1938_v27, %v1934_v46  ;;  %v2001_v63 = vshrl.u32 %v10684_v15, %v1998_v4 }
 0x21f   : > { %v1772_v51 = vsel %vm1770_vm4, %v1771_v59, %v6048_v52  ;;  %v2004_v36 = vshrl.u32 %v10693_v23, %v1998_v4  ;;  %vm1881_vm8 = vcmp.lt.s32.totalorder %v6411_v2, 0  ;;  %v2007_v48 = vshrl.u32 %v10694_v25, %v1998_v4 }
 0x220   : > { %v1769_v11 = vsel %vm1767_vm1, %v6046_v16, %v1768_v47  ;;  %v1855_v9 = vand.u32 2147483647, %v1854_v13  ;;  %v2010_v31 = vshrl.u32 %v10695_v35, %v1998_v4  ;;  %v1940_v34 = vadd.s32 536870912, %v1939_v5 }
 0x221   : > { %v1773_v17 = vsel %vm1766_vm5, %v1769_v11, %v1772_v51  ;;  %v2002_v30 = vor.u32 %v2001_v63, %v2000_v45  ;;  %v2006_v39 = vshll.u32 %v10693_v23, %v1997_v33  ;;  %v2005_v49 = vor.u32 %v2004_v36, %v2003_v12 }
 0x222   : > { %v1774_v22 = vsel %vm1763_vm7, nan, %v1773_v17  ;;  %v1858_v56 = vmul.f32 %v1857_v26, %v1855_v9  ;;  %v2011_v29 = vor.u32 %v2010_v31, %v2009_v55  ;;  %v1941_v21 = vshrl.u32 %v1940_v34, 30 }
 0x223   : > { %v2013_v6 = vshrl.u32 %v10696_v38, %v1998_v4  ;;  %v7741_v42 = vshll.u32 %v1991_v58, 8  ;;  %v2087_v41 = vand.u32 2147483647, %v6418_v7  ;;  %5427 = vst [vmem:[%s6771_s9 + $0x60] sm:$0xff] %v1774_v22  ;;  %v7745_v24 = vand.u32 3, %v1868_v40 }
 0x224   : > { %v1859_v32 = vxor.u32 2147483648, %v1858_v56  ;;  %v2008_v60 = vor.u32 %v2007_v48, %v2006_v39  ;;  %v2012_v54 = vshll.u32 %v10695_v35, %v1997_v33  ;;  %v1942_v10 = vshll.u32 %v1941_v21, 30 }
 0x225   : > { %v1965_v0 = vsub.s32 4, %v1941_v21  ;;  %vm2015_vm9 = vcmp.lt.s32.totalorder %v7718_v62, 1  ;;  %vm2018_vm12 = vcmp.lt.s32.totalorder %v7718_v62, 4  ;;  %v1999_v28 = vshrl.u32 %v10691_v37, %v1998_v4 }
 0x226   : > { %v1860_v46 = vsel %vm1777_vm13, %v1859_v32, %v1858_v56  ;;  %v2014_v58 = vor.u32 %v2013_v6, %v2012_v54  ;;  %v2023_v57 = vsel %vm2015_vm9, %v2002_v30, %v2005_v49  ;;  %v2024_v40 = vsel %vm2018_vm12, %v2011_v29, 920167782 }
 0x227   : > { %v1863_v33 = vsel %vm7676_vm11, %v6408_v1, %v1860_v46  ;;  %v7759_v16 = vsub.s32 %v1939_v5, %v1942_v10  ;;  %vm2017_vm0 = vcmp.lt.s32.totalorder %v7718_v62, 3  ;;  %vm2016_vm13 = vcmp.lt.s32.totalorder %v7718_v62, 2 }
 0x228   : > { %6049 = vcosq.f32 %v1863_v33  ;;  %v2020_v43 = vsel %vm2018_vm12, %v2008_v60, 2102212464  ;;  %v2025_v45 = vsel %vm2017_vm0, %v2008_v60, %v2024_v40  ;;  %v1966_v14 = vsel %vm1881_vm8, %v1965_v0, %v1941_v21 }
 0x229   : > { %6051 = vsinq.f32 %v1863_v33  ;;  %v1945_v52 = vsub.s32 0, %v7759_v16  ;;  %v2026_v59 = vsel %vm2016_vm13, %v2023_v57, %v2025_v45  ;;  %v2027_v4 = vsel %vm2015_vm9, %v2005_v49, %v2008_v60 }
 0x22a   : > { %v2028_v12 = vsel %vm2018_vm12, %v2014_v58, 1326507024  ;;  %v7776_v55 = vmul.u32.u64.low %v7741_v42, %v2026_v59  ;;  %v7777_v47 = vmul.u32.u64.high %v7741_v42, %v2026_v59, %v7776_v55  ;;  %v2019_v26 = vsel %vm2015_vm9, %v1999_v28, %v2002_v30 }
 0x22b   : > { %v5610_v13 = vmin.u32 %v1945_v52, %v7759_v16  ;;  %v2021_v27 = vsel %vm2017_vm0, %v2005_v49, %v2020_v43  ;;  %v2029_v51 = vsel %vm2017_vm0, %v2011_v29, %v2028_v12  ;;  %vm7785_vm11 = vcmp.le.f32.partialorder %v1879_v53, 0.7853982 }
 0x22c   : > { %v2030_v63 = vsel %vm2016_vm13, %v2027_v4, %v2029_v51  ;;  %v2090_v36 = vand.u32 2139095040, %v6418_v7  ;;  %v1968_v9 = vsel %vm7785_vm11, 0, %v1966_v14  ;;  %v2022_v48 = vsel %vm2016_vm13, %v2019_v26, %v2021_v27 }
 0x22d   : > { %v1947_v11 = vclz %v5610_v13  ;;  %v7797_v31 = vmul.u32.u64.low %v7741_v42, %v2030_v63  ;;  %v7798_v17 = vmul.u32.u64.high %v7741_v42, %v2030_v63, %v7797_v31  ;;  %vm1867_vm15 = vweird.f32 %v6408_v1 }
 0x22e   : > { %v2091_v53 = vshrl.u32 %v2090_v36, 23  ;;  %vm1870_vm2 = vcmp.lt.s32.totalorder %v7745_v24, 2  ;;  %v2094_v30 = vand.u32 8388607, %v2087_v41  ;;  %vm1871_vm14 = vcmp.eq.s32.totalorder %v7745_v24, 0 }
 0x22f   : > { %v5611_v34 = vadd.s32 4294967294, %v1947_v11  ;;  %vm1874_vm6 = vcmp.eq.s32.totalorder %v7745_v24, 2  ;;  %v2041_v62 = vadd.s32 1, %v7777_v47  ;;  %v1935_v22 = vadd.s32 %v7701_v50, %v7711_v44 }
 0x230   : > { %v5617_v39 = vadd.s32 4294967169, %v2091_v53  ;;  %v1972_v56 = vadd.s32 3, %v1968_v9  ;;  %v2038_v49 = vmul.u32 %v7741_v42, %v2022_v48  ;;  %vm2040_vm1 = vc.u32 %v7798_v17, %v7776_v55 }
 0x231   : > { %vm5612_vm3 = vcmp.lt.s32.totalorder %v5611_v34, 0  ;;  %v2194_v32 = vand.u32 2139095040, %v6421_v8  ;;  %v2095_v46 = vor.u32 8388608, %v2094_v30  ;;  %v2042_v44 = vsel %vm2040_vm1, %v2041_v62, %v7777_v47 }
 0x232   : > { %v6050_v29 = vpop.eup %6049  ;;  %v1950_v21 = vsel %vm5612_vm3, 0, %v5611_v34  ;;  %v2097_v6 = vadd.s32 1, %v5617_v39  ;;  %v2043_v33 = vadd.s32 %v2042_v44, %v2038_v49  ;;  %v2191_v45 = vand.u32 2147483647, %v6421_v8 }
 0x233   : > { %v6052_v60 = vpop.eup %6051  ;;  %v1875_v54 = vxor.u32 2147483648, %v6050_v29  ;;  %v1951_v10 = vsub.s32 32, %v1950_v21  ;;  %v1955_v0 = vsub.s32 4294967266, %v1950_v21  ;;  %v1952_v50 = vshll.u32 %v7759_v16, %v1950_v21 }
 0x234   : > { %v1872_v58 = vxor.u32 2147483648, %v6052_v60  ;;  %vm2098_vm5 = vcmp.gt.s32.totalorder %v2097_v6, 0  ;;  %v2195_v52 = vshrl.u32 %v2194_v32, 23  ;;  %v2044_v4 = vadd.s32 536870912, %v2043_v33 }
 0x235   : > { %v1876_v42 = vsel %vm1874_vm6, %v1875_v54, %v6052_v60  ;;  %v1953_v57 = vshrl.u32 %v1935_v22, %v1951_v10  ;;  %v1956_v40 = vadd.s32 127, %v1955_v0  ;;  %v2099_v43 = vsel %vm2098_vm5, %v2097_v6, 0 }
 0x236   : > { %v1873_v28 = vsel %vm1871_vm14, %v6050_v29, %v1872_v58  ;;  %v2101_v47 = vand.u32 31, %v2099_v43  ;;  %v7824_v26 = vand.u32 3, %v1972_v56  ;;  %vm1985_vm7 = vcmp.lt.s32.totalorder %v6414_v3, 0 }
 0x237   : > { %v1877_v16 = vsel %vm1870_vm2, %v1873_v28, %v1876_v42  ;;  %v1954_v14 = vor.u32 %v1953_v57, %v1952_v50  ;;  %v1957_v59 = vshll.u32 %v1956_v40, 23  ;;  %v2045_v27 = vshrl.u32 %v2044_v4, 30 }
 0x238   : > { %v1878_v12 = vsel %vm1867_vm15, nan, %v1877_v16  ;;  %v2102_v51 = vsub.s32 32, %v2101_v47  ;;  %v7828_v63 = vshll.u32 %v2095_v46, 8  ;;  %v5621_v36 = vadd.s32 4294967169, %v2195_v52 }
 0x239   : > { %v1958_v13 = vor.u32 4788187, %v1957_v59  ;;  %5428 = vst [vmem:[%s6771_s9 + $0x68] sm:$0xff] %v1878_v12  ;;  %v7832_v24 = vand.u32 8388607, %v2191_v45  ;;  %v1961_v9 = vcvt.s32.f32 %v1954_v14  ;;  %v7836_v1 = vadd.s32 %v7776_v55, %v7798_v17 }
 0x23a   : > { %v2046_v48 = vshll.u32 %v2045_v27, 30  ;;  %v2100_v31 = vshrl.u32 %v2099_v43, 5  ;;  %v2105_v53 = vshrl.u32 %v10684_v15, %v2102_v51  ;;  %v2108_v34 = vshrl.u32 %v10693_v23, %v2102_v51 }
 0x23b   : > { %v1959_v11 = vand.u32 2147483647, %v1958_v13  ;;  %v2111_v30 = vshrl.u32 %v10694_v25, %v2102_v51  ;;  %v2104_v22 = vshll.u32 %v10691_v37, %v2101_v47  ;;  %v2114_v56 = vshrl.u32 %v10695_v35, %v2102_v51 }
 0x23c   : > { %v7841_v39 = vsub.s32 %v2043_v33, %v2046_v48  ;;  %vm7847_vm4 = vcmp.le.f32.partialorder %v1983_v61, 0.7853982  ;;  %v2069_v17 = vsub.s32 4, %v2045_v27  ;;  %v2107_v49 = vshll.u32 %v10684_v15, %v2101_v47 }
 0x23d   : > { %v1962_v62 = vmul.f32 %v1961_v9, %v1959_v11  ;;  %v2110_v29 = vshll.u32 %v10693_v23, %v2101_v47  ;;  %v2201_v21 = vadd.s32 1, %v5621_v36  ;;  %v2106_v60 = vor.u32 %v2105_v53, %v2104_v22 }
 0x23e   : > { %v2049_v32 = vsub.s32 0, %v7841_v39  ;;  %v2113_v54 = vshll.u32 %v10694_v25, %v2101_v47  ;;  %v2109_v10 = vor.u32 %v2108_v34, %v2107_v49  ;;  %v2116_v46 = vshll.u32 %v10695_v35, %v2101_v47 }
 0x23f   : > { %v1963_v6 = vxor.u32 2147483648, %v1962_v62  ;;  %v2112_v0 = vor.u32 %v2111_v30, %v2110_v29  ;;  %v2117_v61 = vshrl.u32 %v10696_v38, %v2102_v51  ;;  %v2103_v44 = vshrl.u32 %v10691_v37, %v2102_v51 }
 0x240   : > { %v5614_v50 = vmin.u32 %v2049_v32, %v7841_v39  ;;  %v2115_v42 = vor.u32 %v2114_v56, %v2113_v54  ;;  %v2070_v40 = vsel %vm1985_vm7, %v2069_v17, %v2045_v27  ;;  %vm2119_vm10 = vcmp.lt.s32.totalorder %v2100_v31, 1 }
 0x241   : > { %v1964_v58 = vsel %vm1881_vm8, %v1963_v6, %v1962_v62  ;;  %v2118_v33 = vor.u32 %v2117_v61, %v2116_v46  ;;  %vm2120_vm9 = vcmp.lt.s32.totalorder %v2100_v31, 2  ;;  %vm2122_vm12 = vcmp.lt.s32.totalorder %v2100_v31, 4 }
 0x242   : > { %v1967_v57 = vsel %vm7785_vm11, %v6411_v2, %v1964_v58  ;;  %v2051_v28 = vclz %v5614_v50  ;;  %vm2121_vm8 = vcmp.lt.s32.totalorder %v2100_v31, 3  ;;  %v2124_v43 = vsel %vm2122_vm12, %v2112_v0, 2102212464 }
 0x243   : > { %6053 = vcosq.f32 %v1967_v57  ;;  %v2127_v52 = vsel %vm2119_vm10, %v2106_v60, %v2109_v10  ;;  %v2123_v14 = vsel %vm2119_vm10, %v2103_v44, %v2106_v60  ;;  %v2128_v59 = vsel %vm2122_vm12, %v2115_v42, 920167782 }
 0x244   : > { %6055 = vsinq.f32 %v1967_v57  ;;  %v5615_v16 = vadd.s32 4294967294, %v2051_v28  ;;  %v2131_v4 = vsel %vm2119_vm10, %v2109_v10, %v2112_v0  ;;  %v2125_v12 = vsel %vm2121_vm8, %v2109_v10, %v2124_v43 }
 0x245   : > { %v2129_v5 = vsel %vm2121_vm8, %v2112_v0, %v2128_v59  ;;  %v2132_v47 = vsel %vm2122_vm12, %v2118_v33, 1326507024  ;;  %vm2202_vm0 = vcmp.gt.s32.totalorder %v2201_v21, 0  ;;  %v2072_v13 = vsel %vm7847_vm4, 0, %v2070_v40 }
 0x246   : > { %vm5616_vm13 = vcmp.lt.s32.totalorder %v5615_v16, 0  ;;  %v2130_v27 = vsel %vm2120_vm9, %v2127_v52, %v2129_v5  ;;  %v2133_v51 = vsel %vm2121_vm8, %v2115_v42, %v2132_v47  ;;  %vm1975_vm11 = vcmp.eq.s32.totalorder %v7824_v26, 0 }
 0x247   : > { %v2054_v36 = vsel %vm5616_vm13, 0, %v5615_v16  ;;  %v2134_v11 = vsel %vm2120_vm9, %v2131_v4, %v2133_v51  ;;  %v7872_v9 = vmul.u32.u64.low %v7828_v63, %v2130_v27  ;;  %v7873_v48 = vmul.u32.u64.high %v7828_v63, %v2130_v27, %v7872_v9 }
 0x248   : > { %vm1974_vm15 = vcmp.lt.s32.totalorder %v7824_v26, 2  ;;  %v2055_v53 = vsub.s32 32, %v2054_v36  ;;  %v2059_v34 = vsub.s32 4294967266, %v2054_v36  ;;  %v2126_v30 = vsel %vm2120_vm9, %v2123_v14, %v2125_v12 }
 0x249   : > { %v2203_v62 = vsel %vm2202_vm0, %v2201_v21, 0  ;;  %vm1971_vm2 = vweird.f32 %v6411_v2  ;;  %vm1978_vm14 = vcmp.eq.s32.totalorder %v7824_v26, 2  ;;  %v2056_v49 = vshll.u32 %v7841_v39, %v2054_v36 }
 0x24a   : > { %v7881_v22 = vmul.u32.u64.low %v7828_v63, %v2134_v11  ;;  %v7882_v56 = vmul.u32.u64.high %v7828_v63, %v2134_v11, %v7881_v22  ;;  %v2205_v17 = vand.u32 31, %v2203_v62  ;;  %v2057_v29 = vshrl.u32 %v7836_v1, %v2055_v53 }
 0x24b   : > { %v2060_v6 = vadd.s32 127, %v2059_v34  ;;  %v2199_v32 = vor.u32 8388608, %v7832_v24  ;;  %v2076_v60 = vadd.s32 3, %v2072_v13  ;;  %v2142_v31 = vmul.u32 %v7828_v63, %v2126_v30 }
 0x24c   : > { %v2145_v21 = vadd.s32 1, %v7873_v48  ;;  %v2206_v54 = vsub.s32 32, %v2205_v17  ;;  %v2058_v0 = vor.u32 %v2057_v29, %v2056_v49  ;;  %v7889_v61 = vshrl.u32 %v2203_v62, 5 }
 0x24d   : > { %v6054_v10 = vpop.eup %6053  ;;  %v2061_v46 = vshll.u32 %v2060_v6, 23  ;;  %v2208_v58 = vshll.u32 %v10691_v37, %v2205_v17  ;;  %vm2144_vm6 = vc.u32 %v7882_v56, %v7872_v9  ;;  %v2211_v24 = vshll.u32 %v10684_v15, %v2205_v17 }
 0x24e   : > { %v6056_v50 = vpop.eup %6055  ;;  %v1979_v39 = vxor.u32 2147483648, %v6054_v10  ;;  %v2217_v1 = vshll.u32 %v10694_v25, %v2205_v17  ;;  %v2065_v42 = vcvt.s32.f32 %v2058_v0  ;;  %v2146_v57 = vsel %vm2144_vm6, %v2145_v21, %v7873_v48 }
 0x24f   : > { %v1976_v63 = vxor.u32 2147483648, %v6056_v50  ;;  %v2062_v44 = vor.u32 4788187, %v2061_v46  ;;  %v2147_v33 = vadd.s32 %v2146_v57, %v2142_v31  ;;  %v2209_v28 = vshrl.u32 %v10684_v15, %v2206_v54 }
 0x250   : > { %v1980_v40 = vsel %vm1978_vm14, %v1979_v39, %v6056_v50  ;;  %v2212_v43 = vshrl.u32 %v10693_v23, %v2206_v54  ;;  %vm2089_vm3 = vcmp.lt.s32.totalorder %v6418_v7, 0  ;;  %v2215_v14 = vshrl.u32 %v10694_v25, %v2206_v54 }
 0x251   : > { %v1977_v52 = vsel %vm1975_vm11, %v6054_v10, %v1976_v63  ;;  %v2063_v16 = vand.u32 2147483647, %v2062_v44  ;;  %v2218_v59 = vshrl.u32 %v10695_v35, %v2206_v54  ;;  %v2148_v12 = vadd.s32 536870912, %v2147_v33 }
 0x252   : > { %v1981_v4 = vsel %vm1974_vm15, %v1977_v52, %v1980_v40  ;;  %v2210_v5 = vor.u32 %v2209_v28, %v2208_v58  ;;  %v2214_v47 = vshll.u32 %v10693_v23, %v2205_v17  ;;  %v2213_v51 = vor.u32 %v2212_v43, %v2211_v24 }
 0x253   : > { %v1982_v13 = vsel %vm1971_vm2, nan, %v1981_v4  ;;  %v2066_v27 = vmul.f32 %v2065_v42, %v2063_v16  ;;  %v2219_v36 = vor.u32 %v2218_v59, %v2217_v1  ;;  %v2149_v11 = vshrl.u32 %v2148_v12, 30 }
 0x254   : > { %v2221_v48 = vshrl.u32 %v10696_v38, %v2206_v54  ;;  %v7912_v53 = vshll.u32 %v2199_v32, 8  ;;  %v2295_v34 = vand.u32 2147483647, %v6431_v18  ;;  %5429 = vst [vmem:[%s6771_s9 + $0x70] sm:$0xff] %v1982_v13  ;;  %v7916_v30 = vand.u32 3, %v2076_v60 }
 0x255   : > { %v2067_v26 = vxor.u32 2147483648, %v2066_v27  ;;  %v2216_v62 = vor.u32 %v2215_v14, %v2214_v47  ;;  %v2220_v22 = vshll.u32 %v10695_v35, %v2205_v17  ;;  %v2150_v49 = vshll.u32 %v2149_v11, 30 }
 0x256   : > { %v2173_v2 = vsub.s32 4, %v2149_v11  ;;  %vm2223_vm1 = vcmp.lt.s32.totalorder %v7889_v61, 1  ;;  %vm2226_vm5 = vcmp.lt.s32.totalorder %v7889_v61, 4  ;;  %v2207_v21 = vshrl.u32 %v10691_v37, %v2206_v54 }
 0x257   : > { %v2068_v29 = vsel %vm1985_vm7, %v2067_v26, %v2066_v27  ;;  %v2222_v6 = vor.u32 %v2221_v48, %v2220_v22  ;;  %v2231_v32 = vsel %vm2223_vm1, %v2210_v5, %v2213_v51  ;;  %v2232_v60 = vsel %vm2226_vm5, %v2219_v36, 920167782 }
 0x258   : > { %v2071_v17 = vsel %vm7847_vm4, %v6414_v3, %v2068_v29  ;;  %v7930_v31 = vsub.s32 %v2147_v33, %v2150_v49  ;;  %vm2225_vm10 = vcmp.lt.s32.totalorder %v7889_v61, 3  ;;  %vm2224_vm7 = vcmp.lt.s32.totalorder %v7889_v61, 2 }
 0x259   : > { %6057 = vcosq.f32 %v2071_v17  ;;  %v2228_v10 = vsel %vm2226_vm5, %v2216_v62, 2102212464  ;;  %v2233_v0 = vsel %vm2225_vm10, %v2216_v62, %v2232_v60  ;;  %v2174_v55 = vsel %vm2089_vm3, %v2173_v2, %v2149_v11 }
 0x25a   : > { %6059 = vsinq.f32 %v2071_v17  ;;  %v2153_v46 = vsub.s32 0, %v7930_v31  ;;  %v2234_v58 = vsel %vm2224_vm7, %v2231_v32, %v2233_v0  ;;  %v2235_v54 = vsel %vm2223_vm1, %v2213_v51, %v2216_v62 }
 0x25b   : > { %v2236_v50 = vsel %vm2226_vm5, %v2222_v6, 1326507024  ;;  %v7947_v39 = vmul.u32.u64.low %v7912_v53, %v2234_v58  ;;  %v7948_v24 = vmul.u32.u64.high %v7912_v53, %v2234_v58, %v7947_v39  ;;  %v2227_v63 = vsel %vm2223_vm1, %v2207_v21, %v2210_v5 }
 0x25c   : > { %v5618_v1 = vmin.u32 %v2153_v46, %v7930_v31  ;;  %v2229_v44 = vsel %vm2225_vm10, %v2213_v51, %v2228_v10  ;;  %v2237_v42 = vsel %vm2225_vm10, %v2219_v36, %v2236_v50  ;;  %vm7956_vm4 = vcmp.le.f32.partialorder %v2087_v41, 0.7853982 }
 0x25d   : > { %v2238_v40 = vsel %vm2224_vm7, %v2235_v54, %v2237_v42  ;;  %v2298_v33 = vand.u32 2139095040, %v6431_v18  ;;  %v2176_v43 = vsel %vm7956_vm4, 0, %v2174_v55  ;;  %v2230_v52 = vsel %vm2224_vm7, %v2227_v63, %v2229_v44 }
 0x25e   : > { %v2155_v28 = vclz %v5618_v1  ;;  %v7968_v16 = vmul.u32.u64.low %v7912_v53, %v2238_v40  ;;  %v7969_v14 = vmul.u32.u64.high %v7912_v53, %v2238_v40, %v7968_v16  ;;  %vm2075_vm9 = vweird.f32 %v6414_v3 }
 0x25f   : > { %v2299_v41 = vshrl.u32 %v2298_v33, 23  ;;  %vm2078_vm12 = vcmp.lt.s32.totalorder %v7916_v30, 2  ;;  %v2302_v4 = vand.u32 8388607, %v2295_v34  ;;  %vm2079_vm8 = vcmp.eq.s32.totalorder %v7916_v30, 0 }
 0x260   : > { %v5619_v59 = vadd.s32 4294967294, %v2155_v28  ;;  %vm2082_vm0 = vcmp.eq.s32.totalorder %v7916_v30, 2  ;;  %v2249_v61 = vadd.s32 1, %v7948_v24  ;;  %v2143_v5 = vadd.s32 %v7872_v9, %v7882_v56 }
 0x261   : > { %v5625_v12 = vadd.s32 4294967169, %v2299_v41  ;;  %v2180_v47 = vadd.s32 3, %v2176_v43  ;;  %v2246_v13 = vmul.u32 %v7912_v53, %v2230_v52  ;;  %vm2248_vm11 = vc.u32 %v7969_v14, %v7947_v39 }
 0x262   : > { %vm5620_vm13 = vcmp.lt.s32.totalorder %v5619_v59, 0  ;;  %v2402_v11 = vand.u32 2139095040, %v6434_v19  ;;  %v2303_v49 = vor.u32 8388608, %v2302_v4  ;;  %v2250_v56 = vsel %vm2248_vm11, %v2249_v61, %v7948_v24 }
 0x263   : > { %v6058_v27 = vpop.eup %6057  ;;  %v2158_v51 = vsel %vm5620_vm13, 0, %v5619_v59  ;;  %v2305_v36 = vadd.s32 1, %v5625_v12  ;;  %v2251_v32 = vadd.s32 %v2250_v56, %v2246_v13  ;;  %v2399_v21 = vand.u32 2147483647, %v6434_v19 }
 0x264   : > { %v6060_v48 = vpop.eup %6059  ;;  %v2083_v26 = vxor.u32 2147483648, %v6058_v27  ;;  %v2159_v62 = vsub.s32 32, %v2158_v51  ;;  %v2163_v22 = vsub.s32 4294967266, %v2158_v51  ;;  %v2160_v9 = vshll.u32 %v7930_v31, %v2158_v51 }
 0x265   : > { %v2080_v2 = vxor.u32 2147483648, %v6060_v48  ;;  %vm2306_vm15 = vcmp.gt.s32.totalorder %v2305_v36, 0  ;;  %v2403_v10 = vshrl.u32 %v2402_v11, 23  ;;  %v2252_v55 = vadd.s32 536870912, %v2251_v32 }
 0x266   : > { %v2084_v53 = vsel %vm2082_vm0, %v2083_v26, %v6060_v48  ;;  %v2161_v29 = vshrl.u32 %v2143_v5, %v2159_v62  ;;  %v2164_v6 = vadd.s32 127, %v2163_v22  ;;  %v2307_v17 = vsel %vm2306_vm15, %v2305_v36, 0 }
 0x267   : > { %v2081_v60 = vsel %vm2079_vm8, %v6058_v27, %v2080_v2  ;;  %v2309_v54 = vand.u32 31, %v2307_v17  ;;  %v7995_v24 = vand.u32 3, %v2180_v47  ;;  %vm2193_vm2 = vcmp.lt.s32.totalorder %v6421_v8, 0 }
 0x268   : > { %v2085_v31 = vsel %vm2078_vm12, %v2081_v60, %v2084_v53  ;;  %v2162_v0 = vor.u32 %v2161_v29, %v2160_v9  ;;  %v2165_v46 = vshll.u32 %v2164_v6, 23  ;;  %v2253_v1 = vshrl.u32 %v2252_v55, 30 }
 0x269   : > { %v2086_v58 = vsel %vm2075_vm9, nan, %v2085_v31  ;;  %v2310_v63 = vsub.s32 32, %v2309_v54  ;;  %v7999_v44 = vshll.u32 %v2303_v49, 8  ;;  %v5629_v42 = vadd.s32 4294967169, %v2403_v10 }
 0x26a   : > { %v2166_v50 = vor.u32 4788187, %v2165_v46  ;;  %5430 = vst [vmem:[%s6771_s9 + $0x78] sm:$0xff] %v2086_v58  ;;  %v8003_v30 = vand.u32 8388607, %v2399_v21  ;;  %v2169_v33 = vcvt.s32.f32 %v2162_v0  ;;  %v8007_v3 = vadd.s32 %v7947_v39, %v7969_v14 }
 0x26b   : > { %v2254_v28 = vshll.u32 %v2253_v1, 30  ;;  %v2308_v43 = vshrl.u32 %v2307_v17, 5  ;;  %v2313_v52 = vshrl.u32 %v10684_v15, %v2310_v63  ;;  %v2316_v16 = vshrl.u32 %v10693_v23, %v2310_v63 }
 0x26c   : > { %v2167_v40 = vand.u32 2147483647, %v2166_v50  ;;  %v2319_v41 = vshrl.u32 %v10694_v25, %v2310_v63  ;;  %v2312_v61 = vshll.u32 %v10691_v37, %v2309_v54  ;;  %v2322_v12 = vshrl.u32 %v10695_v35, %v2310_v63 }
 0x26d   : > { %v8012_v4 = vsub.s32 %v2251_v32, %v2254_v28  ;;  %vm8018_vm14 = vcmp.le.f32.partialorder %v2191_v45, 0.7853982  ;;  %v2277_v14 = vsub.s32 4, %v2253_v1  ;;  %v2315_v5 = vshll.u32 %v10684_v15, %v2309_v54 }
 0x26e   : > { %v2170_v59 = vmul.f32 %v2169_v33, %v2167_v40  ;;  %v2318_v47 = vshll.u32 %v10693_v23, %v2309_v54  ;;  %v2409_v13 = vadd.s32 1, %v5629_v42  ;;  %v2314_v36 = vor.u32 %v2313_v52, %v2312_v61 }
 0x26f   : > { %v2257_v51 = vsub.s32 0, %v8012_v4  ;;  %v2321_v11 = vshll.u32 %v10694_v25, %v2309_v54  ;;  %v2317_v48 = vor.u32 %v2316_v16, %v2315_v5  ;;  %v2324_v62 = vshll.u32 %v10695_v35, %v2309_v54 }
 0x270   : > { %v2171_v27 = vxor.u32 2147483648, %v2170_v59  ;;  %v2320_v26 = vor.u32 %v2319_v41, %v2318_v47  ;;  %v2325_v45 = vshrl.u32 %v10696_v38, %v2310_v63  ;;  %v2311_v2 = vshrl.u32 %v10691_v37, %v2310_v63 }
 0x271   : > { %v5622_v49 = vmin.u32 %v2257_v51, %v8012_v4  ;;  %v2323_v9 = vor.u32 %v2322_v12, %v2321_v11  ;;  %v2278_v53 = vsel %vm2193_vm2, %v2277_v14, %v2253_v1  ;;  %vm2327_vm6 = vcmp.lt.s32.totalorder %v2308_v43, 1 }
 0x272   : > { %v2172_v22 = vsel %vm2089_vm3, %v2171_v27, %v2170_v59  ;;  %v2326_v29 = vor.u32 %v2325_v45, %v2324_v62  ;;  %vm2328_vm1 = vcmp.lt.s32.totalorder %v2308_v43, 2  ;;  %vm2330_vm5 = vcmp.lt.s32.totalorder %v2308_v43, 4 }
 0x273   : > { %v2175_v56 = vsel %vm7956_vm4, %v6418_v7, %v2172_v22  ;;  %v2259_v6 = vclz %v5622_v49  ;;  %vm2329_vm3 = vcmp.lt.s32.totalorder %v2308_v43, 3  ;;  %v2332_v32 = vsel %vm2330_vm5, %v2320_v26, 2102212464 }
 0x274   : > { %6061 = vcosq.f32 %v2175_v56  ;;  %v2335_v60 = vsel %vm2327_vm6, %v2314_v36, %v2317_v48  ;;  %v2331_v10 = vsel %vm2327_vm6, %v2311_v2, %v2314_v36  ;;  %v2336_v31 = vsel %vm2330_vm5, %v2323_v9, 920167782 }
 0x275   : > { %6063 = vsinq.f32 %v2175_v56  ;;  %v5623_v17 = vadd.s32 4294967294, %v2259_v6  ;;  %v2339_v0 = vsel %vm2327_vm6, %v2317_v48, %v2320_v26  ;;  %v2333_v46 = vsel %vm2329_vm3, %v2317_v48, %v2332_v32 }
 0x276   : > { %v2337_v57 = vsel %vm2329_vm3, %v2320_v26, %v2336_v31  ;;  %v2340_v55 = vsel %vm2330_vm5, %v2326_v29, 1326507024  ;;  %vm2410_vm10 = vcmp.gt.s32.totalorder %v2409_v13, 0  ;;  %v2280_v58 = vsel %vm8018_vm14, 0, %v2278_v53 }
 0x277   : > { %vm5624_vm7 = vcmp.lt.s32.totalorder %v5623_v17, 0  ;;  %v2338_v54 = vsel %vm2328_vm1, %v2335_v60, %v2337_v57  ;;  %v2341_v50 = vsel %vm2329_vm3, %v2323_v9, %v2340_v55  ;;  %vm2183_vm4 = vcmp.eq.s32.totalorder %v7995_v24, 0 }
 0x278   : > { %v2262_v1 = vsel %vm5624_vm7, 0, %v5623_v17  ;;  %v2342_v63 = vsel %vm2328_vm1, %v2339_v0, %v2341_v50  ;;  %v8043_v42 = vmul.u32.u64.low %v7999_v44, %v2338_v54  ;;  %v8044_v40 = vmul.u32.u64.high %v7999_v44, %v2338_v54, %v8043_v42 }
 0x279   : > { %vm2182_vm9 = vcmp.lt.s32.totalorder %v7995_v24, 2  ;;  %v2263_v33 = vsub.s32 32, %v2262_v1  ;;  %v2267_v28 = vsub.s32 4294967266, %v2262_v1  ;;  %v2334_v52 = vsel %vm2328_vm1, %v2331_v10, %v2333_v46 }
 0x27a   : > { %v2411_v16 = vsel %vm2410_vm10, %v2409_v13, 0  ;;  %vm2179_vm12 = vweird.f32 %v6418_v7  ;;  %vm2186_vm8 = vcmp.eq.s32.totalorder %v7995_v24, 2  ;;  %v2264_v12 = vshll.u32 %v8012_v4, %v2262_v1 }
 0x27b   : > { %v8052_v41 = vmul.u32.u64.low %v7999_v44, %v2342_v63  ;;  %v8053_v59 = vmul.u32.u64.high %v7999_v44, %v2342_v63, %v8052_v41  ;;  %v2413_v61 = vand.u32 31, %v2411_v16  ;;  %v2265_v14 = vshrl.u32 %v8007_v3, %v2263_v33 }
 0x27c   : > { %v2268_v5 = vadd.s32 127, %v2267_v28  ;;  %v2407_v47 = vor.u32 8388608, %v8003_v30  ;;  %v2284_v27 = vadd.s32 3, %v2280_v58  ;;  %v2350_v43 = vmul.u32 %v7999_v44, %v2334_v52 }
 0x27d   : > { %v2353_v13 = vadd.s32 1, %v8044_v40  ;;  %v2414_v51 = vsub.s32 32, %v2413_v61  ;;  %v2266_v11 = vor.u32 %v2265_v14, %v2264_v12  ;;  %v8060_v26 = vshrl.u32 %v2411_v16, 5 }
 0x27e   : > { %v6062_v36 = vpop.eup %6061  ;;  %v2269_v48 = vshll.u32 %v2268_v5, 23  ;;  %v2416_v62 = vshll.u32 %v10691_v37, %v2413_v61  ;;  %vm2352_vm0 = vc.u32 %v8053_v59, %v8043_v42  ;;  %v2419_v30 = vshll.u32 %v10684_v15, %v2413_v61 }
 0x27f   : > { %v6064_v45 = vpop.eup %6063  ;;  %v2187_v4 = vxor.u32 2147483648, %v6062_v36  ;;  %v2425_v3 = vshll.u32 %v10694_v25, %v2413_v61  ;;  %v2273_v49 = vcvt.s32.f32 %v2266_v11  ;;  %v2354_v2 = vsel %vm2352_vm0, %v2353_v13, %v8044_v40 }
 0x280   : > { %v2184_v44 = vxor.u32 2147483648, %v6064_v45  ;;  %v2270_v22 = vor.u32 4788187, %v2269_v48  ;;  %v2355_v56 = vadd.s32 %v2354_v2, %v2350_v43  ;;  %v2417_v53 = vshrl.u32 %v10684_v15, %v2414_v51 }
 0x281   : > { %v2188_v9 = vsel %vm2186_vm8, %v2187_v4, %v6064_v45  ;;  %v2420_v29 = vshrl.u32 %v10693_v23, %v2414_v51  ;;  %vm2297_vm13 = vcmp.lt.s32.totalorder %v6431_v18, 0  ;;  %v2423_v60 = vshrl.u32 %v10694_v25, %v2414_v51 }
 0x282   : > { %v2185_v6 = vsel %vm2183_vm4, %v6062_v36, %v2184_v44  ;;  %v2271_v32 = vand.u32 2147483647, %v2270_v22  ;;  %v2426_v17 = vshrl.u32 %v10695_v35, %v2414_v51  ;;  %v2356_v31 = vadd.s32 536870912, %v2355_v56 }
 0x283   : > { %v2189_v10 = vsel %vm2182_vm9, %v2185_v6, %v2188_v9  ;;  %v2418_v0 = vor.u32 %v2417_v53, %v2416_v62  ;;  %v2422_v46 = vshll.u32 %v10693_v23, %v2413_v61  ;;  %v2421_v58 = vor.u32 %v2420_v29, %v2419_v30 }
 0x284   : > { %v2190_v57 = vsel %vm2179_vm12, nan, %v2189_v10  ;;  %v2274_v55 = vmul.f32 %v2273_v49, %v2271_v32  ;;  %v2427_v54 = vor.u32 %v2426_v17, %v2425_v3  ;;  %v2357_v50 = vshrl.u32 %v2356_v31, 30 }
 0x285   : > { %v2429_v1 = vshrl.u32 %v10696_v38, %v2414_v51  ;;  %v8083_v63 = vshll.u32 %v2407_v47, 8  ;;  %v2503_v40 = vand.u32 2147483647, %v6437_v20  ;;  %5431 = vst [vmem:[%s6771_s9 + $0x80] sm:$0xff] %v2190_v57  ;;  %v8087_v33 = vand.u32 3, %v2284_v27 }
 0x286   : > { %v2275_v24 = vxor.u32 2147483648, %v2274_v55  ;;  %v2424_v28 = vor.u32 %v2423_v60, %v2422_v46  ;;  %v2428_v52 = vshll.u32 %v10695_v35, %v2413_v61  ;;  %v2358_v16 = vshll.u32 %v2357_v50, 30 }
 0x287   : > { %v2381_v7 = vsub.s32 4, %v2357_v50  ;;  %vm2431_vm11 = vcmp.lt.s32.totalorder %v8060_v26, 1  ;;  %vm2434_vm15 = vcmp.lt.s32.totalorder %v8060_v26, 4  ;;  %v2415_v27 = vshrl.u32 %v10691_v37, %v2414_v51 }
 0x288   : > { %v2276_v41 = vsel %vm2193_vm2, %v2275_v24, %v2274_v55  ;;  %v2430_v12 = vor.u32 %v2429_v1, %v2428_v52  ;;  %v2439_v14 = vsel %vm2431_vm11, %v2418_v0, %v2421_v58  ;;  %v2440_v5 = vsel %vm2434_vm15, %v2427_v54, 920167782 }
 0x289   : > { %v2279_v61 = vsel %vm8018_vm14, %v6421_v8, %v2276_v41  ;;  %v8101_v47 = vsub.s32 %v2355_v56, %v2358_v16  ;;  %vm2433_vm6 = vcmp.lt.s32.totalorder %v8060_v26, 3  ;;  %vm2432_vm2 = vcmp.lt.s32.totalorder %v8060_v26, 2 }
 0x28a   : > { %6065 = vcosq.f32 %v2279_v61  ;;  %v2436_v43 = vsel %vm2434_vm15, %v2424_v28, 2102212464  ;;  %v2441_v13 = vsel %vm2433_vm6, %v2424_v28, %v2440_v5  ;;  %v2382_v39 = vsel %vm2297_vm13, %v2381_v7, %v2357_v50 }
 0x28b   : > { %6067 = vsinq.f32 %v2279_v61  ;;  %v2361_v36 = vsub.s32 0, %v8101_v47  ;;  %v2442_v11 = vsel %vm2432_vm2, %v2439_v14, %v2441_v13  ;;  %v2443_v51 = vsel %vm2431_vm11, %v2421_v58, %v2424_v28 }
 0x28c   : > { %v2444_v48 = vsel %vm2434_vm15, %v2430_v12, 1326507024  ;;  %v8118_v62 = vmul.u32.u64.low %v8083_v63, %v2442_v11  ;;  %v8119_v45 = vmul.u32.u64.high %v8083_v63, %v2442_v11, %v8118_v62  ;;  %v2435_v30 = vsel %vm2431_vm11, %v2415_v27, %v2418_v0 }
 0x28d   : > { %v5626_v4 = vmin.u32 %v2361_v36, %v8101_v47  ;;  %v2437_v3 = vsel %vm2433_vm6, %v2421_v58, %v2436_v43  ;;  %v2445_v44 = vsel %vm2433_vm6, %v2427_v54, %v2444_v48  ;;  %vm8127_vm14 = vcmp.le.f32.partialorder %v2295_v34, 0.7853982  ;;  %v10741_v58 = vld [vmem:[#allocation5_spill] sm:$0xff] }
 0x28e   : > { %v2446_v49 = vsel %vm2432_vm2, %v2443_v51, %v2445_v44  ;;  %v2506_v2 = vand.u32 2139095040, %v6437_v20  ;;  %v2384_v56 = vsel %vm8127_vm14, 0, %v2382_v39  ;;  %v2438_v53 = vsel %vm2432_vm2, %v2435_v30, %v2437_v3 }
 0x28f   : > { %v2363_v9 = vclz %v5626_v4  ;;  %v8139_v29 = vmul.u32.u64.low %v8083_v63, %v2446_v49  ;;  %v8140_v6 = vmul.u32.u64.high %v8083_v63, %v2446_v49, %v8139_v29  ;;  %vm2283_vm1 = vweird.f32 %v6421_v8 }
 0x290   : > { %v2507_v34 = vshrl.u32 %v2506_v2, 23  ;;  %vm2286_vm5 = vcmp.lt.s32.totalorder %v8087_v33, 2  ;;  %v2510_v60 = vand.u32 8388607, %v2503_v40  ;;  %vm2287_vm3 = vcmp.eq.s32.totalorder %v8087_v33, 0 }
 0x291   : > { %v5627_v32 = vadd.s32 4294967294, %v2363_v9  ;;  %vm2290_vm10 = vcmp.eq.s32.totalorder %v8087_v33, 2  ;;  %v2457_v26 = vadd.s32 1, %v8119_v45  ;;  %v2351_v10 = vadd.s32 %v8043_v42, %v8053_v59 }
 0x292   : > { %v5633_v17 = vadd.s32 4294967169, %v2507_v34  ;;  %v2388_v31 = vadd.s32 3, %v2384_v56  ;;  %v2454_v0 = vmul.u32 %v8083_v63, %v2438_v53  ;;  %vm2456_vm4 = vc.u32 %v8140_v6, %v8118_v62 }
 0x293   : > { %vm5628_vm7 = vcmp.lt.s32.totalorder %v5627_v32, 0  ;;  %v2610_v54 = vand.u32 2139095040, %v10741_v58  ;;  %v2511_v52 = vor.u32 8388608, %v2510_v60  ;;  %v2458_v59 = vsel %vm2456_vm4, %v2457_v26, %v8119_v45 }
 0x294   : > { %v6066_v46 = vpop.eup %6065  ;;  %v2366_v57 = vsel %vm5628_vm7, 0, %v5627_v32  ;;  %v2513_v55 = vadd.s32 1, %v5633_v17  ;;  %v2459_v12 = vadd.s32 %v2458_v59, %v2454_v0  ;;  %v2607_v61 = vand.u32 2147483647, %v10741_v58 }
 0x295   : > { %v6068_v50 = vpop.eup %6067  ;;  %v2291_v1 = vxor.u32 2147483648, %v6066_v46  ;;  %v2367_v24 = vsub.s32 32, %v2366_v57  ;;  %v2371_v28 = vsub.s32 4294967266, %v2366_v57  ;;  %v2368_v42 = vshll.u32 %v8101_v47, %v2366_v57 }
 0x296   : > { %v2288_v16 = vxor.u32 2147483648, %v6068_v50  ;;  %vm2514_vm9 = vcmp.gt.s32.totalorder %v2513_v55, 0  ;;  %v2611_v27 = vshrl.u32 %v2610_v54, 23  ;;  %v2460_v36 = vadd.s32 536870912, %v2459_v12 }
 0x297   : > { %v2292_v63 = vsel %vm2290_vm10, %v2291_v1, %v6068_v50  ;;  %v2369_v7 = vshrl.u32 %v2351_v10, %v2367_v24  ;;  %v2372_v41 = vadd.s32 127, %v2371_v28  ;;  %v2515_v5 = vsel %vm2514_vm9, %v2513_v55, 0 }
 0x298   : > { %v2289_v14 = vsel %vm2287_vm3, %v6066_v46, %v2288_v16  ;;  %v2517_v11 = vand.u32 31, %v2515_v5  ;;  %v8166_v48 = vand.u32 3, %v2388_v31  ;;  %vm2401_vm12 = vcmp.lt.s32.totalorder %v6434_v19, 0 }
 0x299   : > { %v2293_v47 = vsel %vm2286_vm5, %v2289_v14, %v2292_v63  ;;  %v2370_v43 = vor.u32 %v2369_v7, %v2368_v42  ;;  %v2373_v13 = vshll.u32 %v2372_v41, 23  ;;  %v2461_v45 = vshrl.u32 %v2460_v36, 30 }
 0x29a   : > { %v2294_v39 = vsel %vm2283_vm1, nan, %v2293_v47  ;;  %v2518_v4 = vsub.s32 32, %v2517_v11  ;;  %v8170_v30 = vshll.u32 %v2511_v52, 8  ;;  %v5637_v3 = vadd.s32 4294967169, %v2611_v27 }
 0x29b   : > { %v2374_v51 = vor.u32 4788187, %v2373_v13  ;;  %5432 = vst [vmem:[%s6771_s9 + $0x88] sm:$0xff] %v2294_v39  ;;  %v8174_v33 = vand.u32 8388607, %v2607_v61  ;;  %v2377_v49 = vcvt.s32.f32 %v2370_v43  ;;  %v8178_v8 = vadd.s32 %v8118_v62, %v8140_v6 }
 0x29c   : > { %v2462_v2 = vshll.u32 %v2461_v45, 30  ;;  %v2516_v9 = vshrl.u32 %v2515_v5, 5  ;;  %v2521_v56 = vshrl.u32 %v10684_v15, %v2518_v4  ;;  %v2524_v53 = vshrl.u32 %v10693_v23, %v2518_v4 }
 0x29d   : > { %v2375_v44 = vand.u32 2147483647, %v2374_v51  ;;  %v2527_v29 = vshrl.u32 %v10694_v25, %v2518_v4  ;;  %v2520_v60 = vshll.u32 %v10691_v37, %v2517_v11  ;;  %v2530_v26 = vshrl.u32 %v10695_v35, %v2518_v4 }
 0x29e   : > { %v8183_v32 = vsub.s32 %v2459_v12, %v2462_v2  ;;  %vm8189_vm8 = vcmp.le.f32.partialorder %v2399_v21, 0.7853982  ;;  %v2485_v6 = vsub.s32 4, %v2461_v45  ;;  %v2523_v17 = vshll.u32 %v10684_v15, %v2517_v11 }
 0x29f   : > { %v2378_v34 = vmul.f32 %v2377_v49, %v2375_v44  ;;  %v2526_v10 = vshll.u32 %v10693_v23, %v2517_v11  ;;  %v2617_v31 = vadd.s32 1, %v5637_v3  ;;  %v2522_v57 = vor.u32 %v2521_v56, %v2520_v60 }
 0x2a0   : > { %v2465_v46 = vsub.s32 0, %v8183_v32  ;;  %v2529_v55 = vshll.u32 %v10694_v25, %v2517_v11  ;;  %v2525_v54 = vor.u32 %v2524_v53, %v2523_v17  ;;  %v2532_v1 = vshll.u32 %v10695_v35, %v2517_v11 }
 0x2a1   : > { %v2379_v0 = vxor.u32 2147483648, %v2378_v34  ;;  %v2528_v50 = vor.u32 %v2527_v29, %v2526_v10  ;;  %v2533_v21 = vshrl.u32 %v10696_v38, %v2518_v4  ;;  %v2519_v52 = vshrl.u32 %v10691_v37, %v2518_v4 }
 0x2a2   : > { %v5630_v28 = vmin.u32 %v2465_v46, %v8183_v32  ;;  %v2531_v16 = vor.u32 %v2530_v26, %v2529_v55  ;;  %v2486_v59 = vsel %vm2401_vm12, %v2485_v6, %v2461_v45  ;;  %vm2535_vm0 = vcmp.lt.s32.totalorder %v2516_v9, 1 }
 0x2a3   : > { %v2380_v24 = vsel %vm2297_vm13, %v2379_v0, %v2378_v34  ;;  %v2534_v63 = vor.u32 %v2533_v21, %v2532_v1  ;;  %vm2536_vm11 = vcmp.lt.s32.totalorder %v2516_v9, 2  ;;  %vm2538_vm15 = vcmp.lt.s32.totalorder %v2516_v9, 4 }
 0x2a4   : > { %v2383_v42 = vsel %vm8127_vm14, %v6431_v18, %v2380_v24  ;;  %v2467_v7 = vclz %v5630_v28  ;;  %vm2537_vm13 = vcmp.lt.s32.totalorder %v2516_v9, 3  ;;  %v2540_v41 = vsel %vm2538_vm15, %v2528_v50, 2102212464 }
 0x2a5   : > { %6069 = vcosq.f32 %v2383_v42  ;;  %v2543_v12 = vsel %vm2535_vm0, %v2522_v57, %v2525_v54  ;;  %v2539_v5 = vsel %vm2535_vm0, %v2519_v52, %v2522_v57  ;;  %v2544_v27 = vsel %vm2538_vm15, %v2531_v16, 920167782 }
 0x2a6   : > { %6071 = vsinq.f32 %v2383_v42  ;;  %v5631_v14 = vadd.s32 4294967294, %v2467_v7  ;;  %v2547_v47 = vsel %vm2535_vm0, %v2525_v54, %v2528_v50  ;;  %v2541_v43 = vsel %vm2537_vm13, %v2525_v54, %v2540_v41 }
 0x2a7   : > { %v2545_v22 = vsel %vm2537_vm13, %v2528_v50, %v2544_v27  ;;  %v2548_v13 = vsel %vm2538_vm15, %v2534_v63, 1326507024  ;;  %vm2618_vm6 = vcmp.gt.s32.totalorder %v2617_v31, 0  ;;  %v2488_v36 = vsel %vm8189_vm8, 0, %v2486_v59 }
 0x2a8   : > { %vm5632_vm2 = vcmp.lt.s32.totalorder %v5631_v14, 0  ;;  %v2546_v39 = vsel %vm2536_vm11, %v2543_v12, %v2545_v22  ;;  %v2549_v11 = vsel %vm2537_vm13, %v2531_v16, %v2548_v13  ;;  %vm2391_vm14 = vcmp.eq.s32.totalorder %v8166_v48, 0 }
 0x2a9   : > { %v2470_v51 = vsel %vm5632_vm2, 0, %v5631_v14  ;;  %v2550_v45 = vsel %vm2536_vm11, %v2547_v47, %v2549_v11  ;;  %v8214_v4 = vmul.u32.u64.low %v8170_v30, %v2546_v39  ;;  %v8215_v3 = vmul.u32.u64.high %v8170_v30, %v2546_v39, %v8214_v4 }
 0x2aa   : > { %vm2390_vm1 = vcmp.lt.s32.totalorder %v8166_v48, 2  ;;  %v2471_v44 = vsub.s32 32, %v2470_v51  ;;  %v2475_v49 = vsub.s32 4294967266, %v2470_v51  ;;  %v2542_v2 = vsel %vm2536_vm11, %v2539_v5, %v2541_v43 }
 0x2ab   : > { %v2619_v56 = vsel %vm2618_vm6, %v2617_v31, 0  ;;  %vm2387_vm5 = vweird.f32 %v6431_v18  ;;  %vm2394_vm3 = vcmp.eq.s32.totalorder %v8166_v48, 2  ;;  %v2472_v60 = vshll.u32 %v8183_v32, %v2470_v51 }
 0x2ac   : > { %v8223_v53 = vmul.u32.u64.low %v8170_v30, %v2550_v45  ;;  %v8224_v29 = vmul.u32.u64.high %v8170_v30, %v2550_v45, %v8223_v53  ;;  %v2621_v34 = vand.u32 31, %v2619_v56  ;;  %v2473_v26 = vshrl.u32 %v8178_v8, %v2471_v44  ;;  %v10744_v45 = vld [vmem:[#allocation6_spill] sm:$0xff] }
 0x2ad   : > { %v2476_v6 = vadd.s32 127, %v2475_v49  ;;  %v2615_v17 = vor.u32 8388608, %v8174_v33  ;;  %v2492_v10 = vadd.s32 3, %v2488_v36  ;;  %v2558_v9 = vmul.u32 %v8170_v30, %v2542_v2 }
 0x2ae   : > { %v2561_v31 = vadd.s32 1, %v8215_v3  ;;  %v2622_v0 = vsub.s32 32, %v2621_v34  ;;  %v2474_v57 = vor.u32 %v2473_v26, %v2472_v60  ;;  %v8231_v54 = vshrl.u32 %v2619_v56, 5 }
 0x2af   : > { %v6070_v46 = vpop.eup %6069  ;;  %v2477_v55 = vshll.u32 %v2476_v6, 23  ;;  %v2624_v50 = vshll.u32 %v10691_v37, %v2621_v34  ;;  %vm2560_vm10 = vc.u32 %v8224_v29, %v8214_v4  ;;  %v2627_v33 = vshll.u32 %v10684_v15, %v2621_v34 }
 0x2b0   : > { %v6072_v1 = vpop.eup %6071  ;;  %v2395_v32 = vxor.u32 2147483648, %v6070_v46  ;;  %v2633_v8 = vshll.u32 %v10694_v25, %v2621_v34  ;;  %v2481_v24 = vcvt.s32.f32 %v2474_v57  ;;  %v2562_v28 = vsel %vm2560_vm10, %v2561_v31, %v8215_v3 }
 0x2b1   : > { %v2392_v30 = vxor.u32 2147483648, %v6072_v1  ;;  %v2478_v21 = vor.u32 4788187, %v2477_v55  ;;  %v2563_v16 = vadd.s32 %v2562_v28, %v2558_v9  ;;  %v2625_v42 = vshrl.u32 %v10684_v15, %v2622_v0 }
 0x2b2   : > { %v2396_v52 = vsel %vm2394_vm3, %v2395_v32, %v6072_v1  ;;  %v2628_v59 = vshrl.u32 %v10693_v23, %v2622_v0  ;;  %vm2505_vm7 = vcmp.lt.s32.totalorder %v6437_v20, 0  ;;  %v2631_v41 = vshrl.u32 %v10694_v25, %v2622_v0 }
 0x2b3   : > { %v2393_v63 = vsel %vm2391_vm14, %v6070_v46, %v2392_v30  ;;  %v2479_v7 = vand.u32 2147483647, %v2478_v21  ;;  %v2634_v12 = vshrl.u32 %v10695_v35, %v2622_v0  ;;  %v2564_v5 = vadd.s32 536870912, %v2563_v16 }
 0x2b4   : > { %v2397_v14 = vsel %vm2390_vm1, %v2393_v63, %v2396_v52  ;;  %v2626_v27 = vor.u32 %v2625_v42, %v2624_v50  ;;  %v2630_v47 = vshll.u32 %v10693_v23, %v2621_v34  ;;  %v2629_v13 = vor.u32 %v2628_v59, %v2627_v33 }
 0x2b5   : > { %v2398_v43 = vsel %vm2387_vm5, nan, %v2397_v14  ;;  %v2482_v22 = vmul.f32 %v2481_v24, %v2479_v7  ;;  %v2635_v36 = vor.u32 %v2634_v12, %v2633_v8  ;;  %v2565_v39 = vshrl.u32 %v2564_v5, 30 }
 0x2b6   : > { %v2637_v11 = vshrl.u32 %v10696_v38, %v2622_v0  ;;  %v8254_v51 = vshll.u32 %v2615_v17, 8  ;;  %v2711_v3 = vand.u32 2147483647, %v10744_v45  ;;  %5433 = vst [vmem:[%s6771_s9 + $0x90] sm:$0xff] %v2398_v43  ;;  %v8258_v44 = vand.u32 3, %v2492_v10 }
 0x2b7   : > { %v2483_v48 = vxor.u32 2147483648, %v2482_v22  ;;  %v2632_v49 = vor.u32 %v2631_v41, %v2630_v47  ;;  %v2636_v2 = vshll.u32 %v10695_v35, %v2621_v34  ;;  %v2566_v56 = vshll.u32 %v2565_v39, 30 }
 0x2b8   : > { %v2589_v18 = vsub.s32 4, %v2565_v39  ;;  %vm2639_vm4 = vcmp.lt.s32.totalorder %v8231_v54, 1  ;;  %vm2642_vm9 = vcmp.lt.s32.totalorder %v8231_v54, 4  ;;  %v2623_v10 = vshrl.u32 %v10691_v37, %v2622_v0 }
 0x2b9   : > { %v2484_v53 = vsel %vm2401_vm12, %v2483_v48, %v2482_v22  ;;  %v2638_v60 = vor.u32 %v2637_v11, %v2636_v2  ;;  %v2647_v26 = vsel %vm2639_vm4, %v2626_v27, %v2629_v13  ;;  %v2648_v6 = vsel %vm2642_vm9, %v2635_v36, 920167782 }
 0x2ba   : > { %v2487_v34 = vsel %vm8189_vm8, %v6434_v19, %v2484_v53  ;;  %v8272_v17 = vsub.s32 %v2563_v16, %v2566_v56  ;;  %vm2641_vm0 = vcmp.lt.s32.totalorder %v8231_v54, 3  ;;  %vm2640_vm12 = vcmp.lt.s32.totalorder %v8231_v54, 2 }
 0x2bb   : > { %6073 = vcosq.f32 %v2487_v34  ;;  %v2644_v9 = vsel %vm2642_vm9, %v2632_v49, 2102212464  ;;  %v2649_v31 = vsel %vm2641_vm0, %v2632_v49, %v2648_v6  ;;  %v2590_v62 = vsel %vm2505_vm7, %v2589_v18, %v2565_v39 }
 0x2bc   : > { %6075 = vsinq.f32 %v2487_v34  ;;  %v2569_v46 = vsub.s32 0, %v8272_v17  ;;  %v2650_v57 = vsel %vm2640_vm12, %v2647_v26, %v2649_v31  ;;  %v2651_v0 = vsel %vm2639_vm4, %v2629_v13, %v2632_v49 }
 0x2bd   : > { %v2652_v55 = vsel %vm2642_vm9, %v2638_v60, 1326507024  ;;  %v8289_v50 = vmul.u32.u64.low %v8254_v51, %v2650_v57  ;;  %v8290_v1 = vmul.u32.u64.high %v8254_v51, %v2650_v57, %v8289_v50  ;;  %v2643_v33 = vsel %vm2639_vm4, %v2623_v10, %v2626_v27 }
 0x2be   : > { %v5634_v32 = vmin.u32 %v2569_v46, %v8272_v17  ;;  %v2645_v8 = vsel %vm2641_vm0, %v2629_v13, %v2644_v9  ;;  %v2653_v30 = vsel %vm2641_vm0, %v2635_v36, %v2652_v55  ;;  %vm8298_vm8 = vcmp.le.f32.partialorder %v2503_v40, 0.7853982  ;;  %v10747_v13 = vld [vmem:[#allocation7_spill] sm:$0xff] }
 0x2bf   : > { %v2654_v24 = vsel %vm2640_vm12, %v2651_v0, %v2653_v30  ;;  %v2714_v28 = vand.u32 2139095040, %v10744_v45  ;;  %v2592_v16 = vsel %vm8298_vm8, 0, %v2590_v62  ;;  %v2646_v42 = vsel %vm2640_vm12, %v2643_v33, %v2645_v8 }
 0x2c0   : > { %v2571_v52 = vclz %v5634_v32  ;;  %v8310_v59 = vmul.u32.u64.low %v8254_v51, %v2654_v24  ;;  %v8311_v63 = vmul.u32.u64.high %v8254_v51, %v2654_v24, %v8310_v59  ;;  %vm2491_vm11 = vweird.f32 %v6434_v19 }
 0x2c1   : > { %v2715_v40 = vshrl.u32 %v2714_v28, 23  ;;  %vm2494_vm15 = vcmp.lt.s32.totalorder %v8258_v44, 2  ;;  %v2718_v41 = vand.u32 8388607, %v2711_v3  ;;  %vm2495_vm13 = vcmp.eq.s32.totalorder %v8258_v44, 0 }
 0x2c2   : > { %v5635_v7 = vadd.s32 4294967294, %v2571_v52  ;;  %vm2498_vm6 = vcmp.eq.s32.totalorder %v8258_v44, 2  ;;  %v2665_v54 = vadd.s32 1, %v8290_v1  ;;  %v2559_v14 = vadd.s32 %v8214_v4, %v8224_v29 }
 0x2c3   : > { %v5641_v12 = vadd.s32 4294967169, %v2715_v40  ;;  %v2596_v5 = vadd.s32 3, %v2592_v16  ;;  %v2662_v27 = vmul.u32 %v8254_v51, %v2646_v42  ;;  %vm2664_vm14 = vc.u32 %v8311_v63, %v8289_v50 }
 0x2c4   : > { %vm5636_vm2 = vcmp.lt.s32.totalorder %v5635_v7, 0  ;;  %v2818_v36 = vand.u32 2139095040, %v10747_v13  ;;  %v2719_v2 = vor.u32 8388608, %v2718_v41  ;;  %v2666_v29 = vsel %vm2664_vm14, %v2665_v54, %v8290_v1 }
 0x2c5   : > { %v6074_v47 = vpop.eup %6073  ;;  %v2574_v43 = vsel %vm5636_vm2, 0, %v5635_v7  ;;  %v2721_v22 = vadd.s32 1, %v5641_v12  ;;  %v2667_v60 = vadd.s32 %v2666_v29, %v2662_v27  ;;  %v2815_v34 = vand.u32 2147483647, %v10747_v13 }
 0x2c6   : > { %v6076_v39 = vpop.eup %6075  ;;  %v2499_v11 = vxor.u32 2147483648, %v6074_v47  ;;  %v2575_v48 = vsub.s32 32, %v2574_v43  ;;  %v2579_v49 = vsub.s32 4294967266, %v2574_v43  ;;  %v2576_v4 = vshll.u32 %v8272_v17, %v2574_v43 }
 0x2c7   : > { %v2496_v56 = vxor.u32 2147483648, %v6076_v39  ;;  %vm2722_vm1 = vcmp.gt.s32.totalorder %v2721_v22, 0  ;;  %v2819_v10 = vshrl.u32 %v2818_v36, 23  ;;  %v2668_v46 = vadd.s32 536870912, %v2667_v60 }
 0x2c8   : > { %v2500_v51 = vsel %vm2498_vm6, %v2499_v11, %v6076_v39  ;;  %v2577_v18 = vshrl.u32 %v2559_v14, %v2575_v48  ;;  %v2580_v53 = vadd.s32 127, %v2579_v49  ;;  %v2723_v6 = vsel %vm2722_vm1, %v2721_v22, 0 }
 0x2c9   : > { %v2497_v26 = vsel %vm2495_vm13, %v6074_v47, %v2496_v56  ;;  %v2725_v57 = vand.u32 31, %v2723_v6  ;;  %v8337_v55 = vand.u32 3, %v2596_v5  ;;  %vm2609_vm5 = vcmp.lt.s32.totalorder %v10741_v58, 0 }
 0x2ca   : > { %v2501_v17 = vsel %vm2494_vm15, %v2497_v26, %v2500_v51  ;;  %v2578_v9 = vor.u32 %v2577_v18, %v2576_v4  ;;  %v2581_v31 = vshll.u32 %v2580_v53, 23  ;;  %v2669_v1 = vshrl.u32 %v2668_v46, 30 }
 0x2cb   : > { %v2502_v62 = vsel %vm2491_vm11, nan, %v2501_v17  ;;  %v2726_v32 = vsub.s32 32, %v2725_v57  ;;  %v8341_v33 = vshll.u32 %v2719_v2, 8  ;;  %v5645_v8 = vadd.s32 4294967169, %v2819_v10 }
 0x2cc   : > { %v2582_v0 = vor.u32 4788187, %v2581_v31  ;;  %5434 = vst [vmem:[%s6771_s9 + $0x98] sm:$0xff] %v2502_v62  ;;  %v8345_v44 = vand.u32 8388607, %v2815_v34  ;;  %v2585_v24 = vcvt.s32.f32 %v2578_v9  ;;  %v8349_v19 = vadd.s32 %v8289_v50, %v8311_v63 }
 0x2cd   : > { %v2670_v28 = vshll.u32 %v2669_v1, 30  ;;  %v2724_v52 = vshrl.u32 %v2723_v6, 5  ;;  %v2729_v16 = vshrl.u32 %v10684_v15, %v2726_v32  ;;  %v2732_v42 = vshrl.u32 %v10693_v23, %v2726_v32 }
 0x2ce   : > { %v2583_v30 = vand.u32 2147483647, %v2582_v0  ;;  %v2735_v59 = vshrl.u32 %v10694_v25, %v2726_v32  ;;  %v2728_v41 = vshll.u32 %v10691_v37, %v2725_v57  ;;  %v2738_v54 = vshrl.u32 %v10695_v35, %v2726_v32 }
 0x2cf   : > { %v8354_v7 = vsub.s32 %v2667_v60, %v2670_v28  ;;  %vm8360_vm3 = vcmp.le.f32.partialorder %v2607_v61, 0.7853982  ;;  %v2693_v63 = vsub.s32 4, %v2669_v1  ;;  %v2731_v12 = vshll.u32 %v10684_v15, %v2725_v57 }
 0x2d0   : > { %v2586_v40 = vmul.f32 %v2585_v24, %v2583_v30  ;;  %v2734_v14 = vshll.u32 %v10693_v23, %v2725_v57  ;;  %v2825_v5 = vadd.s32 1, %v5645_v8  ;;  %v2730_v43 = vor.u32 %v2729_v16, %v2728_v41 }
 0x2d1   : > { %v2673_v47 = vsub.s32 0, %v8354_v7  ;;  %v2737_v22 = vshll.u32 %v10694_v25, %v2725_v57  ;;  %v2733_v36 = vor.u32 %v2732_v42, %v2731_v12  ;;  %v2740_v11 = vshll.u32 %v10695_v35, %v2725_v57 }
 0x2d2   : > { %v2587_v27 = vxor.u32 2147483648, %v2586_v40  ;;  %v2736_v39 = vor.u32 %v2735_v59, %v2734_v14  ;;  %v2741_v61 = vshrl.u32 %v10696_v38, %v2726_v32  ;;  %v2727_v2 = vshrl.u32 %v10691_v37, %v2726_v32 }
 0x2d3   : > { %v5638_v49 = vmin.u32 %v2673_v47, %v8354_v7  ;;  %v2739_v56 = vor.u32 %v2738_v54, %v2737_v22  ;;  %v2694_v29 = vsel %vm2609_vm5, %v2693_v63, %v2669_v1  ;;  %vm2743_vm10 = vcmp.lt.s32.totalorder %v2724_v52, 1 }
 0x2d4   : > { %v2588_v48 = vsel %vm2505_vm7, %v2587_v27, %v2586_v40  ;;  %v2742_v51 = vor.u32 %v2741_v61, %v2740_v11  ;;  %vm2744_vm4 = vcmp.lt.s32.totalorder %v2724_v52, 2  ;;  %vm2746_vm9 = vcmp.lt.s32.totalorder %v2724_v52, 4 }
 0x2d5   : > { %v2591_v4 = vsel %vm8298_vm8, %v6437_v20, %v2588_v48  ;;  %v2675_v18 = vclz %v5638_v49  ;;  %vm2745_vm7 = vcmp.lt.s32.totalorder %v2724_v52, 3  ;;  %v2748_v53 = vsel %vm2746_vm9, %v2736_v39, 2102212464 }
 0x2d6   : > { %6077 = vcosq.f32 %v2591_v4  ;;  %v2751_v60 = vsel %vm2743_vm10, %v2730_v43, %v2733_v36  ;;  %v2747_v6 = vsel %vm2743_vm10, %v2727_v2, %v2730_v43  ;;  %v2752_v10 = vsel %vm2746_vm9, %v2739_v56, 920167782 }
 0x2d7   : > { %6079 = vsinq.f32 %v2591_v4  ;;  %v5639_v26 = vadd.s32 4294967294, %v2675_v18  ;;  %v2755_v17 = vsel %vm2743_vm10, %v2733_v36, %v2736_v39  ;;  %v2749_v9 = vsel %vm2745_vm7, %v2733_v36, %v2748_v53 }
 0x2d8   : > { %v2753_v21 = vsel %vm2745_vm7, %v2736_v39, %v2752_v10  ;;  %v2756_v31 = vsel %vm2746_vm9, %v2742_v51, 1326507024  ;;  %vm2826_vm0 = vcmp.gt.s32.totalorder %v2825_v5, 0  ;;  %v2696_v46 = vsel %vm8360_vm3, 0, %v2694_v29 }
 0x2d9   : > { %vm5640_vm12 = vcmp.lt.s32.totalorder %v5639_v26, 0  ;;  %v2754_v62 = vsel %vm2744_vm4, %v2751_v60, %v2753_v21  ;;  %v2757_v57 = vsel %vm2745_vm7, %v2739_v56, %v2756_v31  ;;  %vm2599_vm8 = vcmp.eq.s32.totalorder %v8337_v55, 0 }
 0x2da   : > { %v2678_v0 = vsel %vm5640_vm12, 0, %v5639_v26  ;;  %v2758_v1 = vsel %vm2744_vm4, %v2755_v17, %v2757_v57  ;;  %v8385_v32 = vmul.u32.u64.low %v8341_v33, %v2754_v62  ;;  %v8386_v8 = vmul.u32.u64.high %v8341_v33, %v2754_v62, %v8385_v32 }
 0x2db   : > { %vm2598_vm11 = vcmp.lt.s32.totalorder %v8337_v55, 2  ;;  %v2679_v30 = vsub.s32 32, %v2678_v0  ;;  %v2683_v24 = vsub.s32 4294967266, %v2678_v0  ;;  %v2750_v28 = vsel %vm2744_vm4, %v2747_v6, %v2749_v9 }
 0x2dc   : > { %v2827_v16 = vsel %vm2826_vm0, %v2825_v5, 0  ;;  %vm2595_vm15 = vweird.f32 %v6437_v20  ;;  %vm2602_vm13 = vcmp.eq.s32.totalorder %v8337_v55, 2  ;;  %v2680_v41 = vshll.u32 %v8354_v7, %v2678_v0 }
 0x2dd   : > { %v8394_v42 = vmul.u32.u64.low %v8341_v33, %v2758_v1  ;;  %v8395_v59 = vmul.u32.u64.high %v8341_v33, %v2758_v1, %v8394_v42  ;;  %v2829_v40 = vand.u32 31, %v2827_v16  ;;  %v2681_v54 = vshrl.u32 %v8349_v19, %v2679_v30  ;;  %v10750_v1 = vld [vmem:[#allocation8_spill] sm:$0xff] }
 0x2de   : > { %v2684_v63 = vadd.s32 127, %v2683_v24  ;;  %v2823_v12 = vor.u32 8388608, %v8345_v44  ;;  %v2700_v14 = vadd.s32 3, %v2696_v46  ;;  %v2766_v52 = vmul.u32 %v8341_v33, %v2750_v28 }
 0x2df   : > { %v2769_v5 = vadd.s32 1, %v8386_v8  ;;  %v2830_v27 = vsub.s32 32, %v2829_v40  ;;  %v2682_v43 = vor.u32 %v2681_v54, %v2680_v41  ;;  %v8402_v36 = vshrl.u32 %v2827_v16, 5 }
 0x2e0   : > { %v6078_v47 = vpop.eup %6077  ;;  %v2685_v22 = vshll.u32 %v2684_v63, 23  ;;  %v2832_v39 = vshll.u32 %v10691_v37, %v2829_v40  ;;  %vm2768_vm6 = vc.u32 %v8395_v59, %v8385_v32  ;;  %v2835_v44 = vshll.u32 %v10684_v15, %v2829_v40 }
 0x2e1   : > { %v6080_v11 = vpop.eup %6079  ;;  %v2603_v7 = vxor.u32 2147483648, %v6078_v47  ;;  %v2841_v19 = vshll.u32 %v10694_v25, %v2829_v40  ;;  %v2689_v48 = vcvt.s32.f32 %v2682_v43  ;;  %v2770_v49 = vsel %vm2768_vm6, %v2769_v5, %v8386_v8 }
 0x2e2   : > { %v2600_v33 = vxor.u32 2147483648, %v6080_v11  ;;  %v2686_v61 = vor.u32 4788187, %v2685_v22  ;;  %v2771_v56 = vadd.s32 %v2770_v49, %v2766_v52  ;;  %v2833_v4 = vshrl.u32 %v10684_v15, %v2830_v27 }
 0x2e3   : > { %v2604_v2 = vsel %vm2602_vm13, %v2603_v7, %v6080_v11  ;;  %v2836_v29 = vshrl.u32 %v10693_v23, %v2830_v27  ;;  %vm2713_vm2 = vcmp.lt.s32.totalorder %v10744_v45, 0  ;;  %v2839_v53 = vshrl.u32 %v10694_v25, %v2830_v27 }
 0x2e4   : > { %v2601_v51 = vsel %vm2599_vm8, %v6078_v47, %v2600_v33  ;;  %v2687_v18 = vand.u32 2147483647, %v2686_v61  ;;  %v2842_v60 = vshrl.u32 %v10695_v35, %v2830_v27  ;;  %v2772_v6 = vadd.s32 536870912, %v2771_v56 }
 0x2e5   : > { %v2605_v26 = vsel %vm2598_vm11, %v2601_v51, %v2604_v2  ;;  %v2834_v10 = vor.u32 %v2833_v4, %v2832_v39  ;;  %v2838_v17 = vshll.u32 %v10693_v23, %v2829_v40  ;;  %v2837_v31 = vor.u32 %v2836_v29, %v2835_v44 }
 0x2e6   : > { %v2606_v9 = vsel %vm2595_vm15, nan, %v2605_v26  ;;  %v2690_v21 = vmul.f32 %v2689_v48, %v2687_v18  ;;  %v2843_v46 = vor.u32 %v2842_v60, %v2841_v19  ;;  %v2773_v62 = vshrl.u32 %v2772_v6, 30 }
 0x2e7   : > { %v2845_v57 = vshrl.u32 %v10696_v38, %v2830_v27  ;;  %v8425_v0 = vshll.u32 %v2823_v12, 8  ;;  %v2919_v8 = vand.u32 2147483647, %v10750_v1  ;;  %5435 = vst [vmem:[%s6771_s9 + $0xa0] sm:$0xff] %v2606_v9  ;;  %v8429_v30 = vand.u32 3, %v2700_v14 }
 0x2e8   : > { %v2691_v55 = vxor.u32 2147483648, %v2690_v21  ;;  %v2840_v24 = vor.u32 %v2839_v53, %v2838_v17  ;;  %v2844_v28 = vshll.u32 %v10695_v35, %v2829_v40  ;;  %v2774_v16 = vshll.u32 %v2773_v62, 30 }
 0x2e9   : > { %v2797_v20 = vsub.s32 4, %v2773_v62  ;;  %vm2847_vm14 = vcmp.lt.s32.totalorder %v8402_v36, 1  ;;  %vm2850_vm1 = vcmp.lt.s32.totalorder %v8402_v36, 4  ;;  %v2831_v14 = vshrl.u32 %v10691_v37, %v2830_v27 }
 0x2ea   : > { %v2692_v42 = vsel %vm2609_vm5, %v2691_v55, %v2690_v21  ;;  %v2846_v41 = vor.u32 %v2845_v57, %v2844_v28  ;;  %v2855_v54 = vsel %vm2847_vm14, %v2834_v10, %v2837_v31  ;;  %v2856_v63 = vsel %vm2850_vm1, %v2843_v46, 920167782 }
 0x2eb   : > { %v2695_v40 = vsel %vm8360_vm3, %v10741_v58, %v2692_v42  ;;  %v8443_v12 = vsub.s32 %v2771_v56, %v2774_v16  ;;  %vm2849_vm10 = vcmp.lt.s32.totalorder %v8402_v36, 3  ;;  %vm2848_vm5 = vcmp.lt.s32.totalorder %v8402_v36, 2 }
 0x2ec   : > { %6081 = vcosq.f32 %v2695_v40  ;;  %v2852_v52 = vsel %vm2850_vm1, %v2840_v24, 2102212464  ;;  %v2857_v5 = vsel %vm2849_vm10, %v2840_v24, %v2856_v63  ;;  %v2798_v50 = vsel %vm2713_vm2, %v2797_v20, %v2773_v62 }
 0x2ed   : > { %6083 = vsinq.f32 %v2695_v40  ;;  %v2777_v47 = vsub.s32 0, %v8443_v12  ;;  %v2858_v43 = vsel %vm2848_vm5, %v2855_v54, %v2857_v5  ;;  %v2859_v27 = vsel %vm2847_vm14, %v2837_v31, %v2840_v24 }
 0x2ee   : > { %v2860_v22 = vsel %vm2850_vm1, %v2846_v41, 1326507024  ;;  %v8460_v39 = vmul.u32.u64.low %v8425_v0, %v2858_v43  ;;  %v8461_v11 = vmul.u32.u64.high %v8425_v0, %v2858_v43, %v8460_v39  ;;  %v2851_v44 = vsel %vm2847_vm14, %v2831_v14, %v2834_v10 }
 0x2ef   : > { %v5642_v7 = vmin.u32 %v2777_v47, %v8443_v12  ;;  %v2853_v19 = vsel %vm2849_vm10, %v2837_v31, %v2852_v52  ;;  %v2861_v33 = vsel %vm2849_vm10, %v2843_v46, %v2860_v22  ;;  %vm8469_vm3 = vcmp.le.f32.partialorder %v2711_v3, 0.7853982  ;;  %v10753_v31 = vld [vmem:[#allocation9_spill] sm:$0xff] }
 0x2f0   : > { %v2862_v48 = vsel %vm2848_vm5, %v2859_v27, %v2861_v33  ;;  %v2922_v49 = vand.u32 2139095040, %v10750_v1  ;;  %v2800_v56 = vsel %vm8469_vm3, 0, %v2798_v50  ;;  %v2854_v4 = vsel %vm2848_vm5, %v2851_v44, %v2853_v19 }
 0x2f1   : > { %v2779_v2 = vclz %v5642_v7  ;;  %v8481_v29 = vmul.u32.u64.low %v8425_v0, %v2862_v48  ;;  %v8482_v51 = vmul.u32.u64.high %v8425_v0, %v2862_v48, %v8481_v29  ;;  %vm2699_vm4 = vweird.f32 %v10741_v58 }
 0x2f2   : > { %v2923_v3 = vshrl.u32 %v2922_v49, 23  ;;  %vm2702_vm9 = vcmp.lt.s32.totalorder %v8429_v30, 2  ;;  %v2926_v53 = vand.u32 8388607, %v2919_v8  ;;  %vm2703_vm7 = vcmp.eq.s32.totalorder %v8429_v30, 0 }
 0x2f3   : > { %v5643_v18 = vadd.s32 4294967294, %v2779_v2  ;;  %vm2706_vm0 = vcmp.eq.s32.totalorder %v8429_v30, 2  ;;  %v2873_v36 = vadd.s32 1, %v8461_v11  ;;  %v2767_v26 = vadd.s32 %v8385_v32, %v8395_v59 }
 0x2f4   : > { %v5649_v60 = vadd.s32 4294967169, %v2923_v3  ;;  %v2804_v6 = vadd.s32 3, %v2800_v56  ;;  %v2870_v10 = vmul.u32 %v8425_v0, %v2854_v4  ;;  %vm2872_vm8 = vc.u32 %v8482_v51, %v8460_v39 }
 0x2f5   : > { %vm5644_vm12 = vcmp.lt.s32.totalorder %v5643_v18, 0  ;;  %v3026_v46 = vand.u32 2139095040, %v10753_v31  ;;  %v2927_v28 = vor.u32 8388608, %v2926_v53  ;;  %v2874_v59 = vsel %vm2872_vm8, %v2873_v36, %v8461_v11 }
 0x2f6   : > { %v6082_v17 = vpop.eup %6081  ;;  %v2782_v9 = vsel %vm5644_vm12, 0, %v5643_v18  ;;  %v2929_v21 = vadd.s32 1, %v5649_v60  ;;  %v2875_v41 = vadd.s32 %v2874_v59, %v2870_v10  ;;  %v3023_v40 = vand.u32 2147483647, %v10753_v31 }
 0x2f7   : > { %v6084_v62 = vpop.eup %6083  ;;  %v2707_v57 = vxor.u32 2147483648, %v6082_v17  ;;  %v2783_v55 = vsub.s32 32, %v2782_v9  ;;  %v2787_v24 = vsub.s32 4294967266, %v2782_v9  ;;  %v2784_v32 = vshll.u32 %v8443_v12, %v2782_v9 }
 0x2f8   : > { %v2704_v16 = vxor.u32 2147483648, %v6084_v62  ;;  %vm2930_vm11 = vcmp.gt.s32.totalorder %v2929_v21, 0  ;;  %v3027_v14 = vshrl.u32 %v3026_v46, 23  ;;  %v2876_v47 = vadd.s32 536870912, %v2875_v41 }
 0x2f9   : > { %v2708_v0 = vsel %vm2706_vm0, %v2707_v57, %v6084_v62  ;;  %v2785_v20 = vshrl.u32 %v2767_v26, %v2783_v55  ;;  %v2788_v42 = vadd.s32 127, %v2787_v24  ;;  %v2931_v63 = vsel %vm2930_vm11, %v2929_v21, 0 }
 0x2fa   : > { %v2705_v54 = vsel %vm2703_vm7, %v6082_v17, %v2704_v16  ;;  %v2933_v43 = vand.u32 31, %v2931_v63  ;;  %v8508_v22 = vand.u32 3, %v2804_v6  ;;  %vm2817_vm15 = vcmp.lt.s32.totalorder %v10747_v13, 0 }
 0x2fb   : > { %v2709_v12 = vsel %vm2702_vm9, %v2705_v54, %v2708_v0  ;;  %v2786_v52 = vor.u32 %v2785_v20, %v2784_v32  ;;  %v2789_v5 = vshll.u32 %v2788_v42, 23  ;;  %v2877_v11 = vshrl.u32 %v2876_v47, 30 }
 0x2fc   : > { %v2710_v50 = vsel %vm2699_vm4, nan, %v2709_v12  ;;  %v2934_v7 = vsub.s32 32, %v2933_v43  ;;  %v8512_v44 = vshll.u32 %v2927_v28, 8  ;;  %v5653_v19 = vadd.s32 4294967169, %v3027_v14 }
 0x2fd   : > { %v2790_v27 = vor.u32 4788187, %v2789_v5  ;;  %5436 = vst [vmem:[%s6771_s9 + $0xa8] sm:$0xff] %v2710_v50  ;;  %v8516_v30 = vand.u32 8388607, %v3023_v40  ;;  %v2793_v48 = vcvt.s32.f32 %v2786_v52  ;;  %v8520_v58 = vadd.s32 %v8460_v39, %v8482_v51 }
 0x2fe   : > { %v2878_v49 = vshll.u32 %v2877_v11, 30  ;;  %v2932_v2 = vshrl.u32 %v2931_v63, 5  ;;  %v2937_v56 = vshrl.u32 %v10684_v15, %v2934_v7  ;;  %v2940_v4 = vshrl.u32 %v10693_v23, %v2934_v7 }
 0x2ff   : > { %v2791_v33 = vand.u32 2147483647, %v2790_v27  ;;  %v2943_v29 = vshrl.u32 %v10694_v25, %v2934_v7  ;;  %v2936_v53 = vshll.u32 %v10691_v37, %v2933_v43  ;;  %v2946_v36 = vshrl.u32 %v10695_v35, %v2934_v7 }
 0x300   : > { %v8525_v18 = vsub.s32 %v2875_v41, %v2878_v49  ;;  %vm8531_vm13 = vcmp.le.f32.partialorder %v2815_v34, 0.7853982  ;;  %v2901_v51 = vsub.s32 4, %v2877_v11  ;;  %v2939_v60 = vshll.u32 %v10684_v15, %v2933_v43 }
 0x301   : > { %v2794_v3 = vmul.f32 %v2793_v48, %v2791_v33  ;;  %v2942_v26 = vshll.u32 %v10693_v23, %v2933_v43  ;;  %v3033_v6 = vadd.s32 1, %v5653_v19  ;;  %v2938_v9 = vor.u32 %v2937_v56, %v2936_v53 }
 0x302   : > { %v2881_v17 = vsub.s32 0, %v8525_v18  ;;  %v2945_v21 = vshll.u32 %v10694_v25, %v2933_v43  ;;  %v2941_v46 = vor.u32 %v2940_v4, %v2939_v60  ;;  %v2948_v57 = vshll.u32 %v10695_v35, %v2933_v43 }
 0x303   : > { %v2795_v10 = vxor.u32 2147483648, %v2794_v3  ;;  %v2944_v62 = vor.u32 %v2943_v29, %v2942_v26  ;;  %v2949_v34 = vshrl.u32 %v10696_v38, %v2934_v7  ;;  %v2935_v28 = vshrl.u32 %v10691_v37, %v2934_v7 }
 0x304   : > { %v5646_v24 = vmin.u32 %v2881_v17, %v8525_v18  ;;  %v2947_v16 = vor.u32 %v2946_v36, %v2945_v21  ;;  %v2902_v59 = vsel %vm2817_vm15, %v2901_v51, %v2877_v11  ;;  %vm2951_vm6 = vcmp.lt.s32.totalorder %v2932_v2, 1 }
 0x305   : > { %v2796_v55 = vsel %vm2713_vm2, %v2795_v10, %v2794_v3  ;;  %v2950_v0 = vor.u32 %v2949_v34, %v2948_v57  ;;  %vm2952_vm14 = vcmp.lt.s32.totalorder %v2932_v2, 2  ;;  %vm2954_vm1 = vcmp.lt.s32.totalorder %v2932_v2, 4 }
 0x306   : > { %v2799_v32 = vsel %vm8469_vm3, %v10744_v45, %v2796_v55  ;;  %v2883_v20 = vclz %v5646_v24  ;;  %vm2953_vm2 = vcmp.lt.s32.totalorder %v2932_v2, 3  ;;  %v2956_v42 = vsel %vm2954_vm1, %v2944_v62, 2102212464 }
 0x307   : > { %6085 = vcosq.f32 %v2799_v32  ;;  %v2959_v41 = vsel %vm2951_vm6, %v2938_v9, %v2941_v46  ;;  %v2955_v63 = vsel %vm2951_vm6, %v2935_v28, %v2938_v9  ;;  %v2960_v14 = vsel %vm2954_vm1, %v2947_v16, 920167782 }
 0x308   : > { %6087 = vsinq.f32 %v2799_v32  ;;  %v5647_v54 = vadd.s32 4294967294, %v2883_v20  ;;  %v2963_v12 = vsel %vm2951_vm6, %v2941_v46, %v2944_v62  ;;  %v2957_v52 = vsel %vm2953_vm2, %v2941_v46, %v2956_v42 }
 0x309   : > { %v2961_v61 = vsel %vm2953_vm2, %v2944_v62, %v2960_v14  ;;  %v2964_v5 = vsel %vm2954_vm1, %v2950_v0, 1326507024  ;;  %vm3034_vm10 = vcmp.gt.s32.totalorder %v3033_v6, 0  ;;  %v2904_v47 = vsel %vm8531_vm13, 0, %v2902_v59 }
 0x30a   : > { %vm5648_vm5 = vcmp.lt.s32.totalorder %v5647_v54, 0  ;;  %v2962_v50 = vsel %vm2952_vm14, %v2959_v41, %v2961_v61  ;;  %v2965_v43 = vsel %vm2953_vm2, %v2947_v16, %v2964_v5  ;;  %vm2807_vm3 = vcmp.eq.s32.totalorder %v8508_v22, 0 }
 0x30b   : > { %v2886_v27 = vsel %vm5648_vm5, 0, %v5647_v54  ;;  %v2966_v11 = vsel %vm2952_vm14, %v2963_v12, %v2965_v43  ;;  %v8556_v7 = vmul.u32.u64.low %v8512_v44, %v2962_v50  ;;  %v8557_v19 = vmul.u32.u64.high %v8512_v44, %v2962_v50, %v8556_v7 }
 0x30c   : > { %vm2806_vm4 = vcmp.lt.s32.totalorder %v8508_v22, 2  ;;  %v2887_v33 = vsub.s32 32, %v2886_v27  ;;  %v2891_v48 = vsub.s32 4294967266, %v2886_v27  ;;  %v2958_v49 = vsel %vm2952_vm14, %v2955_v63, %v2957_v52 }
 0x30d   : > { %v3035_v56 = vsel %vm3034_vm10, %v3033_v6, 0  ;;  %vm2803_vm9 = vweird.f32 %v10744_v45  ;;  %vm2810_vm7 = vcmp.eq.s32.totalorder %v8508_v22, 2  ;;  %v2888_v53 = vshll.u32 %v8525_v18, %v2886_v27 }
 0x30e   : > { %v8565_v4 = vmul.u32.u64.low %v8512_v44, %v2966_v11  ;;  %v8566_v29 = vmul.u32.u64.high %v8512_v44, %v2966_v11, %v8565_v4  ;;  %v3037_v3 = vand.u32 31, %v3035_v56  ;;  %v2889_v36 = vshrl.u32 %v8520_v58, %v2887_v33  ;;  %v10756_v11 = vld [vmem:[#allocation10_spill] sm:$0xff] }
 0x30f   : > { %v2892_v51 = vadd.s32 127, %v2891_v48  ;;  %v3031_v60 = vor.u32 8388608, %v8516_v30  ;;  %v2908_v26 = vadd.s32 3, %v2904_v47  ;;  %v2974_v2 = vmul.u32 %v8512_v44, %v2958_v49 }
 0x310   : > { %v2977_v6 = vadd.s32 1, %v8557_v19  ;;  %v3038_v10 = vsub.s32 32, %v3037_v3  ;;  %v2890_v9 = vor.u32 %v2889_v36, %v2888_v53  ;;  %v8573_v46 = vshrl.u32 %v3035_v56, 5 }
 0x311   : > { %v6086_v17 = vpop.eup %6085  ;;  %v2893_v21 = vshll.u32 %v2892_v51, 23  ;;  %v3040_v62 = vshll.u32 %v10691_v37, %v3037_v3  ;;  %vm2976_vm0 = vc.u32 %v8566_v29, %v8556_v7  ;;  %v3043_v30 = vshll.u32 %v10684_v15, %v3037_v3 }
 0x312   : > { %v6088_v57 = vpop.eup %6087  ;;  %v2811_v18 = vxor.u32 2147483648, %v6086_v17  ;;  %v3049_v58 = vshll.u32 %v10694_v25, %v3037_v3  ;;  %v2897_v55 = vcvt.s32.f32 %v2890_v9  ;;  %v2978_v24 = vsel %vm2976_vm0, %v2977_v6, %v8557_v19 }
 0x313   : > { %v2808_v44 = vxor.u32 2147483648, %v6088_v57  ;;  %v2894_v34 = vor.u32 4788187, %v2893_v21  ;;  %v2979_v16 = vadd.s32 %v2978_v24, %v2974_v2  ;;  %v3041_v32 = vshrl.u32 %v10684_v15, %v3038_v10 }
 0x314   : > { %v2812_v28 = vsel %vm2810_vm7, %v2811_v18, %v6088_v57  ;;  %v3044_v59 = vshrl.u32 %v10693_v23, %v3038_v10  ;;  %vm2921_vm12 = vcmp.lt.s32.totalorder %v10750_v1, 0  ;;  %v3047_v42 = vshrl.u32 %v10694_v25, %v3038_v10 }
 0x315   : > { %v2809_v0 = vsel %vm2807_vm3, %v6086_v17, %v2808_v44  ;;  %v2895_v20 = vand.u32 2147483647, %v2894_v34  ;;  %v3050_v41 = vshrl.u32 %v10695_v35, %v3038_v10  ;;  %v2980_v63 = vadd.s32 536870912, %v2979_v16 }
 0x316   : > { %v2813_v54 = vsel %vm2806_vm4, %v2809_v0, %v2812_v28  ;;  %v3042_v14 = vor.u32 %v3041_v32, %v3040_v62  ;;  %v3046_v12 = vshll.u32 %v10693_v23, %v3037_v3  ;;  %v3045_v5 = vor.u32 %v3044_v59, %v3043_v30 }
 0x317   : > { %v2814_v52 = vsel %vm2803_vm9, nan, %v2813_v54  ;;  %v2898_v61 = vmul.f32 %v2897_v55, %v2895_v20  ;;  %v3051_v47 = vor.u32 %v3050_v41, %v3049_v58  ;;  %v2981_v50 = vshrl.u32 %v2980_v63, 30 }
 0x318   : > { %v3053_v43 = vshrl.u32 %v10696_v38, %v3038_v10  ;;  %v8596_v27 = vshll.u32 %v3031_v60, 8  ;;  %v3127_v19 = vand.u32 2147483647, %v10756_v11  ;;  %5437 = vst [vmem:[%s6771_s9 + $0xb0] sm:$0xff] %v2814_v52  ;;  %v8600_v33 = vand.u32 3, %v2908_v26 }
 0x319   : > { %v2899_v22 = vxor.u32 2147483648, %v2898_v61  ;;  %v3048_v48 = vor.u32 %v3047_v42, %v3046_v12  ;;  %v3052_v49 = vshll.u32 %v10695_v35, %v3037_v3  ;;  %v2982_v56 = vshll.u32 %v2981_v50, 30 }
 0x31a   : > { %v3005_v45 = vsub.s32 4, %v2981_v50  ;;  %vm3055_vm8 = vcmp.lt.s32.totalorder %v8573_v46, 1  ;;  %vm3058_vm11 = vcmp.lt.s32.totalorder %v8573_v46, 4  ;;  %v3039_v26 = vshrl.u32 %v10691_v37, %v3038_v10 }
 0x31b   : > { %v2900_v4 = vsel %vm2817_vm15, %v2899_v22, %v2898_v61  ;;  %v3054_v53 = vor.u32 %v3053_v43, %v3052_v49  ;;  %v3063_v36 = vsel %vm3055_vm8, %v3042_v14, %v3045_v5  ;;  %v3064_v51 = vsel %vm3058_vm11, %v3051_v47, 920167782 }
 0x31c   : > { %v2903_v3 = vsel %vm8531_vm13, %v10747_v13, %v2900_v4  ;;  %v8614_v60 = vsub.s32 %v2979_v16, %v2982_v56  ;;  %vm3057_vm6 = vcmp.lt.s32.totalorder %v8573_v46, 3  ;;  %vm3056_vm15 = vcmp.lt.s32.totalorder %v8573_v46, 2 }
 0x31d   : > { %6089 = vcosq.f32 %v2903_v3  ;;  %v3060_v2 = vsel %vm3058_vm11, %v3048_v48, 2102212464  ;;  %v3065_v6 = vsel %vm3057_vm6, %v3048_v48, %v3064_v51  ;;  %v3006_v39 = vsel %vm2921_vm12, %v3005_v45, %v2981_v50 }
 0x31e   : > { %6091 = vsinq.f32 %v2903_v3  ;;  %v2985_v17 = vsub.s32 0, %v8614_v60  ;;  %v3066_v9 = vsel %vm3056_vm15, %v3063_v36, %v3065_v6  ;;  %v3067_v10 = vsel %vm3055_vm8, %v3045_v5, %v3048_v48 }
 0x31f   : > { %v3068_v21 = vsel %vm3058_vm11, %v3054_v53, 1326507024  ;;  %v8631_v62 = vmul.u32.u64.low %v8596_v27, %v3066_v9  ;;  %v8632_v57 = vmul.u32.u64.high %v8596_v27, %v3066_v9, %v8631_v62  ;;  %v3059_v30 = vsel %vm3055_vm8, %v3039_v26, %v3042_v14 }
 0x320   : > { %v5650_v18 = vmin.u32 %v2985_v17, %v8614_v60  ;;  %v3061_v58 = vsel %vm3057_vm6, %v3045_v5, %v3060_v2  ;;  %v3069_v44 = vsel %vm3057_vm6, %v3051_v47, %v3068_v21  ;;  %vm8640_vm13 = vcmp.le.f32.partialorder %v2919_v8, 0.7853982  ;;  %v10759_v5 = vld [vmem:[#allocation11_spill] sm:$0xff] }
 0x321   : > { %v3070_v55 = vsel %vm3056_vm15, %v3067_v10, %v3069_v44  ;;  %v3130_v24 = vand.u32 2139095040, %v10756_v11  ;;  %v3008_v16 = vsel %vm8640_vm13, 0, %v3006_v39  ;;  %v3062_v32 = vsel %vm3056_vm15, %v3059_v30, %v3061_v58 }
 0x322   : > { %v2987_v28 = vclz %v5650_v18  ;;  %v8652_v59 = vmul.u32.u64.low %v8596_v27, %v3070_v55  ;;  %v8653_v0 = vmul.u32.u64.high %v8596_v27, %v3070_v55, %v8652_v59  ;;  %vm2907_vm14 = vweird.f32 %v10747_v13 }
 0x323   : > { %v3131_v8 = vshrl.u32 %v3130_v24, 23  ;;  %vm2910_vm1 = vcmp.lt.s32.totalorder %v8600_v33, 2  ;;  %v3134_v42 = vand.u32 8388607, %v3127_v19  ;;  %vm2911_vm2 = vcmp.eq.s32.totalorder %v8600_v33, 0 }
 0x324   : > { %v5651_v20 = vadd.s32 4294967294, %v2987_v28  ;;  %vm2914_vm10 = vcmp.eq.s32.totalorder %v8600_v33, 2  ;;  %v3081_v46 = vadd.s32 1, %v8632_v57  ;;  %v2975_v54 = vadd.s32 %v8556_v7, %v8566_v29 }
 0x325   : > { %v5657_v41 = vadd.s32 4294967169, %v3131_v8  ;;  %v3012_v63 = vadd.s32 3, %v3008_v16  ;;  %v3078_v14 = vmul.u32 %v8596_v27, %v3062_v32  ;;  %vm3080_vm3 = vc.u32 %v8653_v0, %v8631_v62 }
 0x326   : > { %vm5652_vm5 = vcmp.lt.s32.totalorder %v5651_v20, 0  ;;  %v3234_v47 = vand.u32 2139095040, %v10759_v5  ;;  %v3135_v49 = vor.u32 8388608, %v3134_v42  ;;  %v3082_v29 = vsel %vm3080_vm3, %v3081_v46, %v8632_v57 }
 0x327   : > { %v6090_v12 = vpop.eup %6089  ;;  %v2990_v52 = vsel %vm5652_vm5, 0, %v5651_v20  ;;  %v3137_v61 = vadd.s32 1, %v5657_v41  ;;  %v3083_v53 = vadd.s32 %v3082_v29, %v3078_v14  ;;  %v3231_v3 = vand.u32 2147483647, %v10759_v5 }
 0x328   : > { %v6092_v50 = vpop.eup %6091  ;;  %v2915_v43 = vxor.u32 2147483648, %v6090_v12  ;;  %v2991_v22 = vsub.s32 32, %v2990_v52  ;;  %v2995_v48 = vsub.s32 4294967266, %v2990_v52  ;;  %v2992_v7 = vshll.u32 %v8614_v60, %v2990_v52 }
 0x329   : > { %v2912_v56 = vxor.u32 2147483648, %v6092_v50  ;;  %vm3138_vm4 = vcmp.gt.s32.totalorder %v3137_v61, 0  ;;  %v3235_v26 = vshrl.u32 %v3234_v47, 23  ;;  %v3084_v17 = vadd.s32 536870912, %v3083_v53 }
 0x32a   : > { %v2916_v27 = vsel %vm2914_vm10, %v2915_v43, %v6092_v50  ;;  %v2993_v45 = vshrl.u32 %v2975_v54, %v2991_v22  ;;  %v2996_v4 = vadd.s32 127, %v2995_v48  ;;  %v3139_v51 = vsel %vm3138_vm4, %v3137_v61, 0 }
 0x32b   : > { %v2913_v36 = vsel %vm2911_vm2, %v6090_v12, %v2912_v56  ;;  %v3141_v9 = vand.u32 31, %v3139_v51  ;;  %v8679_v21 = vand.u32 3, %v3012_v63  ;;  %vm3025_vm9 = vcmp.lt.s32.totalorder %v10753_v31, 0 }
 0x32c   : > { %v2917_v60 = vsel %vm2910_vm1, %v2913_v36, %v2916_v27  ;;  %v2994_v2 = vor.u32 %v2993_v45, %v2992_v7  ;;  %v2997_v6 = vshll.u32 %v2996_v4, 23  ;;  %v3085_v57 = vshrl.u32 %v3084_v17, 30 }
 0x32d   : > { %v2918_v39 = vsel %vm2907_vm14, nan, %v2917_v60  ;;  %v3142_v18 = vsub.s32 32, %v3141_v9  ;;  %v8683_v30 = vshll.u32 %v3135_v49, 8  ;;  %v5661_v58 = vadd.s32 4294967169, %v3235_v26 }
 0x32e   : > { %v2998_v10 = vor.u32 4788187, %v2997_v6  ;;  %5438 = vst [vmem:[%s6771_s9 + $0xb8] sm:$0xff] %v2918_v39  ;;  %v8687_v33 = vand.u32 8388607, %v3231_v3  ;;  %v3001_v55 = vcvt.s32.f32 %v2994_v2  ;;  %v8691_v13 = vadd.s32 %v8631_v62, %v8653_v0 }
 0x32f   : > { %v3086_v24 = vshll.u32 %v3085_v57, 30  ;;  %v3140_v28 = vshrl.u32 %v3139_v51, 5  ;;  %v3145_v16 = vshrl.u32 %v10684_v15, %v3142_v18  ;;  %v3148_v32 = vshrl.u32 %v10693_v23, %v3142_v18 }
 0x330   : > { %v2999_v44 = vand.u32 2147483647, %v2998_v10  ;;  %v3151_v59 = vshrl.u32 %v10694_v25, %v3142_v18  ;;  %v3144_v42 = vshll.u32 %v10691_v37, %v3141_v9  ;;  %v3154_v46 = vshrl.u32 %v10695_v35, %v3142_v18 }
 0x331   : > { %v8696_v20 = vsub.s32 %v3083_v53, %v3086_v24  ;;  %vm8702_vm7 = vcmp.le.f32.partialorder %v3023_v40, 0.7853982  ;;  %v3109_v0 = vsub.s32 4, %v3085_v57  ;;  %v3147_v41 = vshll.u32 %v10684_v15, %v3141_v9 }
 0x332   : > { %v3002_v8 = vmul.f32 %v3001_v55, %v2999_v44  ;;  %v3150_v54 = vshll.u32 %v10693_v23, %v3141_v9  ;;  %v3241_v63 = vadd.s32 1, %v5661_v58  ;;  %v3146_v52 = vor.u32 %v3145_v16, %v3144_v42 }
 0x333   : > { %v3089_v12 = vsub.s32 0, %v8696_v20  ;;  %v3153_v61 = vshll.u32 %v10694_v25, %v3141_v9  ;;  %v3149_v47 = vor.u32 %v3148_v32, %v3147_v41  ;;  %v3156_v43 = vshll.u32 %v10695_v35, %v3141_v9 }
 0x334   : > { %v3003_v14 = vxor.u32 2147483648, %v3002_v8  ;;  %v3152_v50 = vor.u32 %v3151_v59, %v3150_v54  ;;  %v3157_v40 = vshrl.u32 %v10696_v38, %v3142_v18  ;;  %v3143_v49 = vshrl.u32 %v10691_v37, %v3142_v18 }
 0x335   : > { %v5654_v48 = vmin.u32 %v3089_v12, %v8696_v20  ;;  %v3155_v56 = vor.u32 %v3154_v46, %v3153_v61  ;;  %v3110_v29 = vsel %vm3025_vm9, %v3109_v0, %v3085_v57  ;;  %vm3159_vm0 = vcmp.lt.s32.totalorder %v3140_v28, 1 }
 0x336   : > { %v3004_v22 = vsel %vm2921_vm12, %v3003_v14, %v3002_v8  ;;  %v3158_v27 = vor.u32 %v3157_v40, %v3156_v43  ;;  %vm3160_vm8 = vcmp.lt.s32.totalorder %v3140_v28, 2  ;;  %vm3162_vm11 = vcmp.lt.s32.totalorder %v3140_v28, 4 }
 0x337   : > { %v3007_v7 = vsel %vm8640_vm13, %v10750_v1, %v3004_v22  ;;  %v3091_v45 = vclz %v5654_v48  ;;  %vm3161_vm12 = vcmp.lt.s32.totalorder %v3140_v28, 3  ;;  %v3164_v4 = vsel %vm3162_vm11, %v3152_v50, 2102212464 }
 0x338   : > { %6093 = vcosq.f32 %v3007_v7  ;;  %v3167_v53 = vsel %vm3159_vm0, %v3146_v52, %v3149_v47  ;;  %v3163_v51 = vsel %vm3159_vm0, %v3143_v49, %v3146_v52  ;;  %v3168_v26 = vsel %vm3162_vm11, %v3155_v56, 920167782 }
 0x339   : > { %6095 = vsinq.f32 %v3007_v7  ;;  %v5655_v36 = vadd.s32 4294967294, %v3091_v45  ;;  %v3171_v60 = vsel %vm3159_vm0, %v3149_v47, %v3152_v50  ;;  %v3165_v2 = vsel %vm3161_vm12, %v3149_v47, %v3164_v4 }
 0x33a   : > { %v3169_v34 = vsel %vm3161_vm12, %v3152_v50, %v3168_v26  ;;  %v3172_v6 = vsel %vm3162_vm11, %v3158_v27, 1326507024  ;;  %vm3242_vm6 = vcmp.gt.s32.totalorder %v3241_v63, 0  ;;  %v3112_v17 = vsel %vm8702_vm7, 0, %v3110_v29 }
 0x33b   : > { %vm5656_vm15 = vcmp.lt.s32.totalorder %v5655_v36, 0  ;;  %v3170_v39 = vsel %vm3160_vm8, %v3167_v53, %v3169_v34  ;;  %v3173_v9 = vsel %vm3161_vm12, %v3155_v56, %v3172_v6  ;;  %vm3015_vm13 = vcmp.eq.s32.totalorder %v8679_v21, 0 }
 0x33c   : > { %v3094_v10 = vsel %vm5656_vm15, 0, %v5655_v36  ;;  %v3174_v57 = vsel %vm3160_vm8, %v3171_v60, %v3173_v9  ;;  %v8727_v18 = vmul.u32.u64.low %v8683_v30, %v3170_v39  ;;  %v8728_v58 = vmul.u32.u64.high %v8683_v30, %v3170_v39, %v8727_v18 }
 0x33d   : > { %vm3014_vm14 = vcmp.lt.s32.totalorder %v8679_v21, 2  ;;  %v3095_v44 = vsub.s32 32, %v3094_v10  ;;  %v3099_v55 = vsub.s32 4294967266, %v3094_v10  ;;  %v3166_v24 = vsel %vm3160_vm8, %v3163_v51, %v3165_v2 }
 0x33e   : > { %v3243_v16 = vsel %vm3242_vm6, %v3241_v63, 0  ;;  %vm3011_vm1 = vweird.f32 %v10750_v1  ;;  %vm3018_vm2 = vcmp.eq.s32.totalorder %v8679_v21, 2  ;;  %v3096_v42 = vshll.u32 %v8696_v20, %v3094_v10 }
 0x33f   : > { %v8736_v32 = vmul.u32.u64.low %v8683_v30, %v3174_v57  ;;  %v8737_v59 = vmul.u32.u64.high %v8683_v30, %v3174_v57, %v8736_v32  ;;  %v3245_v8 = vand.u32 31, %v3243_v16  ;;  %v3097_v46 = vshrl.u32 %v8691_v13, %v3095_v44  ;;  %v10762_v57 = vld [vmem:[#allocation12_spill] sm:$0xff] }
 0x340   : > { %v3100_v0 = vadd.s32 127, %v3099_v55  ;;  %v3239_v41 = vor.u32 8388608, %v8687_v33  ;;  %v3116_v54 = vadd.s32 3, %v3112_v17  ;;  %v3182_v28 = vmul.u32 %v8683_v30, %v3166_v24 }
 0x341   : > { %v3185_v63 = vadd.s32 1, %v8728_v58  ;;  %v3246_v14 = vsub.s32 32, %v3245_v8  ;;  %v3098_v52 = vor.u32 %v3097_v46, %v3096_v42  ;;  %v8744_v47 = vshrl.u32 %v3243_v16, 5 }
 0x342   : > { %v6094_v12 = vpop.eup %6093  ;;  %v3101_v61 = vshll.u32 %v3100_v0, 23  ;;  %v3248_v50 = vshll.u32 %v10691_v37, %v3245_v8  ;;  %vm3184_vm10 = vc.u32 %v8737_v59, %v8727_v18  ;;  %v3251_v33 = vshll.u32 %v10684_v15, %v3245_v8 }
 0x343   : > { %v6096_v43 = vpop.eup %6095  ;;  %v3019_v20 = vxor.u32 2147483648, %v6094_v12  ;;  %v3257_v13 = vshll.u32 %v10694_v25, %v3245_v8  ;;  %v3105_v22 = vcvt.s32.f32 %v3098_v52  ;;  %v3186_v48 = vsel %vm3184_vm10, %v3185_v63, %v8728_v58 }
 0x344   : > { %v3016_v30 = vxor.u32 2147483648, %v6096_v43  ;;  %v3102_v40 = vor.u32 4788187, %v3101_v61  ;;  %v3187_v56 = vadd.s32 %v3186_v48, %v3182_v28  ;;  %v3249_v7 = vshrl.u32 %v10684_v15, %v3246_v14 }
 0x345   : > { %v3020_v49 = vsel %vm3018_vm2, %v3019_v20, %v6096_v43  ;;  %v3252_v29 = vshrl.u32 %v10693_v23, %v3246_v14  ;;  %vm3129_vm5 = vcmp.lt.s32.totalorder %v10756_v11, 0  ;;  %v3255_v4 = vshrl.u32 %v10694_v25, %v3246_v14 }
 0x346   : > { %v3017_v27 = vsel %vm3015_vm13, %v6094_v12, %v3016_v30  ;;  %v3103_v45 = vand.u32 2147483647, %v3102_v40  ;;  %v3258_v53 = vshrl.u32 %v10695_v35, %v3246_v14  ;;  %v3188_v51 = vadd.s32 536870912, %v3187_v56 }
 0x347   : > { %v3021_v36 = vsel %vm3014_vm14, %v3017_v27, %v3020_v49  ;;  %v3250_v26 = vor.u32 %v3249_v7, %v3248_v50  ;;  %v3254_v60 = vshll.u32 %v10693_v23, %v3245_v8  ;;  %v3253_v6 = vor.u32 %v3252_v29, %v3251_v33 }
 0x348   : > { %v3022_v2 = vsel %vm3011_vm1, nan, %v3021_v36  ;;  %v3106_v34 = vmul.f32 %v3105_v22, %v3103_v45  ;;  %v3259_v17 = vor.u32 %v3258_v53, %v3257_v13  ;;  %v3189_v39 = vshrl.u32 %v3188_v51, 30 }
 0x349   : > { %v3261_v9 = vshrl.u32 %v10696_v38, %v3246_v14  ;;  %v8767_v10 = vshll.u32 %v3239_v41, 8  ;;  %v3335_v58 = vand.u32 2147483647, %v10762_v57  ;;  %5439 = vst [vmem:[%s6771_s9 + $0xc0] sm:$0xff] %v3022_v2  ;;  %v8771_v44 = vand.u32 3, %v3116_v54 }
 0x34a   : > { %v3107_v21 = vxor.u32 2147483648, %v3106_v34  ;;  %v3256_v55 = vor.u32 %v3255_v4, %v3254_v60  ;;  %v3260_v24 = vshll.u32 %v10695_v35, %v3245_v8  ;;  %v3190_v16 = vshll.u32 %v3189_v39, 30 }
 0x34b   : > { %v3213_v1 = vsub.s32 4, %v3189_v39  ;;  %vm3263_vm3 = vcmp.lt.s32.totalorder %v8744_v47, 1  ;;  %vm3266_vm4 = vcmp.lt.s32.totalorder %v8744_v47, 4  ;;  %v3247_v54 = vshrl.u32 %v10691_v37, %v3246_v14 }
 0x34c   : > { %v3108_v32 = vsel %vm3025_vm9, %v3107_v21, %v3106_v34  ;;  %v3262_v42 = vor.u32 %v3261_v9, %v3260_v24  ;;  %v3271_v46 = vsel %vm3263_vm3, %v3250_v26, %v3253_v6  ;;  %v3272_v0 = vsel %vm3266_vm4, %v3259_v17, 920167782 }
 0x34d   : > { %v3111_v8 = vsel %vm8702_vm7, %v10753_v31, %v3108_v32  ;;  %v8785_v41 = vsub.s32 %v3187_v56, %v3190_v16  ;;  %vm3265_vm0 = vcmp.lt.s32.totalorder %v8744_v47, 3  ;;  %vm3264_vm9 = vcmp.lt.s32.totalorder %v8744_v47, 2 }
 0x34e   : > { %6097 = vcosq.f32 %v3111_v8  ;;  %v3268_v28 = vsel %vm3266_vm4, %v3256_v55, 2102212464  ;;  %v3273_v63 = vsel %vm3265_vm0, %v3256_v55, %v3272_v0  ;;  %v3214_v62 = vsel %vm3129_vm5, %v3213_v1, %v3189_v39 }
 0x34f   : > { %6099 = vsinq.f32 %v3111_v8  ;;  %v3193_v12 = vsub.s32 0, %v8785_v41  ;;  %v3274_v52 = vsel %vm3264_vm9, %v3271_v46, %v3273_v63  ;;  %v3275_v14 = vsel %vm3263_vm3, %v3253_v6, %v3256_v55 }
 0x350   : > { %v3276_v61 = vsel %vm3266_vm4, %v3262_v42, 1326507024  ;;  %v8802_v50 = vmul.u32.u64.low %v8767_v10, %v3274_v52  ;;  %v8803_v43 = vmul.u32.u64.high %v8767_v10, %v3274_v52, %v8802_v50  ;;  %v3267_v33 = vsel %vm3263_vm3, %v3247_v54, %v3250_v26 }
 0x351   : > { %v5658_v20 = vmin.u32 %v3193_v12, %v8785_v41  ;;  %v3269_v13 = vsel %vm3265_vm0, %v3253_v6, %v3268_v28  ;;  %v3277_v30 = vsel %vm3265_vm0, %v3259_v17, %v3276_v61  ;;  %vm8811_vm7 = vcmp.le.f32.partialorder %v3127_v19, 0.7853982  ;;  %v10765_v6 = vld [vmem:[#allocation13_spill] sm:$0xff] }
 0x352   : > { %v3278_v22 = vsel %vm3264_vm9, %v3275_v14, %v3277_v30  ;;  %v3338_v48 = vand.u32 2139095040, %v10762_v57  ;;  %v3216_v56 = vsel %vm8811_vm7, 0, %v3214_v62  ;;  %v3270_v7 = vsel %vm3264_vm9, %v3267_v33, %v3269_v13 }
 0x353   : > { %v3195_v49 = vclz %v5658_v20  ;;  %v8823_v29 = vmul.u32.u64.low %v8767_v10, %v3278_v22  ;;  %v8824_v27 = vmul.u32.u64.high %v8767_v10, %v3278_v22, %v8823_v29  ;;  %vm3115_vm8 = vweird.f32 %v10753_v31 }
 0x354   : > { %v3339_v19 = vshrl.u32 %v3338_v48, 23  ;;  %vm3118_vm11 = vcmp.lt.s32.totalorder %v8771_v44, 2  ;;  %v3342_v4 = vand.u32 8388607, %v3335_v58  ;;  %vm3119_vm12 = vcmp.eq.s32.totalorder %v8771_v44, 0 }
 0x355   : > { %v5659_v45 = vadd.s32 4294967294, %v3195_v49  ;;  %vm3122_vm6 = vcmp.eq.s32.totalorder %v8771_v44, 2  ;;  %v3289_v47 = vadd.s32 1, %v8803_v43  ;;  %v3183_v36 = vadd.s32 %v8727_v18, %v8737_v59 }
 0x356   : > { %v5665_v53 = vadd.s32 4294967169, %v3339_v19  ;;  %v3220_v51 = vadd.s32 3, %v3216_v56  ;;  %v3286_v26 = vmul.u32 %v8767_v10, %v3270_v7  ;;  %vm3288_vm13 = vc.u32 %v8824_v27, %v8802_v50 }
 0x357   : > { %vm5660_vm15 = vcmp.lt.s32.totalorder %v5659_v45, 0  ;;  %v3442_v17 = vand.u32 2139095040, %v10765_v6  ;;  %v3343_v24 = vor.u32 8388608, %v3342_v4  ;;  %v3290_v59 = vsel %vm3288_vm13, %v3289_v47, %v8803_v43 }
 0x358   : > { %v6098_v60 = vpop.eup %6097  ;;  %v3198_v2 = vsel %vm5660_vm15, 0, %v5659_v45  ;;  %v3345_v34 = vadd.s32 1, %v5665_v53  ;;  %v3291_v42 = vadd.s32 %v3290_v59, %v3286_v26  ;;  %v3439_v8 = vand.u32 2147483647, %v10765_v6 }
 0x359   : > { %v6100_v39 = vpop.eup %6099  ;;  %v3123_v9 = vxor.u32 2147483648, %v6098_v60  ;;  %v3199_v21 = vsub.s32 32, %v3198_v2  ;;  %v3203_v55 = vsub.s32 4294967266, %v3198_v2  ;;  %v3200_v18 = vshll.u32 %v8785_v41, %v3198_v2 }
 0x35a   : > { %v3120_v16 = vxor.u32 2147483648, %v6100_v39  ;;  %vm3346_vm14 = vcmp.gt.s32.totalorder %v3345_v34, 0  ;;  %v3443_v54 = vshrl.u32 %v3442_v17, 23  ;;  %v3292_v12 = vadd.s32 536870912, %v3291_v42 }
 0x35b   : > { %v3124_v10 = vsel %vm3122_vm6, %v3123_v9, %v6100_v39  ;;  %v3201_v1 = vshrl.u32 %v3183_v36, %v3199_v21  ;;  %v3204_v32 = vadd.s32 127, %v3203_v55  ;;  %v3347_v0 = vsel %vm3346_vm14, %v3345_v34, 0 }
 0x35c   : > { %v3121_v46 = vsel %vm3119_vm12, %v6098_v60, %v3120_v16  ;;  %v3349_v52 = vand.u32 31, %v3347_v0  ;;  %v8850_v61 = vand.u32 3, %v3220_v51  ;;  %vm3233_vm1 = vcmp.lt.s32.totalorder %v10759_v5, 0 }
 0x35d   : > { %v3125_v41 = vsel %vm3118_vm11, %v3121_v46, %v3124_v10  ;;  %v3202_v28 = vor.u32 %v3201_v1, %v3200_v18  ;;  %v3205_v63 = vshll.u32 %v3204_v32, 23  ;;  %v3293_v43 = vshrl.u32 %v3292_v12, 30 }
 0x35e   : > { %v3126_v62 = vsel %vm3115_vm8, nan, %v3125_v41  ;;  %v3350_v20 = vsub.s32 32, %v3349_v52  ;;  %v8854_v33 = vshll.u32 %v3343_v24, 8  ;;  %v5669_v13 = vadd.s32 4294967169, %v3443_v54 }
 0x35f   : > { %v3206_v14 = vor.u32 4788187, %v3205_v63  ;;  %5440 = vst [vmem:[%s6771_s9 + $0xc8] sm:$0xff] %v3126_v62  ;;  %v8858_v44 = vand.u32 8388607, %v3439_v8  ;;  %v3209_v22 = vcvt.s32.f32 %v3202_v28  ;;  %v8862_v31 = vadd.s32 %v8802_v50, %v8824_v27 }
 0x360   : > { %v3294_v48 = vshll.u32 %v3293_v43, 30  ;;  %v3348_v49 = vshrl.u32 %v3347_v0, 5  ;;  %v3353_v56 = vshrl.u32 %v10684_v15, %v3350_v20  ;;  %v3356_v7 = vshrl.u32 %v10693_v23, %v3350_v20 }
 0x361   : > { %v3207_v30 = vand.u32 2147483647, %v3206_v14  ;;  %v3359_v29 = vshrl.u32 %v10694_v25, %v3350_v20  ;;  %v3352_v4 = vshll.u32 %v10691_v37, %v3349_v52  ;;  %v3362_v47 = vshrl.u32 %v10695_v35, %v3350_v20 }
 0x362   : > { %v8867_v45 = vsub.s32 %v3291_v42, %v3294_v48  ;;  %vm8873_vm2 = vcmp.le.f32.partialorder %v3231_v3, 0.7853982  ;;  %v3317_v27 = vsub.s32 4, %v3293_v43  ;;  %v3355_v53 = vshll.u32 %v10684_v15, %v3349_v52 }
 0x363   : > { %v3210_v19 = vmul.f32 %v3209_v22, %v3207_v30  ;;  %v3358_v36 = vshll.u32 %v10693_v23, %v3349_v52  ;;  %v3449_v51 = vadd.s32 1, %v5669_v13  ;;  %v3354_v2 = vor.u32 %v3353_v56, %v3352_v4 }
 0x364   : > { %v3297_v60 = vsub.s32 0, %v8867_v45  ;;  %v3361_v34 = vshll.u32 %v10694_v25, %v3349_v52  ;;  %v3357_v17 = vor.u32 %v3356_v7, %v3355_v53  ;;  %v3364_v9 = vshll.u32 %v10695_v35, %v3349_v52 }
 0x365   : > { %v3211_v26 = vxor.u32 2147483648, %v3210_v19  ;;  %v3360_v39 = vor.u32 %v3359_v29, %v3358_v36  ;;  %v3365_v3 = vshrl.u32 %v10696_v38, %v3350_v20  ;;  %v3351_v24 = vshrl.u32 %v10691_v37, %v3350_v20 }
 0x366   : > { %v5662_v55 = vmin.u32 %v3297_v60, %v8867_v45  ;;  %v3363_v16 = vor.u32 %v3362_v47, %v3361_v34  ;;  %v3318_v59 = vsel %vm3233_vm1, %v3317_v27, %v3293_v43  ;;  %vm3367_vm10 = vcmp.lt.s32.totalorder %v3348_v49, 1 }
 0x367   : > { %v3212_v21 = vsel %vm3129_vm5, %v3211_v26, %v3210_v19  ;;  %v3366_v10 = vor.u32 %v3365_v3, %v3364_v9  ;;  %vm3368_vm3 = vcmp.lt.s32.totalorder %v3348_v49, 2  ;;  %vm3370_vm4 = vcmp.lt.s32.totalorder %v3348_v49, 4 }
 0x368   : > { %v3215_v18 = vsel %vm8811_vm7, %v10756_v11, %v3212_v21  ;;  %v3299_v1 = vclz %v5662_v55  ;;  %vm3369_vm5 = vcmp.lt.s32.totalorder %v3348_v49, 3  ;;  %v3372_v32 = vsel %vm3370_vm4, %v3360_v39, 2102212464 }
 0x369   : > { %6101 = vcosq.f32 %v3215_v18  ;;  %v3375_v42 = vsel %vm3367_vm10, %v3354_v2, %v3357_v17  ;;  %v3371_v0 = vsel %vm3367_vm10, %v3351_v24, %v3354_v2  ;;  %v3376_v54 = vsel %vm3370_vm4, %v3363_v16, 920167782 }
 0x36a   : > { %6103 = vsinq.f32 %v3215_v18  ;;  %v5663_v46 = vadd.s32 4294967294, %v3299_v1  ;;  %v3379_v41 = vsel %vm3367_vm10, %v3357_v17, %v3360_v39  ;;  %v3373_v28 = vsel %vm3369_vm5, %v3357_v17, %v3372_v32 }
 0x36b   : > { %v3377_v40 = vsel %vm3369_vm5, %v3360_v39, %v3376_v54  ;;  %v3380_v63 = vsel %vm3370_vm4, %v3366_v10, 1326507024  ;;  %vm3450_vm0 = vcmp.gt.s32.totalorder %v3449_v51, 0  ;;  %v3320_v12 = vsel %vm8873_vm2, 0, %v3318_v59 }
 0x36c   : > { %vm5664_vm9 = vcmp.lt.s32.totalorder %v5663_v46, 0  ;;  %v3378_v62 = vsel %vm3368_vm3, %v3375_v42, %v3377_v40  ;;  %v3381_v52 = vsel %vm3369_vm5, %v3363_v16, %v3380_v63  ;;  %vm3223_vm7 = vcmp.eq.s32.totalorder %v8850_v61, 0 }
 0x36d   : > { %v3302_v14 = vsel %vm5664_vm9, 0, %v5663_v46  ;;  %v3382_v43 = vsel %vm3368_vm3, %v3379_v41, %v3381_v52  ;;  %v8898_v20 = vmul.u32.u64.low %v8854_v33, %v3378_v62  ;;  %v8899_v13 = vmul.u32.u64.high %v8854_v33, %v3378_v62, %v8898_v20 }
 0x36e   : > { %vm3222_vm8 = vcmp.lt.s32.totalorder %v8850_v61, 2  ;;  %v3303_v30 = vsub.s32 32, %v3302_v14  ;;  %v3307_v22 = vsub.s32 4294967266, %v3302_v14  ;;  %v3374_v48 = vsel %vm3368_vm3, %v3371_v0, %v3373_v28 }
 0x36f   : > { %v3451_v56 = vsel %vm3450_vm0, %v3449_v51, 0  ;;  %vm3219_vm11 = vweird.f32 %v10756_v11  ;;  %vm3226_vm12 = vcmp.eq.s32.totalorder %v8850_v61, 2  ;;  %v3304_v4 = vshll.u32 %v8867_v45, %v3302_v14 }
 0x370   : > { %v8907_v7 = vmul.u32.u64.low %v8854_v33, %v3382_v43  ;;  %v8908_v29 = vmul.u32.u64.high %v8854_v33, %v3382_v43, %v8907_v7  ;;  %v3453_v19 = vand.u32 31, %v3451_v56  ;;  %v3305_v47 = vshrl.u32 %v8862_v31, %v3303_v30  ;;  %v10768_v43 = vld [vmem:[#allocation14_spill] sm:$0xff] }
 0x371   : > { %v3308_v27 = vadd.s32 127, %v3307_v22  ;;  %v3447_v53 = vor.u32 8388608, %v8858_v44  ;;  %v3324_v36 = vadd.s32 3, %v3320_v12  ;;  %v3390_v49 = vmul.u32 %v8854_v33, %v3374_v48 }
 0x372   : > { %v3393_v51 = vadd.s32 1, %v8899_v13  ;;  %v3454_v26 = vsub.s32 32, %v3453_v19  ;;  %v3306_v2 = vor.u32 %v3305_v47, %v3304_v4  ;;  %v8915_v17 = vshrl.u32 %v3451_v56, 5 }
 0x373   : > { %v6102_v60 = vpop.eup %6101  ;;  %v3309_v34 = vshll.u32 %v3308_v27, 23  ;;  %v3456_v39 = vshll.u32 %v10691_v37, %v3453_v19  ;;  %vm3392_vm6 = vc.u32 %v8908_v29, %v8898_v20  ;;  %v3459_v44 = vshll.u32 %v10684_v15, %v3453_v19 }
 0x374   : > { %v6104_v9 = vpop.eup %6103  ;;  %v3227_v45 = vxor.u32 2147483648, %v6102_v60  ;;  %v3465_v31 = vshll.u32 %v10694_v25, %v3453_v19  ;;  %v3313_v21 = vcvt.s32.f32 %v3306_v2  ;;  %v3394_v55 = vsel %vm3392_vm6, %v3393_v51, %v8899_v13 }
 0x375   : > { %v3224_v33 = vxor.u32 2147483648, %v6104_v9  ;;  %v3310_v3 = vor.u32 4788187, %v3309_v34  ;;  %v3395_v16 = vadd.s32 %v3394_v55, %v3390_v49  ;;  %v3457_v18 = vshrl.u32 %v10684_v15, %v3454_v26 }
 0x376   : > { %v3228_v24 = vsel %vm3226_vm12, %v3227_v45, %v6104_v9  ;;  %v3460_v59 = vshrl.u32 %v10693_v23, %v3454_v26  ;;  %vm3337_vm15 = vcmp.lt.s32.totalorder %v10762_v57, 0  ;;  %v3463_v32 = vshrl.u32 %v10694_v25, %v3454_v26 }
 0x377   : > { %v3225_v10 = vsel %vm3223_vm7, %v6102_v60, %v3224_v33  ;;  %v3311_v1 = vand.u32 2147483647, %v3310_v3  ;;  %v3466_v42 = vshrl.u32 %v10695_v35, %v3454_v26  ;;  %v3396_v0 = vadd.s32 536870912, %v3395_v16 }
 0x378   : > { %v3229_v46 = vsel %vm3222_vm8, %v3225_v10, %v3228_v24  ;;  %v3458_v54 = vor.u32 %v3457_v18, %v3456_v39  ;;  %v3462_v41 = vshll.u32 %v10693_v23, %v3453_v19  ;;  %v3461_v63 = vor.u32 %v3460_v59, %v3459_v44 }
 0x379   : > { %v3230_v28 = vsel %vm3219_vm11, nan, %v3229_v46  ;;  %v3314_v40 = vmul.f32 %v3313_v21, %v3311_v1  ;;  %v3467_v12 = vor.u32 %v3466_v42, %v3465_v31  ;;  %v3397_v62 = vshrl.u32 %v3396_v0, 30 }
 0x37a   : > { %v3469_v52 = vshrl.u32 %v10696_v38, %v3454_v26  ;;  %v8938_v14 = vshll.u32 %v3447_v53, 8  ;;  %v3543_v13 = vand.u32 2147483647, %v10768_v43  ;;  %5441 = vst [vmem:[%s6771_s9 + $0xd0] sm:$0xff] %v3230_v28  ;;  %v8942_v30 = vand.u32 3, %v3324_v36 }
 0x37b   : > { %v3315_v61 = vxor.u32 2147483648, %v3314_v40  ;;  %v3464_v22 = vor.u32 %v3463_v32, %v3462_v41  ;;  %v3468_v48 = vshll.u32 %v10695_v35, %v3453_v19  ;;  %v3398_v56 = vshll.u32 %v3397_v62, 30 }
 0x37c   : > { %v3421_v11 = vsub.s32 4, %v3397_v62  ;;  %vm3471_vm13 = vcmp.lt.s32.totalorder %v8915_v17, 1  ;;  %vm3474_vm14 = vcmp.lt.s32.totalorder %v8915_v17, 4  ;;  %v3455_v36 = vshrl.u32 %v10691_v37, %v3454_v26 }
 0x37d   : > { %v3316_v7 = vsel %vm3233_vm1, %v3315_v61, %v3314_v40  ;;  %v3470_v4 = vor.u32 %v3469_v52, %v3468_v48  ;;  %v3479_v47 = vsel %vm3471_vm13, %v3458_v54, %v3461_v63  ;;  %v3480_v27 = vsel %vm3474_vm14, %v3467_v12, 920167782 }
 0x37e   : > { %v3319_v19 = vsel %vm8873_vm2, %v10759_v5, %v3316_v7  ;;  %v8956_v53 = vsub.s32 %v3395_v16, %v3398_v56  ;;  %vm3473_vm10 = vcmp.lt.s32.totalorder %v8915_v17, 3  ;;  %vm3472_vm1 = vcmp.lt.s32.totalorder %v8915_v17, 2 }
 0x37f   : > { %6105 = vcosq.f32 %v3319_v19  ;;  %v3476_v49 = vsel %vm3474_vm14, %v3464_v22, 2102212464  ;;  %v3481_v51 = vsel %vm3473_vm10, %v3464_v22, %v3480_v27  ;;  %v3422_v50 = vsel %vm3337_vm15, %v3421_v11, %v3397_v62 }
 0x380   : > { %6107 = vsinq.f32 %v3319_v19  ;;  %v3401_v60 = vsub.s32 0, %v8956_v53  ;;  %v3482_v2 = vsel %vm3472_vm1, %v3479_v47, %v3481_v51  ;;  %v3483_v26 = vsel %vm3471_vm13, %v3461_v63, %v3464_v22 }
 0x381   : > { %v3484_v34 = vsel %vm3474_vm14, %v3470_v4, 1326507024  ;;  %v8973_v39 = vmul.u32.u64.low %v8938_v14, %v3482_v2  ;;  %v8974_v9 = vmul.u32.u64.high %v8938_v14, %v3482_v2, %v8973_v39  ;;  %v3475_v44 = vsel %vm3471_vm13, %v3455_v36, %v3458_v54 }
 0x382   : > { %v5666_v45 = vmin.u32 %v3401_v60, %v8956_v53  ;;  %v3477_v31 = vsel %vm3473_vm10, %v3461_v63, %v3476_v49  ;;  %v3485_v33 = vsel %vm3473_vm10, %v3467_v12, %v3484_v34  ;;  %vm8982_vm2 = vcmp.le.f32.partialorder %v3335_v58, 0.7853982  ;;  %v10771_v63 = vld [vmem:[#allocation15_spill] sm:$0xff] }
 0x383   : > { %v3486_v21 = vsel %vm3472_vm1, %v3483_v26, %v3485_v33  ;;  %v3546_v55 = vand.u32 2139095040, %v10768_v43  ;;  %v3424_v16 = vsel %vm8982_vm2, 0, %v3422_v50  ;;  %v3478_v18 = vsel %vm3472_vm1, %v3475_v44, %v3477_v31 }
 0x384   : > { %v3403_v24 = vclz %v5666_v45  ;;  %v8994_v59 = vmul.u32.u64.low %v8938_v14, %v3486_v21  ;;  %v8995_v10 = vmul.u32.u64.high %v8938_v14, %v3486_v21, %v8994_v59  ;;  %vm3323_vm3 = vweird.f32 %v10759_v5 }
 0x385   : > { %v3547_v58 = vshrl.u32 %v3546_v55, 23  ;;  %vm3326_vm4 = vcmp.lt.s32.totalorder %v8942_v30, 2  ;;  %v3550_v32 = vand.u32 8388607, %v3543_v13  ;;  %vm3327_vm5 = vcmp.eq.s32.totalorder %v8942_v30, 0 }
 0x386   : > { %v5667_v1 = vadd.s32 4294967294, %v3403_v24  ;;  %vm3330_vm0 = vcmp.eq.s32.totalorder %v8942_v30, 2  ;;  %v3497_v17 = vadd.s32 1, %v8974_v9  ;;  %v3391_v46 = vadd.s32 %v8898_v20, %v8908_v29 }
 0x387   : > { %v5673_v42 = vadd.s32 4294967169, %v3547_v58  ;;  %v3428_v0 = vadd.s32 3, %v3424_v16  ;;  %v3494_v54 = vmul.u32 %v8938_v14, %v3478_v18  ;;  %vm3496_vm7 = vc.u32 %v8995_v10, %v8973_v39 }
 0x388   : > { %vm5668_vm9 = vcmp.lt.s32.totalorder %v5667_v1, 0  ;;  %v3650_v12 = vand.u32 2139095040, %v10771_v63  ;;  %v3551_v48 = vor.u32 8388608, %v3550_v32  ;;  %v3498_v29 = vsel %vm3496_vm7, %v3497_v17, %v8974_v9 }
 0x389   : > { %v6106_v41 = vpop.eup %6105  ;;  %v3406_v28 = vsel %vm5668_vm9, 0, %v5667_v1  ;;  %v3553_v40 = vadd.s32 1, %v5673_v42  ;;  %v3499_v4 = vadd.s32 %v3498_v29, %v3494_v54  ;;  %v3647_v19 = vand.u32 2147483647, %v10771_v63 }
 0x38a   : > { %v6108_v62 = vpop.eup %6107  ;;  %v3331_v52 = vxor.u32 2147483648, %v6106_v41  ;;  %v3407_v61 = vsub.s32 32, %v3406_v28  ;;  %v3411_v22 = vsub.s32 4294967266, %v3406_v28  ;;  %v3408_v20 = vshll.u32 %v8956_v53, %v3406_v28 }
 0x38b   : > { %v3328_v56 = vxor.u32 2147483648, %v6108_v62  ;;  %vm3554_vm8 = vcmp.gt.s32.totalorder %v3553_v40, 0  ;;  %v3651_v36 = vshrl.u32 %v3650_v12, 23  ;;  %v3500_v60 = vadd.s32 536870912, %v3499_v4 }
 0x38c   : > { %v3332_v14 = vsel %vm3330_vm0, %v3331_v52, %v6108_v62  ;;  %v3409_v11 = vshrl.u32 %v3391_v46, %v3407_v61  ;;  %v3412_v7 = vadd.s32 127, %v3411_v22  ;;  %v3555_v27 = vsel %vm3554_vm8, %v3553_v40, 0 }
 0x38d   : > { %v3329_v47 = vsel %vm3327_vm5, %v6106_v41, %v3328_v56  ;;  %v3557_v2 = vand.u32 31, %v3555_v27  ;;  %v9021_v34 = vand.u32 3, %v3428_v0  ;;  %vm3441_vm11 = vcmp.lt.s32.totalorder %v10765_v6, 0 }
 0x38e   : > { %v3333_v53 = vsel %vm3326_vm4, %v3329_v47, %v3332_v14  ;;  %v3410_v49 = vor.u32 %v3409_v11, %v3408_v20  ;;  %v3413_v51 = vshll.u32 %v3412_v7, 23  ;;  %v3501_v9 = vshrl.u32 %v3500_v60, 30 }
 0x38f   : > { %v3334_v50 = vsel %vm3323_vm3, nan, %v3333_v53  ;;  %v3558_v45 = vsub.s32 32, %v3557_v2  ;;  %v9025_v44 = vshll.u32 %v3551_v48, 8  ;;  %v5677_v31 = vadd.s32 4294967169, %v3651_v36 }
 0x390   : > { %v3414_v26 = vor.u32 4788187, %v3413_v51  ;;  %5442 = vst [vmem:[%s6771_s9 + $0xd8] sm:$0xff] %v3334_v50  ;;  %v9029_v30 = vand.u32 8388607, %v3647_v19  ;;  %v3417_v21 = vcvt.s32.f32 %v3410_v49  ;;  %v9033_v5 = vadd.s32 %v8973_v39, %v8995_v10 }
 0x391   : > { %v3502_v55 = vshll.u32 %v3501_v9, 30  ;;  %v3556_v24 = vshrl.u32 %v3555_v27, 5  ;;  %v3561_v16 = vshrl.u32 %v10684_v15, %v3558_v45  ;;  %v3564_v18 = vshrl.u32 %v10693_v23, %v3558_v45 }
 0x392   : > { %v3415_v33 = vand.u32 2147483647, %v3414_v26  ;;  %v3567_v59 = vshrl.u32 %v10694_v25, %v3558_v45  ;;  %v3560_v32 = vshll.u32 %v10691_v37, %v3557_v2  ;;  %v3570_v17 = vshrl.u32 %v10695_v35, %v3558_v45 }
 0x393   : > { %v9038_v1 = vsub.s32 %v3499_v4, %v3502_v55  ;;  %vm9044_vm12 = vcmp.le.f32.partialorder %v3439_v8, 0.7853982  ;;  %v3525_v10 = vsub.s32 4, %v3501_v9  ;;  %v3563_v42 = vshll.u32 %v10684_v15, %v3557_v2 }
 0x394   : > { %v3418_v58 = vmul.f32 %v3417_v21, %v3415_v33  ;;  %v3566_v46 = vshll.u32 %v10693_v23, %v3557_v2  ;;  %v3657_v0 = vadd.s32 1, %v5677_v31  ;;  %v3562_v28 = vor.u32 %v3561_v16, %v3560_v32 }
 0x395   : > { %v3505_v41 = vsub.s32 0, %v9038_v1  ;;  %v3569_v40 = vshll.u32 %v10694_v25, %v3557_v2  ;;  %v3565_v12 = vor.u32 %v3564_v18, %v3563_v42  ;;  %v3572_v52 = vshll.u32 %v10695_v35, %v3557_v2 }
 0x396   : > { %v3419_v54 = vxor.u32 2147483648, %v3418_v58  ;;  %v3568_v62 = vor.u32 %v3567_v59, %v3566_v46  ;;  %v3573_v8 = vshrl.u32 %v10696_v38, %v3558_v45  ;;  %v3559_v48 = vshrl.u32 %v10691_v37, %v3558_v45 }
 0x397   : > { %v5670_v22 = vmin.u32 %v3505_v41, %v9038_v1  ;;  %v3571_v56 = vor.u32 %v3570_v17, %v3569_v40  ;;  %v3526_v29 = vsel %vm3441_vm11, %v3525_v10, %v3501_v9  ;;  %vm3575_vm6 = vcmp.lt.s32.totalorder %v3556_v24, 1 }
 0x398   : > { %v3420_v61 = vsel %vm3337_vm15, %v3419_v54, %v3418_v58  ;;  %v3574_v14 = vor.u32 %v3573_v8, %v3572_v52  ;;  %vm3576_vm13 = vcmp.lt.s32.totalorder %v3556_v24, 2  ;;  %vm3578_vm14 = vcmp.lt.s32.totalorder %v3556_v24, 4 }
 0x399   : > { %v3423_v20 = vsel %vm8982_vm2, %v10762_v57, %v3420_v61  ;;  %v3507_v11 = vclz %v5670_v22  ;;  %vm3577_vm15 = vcmp.lt.s32.totalorder %v3556_v24, 3  ;;  %v3580_v7 = vsel %vm3578_vm14, %v3568_v62, 2102212464 }
 0x39a   : > { %6109 = vcosq.f32 %v3423_v20  ;;  %v3583_v4 = vsel %vm3575_vm6, %v3562_v28, %v3565_v12  ;;  %v3579_v27 = vsel %vm3575_vm6, %v3559_v48, %v3562_v28  ;;  %v3584_v36 = vsel %vm3578_vm14, %v3571_v56, 920167782 }
 0x39b   : > { %6111 = vsinq.f32 %v3423_v20  ;;  %v5671_v47 = vadd.s32 4294967294, %v3507_v11  ;;  %v3587_v53 = vsel %vm3575_vm6, %v3565_v12, %v3568_v62  ;;  %v3581_v49 = vsel %vm3577_vm15, %v3565_v12, %v3580_v7 }
 0x39c   : > { %v3585_v3 = vsel %vm3577_vm15, %v3568_v62, %v3584_v36  ;;  %v3588_v51 = vsel %vm3578_vm14, %v3574_v14, 1326507024  ;;  %vm3658_vm10 = vcmp.gt.s32.totalorder %v3657_v0, 0  ;;  %v3528_v60 = vsel %vm9044_vm12, 0, %v3526_v29 }
 0x39d   : > { %vm5672_vm1 = vcmp.lt.s32.totalorder %v5671_v47, 0  ;;  %v3586_v50 = vsel %vm3576_vm13, %v3583_v4, %v3585_v3  ;;  %v3589_v2 = vsel %vm3577_vm15, %v3571_v56, %v3588_v51  ;;  %vm3431_vm2 = vcmp.eq.s32.totalorder %v9021_v34, 0 }
 0x39e   : > { %v3510_v26 = vsel %vm5672_vm1, 0, %v5671_v47  ;;  %v3590_v9 = vsel %vm3576_vm13, %v3587_v53, %v3589_v2  ;;  %v9069_v45 = vmul.u32.u64.low %v9025_v44, %v3586_v50  ;;  %v9070_v31 = vmul.u32.u64.high %v9025_v44, %v3586_v50, %v9069_v45 }
 0x39f   : > { %vm3430_vm3 = vcmp.lt.s32.totalorder %v9021_v34, 2  ;;  %v3511_v33 = vsub.s32 32, %v3510_v26  ;;  %v3515_v21 = vsub.s32 4294967266, %v3510_v26  ;;  %v3582_v55 = vsel %vm3576_vm13, %v3579_v27, %v3581_v49 }
 0x3a0   : > { %v3659_v16 = vsel %vm3658_vm10, %v3657_v0, 0  ;;  %vm3427_vm4 = vweird.f32 %v10762_v57  ;;  %vm3434_vm5 = vcmp.eq.s32.totalorder %v9021_v34, 2  ;;  %v3512_v32 = vshll.u32 %v9038_v1, %v3510_v26 }
 0x3a1   : > { %v9078_v18 = vmul.u32.u64.low %v9025_v44, %v3590_v9  ;;  %v9079_v59 = vmul.u32.u64.high %v9025_v44, %v3590_v9, %v9078_v18  ;;  %v3661_v58 = vand.u32 31, %v3659_v16  ;;  %v3513_v17 = vshrl.u32 %v9033_v5, %v3511_v33  ;;  %v10774_v9 = vld [vmem:[#allocation16_spill] sm:$0xff] }
 0x3a2   : > { %v3516_v10 = vadd.s32 127, %v3515_v21  ;;  %v3655_v42 = vor.u32 8388608, %v9029_v30  ;;  %v3532_v46 = vadd.s32 3, %v3528_v60  ;;  %v3598_v24 = vmul.u32 %v9025_v44, %v3582_v55 }
 0x3a3   : > { %v3601_v0 = vadd.s32 1, %v9070_v31  ;;  %v3662_v54 = vsub.s32 32, %v3661_v58  ;;  %v3514_v28 = vor.u32 %v3513_v17, %v3512_v32  ;;  %v9086_v12 = vshrl.u32 %v3659_v16, 5 }
 0x3a4   : > { %v6110_v41 = vpop.eup %6109  ;;  %v3517_v40 = vshll.u32 %v3516_v10, 23  ;;  %v3664_v62 = vshll.u32 %v10691_v37, %v3661_v58  ;;  %vm3600_vm0 = vc.u32 %v9079_v59, %v9069_v45  ;;  %v3667_v30 = vshll.u32 %v10684_v15, %v3661_v58 }
 0x3a5   : > { %v6112_v52 = vpop.eup %6111  ;;  %v3435_v1 = vxor.u32 2147483648, %v6110_v41  ;;  %v3673_v5 = vshll.u32 %v10694_v25, %v3661_v58  ;;  %v3521_v61 = vcvt.s32.f32 %v3514_v28  ;;  %v3602_v22 = vsel %vm3600_vm0, %v3601_v0, %v9070_v31 }
 0x3a6   : > { %v3432_v44 = vxor.u32 2147483648, %v6112_v52  ;;  %v3518_v8 = vor.u32 4788187, %v3517_v40  ;;  %v3603_v56 = vadd.s32 %v3602_v22, %v3598_v24  ;;  %v3665_v20 = vshrl.u32 %v10684_v15, %v3662_v54 }
 0x3a7   : > { %v3436_v48 = vsel %vm3434_vm5, %v3435_v1, %v6112_v52  ;;  %v3668_v29 = vshrl.u32 %v10693_v23, %v3662_v54  ;;  %vm3545_vm9 = vcmp.lt.s32.totalorder %v10768_v43, 0  ;;  %v3671_v7 = vshrl.u32 %v10694_v25, %v3662_v54 }
 0x3a8   : > { %v3433_v14 = vsel %vm3431_vm2, %v6110_v41, %v3432_v44  ;;  %v3519_v11 = vand.u32 2147483647, %v3518_v8  ;;  %v3674_v4 = vshrl.u32 %v10695_v35, %v3662_v54  ;;  %v3604_v27 = vadd.s32 536870912, %v3603_v56 }
 0x3a9   : > { %v3437_v47 = vsel %vm3430_vm3, %v3433_v14, %v3436_v48  ;;  %v3666_v36 = vor.u32 %v3665_v20, %v3664_v62  ;;  %v3670_v53 = vshll.u32 %v10693_v23, %v3661_v58  ;;  %v3669_v51 = vor.u32 %v3668_v29, %v3667_v30 }
 0x3aa   : > { %v3438_v49 = vsel %vm3427_vm4, nan, %v3437_v47  ;;  %v3522_v3 = vmul.f32 %v3521_v61, %v3519_v11  ;;  %v3675_v60 = vor.u32 %v3674_v4, %v3673_v5  ;;  %v3605_v50 = vshrl.u32 %v3604_v27, 30 }
 0x3ab   : > { %v3677_v2 = vshrl.u32 %v10696_v38, %v3662_v54  ;;  %v9109_v26 = vshll.u32 %v3655_v42, 8  ;;  %v3751_v31 = vand.u32 2147483647, %v10774_v9  ;;  %5443 = vst [vmem:[%s6771_s9 + $0xe0] sm:$0xff] %v3438_v49  ;;  %v9113_v33 = vand.u32 3, %v3532_v46 }
 0x3ac   : > { %v3523_v34 = vxor.u32 2147483648, %v3522_v3  ;;  %v3672_v21 = vor.u32 %v3671_v7, %v3670_v53  ;;  %v3676_v55 = vshll.u32 %v10695_v35, %v3661_v58  ;;  %v3606_v16 = vshll.u32 %v3605_v50, 30 }
 0x3ad   : > { %v3629_v57 = vsub.s32 4, %v3605_v50  ;;  %vm3679_vm7 = vcmp.lt.s32.totalorder %v9086_v12, 1  ;;  %vm3682_vm8 = vcmp.lt.s32.totalorder %v9086_v12, 4  ;;  %v3663_v46 = vshrl.u32 %v10691_v37, %v3662_v54 }
 0x3ae   : > { %v3524_v18 = vsel %vm3441_vm11, %v3523_v34, %v3522_v3  ;;  %v3678_v32 = vor.u32 %v3677_v2, %v3676_v55  ;;  %v3687_v17 = vsel %vm3679_vm7, %v3666_v36, %v3669_v51  ;;  %v3688_v10 = vsel %vm3682_vm8, %v3675_v60, 920167782 }
 0x3af   : > { %v3527_v58 = vsel %vm9044_vm12, %v10765_v6, %v3524_v18  ;;  %v9127_v42 = vsub.s32 %v3603_v56, %v3606_v16  ;;  %vm3681_vm6 = vcmp.lt.s32.totalorder %v9086_v12, 3  ;;  %vm3680_vm11 = vcmp.lt.s32.totalorder %v9086_v12, 2 }
 0x3b0   : > { %6113 = vcosq.f32 %v3527_v58  ;;  %v3684_v24 = vsel %vm3682_vm8, %v3672_v21, 2102212464  ;;  %v3689_v0 = vsel %vm3681_vm6, %v3672_v21, %v3688_v10  ;;  %v3630_v39 = vsel %vm3545_vm9, %v3629_v57, %v3605_v50 }
 0x3b1   : > { %6115 = vsinq.f32 %v3527_v58  ;;  %v3609_v41 = vsub.s32 0, %v9127_v42  ;;  %v3690_v28 = vsel %vm3680_vm11, %v3687_v17, %v3689_v0  ;;  %v3691_v54 = vsel %vm3679_vm7, %v3669_v51, %v3672_v21 }
 0x3b2   : > { %v3692_v40 = vsel %vm3682_vm8, %v3678_v32, 1326507024  ;;  %v9144_v62 = vmul.u32.u64.low %v9109_v26, %v3690_v28  ;;  %v9145_v52 = vmul.u32.u64.high %v9109_v26, %v3690_v28, %v9144_v62  ;;  %v3683_v30 = vsel %vm3679_vm7, %v3663_v46, %v3666_v36 }
 0x3b3   : > { %v5674_v1 = vmin.u32 %v3609_v41, %v9127_v42  ;;  %v3685_v5 = vsel %vm3681_vm6, %v3669_v51, %v3684_v24  ;;  %v3693_v44 = vsel %vm3681_vm6, %v3675_v60, %v3692_v40  ;;  %vm9153_vm12 = vcmp.le.f32.partialorder %v3543_v13, 0.7853982  ;;  %v10777_v51 = vld [vmem:[#allocation17_spill] sm:$0xff] }
 0x3b4   : > { %v3694_v61 = vsel %vm3680_vm11, %v3691_v54, %v3693_v44  ;;  %v3754_v22 = vand.u32 2139095040, %v10774_v9  ;;  %v3632_v56 = vsel %vm9153_vm12, 0, %v3630_v39  ;;  %v3686_v20 = vsel %vm3680_vm11, %v3683_v30, %v3685_v5 }
 0x3b5   : > { %v3611_v48 = vclz %v5674_v1  ;;  %v9165_v29 = vmul.u32.u64.low %v9109_v26, %v3694_v61  ;;  %v9166_v14 = vmul.u32.u64.high %v9109_v26, %v3694_v61, %v9165_v29  ;;  %vm3531_vm13 = vweird.f32 %v10765_v6 }
 0x3b6   : > { %v3755_v13 = vshrl.u32 %v3754_v22, 23  ;;  %vm3534_vm14 = vcmp.lt.s32.totalorder %v9113_v33, 2  ;;  %v3758_v7 = vand.u32 8388607, %v3751_v31  ;;  %vm3535_vm15 = vcmp.eq.s32.totalorder %v9113_v33, 0 }
 0x3b7   : > { %v5675_v11 = vadd.s32 4294967294, %v3611_v48  ;;  %vm3538_vm10 = vcmp.eq.s32.totalorder %v9113_v33, 2  ;;  %v3705_v12 = vadd.s32 1, %v9145_v52  ;;  %v3599_v47 = vadd.s32 %v9069_v45, %v9079_v59 }
 0x3b8   : > { %v5681_v4 = vadd.s32 4294967169, %v3755_v13  ;;  %v3636_v27 = vadd.s32 3, %v3632_v56  ;;  %v3702_v36 = vmul.u32 %v9109_v26, %v3686_v20  ;;  %vm3704_vm2 = vc.u32 %v9166_v14, %v9144_v62 }
 0x3b9   : > { %vm5676_vm1 = vcmp.lt.s32.totalorder %v5675_v11, 0  ;;  %v3858_v60 = vand.u32 2139095040, %v10777_v51  ;;  %v3759_v55 = vor.u32 8388608, %v3758_v7  ;;  %v3706_v59 = vsel %vm3704_vm2, %v3705_v12, %v9145_v52 }
 0x3ba   : > { %v6114_v53 = vpop.eup %6113  ;;  %v3614_v49 = vsel %vm5676_vm1, 0, %v5675_v11  ;;  %v3761_v3 = vadd.s32 1, %v5681_v4  ;;  %v3707_v32 = vadd.s32 %v3706_v59, %v3702_v36  ;;  %v3855_v58 = vand.u32 2147483647, %v10777_v51 }
 0x3bb   : > { %v6116_v50 = vpop.eup %6115  ;;  %v3539_v2 = vxor.u32 2147483648, %v6114_v53  ;;  %v3615_v34 = vsub.s32 32, %v3614_v49  ;;  %v3619_v21 = vsub.s32 4294967266, %v3614_v49  ;;  %v3616_v45 = vshll.u32 %v9127_v42, %v3614_v49 }
 0x3bc   : > { %v3536_v16 = vxor.u32 2147483648, %v6116_v50  ;;  %vm3762_vm3 = vcmp.gt.s32.totalorder %v3761_v3, 0  ;;  %v3859_v46 = vshrl.u32 %v3858_v60, 23  ;;  %v3708_v41 = vadd.s32 536870912, %v3707_v32 }
 0x3bd   : > { %v3540_v26 = vsel %vm3538_vm10, %v3539_v2, %v6116_v50  ;;  %v3617_v57 = vshrl.u32 %v3599_v47, %v3615_v34  ;;  %v3620_v18 = vadd.s32 127, %v3619_v21  ;;  %v3763_v10 = vsel %vm3762_vm3, %v3761_v3, 0 }
 0x3be   : > { %v3537_v17 = vsel %vm3535_vm15, %v6114_v53, %v3536_v16  ;;  %v3765_v28 = vand.u32 31, %v3763_v10  ;;  %v9192_v40 = vand.u32 3, %v3636_v27  ;;  %vm3649_vm4 = vcmp.lt.s32.totalorder %v10771_v63, 0 }
 0x3bf   : > { %v3541_v42 = vsel %vm3534_vm14, %v3537_v17, %v3540_v26  ;;  %v3618_v24 = vor.u32 %v3617_v57, %v3616_v45  ;;  %v3621_v0 = vshll.u32 %v3620_v18, 23  ;;  %v3709_v52 = vshrl.u32 %v3708_v41, 30 }
 0x3c0   : > { %v3542_v39 = vsel %vm3531_vm13, nan, %v3541_v42  ;;  %v3766_v1 = vsub.s32 32, %v3765_v28  ;;  %v9196_v30 = vshll.u32 %v3759_v55, 8  ;;  %v5685_v5 = vadd.s32 4294967169, %v3859_v46 }
 0x3c1   : > { %v3622_v54 = vor.u32 4788187, %v3621_v0  ;;  %5444 = vst [vmem:[%s6771_s9 + $0xe8] sm:$0xff] %v3542_v39  ;;  %v9200_v33 = vand.u32 8388607, %v3855_v58  ;;  %v3625_v61 = vcvt.s32.f32 %v3618_v24  ;;  %v9204_v6 = vadd.s32 %v9144_v62, %v9166_v14 }
 0x3c2   : > { %v3710_v22 = vshll.u32 %v3709_v52, 30  ;;  %v3764_v48 = vshrl.u32 %v3763_v10, 5  ;;  %v3769_v56 = vshrl.u32 %v10684_v15, %v3766_v1  ;;  %v3772_v20 = vshrl.u32 %v10693_v23, %v3766_v1 }
 0x3c3   : > { %v3623_v44 = vand.u32 2147483647, %v3622_v54  ;;  %v3775_v29 = vshrl.u32 %v10694_v25, %v3766_v1  ;;  %v3768_v7 = vshll.u32 %v10691_v37, %v3765_v28  ;;  %v3778_v12 = vshrl.u32 %v10695_v35, %v3766_v1 }
 0x3c4   : > { %v9209_v11 = vsub.s32 %v3707_v32, %v3710_v22  ;;  %vm9215_vm5 = vcmp.le.f32.partialorder %v3647_v19, 0.7853982  ;;  %v3733_v14 = vsub.s32 4, %v3709_v52  ;;  %v3771_v4 = vshll.u32 %v10684_v15, %v3765_v28 }
 0x3c5   : > { %v3626_v13 = vmul.f32 %v3625_v61, %v3623_v44  ;;  %v3774_v47 = vshll.u32 %v10693_v23, %v3765_v28  ;;  %v3865_v27 = vadd.s32 1, %v5685_v5  ;;  %v3770_v49 = vor.u32 %v3769_v56, %v3768_v7 }
 0x3c6   : > { %v3713_v53 = vsub.s32 0, %v9209_v11  ;;  %v3777_v3 = vshll.u32 %v10694_v25, %v3765_v28  ;;  %v3773_v60 = vor.u32 %v3772_v20, %v3771_v4  ;;  %v3780_v2 = vshll.u32 %v10695_v35, %v3765_v28 }
 0x3c7   : > { %v3627_v36 = vxor.u32 2147483648, %v3626_v13  ;;  %v3776_v50 = vor.u32 %v3775_v29, %v3774_v47  ;;  %v3781_v19 = vshrl.u32 %v10696_v38, %v3766_v1  ;;  %v3767_v55 = vshrl.u32 %v10691_v37, %v3766_v1 }
 0x3c8   : > { %v5678_v21 = vmin.u32 %v3713_v53, %v9209_v11  ;;  %v3779_v16 = vor.u32 %v3778_v12, %v3777_v3  ;;  %v3734_v59 = vsel %vm3649_vm4, %v3733_v14, %v3709_v52  ;;  %vm3783_vm0 = vcmp.lt.s32.totalorder %v3764_v48, 1 }
 0x3c9   : > { %v3628_v34 = vsel %vm3545_vm9, %v3627_v36, %v3626_v13  ;;  %v3782_v26 = vor.u32 %v3781_v19, %v3780_v2  ;;  %vm3784_vm7 = vcmp.lt.s32.totalorder %v3764_v48, 2  ;;  %vm3786_vm8 = vcmp.lt.s32.totalorder %v3764_v48, 4 }
 0x3ca   : > { %v3631_v45 = vsel %vm9153_vm12, %v10768_v43, %v3628_v34  ;;  %v3715_v57 = vclz %v5678_v21  ;;  %vm3785_vm9 = vcmp.lt.s32.totalorder %v3764_v48, 3  ;;  %v3788_v18 = vsel %vm3786_vm8, %v3776_v50, 2102212464 }
 0x3cb   : > { %6117 = vcosq.f32 %v3631_v45  ;;  %v3791_v32 = vsel %vm3783_vm0, %v3770_v49, %v3773_v60  ;;  %v3787_v10 = vsel %vm3783_vm0, %v3767_v55, %v3770_v49  ;;  %v3792_v46 = vsel %vm3786_vm8, %v3779_v16, 920167782 }
 0x3cc   : > { %6119 = vsinq.f32 %v3631_v45  ;;  %v5679_v17 = vadd.s32 4294967294, %v3715_v57  ;;  %v3795_v42 = vsel %vm3783_vm0, %v3773_v60, %v3776_v50  ;;  %v3789_v24 = vsel %vm3785_vm9, %v3773_v60, %v3788_v18 }
 0x3cd   : > { %v3793_v8 = vsel %vm3785_vm9, %v3776_v50, %v3792_v46  ;;  %v3796_v0 = vsel %vm3786_vm8, %v3782_v26, 1326507024  ;;  %vm3866_vm6 = vcmp.gt.s32.totalorder %v3865_v27, 0  ;;  %v3736_v41 = vsel %vm9215_vm5, 0, %v3734_v59 }
 0x3ce   : > { %vm5680_vm11 = vcmp.lt.s32.totalorder %v5679_v17, 0  ;;  %v3794_v39 = vsel %vm3784_vm7, %v3791_v32, %v3793_v8  ;;  %v3797_v28 = vsel %vm3785_vm9, %v3779_v16, %v3796_v0  ;;  %vm3639_vm12 = vcmp.eq.s32.totalorder %v9192_v40, 0 }
 0x3cf   : > { %v3718_v54 = vsel %vm5680_vm11, 0, %v5679_v17  ;;  %v3798_v52 = vsel %vm3784_vm7, %v3795_v42, %v3797_v28  ;;  %v9240_v1 = vmul.u32.u64.low %v9196_v30, %v3794_v39  ;;  %v9241_v5 = vmul.u32.u64.high %v9196_v30, %v3794_v39, %v9240_v1 }
 0x3d0   : > { %vm3638_vm13 = vcmp.lt.s32.totalorder %v9192_v40, 2  ;;  %v3719_v44 = vsub.s32 32, %v3718_v54  ;;  %v3723_v61 = vsub.s32 4294967266, %v3718_v54  ;;  %v3790_v22 = vsel %vm3784_vm7, %v3787_v10, %v3789_v24 }
 0x3d1   : > { %v3867_v56 = vsel %vm3866_vm6, %v3865_v27, 0  ;;  %vm3635_vm14 = vweird.f32 %v10768_v43  ;;  %vm3642_vm15 = vcmp.eq.s32.totalorder %v9192_v40, 2  ;;  %v3720_v7 = vshll.u32 %v9209_v11, %v3718_v54 }
 0x3d2   : > { %v9249_v20 = vmul.u32.u64.low %v9196_v30, %v3798_v52  ;;  %v9250_v29 = vmul.u32.u64.high %v9196_v30, %v3798_v52, %v9249_v20  ;;  %v3869_v13 = vand.u32 31, %v3867_v56  ;;  %v3721_v12 = vshrl.u32 %v9204_v6, %v3719_v44  ;;  %v10780_v52 = vld [vmem:[#allocation18_spill] sm:$0xff] }
 0x3d3   : > { %v3724_v14 = vadd.s32 127, %v3723_v61  ;;  %v3863_v4 = vor.u32 8388608, %v9200_v33  ;;  %v3740_v47 = vadd.s32 3, %v3736_v41  ;;  %v3806_v48 = vmul.u32 %v9196_v30, %v3790_v22 }
 0x3d4   : > { %v3809_v27 = vadd.s32 1, %v9241_v5  ;;  %v3870_v36 = vsub.s32 32, %v3869_v13  ;;  %v3722_v49 = vor.u32 %v3721_v12, %v3720_v7  ;;  %v9257_v60 = vshrl.u32 %v3867_v56, 5 }
 0x3d5   : > { %v6118_v53 = vpop.eup %6117  ;;  %v3725_v3 = vshll.u32 %v3724_v14, 23  ;;  %v3872_v50 = vshll.u32 %v10691_v37, %v3869_v13  ;;  %vm3808_vm10 = vc.u32 %v9250_v29, %v9240_v1  ;;  %v3875_v33 = vshll.u32 %v10684_v15, %v3869_v13 }
 0x3d6   : > { %v6120_v2 = vpop.eup %6119  ;;  %v3643_v11 = vxor.u32 2147483648, %v6118_v53  ;;  %v3881_v6 = vshll.u32 %v10694_v25, %v3869_v13  ;;  %v3729_v34 = vcvt.s32.f32 %v3722_v49  ;;  %v3810_v21 = vsel %vm3808_vm10, %v3809_v27, %v9241_v5 }
 0x3d7   : > { %v3640_v30 = vxor.u32 2147483648, %v6120_v2  ;;  %v3726_v19 = vor.u32 4788187, %v3725_v3  ;;  %v3811_v16 = vadd.s32 %v3810_v21, %v3806_v48  ;;  %v3873_v45 = vshrl.u32 %v10684_v15, %v3870_v36 }
 0x3d8   : > { %v3644_v55 = vsel %vm3642_vm15, %v3643_v11, %v6120_v2  ;;  %v3876_v59 = vshrl.u32 %v10693_v23, %v3870_v36  ;;  %vm3753_vm1 = vcmp.lt.s32.totalorder %v10774_v9, 0  ;;  %v3879_v18 = vshrl.u32 %v10694_v25, %v3870_v36 }
 0x3d9   : > { %v3641_v26 = vsel %vm3639_vm12, %v6118_v53, %v3640_v30  ;;  %v3727_v57 = vand.u32 2147483647, %v3726_v19  ;;  %v3882_v32 = vshrl.u32 %v10695_v35, %v3870_v36  ;;  %v3812_v10 = vadd.s32 536870912, %v3811_v16 }
 0x3da   : > { %v3645_v17 = vsel %vm3638_vm13, %v3641_v26, %v3644_v55  ;;  %v3874_v46 = vor.u32 %v3873_v45, %v3872_v50  ;;  %v3878_v42 = vshll.u32 %v10693_v23, %v3869_v13  ;;  %v3877_v0 = vor.u32 %v3876_v59, %v3875_v33 }
 0x3db   : > { %v3646_v24 = vsel %vm3635_vm14, nan, %v3645_v17  ;;  %v3730_v8 = vmul.f32 %v3729_v34, %v3727_v57  ;;  %v3883_v41 = vor.u32 %v3882_v32, %v3881_v6  ;;  %v3813_v39 = vshrl.u32 %v3812_v10, 30 }
 0x3dc   : > { %v3885_v28 = vshrl.u32 %v10696_v38, %v3870_v36  ;;  %v9280_v54 = vshll.u32 %v3863_v4, 8  ;;  %v3959_v5 = vand.u32 2147483647, %v10780_v52  ;;  %5445 = vst [vmem:[%s6771_s9 + $0xf0] sm:$0xff] %v3646_v24  ;;  %v9284_v44 = vand.u32 3, %v3740_v47 }
 0x3dd   : > { %v3731_v40 = vxor.u32 2147483648, %v3730_v8  ;;  %v3880_v61 = vor.u32 %v3879_v18, %v3878_v42  ;;  %v3884_v22 = vshll.u32 %v10695_v35, %v3869_v13  ;;  %v3814_v56 = vshll.u32 %v3813_v39, 30 }
 0x3de   : > { %v3837_v43 = vsub.s32 4, %v3813_v39  ;;  %vm3887_vm2 = vcmp.lt.s32.totalorder %v9257_v60, 1  ;;  %vm3890_vm3 = vcmp.lt.s32.totalorder %v9257_v60, 4  ;;  %v3871_v47 = vshrl.u32 %v10691_v37, %v3870_v36 }
 0x3df   : > { %v3732_v20 = vsel %vm3649_vm4, %v3731_v40, %v3730_v8  ;;  %v3886_v7 = vor.u32 %v3885_v28, %v3884_v22  ;;  %v3895_v12 = vsel %vm3887_vm2, %v3874_v46, %v3877_v0  ;;  %v3896_v14 = vsel %vm3890_vm3, %v3883_v41, 920167782 }
 0x3e0   : > { %v3735_v13 = vsel %vm9215_vm5, %v10771_v63, %v3732_v20  ;;  %v9298_v4 = vsub.s32 %v3811_v16, %v3814_v56  ;;  %vm3889_vm0 = vcmp.lt.s32.totalorder %v9257_v60, 3  ;;  %vm3888_vm4 = vcmp.lt.s32.totalorder %v9257_v60, 2 }
 0x3e1   : > { %6121 = vcosq.f32 %v3735_v13  ;;  %v3892_v48 = vsel %vm3890_vm3, %v3880_v61, 2102212464  ;;  %v3897_v27 = vsel %vm3889_vm0, %v3880_v61, %v3896_v14  ;;  %v3838_v62 = vsel %vm3753_vm1, %v3837_v43, %v3813_v39 }
 0x3e2   : > { %6123 = vsinq.f32 %v3735_v13  ;;  %v3817_v53 = vsub.s32 0, %v9298_v4  ;;  %v3898_v49 = vsel %vm3888_vm4, %v3895_v12, %v3897_v27  ;;  %v3899_v36 = vsel %vm3887_vm2, %v3877_v0, %v3880_v61 }
 0x3e3   : > { %v3900_v3 = vsel %vm3890_vm3, %v3886_v7, 1326507024  ;;  %v9315_v50 = vmul.u32.u64.low %v9280_v54, %v3898_v49  ;;  %v9316_v2 = vmul.u32.u64.high %v9280_v54, %v3898_v49, %v9315_v50  ;;  %v3891_v33 = vsel %vm3887_vm2, %v3871_v47, %v3874_v46 }
 0x3e4   : > { %v5682_v11 = vmin.u32 %v3817_v53, %v9298_v4  ;;  %v3893_v6 = vsel %vm3889_vm0, %v3877_v0, %v3892_v48  ;;  %v3901_v30 = vsel %vm3889_vm0, %v3883_v41, %v3900_v3  ;;  %vm9324_vm5 = vcmp.le.f32.partialorder %v3751_v31, 0.7853982  ;;  %v10783_v0 = vld [vmem:[#allocation19_spill] sm:$0xff] }
 0x3e5   : > { %v3902_v34 = vsel %vm3888_vm4, %v3899_v36, %v3901_v30  ;;  %v3962_v21 = vand.u32 2139095040, %v10780_v52  ;;  %v3840_v16 = vsel %vm9324_vm5, 0, %v3838_v62  ;;  %v3894_v45 = vsel %vm3888_vm4, %v3891_v33, %v3893_v6 }
 0x3e6   : > { %v3819_v55 = vclz %v5682_v11  ;;  %v9336_v59 = vmul.u32.u64.low %v9280_v54, %v3902_v34  ;;  %v9337_v26 = vmul.u32.u64.high %v9280_v54, %v3902_v34, %v9336_v59  ;;  %vm3739_vm7 = vweird.f32 %v10771_v63 }
 0x3e7   : > { %v3963_v31 = vshrl.u32 %v3962_v21, 23  ;;  %vm3742_vm8 = vcmp.lt.s32.totalorder %v9284_v44, 2  ;;  %v3966_v18 = vand.u32 8388607, %v3959_v5  ;;  %vm3743_vm9 = vcmp.eq.s32.totalorder %v9284_v44, 0 }
 0x3e8   : > { %v5683_v57 = vadd.s32 4294967294, %v3819_v55  ;;  %vm3746_vm6 = vcmp.eq.s32.totalorder %v9284_v44, 2  ;;  %v3913_v60 = vadd.s32 1, %v9316_v2  ;;  %v3807_v17 = vadd.s32 %v9240_v1, %v9250_v29 }
 0x3e9   : > { %v5689_v32 = vadd.s32 4294967169, %v3963_v31  ;;  %v3844_v10 = vadd.s32 3, %v3840_v16  ;;  %v3910_v46 = vmul.u32 %v9280_v54, %v3894_v45  ;;  %vm3912_vm12 = vc.u32 %v9337_v26, %v9315_v50 }
 0x3ea   : > { %vm5684_vm11 = vcmp.lt.s32.totalorder %v5683_v57, 0  ;;  %v4066_v41 = vand.u32 2139095040, %v10783_v0  ;;  %v3967_v22 = vor.u32 8388608, %v3966_v18  ;;  %v3914_v29 = vsel %vm3912_vm12, %v3913_v60, %v9316_v2 }
 0x3eb   : > { %v6122_v42 = vpop.eup %6121  ;;  %v3822_v24 = vsel %vm5684_vm11, 0, %v5683_v57  ;;  %v3969_v8 = vadd.s32 1, %v5689_v32  ;;  %v3915_v7 = vadd.s32 %v3914_v29, %v3910_v46  ;;  %v4063_v13 = vand.u32 2147483647, %v10783_v0 }
 0x3ec   : > { %v6124_v39 = vpop.eup %6123  ;;  %v3747_v28 = vxor.u32 2147483648, %v6122_v42  ;;  %v3823_v40 = vsub.s32 32, %v3822_v24  ;;  %v3827_v61 = vsub.s32 4294967266, %v3822_v24  ;;  %v3824_v1 = vshll.u32 %v9298_v4, %v3822_v24 }
 0x3ed   : > { %v3744_v56 = vxor.u32 2147483648, %v6124_v39  ;;  %vm3970_vm13 = vcmp.gt.s32.totalorder %v3969_v8, 0  ;;  %v4067_v47 = vshrl.u32 %v4066_v41, 23  ;;  %v3916_v53 = vadd.s32 536870912, %v3915_v7 }
 0x3ee   : > { %v3748_v54 = vsel %vm3746_vm6, %v3747_v28, %v6124_v39  ;;  %v3825_v43 = vshrl.u32 %v3807_v17, %v3823_v40  ;;  %v3828_v20 = vadd.s32 127, %v3827_v61  ;;  %v3971_v14 = vsel %vm3970_vm13, %v3969_v8, 0 }
 0x3ef   : > { %v3745_v12 = vsel %vm3743_vm9, %v6122_v42, %v3744_v56  ;;  %v3973_v49 = vand.u32 31, %v3971_v14  ;;  %v9363_v3 = vand.u32 3, %v3844_v10  ;;  %vm3857_vm14 = vcmp.lt.s32.totalorder %v10777_v51, 0 }
 0x3f0   : > { %v3749_v4 = vsel %vm3742_vm8, %v3745_v12, %v3748_v54  ;;  %v3826_v48 = vor.u32 %v3825_v43, %v3824_v1  ;;  %v3829_v27 = vshll.u32 %v3828_v20, 23  ;;  %v3917_v2 = vshrl.u32 %v3916_v53, 30 }
 0x3f1   : > { %v3750_v62 = vsel %vm3739_vm7, nan, %v3749_v4  ;;  %v3974_v11 = vsub.s32 32, %v3973_v49  ;;  %v9367_v33 = vshll.u32 %v3967_v22, 8  ;;  %v5693_v6 = vadd.s32 4294967169, %v4067_v47 }
 0x3f2   : > { %v3830_v36 = vor.u32 4788187, %v3829_v27  ;;  %5446 = vst [vmem:[%s6771_s9 + $0xf8] sm:$0xff] %v3750_v62  ;;  %v9371_v44 = vand.u32 8388607, %v4063_v13  ;;  %v3833_v34 = vcvt.s32.f32 %v3826_v48  ;;  %v9375_v63 = vadd.s32 %v9315_v50, %v9337_v26 }
 0x3f3   : > { %v3918_v21 = vshll.u32 %v3917_v2, 30  ;;  %v3972_v55 = vshrl.u32 %v3971_v14, 5  ;;  %v3977_v16 = vshrl.u32 %v10684_v15, %v3974_v11  ;;  %v3980_v45 = vshrl.u32 %v10693_v23, %v3974_v11 }
 0x3f4   : > { %v3831_v30 = vand.u32 2147483647, %v3830_v36  ;;  %v3983_v59 = vshrl.u32 %v10694_v25, %v3974_v11  ;;  %v3976_v18 = vshll.u32 %v10691_v37, %v3973_v49  ;;  %v3986_v60 = vshrl.u32 %v10695_v35, %v3974_v11 }
 0x3f5   : > { %v9380_v57 = vsub.s32 %v3915_v7, %v3918_v21  ;;  %vm9386_vm15 = vcmp.le.f32.partialorder %v3855_v58, 0.7853982  ;;  %v3941_v26 = vsub.s32 4, %v3917_v2  ;;  %v3979_v32 = vshll.u32 %v10684_v15, %v3973_v49 }
 0x3f6   : > { %v3834_v31 = vmul.f32 %v3833_v34, %v3831_v30  ;;  %v3982_v17 = vshll.u32 %v10693_v23, %v3973_v49  ;;  %v4073_v10 = vadd.s32 1, %v5693_v6  ;;  %v3978_v24 = vor.u32 %v3977_v16, %v3976_v18 }
 0x3f7   : > { %v3921_v42 = vsub.s32 0, %v9380_v57  ;;  %v3985_v8 = vshll.u32 %v10694_v25, %v3973_v49  ;;  %v3981_v41 = vor.u32 %v3980_v45, %v3979_v32  ;;  %v3988_v28 = vshll.u32 %v10695_v35, %v3973_v49 }
 0x3f8   : > { %v3835_v46 = vxor.u32 2147483648, %v3834_v31  ;;  %v3984_v39 = vor.u32 %v3983_v59, %v3982_v17  ;;  %v3989_v58 = vshrl.u32 %v10696_v38, %v3974_v11  ;;  %v3975_v22 = vshrl.u32 %v10691_v37, %v3974_v11 }
 0x3f9   : > { %v5686_v61 = vmin.u32 %v3921_v42, %v9380_v57  ;;  %v3987_v56 = vor.u32 %v3986_v60, %v3985_v8  ;;  %v3942_v29 = vsel %vm3857_vm14, %v3941_v26, %v3917_v2  ;;  %vm3991_vm10 = vcmp.lt.s32.totalorder %v3972_v55, 1 }
 0x3fa   : > { %v3836_v40 = vsel %vm3753_vm1, %v3835_v46, %v3834_v31  ;;  %v3990_v54 = vor.u32 %v3989_v58, %v3988_v28  ;;  %vm3992_vm2 = vcmp.lt.s32.totalorder %v3972_v55, 2  ;;  %vm3994_vm3 = vcmp.lt.s32.totalorder %v3972_v55, 4 }
 0x3fb   : > { %v3839_v1 = vsel %vm9324_vm5, %v10774_v9, %v3836_v40  ;;  %v3923_v43 = vclz %v5686_v61  ;;  %vm3993_vm1 = vcmp.lt.s32.totalorder %v3972_v55, 3  ;;  %v3996_v20 = vsel %vm3994_vm3, %v3984_v39, 2102212464 }
 0x3fc   : > { %6125 = vcosq.f32 %v3839_v1  ;;  %v3999_v7 = vsel %vm3991_vm10, %v3978_v24, %v3981_v41  ;;  %v3995_v14 = vsel %vm3991_vm10, %v3975_v22, %v3978_v24  ;;  %v4000_v47 = vsel %vm3994_vm3, %v3987_v56, 920167782 }
 0x3fd   : > { %6127 = vsinq.f32 %v3839_v1  ;;  %v5687_v12 = vadd.s32 4294967294, %v3923_v43  ;;  %v4003_v4 = vsel %vm3991_vm10, %v3981_v41, %v3984_v39  ;;  %v3997_v48 = vsel %vm3993_vm1, %v3981_v41, %v3996_v20 }
 0x3fe   : > { %v4001_v19 = vsel %vm3993_vm1, %v3984_v39, %v4000_v47  ;;  %v4004_v27 = vsel %vm3994_vm3, %v3990_v54, 1326507024  ;;  %vm4074_vm0 = vcmp.gt.s32.totalorder %v4073_v10, 0  ;;  %v3944_v53 = vsel %vm9386_vm15, 0, %v3942_v29 }
 0x3ff   : > { %vm5688_vm4 = vcmp.lt.s32.totalorder %v5687_v12, 0  ;;  %v4002_v62 = vsel %vm3992_vm2, %v3999_v7, %v4001_v19  ;;  %v4005_v49 = vsel %vm3993_vm1, %v3987_v56, %v4004_v27  ;;  %vm3847_vm5 = vcmp.eq.s32.totalorder %v9363_v3, 0 }
 0x400   : > { %v3926_v36 = vsel %vm5688_vm4, 0, %v5687_v12  ;;  %v4006_v2 = vsel %vm3992_vm2, %v4003_v4, %v4005_v49  ;;  %v9411_v11 = vmul.u32.u64.low %v9367_v33, %v4002_v62  ;;  %v9412_v6 = vmul.u32.u64.high %v9367_v33, %v4002_v62, %v9411_v11 }
 0x401   : > { %vm3846_vm7 = vcmp.lt.s32.totalorder %v9363_v3, 2  ;;  %v3927_v30 = vsub.s32 32, %v3926_v36  ;;  %v3931_v34 = vsub.s32 4294967266, %v3926_v36  ;;  %v3998_v21 = vsel %vm3992_vm2, %v3995_v14, %v3997_v48 }
 0x402   : > { %v4075_v16 = vsel %vm4074_vm0, %v4073_v10, 0  ;;  %vm3843_vm8 = vweird.f32 %v10774_v9  ;;  %vm3850_vm9 = vcmp.eq.s32.totalorder %v9363_v3, 2  ;;  %v3928_v18 = vshll.u32 %v9380_v57, %v3926_v36 }
 0x403   : > { %v9420_v45 = vmul.u32.u64.low %v9367_v33, %v4006_v2  ;;  %v9421_v59 = vmul.u32.u64.high %v9367_v33, %v4006_v2, %v9420_v45  ;;  %v4077_v31 = vand.u32 31, %v4075_v16  ;;  %v3929_v60 = vshrl.u32 %v9375_v63, %v3927_v30  ;;  %v10786_v2 = vld [vmem:[#allocation20_spill] sm:$0xff] }
 0x404   : > { %v3932_v26 = vadd.s32 127, %v3931_v34  ;;  %v4071_v32 = vor.u32 8388608, %v9371_v44  ;;  %v3948_v17 = vadd.s32 3, %v3944_v53  ;;  %v4014_v55 = vmul.u32 %v9367_v33, %v3998_v21 }
 0x405   : > { %v4017_v10 = vadd.s32 1, %v9412_v6  ;;  %v4078_v46 = vsub.s32 32, %v4077_v31  ;;  %v3930_v24 = vor.u32 %v3929_v60, %v3928_v18  ;;  %v9428_v41 = vshrl.u32 %v4075_v16, 5 }
 0x406   : > { %v6126_v42 = vpop.eup %6125  ;;  %v3933_v8 = vshll.u32 %v3932_v26, 23  ;;  %v4080_v39 = vshll.u32 %v10691_v37, %v4077_v31  ;;  %vm4016_vm6 = vc.u32 %v9421_v59, %v9411_v11  ;;  %v4083_v44 = vshll.u32 %v10684_v15, %v4077_v31 }
 0x407   : > { %v6128_v28 = vpop.eup %6127  ;;  %v3851_v57 = vxor.u32 2147483648, %v6126_v42  ;;  %v4089_v63 = vshll.u32 %v10694_v25, %v4077_v31  ;;  %v3937_v40 = vcvt.s32.f32 %v3930_v24  ;;  %v4018_v61 = vsel %vm4016_vm6, %v4017_v10, %v9412_v6 }
 0x408   : > { %v3848_v33 = vxor.u32 2147483648, %v6128_v28  ;;  %v3934_v58 = vor.u32 4788187, %v3933_v8  ;;  %v4019_v56 = vadd.s32 %v4018_v61, %v4014_v55  ;;  %v4081_v1 = vshrl.u32 %v10684_v15, %v4078_v46 }
 0x409   : > { %v3852_v22 = vsel %vm3850_vm9, %v3851_v57, %v6128_v28  ;;  %v4084_v29 = vshrl.u32 %v10693_v23, %v4078_v46  ;;  %vm3961_vm11 = vcmp.lt.s32.totalorder %v10780_v52, 0  ;;  %v4087_v20 = vshrl.u32 %v10694_v25, %v4078_v46 }
 0x40a   : > { %v3849_v54 = vsel %vm3847_vm5, %v6126_v42, %v3848_v33  ;;  %v3935_v43 = vand.u32 2147483647, %v3934_v58  ;;  %v4090_v7 = vshrl.u32 %v10695_v35, %v4078_v46  ;;  %v4020_v14 = vadd.s32 536870912, %v4019_v56 }
 0x40b   : > { %v3853_v12 = vsel %vm3846_vm7, %v3849_v54, %v3852_v22  ;;  %v4082_v47 = vor.u32 %v4081_v1, %v4080_v39  ;;  %v4086_v4 = vshll.u32 %v10693_v23, %v4077_v31  ;;  %v4085_v27 = vor.u32 %v4084_v29, %v4083_v44 }
 0x40c   : > { %v3854_v48 = vsel %vm3843_vm8, nan, %v3853_v12  ;;  %v3938_v19 = vmul.f32 %v3937_v40, %v3935_v43  ;;  %v4091_v53 = vor.u32 %v4090_v7, %v4089_v63  ;;  %v4021_v62 = vshrl.u32 %v4020_v14, 30 }
 0x40d   : > { %v4093_v49 = vshrl.u32 %v10696_v38, %v4078_v46  ;;  %v9451_v36 = vshll.u32 %v4071_v32, 8  ;;  %v4167_v6 = vand.u32 2147483647, %v10786_v2  ;;  %5447 = vst [vmem:[%s6771_s9 + $0x100] sm:$0xff] %v3854_v48  ;;  %v9455_v30 = vand.u32 3, %v3948_v17 }
 0x40e   : > { %v3939_v3 = vxor.u32 2147483648, %v3938_v19  ;;  %v4088_v34 = vor.u32 %v4087_v20, %v4086_v4  ;;  %v4092_v21 = vshll.u32 %v10695_v35, %v4077_v31  ;;  %v4022_v16 = vshll.u32 %v4021_v62, 30 }
 0x40f   : > { %v4045_v9 = vsub.s32 4, %v4021_v62  ;;  %vm4095_vm12 = vcmp.lt.s32.totalorder %v9428_v41, 1  ;;  %vm4098_vm13 = vcmp.lt.s32.totalorder %v9428_v41, 4  ;;  %v4079_v17 = vshrl.u32 %v10691_v37, %v4078_v46 }
 0x410   : > { %v3940_v45 = vsel %vm3857_vm14, %v3939_v3, %v3938_v19  ;;  %v4094_v18 = vor.u32 %v4093_v49, %v4092_v21  ;;  %v4103_v60 = vsel %vm4095_vm12, %v4082_v47, %v4085_v27  ;;  %v4104_v26 = vsel %vm4098_vm13, %v4091_v53, 920167782 }
 0x411   : > { %v3943_v31 = vsel %vm9386_vm15, %v10777_v51, %v3940_v45  ;;  %v9469_v32 = vsub.s32 %v4019_v56, %v4022_v16  ;;  %vm4097_vm10 = vcmp.lt.s32.totalorder %v9428_v41, 3  ;;  %vm4096_vm14 = vcmp.lt.s32.totalorder %v9428_v41, 2 }
 0x412   : > { %6129 = vcosq.f32 %v3943_v31  ;;  %v4100_v55 = vsel %vm4098_vm13, %v4088_v34, 2102212464  ;;  %v4105_v10 = vsel %vm4097_vm10, %v4088_v34, %v4104_v26  ;;  %v4046_v50 = vsel %vm3961_vm11, %v4045_v9, %v4021_v62 }
 0x413   : > { %6131 = vsinq.f32 %v3943_v31  ;;  %v4025_v42 = vsub.s32 0, %v9469_v32  ;;  %v4106_v24 = vsel %vm4096_vm14, %v4103_v60, %v4105_v10  ;;  %v4107_v46 = vsel %vm4095_vm12, %v4085_v27, %v4088_v34 }
 0x414   : > { %v4108_v8 = vsel %vm4098_vm13, %v4094_v18, 1326507024  ;;  %v9486_v39 = vmul.u32.u64.low %v9451_v36, %v4106_v24  ;;  %v9487_v28 = vmul.u32.u64.high %v9451_v36, %v4106_v24, %v9486_v39  ;;  %v4099_v44 = vsel %vm4095_vm12, %v4079_v17, %v4082_v47 }
 0x415   : > { %v5690_v57 = vmin.u32 %v4025_v42, %v9469_v32  ;;  %v4101_v63 = vsel %vm4097_vm10, %v4085_v27, %v4100_v55  ;;  %v4109_v33 = vsel %vm4097_vm10, %v4091_v53, %v4108_v8  ;;  %vm9495_vm15 = vcmp.le.f32.partialorder %v3959_v5, 0.7853982  ;;  %v10789_v27 = vld [vmem:[#allocation21_spill] sm:$0xff] }
 0x416   : > { %v4110_v40 = vsel %vm4096_vm14, %v4107_v46, %v4109_v33  ;;  %v4170_v61 = vand.u32 2139095040, %v10786_v2  ;;  %v4048_v56 = vsel %vm9495_vm15, 0, %v4046_v50  ;;  %v4102_v1 = vsel %vm4096_vm14, %v4099_v44, %v4101_v63 }
 0x417   : > { %v4027_v22 = vclz %v5690_v57  ;;  %v9507_v29 = vmul.u32.u64.low %v9451_v36, %v4110_v40  ;;  %v9508_v54 = vmul.u32.u64.high %v9451_v36, %v4110_v40, %v9507_v29  ;;  %vm3947_vm2 = vweird.f32 %v10777_v51 }
 0x418   : > { %v4171_v5 = vshrl.u32 %v4170_v61, 23  ;;  %vm3950_vm3 = vcmp.lt.s32.totalorder %v9455_v30, 2  ;;  %v4174_v20 = vand.u32 8388607, %v4167_v6  ;;  %vm3951_vm1 = vcmp.eq.s32.totalorder %v9455_v30, 0 }
 0x419   : > { %v5691_v43 = vadd.s32 4294967294, %v4027_v22  ;;  %vm3954_vm0 = vcmp.eq.s32.totalorder %v9455_v30, 2  ;;  %v4121_v41 = vadd.s32 1, %v9487_v28  ;;  %v4015_v12 = vadd.s32 %v9411_v11, %v9421_v59 }
 0x41a   : > { %v5697_v7 = vadd.s32 4294967169, %v4171_v5  ;;  %v4052_v14 = vadd.s32 3, %v4048_v56  ;;  %v4118_v47 = vmul.u32 %v9451_v36, %v4102_v1  ;;  %vm4120_vm5 = vc.u32 %v9508_v54, %v9486_v39 }
 0x41b   : > { %vm5692_vm4 = vcmp.lt.s32.totalorder %v5691_v43, 0  ;;  %v4274_v53 = vand.u32 2139095040, %v10789_v27  ;;  %v4175_v21 = vor.u32 8388608, %v4174_v20  ;;  %v4122_v59 = vsel %vm4120_vm5, %v4121_v41, %v9487_v28 }
 0x41c   : > { %v6130_v4 = vpop.eup %6129  ;;  %v4030_v48 = vsel %vm5692_vm4, 0, %v5691_v43  ;;  %v4177_v19 = vadd.s32 1, %v5697_v7  ;;  %v4123_v18 = vadd.s32 %v4122_v59, %v4118_v47  ;;  %v4271_v31 = vand.u32 2147483647, %v10789_v27 }
 0x41d   : > { %v6132_v62 = vpop.eup %6131  ;;  %v3955_v49 = vxor.u32 2147483648, %v6130_v4  ;;  %v4031_v3 = vsub.s32 32, %v4030_v48  ;;  %v4035_v34 = vsub.s32 4294967266, %v4030_v48  ;;  %v4032_v11 = vshll.u32 %v9469_v32, %v4030_v48 }
 0x41e   : > { %v3952_v16 = vxor.u32 2147483648, %v6132_v62  ;;  %vm4178_vm7 = vcmp.gt.s32.totalorder %v4177_v19, 0  ;;  %v4275_v17 = vshrl.u32 %v4274_v53, 23  ;;  %v4124_v42 = vadd.s32 536870912, %v4123_v18 }
 0x41f   : > { %v3956_v36 = vsel %vm3954_vm0, %v3955_v49, %v6132_v62  ;;  %v4033_v9 = vshrl.u32 %v4015_v12, %v4031_v3  ;;  %v4036_v45 = vadd.s32 127, %v4035_v34  ;;  %v4179_v26 = vsel %vm4178_vm7, %v4177_v19, 0 }
 0x420   : > { %v3953_v60 = vsel %vm3951_vm1, %v6130_v4, %v3952_v16  ;;  %v4181_v24 = vand.u32 31, %v4179_v26  ;;  %v9534_v8 = vand.u32 3, %v4052_v14  ;;  %vm4065_vm8 = vcmp.lt.s32.totalorder %v10783_v0, 0 }
 0x421   : > { %v3957_v32 = vsel %vm3950_vm3, %v3953_v60, %v3956_v36  ;;  %v4034_v55 = vor.u32 %v4033_v9, %v4032_v11  ;;  %v4037_v10 = vshll.u32 %v4036_v45, 23  ;;  %v4125_v28 = vshrl.u32 %v4124_v42, 30 }
 0x422   : > { %v3958_v50 = vsel %vm3947_vm2, nan, %v3957_v32  ;;  %v4182_v57 = vsub.s32 32, %v4181_v24  ;;  %v9538_v44 = vshll.u32 %v4175_v21, 8  ;;  %v5701_v63 = vadd.s32 4294967169, %v4275_v17 }
 0x423   : > { %v4038_v46 = vor.u32 4788187, %v4037_v10  ;;  %5448 = vst [vmem:[%s6771_s9 + $0x108] sm:$0xff] %v3958_v50  ;;  %v9542_v30 = vand.u32 8388607, %v4271_v31  ;;  %v4041_v40 = vcvt.s32.f32 %v4034_v55  ;;  %v9546_v51 = vadd.s32 %v9486_v39, %v9508_v54 }
 0x424   : > { %v4126_v61 = vshll.u32 %v4125_v28, 30  ;;  %v4180_v22 = vshrl.u32 %v4179_v26, 5  ;;  %v4185_v56 = vshrl.u32 %v10684_v15, %v4182_v57  ;;  %v4188_v1 = vshrl.u32 %v10693_v23, %v4182_v57 }
 0x425   : > { %v4039_v33 = vand.u32 2147483647, %v4038_v46  ;;  %v4191_v29 = vshrl.u32 %v10694_v25, %v4182_v57  ;;  %v4184_v20 = vshll.u32 %v10691_v37, %v4181_v24  ;;  %v4194_v41 = vshrl.u32 %v10695_v35, %v4182_v57 }
 0x426   : > { %v9551_v43 = vsub.s32 %v4123_v18, %v4126_v61  ;;  %vm9557_vm9 = vcmp.le.f32.partialorder %v4063_v13, 0.7853982  ;;  %v4149_v54 = vsub.s32 4, %v4125_v28  ;;  %v4187_v7 = vshll.u32 %v10684_v15, %v4181_v24 }
 0x427   : > { %v4042_v5 = vmul.f32 %v4041_v40, %v4039_v33  ;;  %v4190_v12 = vshll.u32 %v10693_v23, %v4181_v24  ;;  %v4281_v14 = vadd.s32 1, %v5701_v63  ;;  %v4186_v48 = vor.u32 %v4185_v56, %v4184_v20 }
 0x428   : > { %v4129_v4 = vsub.s32 0, %v9551_v43  ;;  %v4193_v19 = vshll.u32 %v10694_v25, %v4181_v24  ;;  %v4189_v53 = vor.u32 %v4188_v1, %v4187_v7  ;;  %v4196_v49 = vshll.u32 %v10695_v35, %v4181_v24 }
 0x429   : > { %v4043_v47 = vxor.u32 2147483648, %v4042_v5  ;;  %v4192_v62 = vor.u32 %v4191_v29, %v4190_v12  ;;  %v4197_v13 = vshrl.u32 %v10696_v38, %v4182_v57  ;;  %v4183_v21 = vshrl.u32 %v10691_v37, %v4182_v57 }
 0x42a   : > { %v5694_v34 = vmin.u32 %v4129_v4, %v9551_v43  ;;  %v4195_v16 = vor.u32 %v4194_v41, %v4193_v19  ;;  %v4150_v59 = vsel %vm4065_vm8, %v4149_v54, %v4125_v28  ;;  %vm4199_vm6 = vcmp.lt.s32.totalorder %v4180_v22, 1 }
 0x42b   : > { %v4044_v3 = vsel %vm3961_vm11, %v4043_v47, %v4042_v5  ;;  %v4198_v36 = vor.u32 %v4197_v13, %v4196_v49  ;;  %vm4200_vm12 = vcmp.lt.s32.totalorder %v4180_v22, 2  ;;  %vm4202_vm13 = vcmp.lt.s32.totalorder %v4180_v22, 4 }
 0x42c   : > { %v4047_v11 = vsel %vm9495_vm15, %v10780_v52, %v4044_v3  ;;  %v4131_v9 = vclz %v5694_v34  ;;  %vm4201_vm11 = vcmp.lt.s32.totalorder %v4180_v22, 3  ;;  %v4204_v45 = vsel %vm4202_vm13, %v4192_v62, 2102212464 }
 0x42d   : > { %6133 = vcosq.f32 %v4047_v11  ;;  %v4207_v18 = vsel %vm4199_vm6, %v4186_v48, %v4189_v53  ;;  %v4203_v26 = vsel %vm4199_vm6, %v4183_v21, %v4186_v48  ;;  %v4208_v17 = vsel %vm4202_vm13, %v4195_v16, 920167782 }
 0x42e   : > { %6135 = vsinq.f32 %v4047_v11  ;;  %v5695_v60 = vadd.s32 4294967294, %v4131_v9  ;;  %v4211_v32 = vsel %vm4199_vm6, %v4189_v53, %v4192_v62  ;;  %v4205_v55 = vsel %vm4201_vm11, %v4189_v53, %v4204_v45 }
 0x42f   : > { %v4209_v58 = vsel %vm4201_vm11, %v4192_v62, %v4208_v17  ;;  %v4212_v10 = vsel %vm4202_vm13, %v4198_v36, 1326507024  ;;  %vm4282_vm10 = vcmp.gt.s32.totalorder %v4281_v14, 0  ;;  %v4152_v42 = vsel %vm9557_vm9, 0, %v4150_v59 }
 0x430   : > { %vm5696_vm14 = vcmp.lt.s32.totalorder %v5695_v60, 0  ;;  %v4210_v50 = vsel %vm4200_vm12, %v4207_v18, %v4209_v58  ;;  %v4213_v24 = vsel %vm4201_vm11, %v4195_v16, %v4212_v10  ;;  %vm4055_vm15 = vcmp.eq.s32.totalorder %v9534_v8, 0 }
 0x431   : > { %v4134_v46 = vsel %vm5696_vm14, 0, %v5695_v60  ;;  %v4214_v28 = vsel %vm4200_vm12, %v4211_v32, %v4213_v24  ;;  %v9582_v57 = vmul.u32.u64.low %v9538_v44, %v4210_v50  ;;  %v9583_v63 = vmul.u32.u64.high %v9538_v44, %v4210_v50, %v9582_v57 }
 0x432   : > { %vm4054_vm2 = vcmp.lt.s32.totalorder %v9534_v8, 2  ;;  %v4135_v33 = vsub.s32 32, %v4134_v46  ;;  %v4139_v40 = vsub.s32 4294967266, %v4134_v46  ;;  %v4206_v61 = vsel %vm4200_vm12, %v4203_v26, %v4205_v55 }
 0x433   : > { %v4283_v56 = vsel %vm4282_vm10, %v4281_v14, 0  ;;  %vm4051_vm3 = vweird.f32 %v10780_v52  ;;  %vm4058_vm1 = vcmp.eq.s32.totalorder %v9534_v8, 2  ;;  %v4136_v20 = vshll.u32 %v9551_v43, %v4134_v46 }
 0x434   : > { %v9591_v1 = vmul.u32.u64.low %v9538_v44, %v4214_v28  ;;  %v9592_v29 = vmul.u32.u64.high %v9538_v44, %v4214_v28, %v9591_v1  ;;  %v4285_v5 = vand.u32 31, %v4283_v56  ;;  %v4137_v41 = vshrl.u32 %v9546_v51, %v4135_v33  ;;  %v10792_v28 = vld [vmem:[#allocation22_spill] sm:$0xff] }
 0x435   : > { %v4140_v54 = vadd.s32 127, %v4139_v40  ;;  %v4279_v7 = vor.u32 8388608, %v9542_v30  ;;  %v4156_v12 = vadd.s32 3, %v4152_v42  ;;  %v4222_v22 = vmul.u32 %v9538_v44, %v4206_v61 }
 0x436   : > { %v4225_v14 = vadd.s32 1, %v9583_v63  ;;  %v4286_v47 = vsub.s32 32, %v4285_v5  ;;  %v4138_v48 = vor.u32 %v4137_v41, %v4136_v20  ;;  %v9599_v53 = vshrl.u32 %v4283_v56, 5 }
 0x437   : > { %v6134_v4 = vpop.eup %6133  ;;  %v4141_v19 = vshll.u32 %v4140_v54, 23  ;;  %v4288_v62 = vshll.u32 %v10691_v37, %v4285_v5  ;;  %vm4224_vm0 = vc.u32 %v9592_v29, %v9582_v57  ;;  %v4291_v30 = vshll.u32 %v10684_v15, %v4285_v5 }
 0x438   : > { %v6136_v49 = vpop.eup %6135  ;;  %v4059_v43 = vxor.u32 2147483648, %v6134_v4  ;;  %v4297_v51 = vshll.u32 %v10694_v25, %v4285_v5  ;;  %v4145_v3 = vcvt.s32.f32 %v4138_v48  ;;  %v4226_v34 = vsel %vm4224_vm0, %v4225_v14, %v9583_v63 }
 0x439   : > { %v4056_v44 = vxor.u32 2147483648, %v6136_v49  ;;  %v4142_v13 = vor.u32 4788187, %v4141_v19  ;;  %v4227_v16 = vadd.s32 %v4226_v34, %v4222_v22  ;;  %v4289_v11 = vshrl.u32 %v10684_v15, %v4286_v47 }
 0x43a   : > { %v4060_v21 = vsel %vm4058_vm1, %v4059_v43, %v6136_v49  ;;  %v4292_v59 = vshrl.u32 %v10693_v23, %v4286_v47  ;;  %vm4169_vm4 = vcmp.lt.s32.totalorder %v10786_v2, 0  ;;  %v4295_v45 = vshrl.u32 %v10694_v25, %v4286_v47 }
 0x43b   : > { %v4057_v36 = vsel %vm4055_vm15, %v6134_v4, %v4056_v44  ;;  %v4143_v9 = vand.u32 2147483647, %v4142_v13  ;;  %v4298_v18 = vshrl.u32 %v10695_v35, %v4286_v47  ;;  %v4228_v26 = vadd.s32 536870912, %v4227_v16 }
 0x43c   : > { %v4061_v60 = vsel %vm4054_vm2, %v4057_v36, %v4060_v21  ;;  %v4290_v17 = vor.u32 %v4289_v11, %v4288_v62  ;;  %v4294_v32 = vshll.u32 %v10693_v23, %v4285_v5  ;;  %v4293_v10 = vor.u32 %v4292_v59, %v4291_v30 }
 0x43d   : > { %v4062_v55 = vsel %vm4051_vm3, nan, %v4061_v60  ;;  %v4146_v58 = vmul.f32 %v4145_v3, %v4143_v9  ;;  %v4299_v42 = vor.u32 %v4298_v18, %v4297_v51  ;;  %v4229_v50 = vshrl.u32 %v4228_v26, 30 }
 0x43e   : > { %v4301_v24 = vshrl.u32 %v10696_v38, %v4286_v47  ;;  %v9622_v46 = vshll.u32 %v4279_v7, 8  ;;  %v4375_v63 = vand.u32 2147483647, %v10792_v28  ;;  %5449 = vst [vmem:[%s6771_s9 + $0x110] sm:$0xff] %v4062_v55  ;;  %v9626_v33 = vand.u32 3, %v4156_v12 }
 0x43f   : > { %v4147_v8 = vxor.u32 2147483648, %v4146_v58  ;;  %v4296_v40 = vor.u32 %v4295_v45, %v4294_v32  ;;  %v4300_v61 = vshll.u32 %v10695_v35, %v4285_v5  ;;  %v4230_v56 = vshll.u32 %v4229_v50, 30 }
 0x440   : > { %v4253_v52 = vsub.s32 4, %v4229_v50  ;;  %vm4303_vm5 = vcmp.lt.s32.totalorder %v9599_v53, 1  ;;  %vm4306_vm7 = vcmp.lt.s32.totalorder %v9599_v53, 4  ;;  %v4287_v12 = vshrl.u32 %v10691_v37, %v4286_v47 }
 0x441   : > { %v4148_v1 = vsel %vm4065_vm8, %v4147_v8, %v4146_v58  ;;  %v4302_v20 = vor.u32 %v4301_v24, %v4300_v61  ;;  %v4311_v41 = vsel %vm4303_vm5, %v4290_v17, %v4293_v10  ;;  %v4312_v54 = vsel %vm4306_vm7, %v4299_v42, 920167782 }
 0x442   : > { %v4151_v5 = vsel %vm9557_vm9, %v10783_v0, %v4148_v1  ;;  %v9640_v7 = vsub.s32 %v4227_v16, %v4230_v56  ;;  %vm4305_vm6 = vcmp.lt.s32.totalorder %v9599_v53, 3  ;;  %vm4304_vm8 = vcmp.lt.s32.totalorder %v9599_v53, 2 }
 0x443   : > { %6137 = vcosq.f32 %v4151_v5  ;;  %v4308_v22 = vsel %vm4306_vm7, %v4296_v40, 2102212464  ;;  %v4313_v14 = vsel %vm4305_vm6, %v4296_v40, %v4312_v54  ;;  %v4254_v39 = vsel %vm4169_vm4, %v4253_v52, %v4229_v50 }
 0x444   : > { %6139 = vsinq.f32 %v4151_v5  ;;  %v4233_v4 = vsub.s32 0, %v9640_v7  ;;  %v4314_v48 = vsel %vm4304_vm8, %v4311_v41, %v4313_v14  ;;  %v4315_v47 = vsel %vm4303_vm5, %v4293_v10, %v4296_v40 }
 0x445   : > { %v4316_v19 = vsel %vm4306_vm7, %v4302_v20, 1326507024  ;;  %v9657_v62 = vmul.u32.u64.low %v9622_v46, %v4314_v48  ;;  %v9658_v49 = vmul.u32.u64.high %v9622_v46, %v4314_v48, %v9657_v62  ;;  %v4307_v30 = vsel %vm4303_vm5, %v4287_v12, %v4290_v17 }
 0x446   : > { %v5698_v43 = vmin.u32 %v4233_v4, %v9640_v7  ;;  %v4309_v51 = vsel %vm4305_vm6, %v4293_v10, %v4308_v22  ;;  %v4317_v44 = vsel %vm4305_vm6, %v4299_v42, %v4316_v19  ;;  %vm9666_vm9 = vcmp.le.f32.partialorder %v4167_v6, 0.7853982  ;;  %v10795_v10 = vld [vmem:[#allocation23_spill] sm:$0xff] }
 0x447   : > { %v4318_v3 = vsel %vm4304_vm8, %v4315_v47, %v4317_v44  ;;  %v4378_v34 = vand.u32 2139095040, %v10792_v28  ;;  %v4256_v16 = vsel %vm9666_vm9, 0, %v4254_v39  ;;  %v4310_v11 = vsel %vm4304_vm8, %v4307_v30, %v4309_v51 }
 0x448   : > { %v4235_v21 = vclz %v5698_v43  ;;  %v9678_v59 = vmul.u32.u64.low %v9622_v46, %v4318_v3  ;;  %v9679_v36 = vmul.u32.u64.high %v9622_v46, %v4318_v3, %v9678_v59  ;;  %vm4155_vm12 = vweird.f32 %v10783_v0 }
 0x449   : > { %v4379_v6 = vshrl.u32 %v4378_v34, 23  ;;  %vm4158_vm13 = vcmp.lt.s32.totalorder %v9626_v33, 2  ;;  %v4382_v45 = vand.u32 8388607, %v4375_v63  ;;  %vm4159_vm11 = vcmp.eq.s32.totalorder %v9626_v33, 0 }
 0x44a   : > { %v5699_v9 = vadd.s32 4294967294, %v4235_v21  ;;  %vm4162_vm10 = vcmp.eq.s32.totalorder %v9626_v33, 2  ;;  %v4329_v53 = vadd.s32 1, %v9658_v49  ;;  %v4223_v60 = vadd.s32 %v9582_v57, %v9592_v29 }
 0x44b   : > { %v5705_v18 = vadd.s32 4294967169, %v4379_v6  ;;  %v4260_v26 = vadd.s32 3, %v4256_v16  ;;  %v4326_v17 = vmul.u32 %v9622_v46, %v4310_v11  ;;  %vm4328_vm15 = vc.u32 %v9679_v36, %v9657_v62 }
 0x44c   : > { %vm5700_vm14 = vcmp.lt.s32.totalorder %v5699_v9, 0  ;;  %v4482_v42 = vand.u32 2139095040, %v10795_v10  ;;  %v4383_v61 = vor.u32 8388608, %v4382_v45  ;;  %v4330_v29 = vsel %vm4328_vm15, %v4329_v53, %v9658_v49 }
 0x44d   : > { %v6138_v32 = vpop.eup %6137  ;;  %v4238_v55 = vsel %vm5700_vm14, 0, %v5699_v9  ;;  %v4385_v58 = vadd.s32 1, %v5705_v18  ;;  %v4331_v20 = vadd.s32 %v4330_v29, %v4326_v17  ;;  %v4479_v5 = vand.u32 2147483647, %v10795_v10 }
 0x44e   : > { %v6140_v50 = vpop.eup %6139  ;;  %v4163_v24 = vxor.u32 2147483648, %v6138_v32  ;;  %v4239_v8 = vsub.s32 32, %v4238_v55  ;;  %v4243_v40 = vsub.s32 4294967266, %v4238_v55  ;;  %v4240_v57 = vshll.u32 %v9640_v7, %v4238_v55 }
 0x44f   : > { %v4160_v56 = vxor.u32 2147483648, %v6140_v50  ;;  %vm4386_vm2 = vcmp.gt.s32.totalorder %v4385_v58, 0  ;;  %v4483_v12 = vshrl.u32 %v4482_v42, 23  ;;  %v4332_v4 = vadd.s32 536870912, %v4331_v20 }
 0x450   : > { %v4164_v46 = vsel %vm4162_vm10, %v4163_v24, %v6140_v50  ;;  %v4241_v52 = vshrl.u32 %v4223_v60, %v4239_v8  ;;  %v4244_v1 = vadd.s32 127, %v4243_v40  ;;  %v4387_v54 = vsel %vm4386_vm2, %v4385_v58, 0 }
 0x451   : > { %v4161_v41 = vsel %vm4159_vm11, %v6138_v32, %v4160_v56  ;;  %v4389_v48 = vand.u32 31, %v4387_v54  ;;  %v9705_v19 = vand.u32 3, %v4260_v26  ;;  %vm4273_vm3 = vcmp.lt.s32.totalorder %v10789_v27, 0 }
 0x452   : > { %v4165_v7 = vsel %vm4158_vm13, %v4161_v41, %v4164_v46  ;;  %v4242_v22 = vor.u32 %v4241_v52, %v4240_v57  ;;  %v4245_v14 = vshll.u32 %v4244_v1, 23  ;;  %v4333_v49 = vshrl.u32 %v4332_v4, 30 }
 0x453   : > { %v4166_v39 = vsel %vm4155_vm12, nan, %v4165_v7  ;;  %v4390_v43 = vsub.s32 32, %v4389_v48  ;;  %v9709_v30 = vshll.u32 %v4383_v61, 8  ;;  %v5709_v51 = vadd.s32 4294967169, %v4483_v12 }
 0x454   : > { %v4246_v47 = vor.u32 4788187, %v4245_v14  ;;  %5450 = vst [vmem:[%s6771_s9 + $0x118] sm:$0xff] %v4166_v39  ;;  %v9713_v33 = vand.u32 8388607, %v4479_v5  ;;  %v4249_v3 = vcvt.s32.f32 %v4242_v22  ;;  %v9717_v0 = vadd.s32 %v9657_v62, %v9679_v36 }
 0x455   : > { %v4334_v34 = vshll.u32 %v4333_v49, 30  ;;  %v4388_v21 = vshrl.u32 %v4387_v54, 5  ;;  %v4393_v16 = vshrl.u32 %v10684_v15, %v4390_v43  ;;  %v4396_v11 = vshrl.u32 %v10693_v23, %v4390_v43 }
 0x456   : > { %v4247_v44 = vand.u32 2147483647, %v4246_v47  ;;  %v4399_v59 = vshrl.u32 %v10694_v25, %v4390_v43  ;;  %v4392_v45 = vshll.u32 %v10691_v37, %v4389_v48  ;;  %v4402_v53 = vshrl.u32 %v10695_v35, %v4390_v43 }
 0x457   : > { %v9722_v9 = vsub.s32 %v4331_v20, %v4334_v34  ;;  %vm9728_vm1 = vcmp.le.f32.partialorder %v4271_v31, 0.7853982  ;;  %v4357_v36 = vsub.s32 4, %v4333_v49  ;;  %v4395_v18 = vshll.u32 %v10684_v15, %v4389_v48 }
 0x458   : > { %v4250_v6 = vmul.f32 %v4249_v3, %v4247_v44  ;;  %v4398_v60 = vshll.u32 %v10693_v23, %v4389_v48  ;;  %v4489_v26 = vadd.s32 1, %v5709_v51  ;;  %v4394_v55 = vor.u32 %v4393_v16, %v4392_v45 }
 0x459   : > { %v4337_v32 = vsub.s32 0, %v9722_v9  ;;  %v4401_v58 = vshll.u32 %v10694_v25, %v4389_v48  ;;  %v4397_v42 = vor.u32 %v4396_v11, %v4395_v18  ;;  %v4404_v24 = vshll.u32 %v10695_v35, %v4389_v48 }
 0x45a   : > { %v4251_v17 = vxor.u32 2147483648, %v4250_v6  ;;  %v4400_v50 = vor.u32 %v4399_v59, %v4398_v60  ;;  %v4405_v31 = vshrl.u32 %v10696_v38, %v4390_v43  ;;  %v4391_v61 = vshrl.u32 %v10691_v37, %v4390_v43 }
 0x45b   : > { %v5702_v40 = vmin.u32 %v4337_v32, %v9722_v9  ;;  %v4403_v56 = vor.u32 %v4402_v53, %v4401_v58  ;;  %v4358_v29 = vsel %vm4273_vm3, %v4357_v36, %v4333_v49  ;;  %vm4407_vm0 = vcmp.lt.s32.totalorder %v4388_v21, 1 }
 0x45c   : > { %v4252_v8 = vsel %vm4169_vm4, %v4251_v17, %v4250_v6  ;;  %v4406_v46 = vor.u32 %v4405_v31, %v4404_v24  ;;  %vm4408_vm5 = vcmp.lt.s32.totalorder %v4388_v21, 2  ;;  %vm4410_vm7 = vcmp.lt.s32.totalorder %v4388_v21, 4 }
 0x45d   : > { %v4255_v57 = vsel %vm9666_vm9, %v10786_v2, %v4252_v8  ;;  %v4339_v52 = vclz %v5702_v40  ;;  %vm4409_vm4 = vcmp.lt.s32.totalorder %v4388_v21, 3  ;;  %v4412_v1 = vsel %vm4410_vm7, %v4400_v50, 2102212464 }
 0x45e   : > { %6141 = vcosq.f32 %v4255_v57  ;;  %v4415_v20 = vsel %vm4407_vm0, %v4394_v55, %v4397_v42  ;;  %v4411_v54 = vsel %vm4407_vm0, %v4391_v61, %v4394_v55  ;;  %v4416_v12 = vsel %vm4410_vm7, %v4403_v56, 920167782 }
 0x45f   : > { %6143 = vsinq.f32 %v4255_v57  ;;  %v5703_v41 = vadd.s32 4294967294, %v4339_v52  ;;  %v4419_v7 = vsel %vm4407_vm0, %v4397_v42, %v4400_v50  ;;  %v4413_v22 = vsel %vm4409_vm4, %v4397_v42, %v4412_v1 }
 0x460   : > { %v4417_v13 = vsel %vm4409_vm4, %v4400_v50, %v4416_v12  ;;  %v4420_v14 = vsel %vm4410_vm7, %v4406_v46, 1326507024  ;;  %vm4490_vm6 = vcmp.gt.s32.totalorder %v4489_v26, 0  ;;  %v4360_v4 = vsel %vm9728_vm1, 0, %v4358_v29 }
 0x461   : > { %vm5704_vm8 = vcmp.lt.s32.totalorder %v5703_v41, 0  ;;  %v4418_v39 = vsel %vm4408_vm5, %v4415_v20, %v4417_v13  ;;  %v4421_v48 = vsel %vm4409_vm4, %v4403_v56, %v4420_v14  ;;  %vm4263_vm9 = vcmp.eq.s32.totalorder %v9705_v19, 0 }
 0x462   : > { %v4342_v47 = vsel %vm5704_vm8, 0, %v5703_v41  ;;  %v4422_v49 = vsel %vm4408_vm5, %v4419_v7, %v4421_v48  ;;  %v9753_v43 = vmul.u32.u64.low %v9709_v30, %v4418_v39  ;;  %v9754_v51 = vmul.u32.u64.high %v9709_v30, %v4418_v39, %v9753_v43 }
 0x463   : > { %vm4262_vm12 = vcmp.lt.s32.totalorder %v9705_v19, 2  ;;  %v4343_v44 = vsub.s32 32, %v4342_v47  ;;  %v4347_v3 = vsub.s32 4294967266, %v4342_v47  ;;  %v4414_v34 = vsel %vm4408_vm5, %v4411_v54, %v4413_v22 }
 0x464   : > { %v4491_v16 = vsel %vm4490_vm6, %v4489_v26, 0  ;;  %vm4259_vm13 = vweird.f32 %v10786_v2  ;;  %vm4266_vm11 = vcmp.eq.s32.totalorder %v9705_v19, 2  ;;  %v4344_v45 = vshll.u32 %v9722_v9, %v4342_v47 }
 0x465   : > { %v9762_v11 = vmul.u32.u64.low %v9709_v30, %v4422_v49  ;;  %v9763_v59 = vmul.u32.u64.high %v9709_v30, %v4422_v49, %v9762_v11  ;;  %v4493_v6 = vand.u32 31, %v4491_v16  ;;  %v4345_v53 = vshrl.u32 %v9717_v0, %v4343_v44  ;;  %v10798_v49 = vld [vmem:[#allocation24_spill] sm:$0xff] }
 0x466   : > { %v4348_v36 = vadd.s32 127, %v4347_v3  ;;  %v4487_v18 = vor.u32 8388608, %v9713_v33  ;;  %v4364_v60 = vadd.s32 3, %v4360_v4  ;;  %v4430_v21 = vmul.u32 %v9709_v30, %v4414_v34 }
 0x467   : > { %v4433_v26 = vadd.s32 1, %v9754_v51  ;;  %v4494_v17 = vsub.s32 32, %v4493_v6  ;;  %v4346_v55 = vor.u32 %v4345_v53, %v4344_v45  ;;  %v9770_v42 = vshrl.u32 %v4491_v16, 5 }
 0x468   : > { %v6142_v32 = vpop.eup %6141  ;;  %v4349_v58 = vshll.u32 %v4348_v36, 23  ;;  %v4496_v50 = vshll.u32 %v10691_v37, %v4493_v6  ;;  %vm4432_vm10 = vc.u32 %v9763_v59, %v9753_v43  ;;  %v4499_v33 = vshll.u32 %v10684_v15, %v4493_v6 }
 0x469   : > { %v6144_v24 = vpop.eup %6143  ;;  %v4267_v9 = vxor.u32 2147483648, %v6142_v32  ;;  %v4505_v0 = vshll.u32 %v10694_v25, %v4493_v6  ;;  %v4353_v8 = vcvt.s32.f32 %v4346_v55  ;;  %v4434_v40 = vsel %vm4432_vm10, %v4433_v26, %v9754_v51 }
 0x46a   : > { %v4264_v30 = vxor.u32 2147483648, %v6144_v24  ;;  %v4350_v31 = vor.u32 4788187, %v4349_v58  ;;  %v4435_v56 = vadd.s32 %v4434_v40, %v4430_v21  ;;  %v4497_v57 = vshrl.u32 %v10684_v15, %v4494_v17 }
 0x46b   : > { %v4268_v61 = vsel %vm4266_vm11, %v4267_v9, %v6144_v24  ;;  %v4500_v29 = vshrl.u32 %v10693_v23, %v4494_v17  ;;  %vm4377_vm14 = vcmp.lt.s32.totalorder %v10792_v28, 0  ;;  %v4503_v1 = vshrl.u32 %v10694_v25, %v4494_v17 }
 0x46c   : > { %v4265_v46 = vsel %vm4263_vm9, %v6142_v32, %v4264_v30  ;;  %v4351_v52 = vand.u32 2147483647, %v4350_v31  ;;  %v4506_v20 = vshrl.u32 %v10695_v35, %v4494_v17  ;;  %v4436_v54 = vadd.s32 536870912, %v4435_v56 }
 0x46d   : > { %v4269_v41 = vsel %vm4262_vm12, %v4265_v46, %v4268_v61  ;;  %v4498_v12 = vor.u32 %v4497_v57, %v4496_v50  ;;  %v4502_v7 = vshll.u32 %v10693_v23, %v4493_v6  ;;  %v4501_v14 = vor.u32 %v4500_v29, %v4499_v33 }
 0x46e   : > { %v4270_v22 = vsel %vm4259_vm13, nan, %v4269_v41  ;;  %v4354_v13 = vmul.f32 %v4353_v8, %v4351_v52  ;;  %v4507_v4 = vor.u32 %v4506_v20, %v4505_v0  ;;  %v4437_v39 = vshrl.u32 %v4436_v54, 30 }
 0x46f   : > { %v4509_v48 = vshrl.u32 %v10696_v38, %v4494_v17  ;;  %v9793_v47 = vshll.u32 %v4487_v18, 8  ;;  %v4583_v51 = vand.u32 2147483647, %v10798_v49  ;;  %5451 = vst [vmem:[%s6771_s9 + $0x120] sm:$0xff] %v4270_v22  ;;  %v9797_v44 = vand.u32 3, %v4364_v60 }
 0x470   : > { %v4355_v19 = vxor.u32 2147483648, %v4354_v13  ;;  %v4504_v3 = vor.u32 %v4503_v1, %v4502_v7  ;;  %v4508_v34 = vshll.u32 %v10695_v35, %v4493_v6  ;;  %v4438_v16 = vshll.u32 %v4437_v39, 30 }
 0x471   : > { %v4461_v2 = vsub.s32 4, %v4437_v39  ;;  %vm4511_vm15 = vcmp.lt.s32.totalorder %v9770_v42, 1  ;;  %vm4514_vm2 = vcmp.lt.s32.totalorder %v9770_v42, 4  ;;  %v4495_v60 = vshrl.u32 %v10691_v37, %v4494_v17 }
 0x472   : > { %v4356_v11 = vsel %vm4273_vm3, %v4355_v19, %v4354_v13  ;;  %v4510_v45 = vor.u32 %v4509_v48, %v4508_v34  ;;  %v4519_v53 = vsel %vm4511_vm15, %v4498_v12, %v4501_v14  ;;  %v4520_v36 = vsel %vm4514_vm2, %v4507_v4, 920167782 }
 0x473   : > { %v4359_v6 = vsel %vm9728_vm1, %v10789_v27, %v4356_v11  ;;  %v9811_v18 = vsub.s32 %v4435_v56, %v4438_v16  ;;  %vm4513_vm0 = vcmp.lt.s32.totalorder %v9770_v42, 3  ;;  %vm4512_vm3 = vcmp.lt.s32.totalorder %v9770_v42, 2 }
 0x474   : > { %6145 = vcosq.f32 %v4359_v6  ;;  %v4516_v21 = vsel %vm4514_vm2, %v4504_v3, 2102212464  ;;  %v4521_v26 = vsel %vm4513_vm0, %v4504_v3, %v4520_v36  ;;  %v4462_v62 = vsel %vm4377_vm14, %v4461_v2, %v4437_v39 }
 0x475   : > { %6147 = vsinq.f32 %v4359_v6  ;;  %v4441_v32 = vsub.s32 0, %v9811_v18  ;;  %v4522_v55 = vsel %vm4512_vm3, %v4519_v53, %v4521_v26  ;;  %v4523_v17 = vsel %vm4511_vm15, %v4501_v14, %v4504_v3 }
 0x476   : > { %v4524_v58 = vsel %vm4514_vm2, %v4510_v45, 1326507024  ;;  %v9828_v50 = vmul.u32.u64.low %v9793_v47, %v4522_v55  ;;  %v9829_v24 = vmul.u32.u64.high %v9793_v47, %v4522_v55, %v9828_v50  ;;  %v4515_v33 = vsel %vm4511_vm15, %v4495_v60, %v4498_v12 }
 0x477   : > { %v5706_v9 = vmin.u32 %v4441_v32, %v9811_v18  ;;  %v4517_v0 = vsel %vm4513_vm0, %v4501_v14, %v4516_v21  ;;  %v4525_v30 = vsel %vm4513_vm0, %v4507_v4, %v4524_v58  ;;  %vm9837_vm1 = vcmp.le.f32.partialorder %v4375_v63, 0.7853982  ;;  %v10801_v14 = vld [vmem:[#allocation25_spill] sm:$0xff] }
 0x478   : > { %v4526_v8 = vsel %vm4512_vm3, %v4523_v17, %v4525_v30  ;;  %v4586_v40 = vand.u32 2139095040, %v10798_v49  ;;  %v4464_v56 = vsel %vm9837_vm1, 0, %v4462_v62  ;;  %v4518_v57 = vsel %vm4512_vm3, %v4515_v33, %v4517_v0 }
 0x479   : > { %v4443_v61 = vclz %v5706_v9  ;;  %v9849_v29 = vmul.u32.u64.low %v9793_v47, %v4526_v8  ;;  %v9850_v46 = vmul.u32.u64.high %v9793_v47, %v4526_v8, %v9849_v29  ;;  %vm4363_vm5 = vweird.f32 %v10789_v27 }
 0x47a   : > { %v4587_v63 = vshrl.u32 %v4586_v40, 23  ;;  %vm4366_vm7 = vcmp.lt.s32.totalorder %v9797_v44, 2  ;;  %v4590_v1 = vand.u32 8388607, %v4583_v51  ;;  %vm4367_vm4 = vcmp.eq.s32.totalorder %v9797_v44, 0 }
 0x47b   : > { %v5707_v52 = vadd.s32 4294967294, %v4443_v61  ;;  %vm4370_vm6 = vcmp.eq.s32.totalorder %v9797_v44, 2  ;;  %v4537_v42 = vadd.s32 1, %v9829_v24  ;;  %v4431_v41 = vadd.s32 %v9753_v43, %v9763_v59 }
 0x47c   : > { %v5713_v20 = vadd.s32 4294967169, %v4587_v63  ;;  %v4468_v54 = vadd.s32 3, %v4464_v56  ;;  %v4534_v12 = vmul.u32 %v9793_v47, %v4518_v57  ;;  %vm4536_vm9 = vc.u32 %v9850_v46, %v9828_v50 }
 0x47d   : > { %vm5708_vm8 = vcmp.lt.s32.totalorder %v5707_v52, 0  ;;  %v4690_v4 = vand.u32 2139095040, %v10801_v14  ;;  %v4591_v34 = vor.u32 8388608, %v4590_v1  ;;  %v4538_v59 = vsel %vm4536_vm9, %v4537_v42, %v9829_v24 }
 0x47e   : > { %v6146_v7 = vpop.eup %6145  ;;  %v4446_v22 = vsel %vm5708_vm8, 0, %v5707_v52  ;;  %v4593_v13 = vadd.s32 1, %v5713_v20  ;;  %v4539_v45 = vadd.s32 %v4538_v59, %v4534_v12  ;;  %v4687_v6 = vand.u32 2147483647, %v10801_v14 }
 0x47f   : > { %v6148_v39 = vpop.eup %6147  ;;  %v4371_v48 = vxor.u32 2147483648, %v6146_v7  ;;  %v4447_v19 = vsub.s32 32, %v4446_v22  ;;  %v4451_v3 = vsub.s32 4294967266, %v4446_v22  ;;  %v4448_v43 = vshll.u32 %v9811_v18, %v4446_v22 }
 0x480   : > { %v4368_v16 = vxor.u32 2147483648, %v6148_v39  ;;  %vm4594_vm12 = vcmp.gt.s32.totalorder %v4593_v13, 0  ;;  %v4691_v60 = vshrl.u32 %v4690_v4, 23  ;;  %v4540_v32 = vadd.s32 536870912, %v4539_v45 }
 0x481   : > { %v4372_v47 = vsel %vm4370_vm6, %v4371_v48, %v6148_v39  ;;  %v4449_v2 = vshrl.u32 %v4431_v41, %v4447_v19  ;;  %v4452_v11 = vadd.s32 127, %v4451_v3  ;;  %v4595_v36 = vsel %vm4594_vm12, %v4593_v13, 0 }
 0x482   : > { %v4369_v53 = vsel %vm4367_vm4, %v6146_v7, %v4368_v16  ;;  %v4597_v55 = vand.u32 31, %v4595_v36  ;;  %v9876_v58 = vand.u32 3, %v4468_v54  ;;  %vm4481_vm13 = vcmp.lt.s32.totalorder %v10795_v10, 0 }
 0x483   : > { %v4373_v18 = vsel %vm4366_vm7, %v4369_v53, %v4372_v47  ;;  %v4450_v21 = vor.u32 %v4449_v2, %v4448_v43  ;;  %v4453_v26 = vshll.u32 %v4452_v11, 23  ;;  %v4541_v24 = vshrl.u32 %v4540_v32, 30 }
 0x484   : > { %v4374_v62 = vsel %vm4363_vm5, nan, %v4373_v18  ;;  %v4598_v9 = vsub.s32 32, %v4597_v55  ;;  %v9880_v33 = vshll.u32 %v4591_v34, 8  ;;  %v5717_v0 = vadd.s32 4294967169, %v4691_v60 }
 0x485   : > { %v4454_v17 = vor.u32 4788187, %v4453_v26  ;;  %5452 = vst [vmem:[%s6771_s9 + $0x128] sm:$0xff] %v4374_v62  ;;  %v9884_v44 = vand.u32 8388607, %v4687_v6  ;;  %v4457_v8 = vcvt.s32.f32 %v4450_v21  ;;  %v9888_v27 = vadd.s32 %v9828_v50, %v9850_v46 }
 0x486   : > { %v4542_v40 = vshll.u32 %v4541_v24, 30  ;;  %v4596_v61 = vshrl.u32 %v4595_v36, 5  ;;  %v4601_v56 = vshrl.u32 %v10684_v15, %v4598_v9  ;;  %v4604_v57 = vshrl.u32 %v10693_v23, %v4598_v9 }
 0x487   : > { %v4455_v30 = vand.u32 2147483647, %v4454_v17  ;;  %v4607_v29 = vshrl.u32 %v10694_v25, %v4598_v9  ;;  %v4600_v1 = vshll.u32 %v10691_v37, %v4597_v55  ;;  %v4610_v42 = vshrl.u32 %v10695_v35, %v4598_v9 }
 0x488   : > { %v9893_v52 = vsub.s32 %v4539_v45, %v4542_v40  ;;  %vm9899_vm11 = vcmp.le.f32.partialorder %v4479_v5, 0.7853982  ;;  %v4565_v46 = vsub.s32 4, %v4541_v24  ;;  %v4603_v20 = vshll.u32 %v10684_v15, %v4597_v55 }
 0x489   : > { %v4458_v63 = vmul.f32 %v4457_v8, %v4455_v30  ;;  %v4606_v41 = vshll.u32 %v10693_v23, %v4597_v55  ;;  %v4697_v54 = vadd.s32 1, %v5717_v0  ;;  %v4602_v22 = vor.u32 %v4601_v56, %v4600_v1 }
 0x48a   : > { %v4545_v7 = vsub.s32 0, %v9893_v52  ;;  %v4609_v13 = vshll.u32 %v10694_v25, %v4597_v55  ;;  %v4605_v4 = vor.u32 %v4604_v57, %v4603_v20  ;;  %v4612_v48 = vshll.u32 %v10695_v35, %v4597_v55 }
 0x48b   : > { %v4459_v12 = vxor.u32 2147483648, %v4458_v63  ;;  %v4608_v39 = vor.u32 %v4607_v29, %v4606_v41  ;;  %v4613_v5 = vshrl.u32 %v10696_v38, %v4598_v9  ;;  %v4599_v34 = vshrl.u32 %v10691_v37, %v4598_v9 }
 0x48c   : > { %v5710_v3 = vmin.u32 %v4545_v7, %v9893_v52  ;;  %v4611_v16 = vor.u32 %v4610_v42, %v4609_v13  ;;  %v4566_v59 = vsel %vm4481_vm13, %v4565_v46, %v4541_v24  ;;  %vm4615_vm10 = vcmp.lt.s32.totalorder %v4596_v61, 1 }
 0x48d   : > { %v4460_v19 = vsel %vm4377_vm14, %v4459_v12, %v4458_v63  ;;  %v4614_v47 = vor.u32 %v4613_v5, %v4612_v48  ;;  %vm4616_vm15 = vcmp.lt.s32.totalorder %v4596_v61, 2  ;;  %vm4618_vm2 = vcmp.lt.s32.totalorder %v4596_v61, 4 }
 0x48e   : > { %v4463_v43 = vsel %vm9837_vm1, %v10792_v28, %v4460_v19  ;;  %v4547_v2 = vclz %v5710_v3  ;;  %vm4617_vm14 = vcmp.lt.s32.totalorder %v4596_v61, 3  ;;  %v4620_v11 = vsel %vm4618_vm2, %v4608_v39, 2102212464 }
 0x48f   : > { %6149 = vcosq.f32 %v4463_v43  ;;  %v4623_v45 = vsel %vm4615_vm10, %v4602_v22, %v4605_v4  ;;  %v4619_v36 = vsel %vm4615_vm10, %v4599_v34, %v4602_v22  ;;  %v4624_v60 = vsel %vm4618_vm2, %v4611_v16, 920167782 }
 0x490   : > { %6151 = vsinq.f32 %v4463_v43  ;;  %v5711_v53 = vadd.s32 4294967294, %v4547_v2  ;;  %v4627_v18 = vsel %vm4615_vm10, %v4605_v4, %v4608_v39  ;;  %v4621_v21 = vsel %vm4617_vm14, %v4605_v4, %v4620_v11 }
 0x491   : > { %v4625_v31 = vsel %vm4617_vm14, %v4608_v39, %v4624_v60  ;;  %v4628_v26 = vsel %vm4618_vm2, %v4614_v47, 1326507024  ;;  %vm4698_vm0 = vcmp.gt.s32.totalorder %v4697_v54, 0  ;;  %v4568_v32 = vsel %vm9899_vm11, 0, %v4566_v59 }
 0x492   : > { %vm5712_vm3 = vcmp.lt.s32.totalorder %v5711_v53, 0  ;;  %v4626_v62 = vsel %vm4616_vm15, %v4623_v45, %v4625_v31  ;;  %v4629_v55 = vsel %vm4617_vm14, %v4611_v16, %v4628_v26  ;;  %vm4471_vm1 = vcmp.eq.s32.totalorder %v9876_v58, 0 }
 0x493   : > { %v4550_v17 = vsel %vm5712_vm3, 0, %v5711_v53  ;;  %v4630_v24 = vsel %vm4616_vm15, %v4627_v18, %v4629_v55  ;;  %v9924_v9 = vmul.u32.u64.low %v9880_v33, %v4626_v62  ;;  %v9925_v0 = vmul.u32.u64.high %v9880_v33, %v4626_v62, %v9924_v9 }
 0x494   : > { %vm4470_vm5 = vcmp.lt.s32.totalorder %v9876_v58, 2  ;;  %v4551_v30 = vsub.s32 32, %v4550_v17  ;;  %v4555_v8 = vsub.s32 4294967266, %v4550_v17  ;;  %v4622_v40 = vsel %vm4616_vm15, %v4619_v36, %v4621_v21 }
 0x495   : > { %v4699_v56 = vsel %vm4698_vm0, %v4697_v54, 0  ;;  %vm4467_vm7 = vweird.f32 %v10792_v28  ;;  %vm4474_vm4 = vcmp.eq.s32.totalorder %v9876_v58, 2  ;;  %v4552_v1 = vshll.u32 %v9893_v52, %v4550_v17 }
 0x496   : > { %v9933_v57 = vmul.u32.u64.low %v9880_v33, %v4630_v24  ;;  %v9934_v29 = vmul.u32.u64.high %v9880_v33, %v4630_v24, %v9933_v57  ;;  %v4701_v63 = vand.u32 31, %v4699_v56  ;;  %v4553_v42 = vshrl.u32 %v9888_v27, %v4551_v30  ;;  %v10804_v24 = vld [vmem:[#allocation26_spill] sm:$0xff] }
 0x497   : > { %v4556_v46 = vadd.s32 127, %v4555_v8  ;;  %v4695_v20 = vor.u32 8388608, %v9884_v44  ;;  %v4572_v41 = vadd.s32 3, %v4568_v32  ;;  %v4638_v61 = vmul.u32 %v9880_v33, %v4622_v40 }
 0x498   : > { %v4641_v54 = vadd.s32 1, %v9925_v0  ;;  %v4702_v12 = vsub.s32 32, %v4701_v63  ;;  %v4554_v22 = vor.u32 %v4553_v42, %v4552_v1  ;;  %v9941_v4 = vshrl.u32 %v4699_v56, 5 }
 0x499   : > { %v6150_v7 = vpop.eup %6149  ;;  %v4557_v13 = vshll.u32 %v4556_v46, 23  ;;  %v4704_v39 = vshll.u32 %v10691_v37, %v4701_v63  ;;  %vm4640_vm6 = vc.u32 %v9934_v29, %v9924_v9  ;;  %v4707_v44 = vshll.u32 %v10684_v15, %v4701_v63 }
 0x49a   : > { %v6152_v48 = vpop.eup %6151  ;;  %v4475_v52 = vxor.u32 2147483648, %v6150_v7  ;;  %v4713_v27 = vshll.u32 %v10694_v25, %v4701_v63  ;;  %v4561_v19 = vcvt.s32.f32 %v4554_v22  ;;  %v4642_v3 = vsel %vm4640_vm6, %v4641_v54, %v9925_v0 }
 0x49b   : > { %v4472_v33 = vxor.u32 2147483648, %v6152_v48  ;;  %v4558_v5 = vor.u32 4788187, %v4557_v13  ;;  %v4643_v16 = vadd.s32 %v4642_v3, %v4638_v61  ;;  %v4705_v43 = vshrl.u32 %v10684_v15, %v4702_v12 }
 0x49c   : > { %v4476_v34 = vsel %vm4474_vm4, %v4475_v52, %v6152_v48  ;;  %v4708_v59 = vshrl.u32 %v10693_v23, %v4702_v12  ;;  %vm4585_vm8 = vcmp.lt.s32.totalorder %v10798_v49, 0  ;;  %v4711_v11 = vshrl.u32 %v10694_v25, %v4702_v12 }
 0x49d   : > { %v4473_v47 = vsel %vm4471_vm1, %v6150_v7, %v4472_v33  ;;  %v4559_v2 = vand.u32 2147483647, %v4558_v5  ;;  %v4714_v45 = vshrl.u32 %v10695_v35, %v4702_v12  ;;  %v4644_v36 = vadd.s32 536870912, %v4643_v16 }
 0x49e   : > { %v4477_v53 = vsel %vm4470_vm5, %v4473_v47, %v4476_v34  ;;  %v4706_v60 = vor.u32 %v4705_v43, %v4704_v39  ;;  %v4710_v18 = vshll.u32 %v10693_v23, %v4701_v63  ;;  %v4709_v26 = vor.u32 %v4708_v59, %v4707_v44 }
 0x49f   : > { %v4478_v21 = vsel %vm4467_vm7, nan, %v4477_v53  ;;  %v4562_v31 = vmul.f32 %v4561_v19, %v4559_v2  ;;  %v4715_v32 = vor.u32 %v4714_v45, %v4713_v27  ;;  %v4645_v62 = vshrl.u32 %v4644_v36, 30 }
 0x4a0   : > { %v4717_v55 = vshrl.u32 %v10696_v38, %v4702_v12  ;;  %v9964_v17 = vshll.u32 %v4695_v20, 8  ;;  %v4791_v0 = vand.u32 2147483647, %v10804_v24  ;;  %5453 = vst [vmem:[%s6771_s9 + $0x130] sm:$0xff] %v4478_v21  ;;  %v9968_v30 = vand.u32 3, %v4572_v41 }
 0x4a1   : > { %v4563_v58 = vxor.u32 2147483648, %v4562_v31  ;;  %v4712_v8 = vor.u32 %v4711_v11, %v4710_v18  ;;  %v4716_v40 = vshll.u32 %v10695_v35, %v4701_v63  ;;  %v4646_v56 = vshll.u32 %v4645_v62, 30 }
 0x4a2   : > { %v4669_v28 = vsub.s32 4, %v4645_v62  ;;  %vm4719_vm9 = vcmp.lt.s32.totalorder %v9941_v4, 1  ;;  %vm4722_vm12 = vcmp.lt.s32.totalorder %v9941_v4, 4  ;;  %v4703_v41 = vshrl.u32 %v10691_v37, %v4702_v12 }
 0x4a3   : > { %v4564_v57 = vsel %vm4481_vm13, %v4563_v58, %v4562_v31  ;;  %v4718_v1 = vor.u32 %v4717_v55, %v4716_v40  ;;  %v4727_v42 = vsel %vm4719_vm9, %v4706_v60, %v4709_v26  ;;  %v4728_v46 = vsel %vm4722_vm12, %v4715_v32, 920167782 }
 0x4a4   : > { %v4567_v63 = vsel %vm9899_vm11, %v10795_v10, %v4564_v57  ;;  %v9982_v20 = vsub.s32 %v4643_v16, %v4646_v56  ;;  %vm4721_vm10 = vcmp.lt.s32.totalorder %v9941_v4, 3  ;;  %vm4720_vm13 = vcmp.lt.s32.totalorder %v9941_v4, 2 }
 0x4a5   : > { %6153 = vcosq.f32 %v4567_v63  ;;  %v4724_v61 = vsel %vm4722_vm12, %v4712_v8, 2102212464  ;;  %v4729_v54 = vsel %vm4721_vm10, %v4712_v8, %v4728_v46  ;;  %v4670_v50 = vsel %vm4585_vm8, %v4669_v28, %v4645_v62 }
 0x4a6   : > { %6155 = vsinq.f32 %v4567_v63  ;;  %v4649_v7 = vsub.s32 0, %v9982_v20  ;;  %v4730_v22 = vsel %vm4720_vm13, %v4727_v42, %v4729_v54  ;;  %v4731_v12 = vsel %vm4719_vm9, %v4709_v26, %v4712_v8 }
 0x4a7   : > { %v4732_v13 = vsel %vm4722_vm12, %v4718_v1, 1326507024  ;;  %v9999_v39 = vmul.u32.u64.low %v9964_v17, %v4730_v22  ;;  %v10000_v48 = vmul.u32.u64.high %v9964_v17, %v4730_v22, %v9999_v39  ;;  %v4723_v44 = vsel %vm4719_vm9, %v4703_v41, %v4706_v60 }
 0x4a8   : > { %v5714_v52 = vmin.u32 %v4649_v7, %v9982_v20  ;;  %v4725_v27 = vsel %vm4721_vm10, %v4709_v26, %v4724_v61  ;;  %v4733_v33 = vsel %vm4721_vm10, %v4715_v32, %v4732_v13  ;;  %vm10008_vm11 = vcmp.le.f32.partialorder %v4583_v51, 0.7853982  ;;  %v10807_v26 = vld [vmem:[#allocation27_spill] sm:$0xff] }
 0x4a9   : > { %v4734_v19 = vsel %vm4720_vm13, %v4731_v12, %v4733_v33  ;;  %v4794_v3 = vand.u32 2139095040, %v10804_v24  ;;  %v4672_v16 = vsel %vm10008_vm11, 0, %v4670_v50  ;;  %v4726_v43 = vsel %vm4720_vm13, %v4723_v44, %v4725_v27 }
 0x4aa   : > { %v4651_v34 = vclz %v5714_v52  ;;  %v10020_v59 = vmul.u32.u64.low %v9964_v17, %v4734_v19  ;;  %v10021_v47 = vmul.u32.u64.high %v9964_v17, %v4734_v19, %v10020_v59  ;;  %vm4571_vm15 = vweird.f32 %v10795_v10 }
 0x4ab   : > { %v4795_v51 = vshrl.u32 %v4794_v3, 23  ;;  %vm4574_vm2 = vcmp.lt.s32.totalorder %v9968_v30, 2  ;;  %v4798_v11 = vand.u32 8388607, %v4791_v0  ;;  %vm4575_vm14 = vcmp.eq.s32.totalorder %v9968_v30, 0 }
 0x4ac   : > { %v5715_v2 = vadd.s32 4294967294, %v4651_v34  ;;  %vm4578_vm0 = vcmp.eq.s32.totalorder %v9968_v30, 2  ;;  %v4745_v4 = vadd.s32 1, %v10000_v48  ;;  %v4639_v53 = vadd.s32 %v9924_v9, %v9934_v29 }
 0x4ad   : > { %v5721_v45 = vadd.s32 4294967169, %v4795_v51  ;;  %v4676_v36 = vadd.s32 3, %v4672_v16  ;;  %v4742_v60 = vmul.u32 %v9964_v17, %v4726_v43  ;;  %vm4744_vm1 = vc.u32 %v10021_v47, %v9999_v39 }
 0x4ae   : > { %vm5716_vm3 = vcmp.lt.s32.totalorder %v5715_v2, 0  ;;  %v4898_v32 = vand.u32 2139095040, %v10807_v26  ;;  %v4799_v40 = vor.u32 8388608, %v4798_v11  ;;  %v4746_v29 = vsel %vm4744_vm1, %v4745_v4, %v10000_v48 }
 0x4af   : > { %v6154_v18 = vpop.eup %6153  ;;  %v4654_v21 = vsel %vm5716_vm3, 0, %v5715_v2  ;;  %v4801_v31 = vadd.s32 1, %v5721_v45  ;;  %v4747_v1 = vadd.s32 %v4746_v29, %v4742_v60  ;;  %v4895_v63 = vand.u32 2147483647, %v10807_v26 }
 0x4b0   : > { %v6156_v62 = vpop.eup %6155  ;;  %v4579_v55 = vxor.u32 2147483648, %v6154_v18  ;;  %v4655_v58 = vsub.s32 32, %v4654_v21  ;;  %v4659_v8 = vsub.s32 4294967266, %v4654_v21  ;;  %v4656_v9 = vshll.u32 %v9982_v20, %v4654_v21 }
 0x4b1   : > { %v4576_v56 = vxor.u32 2147483648, %v6156_v62  ;;  %vm4802_vm5 = vcmp.gt.s32.totalorder %v4801_v31, 0  ;;  %v4899_v41 = vshrl.u32 %v4898_v32, 23  ;;  %v4748_v7 = vadd.s32 536870912, %v4747_v1 }
 0x4b2   : > { %v4580_v17 = vsel %vm4578_vm0, %v4579_v55, %v6156_v62  ;;  %v4657_v28 = vshrl.u32 %v4639_v53, %v4655_v58  ;;  %v4660_v57 = vadd.s32 127, %v4659_v8  ;;  %v4803_v46 = vsel %vm4802_vm5, %v4801_v31, 0 }
 0x4b3   : > { %v4577_v42 = vsel %vm4575_vm14, %v6154_v18, %v4576_v56  ;;  %v4805_v22 = vand.u32 31, %v4803_v46  ;;  %v10047_v13 = vand.u32 3, %v4676_v36  ;;  %vm4689_vm7 = vcmp.lt.s32.totalorder %v10801_v14, 0 }
 0x4b4   : > { %v4581_v20 = vsel %vm4574_vm2, %v4577_v42, %v4580_v17  ;;  %v4658_v61 = vor.u32 %v4657_v28, %v4656_v9  ;;  %v4661_v54 = vshll.u32 %v4660_v57, 23  ;;  %v4749_v48 = vshrl.u32 %v4748_v7, 30 }
 0x4b5   : > { %v4582_v50 = vsel %vm4571_vm15, nan, %v4581_v20  ;;  %v4806_v52 = vsub.s32 32, %v4805_v22  ;;  %v10051_v44 = vshll.u32 %v4799_v40, 8  ;;  %v5725_v27 = vadd.s32 4294967169, %v4899_v41 }
 0x4b6   : > { %v4662_v12 = vor.u32 4788187, %v4661_v54  ;;  %5454 = vst [vmem:[%s6771_s9 + $0x138] sm:$0xff] %v4582_v50  ;;  %v10055_v30 = vand.u32 8388607, %v4895_v63  ;;  %v4665_v19 = vcvt.s32.f32 %v4658_v61  ;;  %v10059_v10 = vadd.s32 %v9999_v39, %v10021_v47 }
 0x4b7   : > { %v4750_v3 = vshll.u32 %v4749_v48, 30  ;;  %v4804_v34 = vshrl.u32 %v4803_v46, 5  ;;  %v4809_v16 = vshrl.u32 %v10684_v15, %v4806_v52  ;;  %v4812_v43 = vshrl.u32 %v10693_v23, %v4806_v52 }
 0x4b8   : > { %v4663_v33 = vand.u32 2147483647, %v4662_v12  ;;  %v4815_v59 = vshrl.u32 %v10694_v25, %v4806_v52  ;;  %v4808_v11 = vshll.u32 %v10691_v37, %v4805_v22  ;;  %v4818_v4 = vshrl.u32 %v10695_v35, %v4806_v52 }
 0x4b9   : > { %v10064_v2 = vsub.s32 %v4747_v1, %v4750_v3  ;;  %vm10070_vm4 = vcmp.le.f32.partialorder %v4687_v6, 0.7853982  ;;  %v4773_v47 = vsub.s32 4, %v4749_v48  ;;  %v4811_v45 = vshll.u32 %v10684_v15, %v4805_v22 }
 0x4ba   : > { %v4666_v51 = vmul.f32 %v4665_v19, %v4663_v33  ;;  %v4814_v53 = vshll.u32 %v10693_v23, %v4805_v22  ;;  %v4905_v36 = vadd.s32 1, %v5725_v27  ;;  %v4810_v21 = vor.u32 %v4809_v16, %v4808_v11 }
 0x4bb   : > { %v4753_v18 = vsub.s32 0, %v10064_v2  ;;  %v4817_v31 = vshll.u32 %v10694_v25, %v4805_v22  ;;  %v4813_v32 = vor.u32 %v4812_v43, %v4811_v45  ;;  %v4820_v55 = vshll.u32 %v10695_v35, %v4805_v22 }
 0x4bc   : > { %v4667_v60 = vxor.u32 2147483648, %v4666_v51  ;;  %v4816_v62 = vor.u32 %v4815_v59, %v4814_v53  ;;  %v4821_v6 = vshrl.u32 %v10696_v38, %v4806_v52  ;;  %v4807_v40 = vshrl.u32 %v10691_v37, %v4806_v52 }
 0x4bd   : > { %v5718_v8 = vmin.u32 %v4753_v18, %v10064_v2  ;;  %v4819_v56 = vor.u32 %v4818_v4, %v4817_v31  ;;  %v4774_v29 = vsel %vm4689_vm7, %v4773_v47, %v4749_v48  ;;  %vm4823_vm6 = vcmp.lt.s32.totalorder %v4804_v34, 1 }
 0x4be   : > { %v4668_v58 = vsel %vm4585_vm8, %v4667_v60, %v4666_v51  ;;  %v4822_v17 = vor.u32 %v4821_v6, %v4820_v55  ;;  %vm4824_vm9 = vcmp.lt.s32.totalorder %v4804_v34, 2  ;;  %vm4826_vm12 = vcmp.lt.s32.totalorder %v4804_v34, 4 }
 0x4bf   : > { %v4671_v9 = vsel %vm10008_vm11, %v10798_v49, %v4668_v58  ;;  %v4755_v28 = vclz %v5718_v8  ;;  %vm4825_vm8 = vcmp.lt.s32.totalorder %v4804_v34, 3  ;;  %v4828_v57 = vsel %vm4826_vm12, %v4816_v62, 2102212464 }
 0x4c0   : > { %6157 = vcosq.f32 %v4671_v9  ;;  %v4831_v1 = vsel %vm4823_vm6, %v4810_v21, %v4813_v32  ;;  %v4827_v46 = vsel %vm4823_vm6, %v4807_v40, %v4810_v21  ;;  %v4832_v41 = vsel %vm4826_vm12, %v4819_v56, 920167782 }
 0x4c1   : > { %6159 = vsinq.f32 %v4671_v9  ;;  %v5719_v42 = vadd.s32 4294967294, %v4755_v28  ;;  %v4835_v20 = vsel %vm4823_vm6, %v4813_v32, %v4816_v62  ;;  %v4829_v61 = vsel %vm4825_vm8, %v4813_v32, %v4828_v57 }
 0x4c2   : > { %v4833_v5 = vsel %vm4825_vm8, %v4816_v62, %v4832_v41  ;;  %v4836_v54 = vsel %vm4826_vm12, %v4822_v17, 1326507024  ;;  %vm4906_vm10 = vcmp.gt.s32.totalorder %v4905_v36, 0  ;;  %v4776_v7 = vsel %vm10070_vm4, 0, %v4774_v29 }
 0x4c3   : > { %vm5720_vm13 = vcmp.lt.s32.totalorder %v5719_v42, 0  ;;  %v4834_v50 = vsel %vm4824_vm9, %v4831_v1, %v4833_v5  ;;  %v4837_v22 = vsel %vm4825_vm8, %v4819_v56, %v4836_v54  ;;  %vm4679_vm11 = vcmp.eq.s32.totalorder %v10047_v13, 0 }
 0x4c4   : > { %v4758_v12 = vsel %vm5720_vm13, 0, %v5719_v42  ;;  %v4838_v48 = vsel %vm4824_vm9, %v4835_v20, %v4837_v22  ;;  %v10095_v52 = vmul.u32.u64.low %v10051_v44, %v4834_v50  ;;  %v10096_v27 = vmul.u32.u64.high %v10051_v44, %v4834_v50, %v10095_v52 }
 0x4c5   : > { %vm4678_vm15 = vcmp.lt.s32.totalorder %v10047_v13, 2  ;;  %v4759_v33 = vsub.s32 32, %v4758_v12  ;;  %v4763_v19 = vsub.s32 4294967266, %v4758_v12  ;;  %v4830_v3 = vsel %vm4824_vm9, %v4827_v46, %v4829_v61 }
 0x4c6   : > { %v4907_v16 = vsel %vm4906_vm10, %v4905_v36, 0  ;;  %vm4675_vm2 = vweird.f32 %v10798_v49  ;;  %vm4682_vm14 = vcmp.eq.s32.totalorder %v10047_v13, 2  ;;  %v4760_v11 = vshll.u32 %v10064_v2, %v4758_v12 }
 0x4c7   : > { %v10104_v43 = vmul.u32.u64.low %v10051_v44, %v4838_v48  ;;  %v10105_v59 = vmul.u32.u64.high %v10051_v44, %v4838_v48, %v10104_v43  ;;  %v4909_v51 = vand.u32 31, %v4907_v16  ;;  %v4761_v4 = vshrl.u32 %v10059_v10, %v4759_v33  ;;  %v10810_v48 = vld [vmem:[#allocation28_spill] sm:$0xff] }
 0x4c8   : > { %v4764_v47 = vadd.s32 127, %v4763_v19  ;;  %v4903_v45 = vor.u32 8388608, %v10055_v30  ;;  %v4780_v53 = vadd.s32 3, %v4776_v7  ;;  %v4846_v34 = vmul.u32 %v10051_v44, %v4830_v3 }
 0x4c9   : > { %v4849_v36 = vadd.s32 1, %v10096_v27  ;;  %v4910_v60 = vsub.s32 32, %v4909_v51  ;;  %v4762_v21 = vor.u32 %v4761_v4, %v4760_v11  ;;  %v10112_v32 = vshrl.u32 %v4907_v16, 5 }
 0x4ca   : > { %v6158_v18 = vpop.eup %6157  ;;  %v4765_v31 = vshll.u32 %v4764_v47, 23  ;;  %v4912_v62 = vshll.u32 %v10691_v37, %v4909_v51  ;;  %vm4848_vm0 = vc.u32 %v10105_v59, %v10095_v52  ;;  %v4915_v30 = vshll.u32 %v10684_v15, %v4909_v51 }
 0x4cb   : > { %v6160_v55 = vpop.eup %6159  ;;  %v4683_v2 = vxor.u32 2147483648, %v6158_v18  ;;  %v4921_v10 = vshll.u32 %v10694_v25, %v4909_v51  ;;  %v4769_v58 = vcvt.s32.f32 %v4762_v21  ;;  %v4850_v8 = vsel %vm4848_vm0, %v4849_v36, %v10096_v27 }
 0x4cc   : > { %v4680_v44 = vxor.u32 2147483648, %v6160_v55  ;;  %v4766_v6 = vor.u32 4788187, %v4765_v31  ;;  %v4851_v56 = vadd.s32 %v4850_v8, %v4846_v34  ;;  %v4913_v9 = vshrl.u32 %v10684_v15, %v4910_v60 }
 0x4cd   : > { %v4684_v40 = vsel %vm4682_vm14, %v4683_v2, %v6160_v55  ;;  %v4916_v29 = vshrl.u32 %v10693_v23, %v4910_v60  ;;  %vm4793_vm3 = vcmp.lt.s32.totalorder %v10804_v24, 0  ;;  %v4919_v57 = vshrl.u32 %v10694_v25, %v4910_v60 }
 0x4ce   : > { %v4681_v17 = vsel %vm4679_vm11, %v6158_v18, %v4680_v44  ;;  %v4767_v28 = vand.u32 2147483647, %v4766_v6  ;;  %v4922_v1 = vshrl.u32 %v10695_v35, %v4910_v60  ;;  %v4852_v46 = vadd.s32 536870912, %v4851_v56 }
 0x4cf   : > { %v4685_v42 = vsel %vm4678_vm15, %v4681_v17, %v4684_v40  ;;  %v4914_v41 = vor.u32 %v4913_v9, %v4912_v62  ;;  %v4918_v20 = vshll.u32 %v10693_v23, %v4909_v51  ;;  %v4917_v54 = vor.u32 %v4916_v29, %v4915_v30 }
 0x4d0   : > { %v4686_v61 = vsel %vm4675_vm2, nan, %v4685_v42  ;;  %v4770_v5 = vmul.f32 %v4769_v58, %v4767_v28  ;;  %v4923_v7 = vor.u32 %v4922_v1, %v4921_v10  ;;  %v4853_v50 = vshrl.u32 %v4852_v46, 30 }
 0x4d1   : > { %v4925_v22 = vshrl.u32 %v10696_v38, %v4910_v60  ;;  %v10135_v12 = vshll.u32 %v4903_v45, 8  ;;  %v4999_v27 = vand.u32 2147483647, %v10810_v48  ;;  %5455 = vst [vmem:[%s6771_s9 + $0x140] sm:$0xff] %v4686_v61  ;;  %v10139_v33 = vand.u32 3, %v4780_v53 }
 0x4d2   : > { %v4771_v13 = vxor.u32 2147483648, %v4770_v5  ;;  %v4920_v19 = vor.u32 %v4919_v57, %v4918_v20  ;;  %v4924_v3 = vshll.u32 %v10695_v35, %v4909_v51  ;;  %v4854_v16 = vshll.u32 %v4853_v50, 30 }
 0x4d3   : > { %v4877_v49 = vsub.s32 4, %v4853_v50  ;;  %vm4927_vm1 = vcmp.lt.s32.totalorder %v10112_v32, 1  ;;  %vm4930_vm5 = vcmp.lt.s32.totalorder %v10112_v32, 4  ;;  %v4911_v53 = vshrl.u32 %v10691_v37, %v4910_v60 }
 0x4d4   : > { %v4772_v43 = vsel %vm4689_vm7, %v4771_v13, %v4770_v5  ;;  %v4926_v11 = vor.u32 %v4925_v22, %v4924_v3  ;;  %v4935_v4 = vsel %vm4927_vm1, %v4914_v41, %v4917_v54  ;;  %v4936_v47 = vsel %vm4930_vm5, %v4923_v7, 920167782 }
 0x4d5   : > { %v4775_v51 = vsel %vm10070_vm4, %v10801_v14, %v4772_v43  ;;  %v10153_v45 = vsub.s32 %v4851_v56, %v4854_v16  ;;  %vm4929_vm6 = vcmp.lt.s32.totalorder %v10112_v32, 3  ;;  %vm4928_vm7 = vcmp.lt.s32.totalorder %v10112_v32, 2 }
 0x4d6   : > { %6161 = vcosq.f32 %v4775_v51  ;;  %v4932_v34 = vsel %vm4930_vm5, %v4920_v19, 2102212464  ;;  %v4937_v36 = vsel %vm4929_vm6, %v4920_v19, %v4936_v47  ;;  %v4878_v39 = vsel %vm4793_vm3, %v4877_v49, %v4853_v50 }
 0x4d7   : > { %6163 = vsinq.f32 %v4775_v51  ;;  %v4857_v18 = vsub.s32 0, %v10153_v45  ;;  %v4938_v21 = vsel %vm4928_vm7, %v4935_v4, %v4937_v36  ;;  %v4939_v60 = vsel %vm4927_vm1, %v4917_v54, %v4920_v19 }
 0x4d8   : > { %v4940_v31 = vsel %vm4930_vm5, %v4926_v11, 1326507024  ;;  %v10170_v62 = vmul.u32.u64.low %v10135_v12, %v4938_v21  ;;  %v10171_v55 = vmul.u32.u64.high %v10135_v12, %v4938_v21, %v10170_v62  ;;  %v4931_v30 = vsel %vm4927_vm1, %v4911_v53, %v4914_v41 }
 0x4d9   : > { %v5722_v2 = vmin.u32 %v4857_v18, %v10153_v45  ;;  %v4933_v10 = vsel %vm4929_vm6, %v4917_v54, %v4932_v34  ;;  %v4941_v44 = vsel %vm4929_vm6, %v4923_v7, %v4940_v31  ;;  %vm10179_vm4 = vcmp.le.f32.partialorder %v4791_v0, 0.7853982  ;;  %v10813_v54 = vld [vmem:[#allocation29_spill] sm:$0xff] }
 0x4da   : > { %v4942_v58 = vsel %vm4928_vm7, %v4939_v60, %v4941_v44  ;;  %v5002_v8 = vand.u32 2139095040, %v10810_v48  ;;  %v4880_v56 = vsel %vm10179_vm4, 0, %v4878_v39  ;;  %v4934_v9 = vsel %vm4928_vm7, %v4931_v30, %v4933_v10 }
 0x4db   : > { %v4859_v40 = vclz %v5722_v2  ;;  %v10191_v29 = vmul.u32.u64.low %v10135_v12, %v4942_v58  ;;  %v10192_v17 = vmul.u32.u64.high %v10135_v12, %v4942_v58, %v10191_v29  ;;  %vm4779_vm9 = vweird.f32 %v10801_v14 }
 0x4dc   : > { %v5003_v0 = vshrl.u32 %v5002_v8, 23  ;;  %vm4782_vm12 = vcmp.lt.s32.totalorder %v10139_v33, 2  ;;  %v5006_v57 = vand.u32 8388607, %v4999_v27  ;;  %vm4783_vm8 = vcmp.eq.s32.totalorder %v10139_v33, 0 }
 0x4dd   : > { %v5723_v28 = vadd.s32 4294967294, %v4859_v40  ;;  %vm4786_vm10 = vcmp.eq.s32.totalorder %v10139_v33, 2  ;;  %v4953_v32 = vadd.s32 1, %v10171_v55  ;;  %v4847_v42 = vadd.s32 %v10095_v52, %v10105_v59 }
 0x4de   : > { %v5729_v1 = vadd.s32 4294967169, %v5003_v0  ;;  %v4884_v46 = vadd.s32 3, %v4880_v56  ;;  %v4950_v41 = vmul.u32 %v10135_v12, %v4934_v9  ;;  %vm4952_vm11 = vc.u32 %v10192_v17, %v10170_v62 }
 0x4df   : > { %vm5724_vm13 = vcmp.lt.s32.totalorder %v5723_v28, 0  ;;  %v5106_v7 = vand.u32 2139095040, %v10813_v54  ;;  %v5007_v3 = vor.u32 8388608, %v5006_v57  ;;  %v4954_v59 = vsel %vm4952_vm11, %v4953_v32, %v10171_v55 }
 0x4e0   : > { %v6162_v20 = vpop.eup %6161  ;;  %v4862_v61 = vsel %vm5724_vm13, 0, %v5723_v28  ;;  %v5009_v5 = vadd.s32 1, %v5729_v1  ;;  %v4955_v11 = vadd.s32 %v4954_v59, %v4950_v41  ;;  %v5103_v51 = vand.u32 2147483647, %v10813_v54 }
 0x4e1   : > { %v6164_v50 = vpop.eup %6163  ;;  %v4787_v22 = vxor.u32 2147483648, %v6162_v20  ;;  %v4863_v13 = vsub.s32 32, %v4862_v61  ;;  %v4867_v19 = vsub.s32 4294967266, %v4862_v61  ;;  %v4864_v52 = vshll.u32 %v10153_v45, %v4862_v61 }
 0x4e2   : > { %v4784_v16 = vxor.u32 2147483648, %v6164_v50  ;;  %vm5010_vm15 = vcmp.gt.s32.totalorder %v5009_v5, 0  ;;  %v5107_v53 = vshrl.u32 %v5106_v7, 23  ;;  %v4956_v18 = vadd.s32 536870912, %v4955_v11 }
 0x4e3   : > { %v4788_v12 = vsel %vm4786_vm10, %v4787_v22, %v6164_v50  ;;  %v4865_v49 = vshrl.u32 %v4847_v42, %v4863_v13  ;;  %v4868_v43 = vadd.s32 127, %v4867_v19  ;;  %v5011_v47 = vsel %vm5010_vm15, %v5009_v5, 0 }
 0x4e4   : > { %v4785_v4 = vsel %vm4783_vm8, %v6162_v20, %v4784_v16  ;;  %v5013_v21 = vand.u32 31, %v5011_v47  ;;  %v10218_v31 = vand.u32 3, %v4884_v46  ;;  %vm4897_vm2 = vcmp.lt.s32.totalorder %v10807_v26, 0 }
 0x4e5   : > { %v4789_v45 = vsel %vm4782_vm12, %v4785_v4, %v4788_v12  ;;  %v4866_v34 = vor.u32 %v4865_v49, %v4864_v52  ;;  %v4869_v36 = vshll.u32 %v4868_v43, 23  ;;  %v4957_v55 = vshrl.u32 %v4956_v18, 30 }
 0x4e6   : > { %v4790_v39 = vsel %vm4779_vm9, nan, %v4789_v45  ;;  %v5014_v2 = vsub.s32 32, %v5013_v21  ;;  %v10222_v30 = vshll.u32 %v5007_v3, 8  ;;  %v5733_v10 = vadd.s32 4294967169, %v5107_v53 }
 0x4e7   : > { %v4870_v60 = vor.u32 4788187, %v4869_v36  ;;  %5456 = vst [vmem:[%s6771_s9 + $0x148] sm:$0xff] %v4790_v39  ;;  %v10226_v33 = vand.u32 8388607, %v5103_v51  ;;  %v4873_v58 = vcvt.s32.f32 %v4866_v34  ;;  %v10230_v14 = vadd.s32 %v10170_v62, %v10192_v17 }
 0x4e8   : > { %v4958_v8 = vshll.u32 %v4957_v55, 30  ;;  %v5012_v40 = vshrl.u32 %v5011_v47, 5  ;;  %v5017_v56 = vshrl.u32 %v10684_v15, %v5014_v2  ;;  %v5020_v9 = vshrl.u32 %v10693_v23, %v5014_v2 }
 0x4e9   : > { %v4871_v44 = vand.u32 2147483647, %v4870_v60  ;;  %v5023_v29 = vshrl.u32 %v10694_v25, %v5014_v2  ;;  %v5016_v57 = vshll.u32 %v10691_v37, %v5013_v21  ;;  %v5026_v32 = vshrl.u32 %v10695_v35, %v5014_v2 }
 0x4ea   : > { %v10235_v28 = vsub.s32 %v4955_v11, %v4958_v8  ;;  %vm10241_vm14 = vcmp.le.f32.partialorder %v4895_v63, 0.7853982  ;;  %v4981_v17 = vsub.s32 4, %v4957_v55  ;;  %v5019_v1 = vshll.u32 %v10684_v15, %v5013_v21 }
 0x4eb   : > { %v4874_v0 = vmul.f32 %v4873_v58, %v4871_v44  ;;  %v5022_v42 = vshll.u32 %v10693_v23, %v5013_v21  ;;  %v5113_v46 = vadd.s32 1, %v5733_v10  ;;  %v5018_v61 = vor.u32 %v5017_v56, %v5016_v57 }
 0x4ec   : > { %v4961_v20 = vsub.s32 0, %v10235_v28  ;;  %v5025_v5 = vshll.u32 %v10694_v25, %v5013_v21  ;;  %v5021_v7 = vor.u32 %v5020_v9, %v5019_v1  ;;  %v5028_v22 = vshll.u32 %v10695_v35, %v5013_v21 }
 0x4ed   : > { %v4875_v41 = vxor.u32 2147483648, %v4874_v0  ;;  %v5024_v50 = vor.u32 %v5023_v29, %v5022_v42  ;;  %v5029_v63 = vshrl.u32 %v10696_v38, %v5014_v2  ;;  %v5015_v3 = vshrl.u32 %v10691_v37, %v5014_v2 }
 0x4ee   : > { %v5726_v19 = vmin.u32 %v4961_v20, %v10235_v28  ;;  %v5027_v16 = vor.u32 %v5026_v32, %v5025_v5  ;;  %v4982_v59 = vsel %vm4897_vm2, %v4981_v17, %v4957_v55  ;;  %vm5031_vm0 = vcmp.lt.s32.totalorder %v5012_v40, 1 }
 0x4ef   : > { %v4876_v13 = vsel %vm4793_vm3, %v4875_v41, %v4874_v0  ;;  %v5030_v12 = vor.u32 %v5029_v63, %v5028_v22  ;;  %vm5032_vm1 = vcmp.lt.s32.totalorder %v5012_v40, 2  ;;  %vm5034_vm5 = vcmp.lt.s32.totalorder %v5012_v40, 4 }
 0x4f0   : > { %v4879_v52 = vsel %vm10179_vm4, %v10804_v24, %v4876_v13  ;;  %v4963_v49 = vclz %v5726_v19  ;;  %vm5033_vm3 = vcmp.lt.s32.totalorder %v5012_v40, 3  ;;  %v5036_v43 = vsel %vm5034_vm5, %v5024_v50, 2102212464 }
 0x4f1   : > { %6165 = vcosq.f32 %v4879_v52  ;;  %v5039_v11 = vsel %vm5031_vm0, %v5018_v61, %v5021_v7  ;;  %v5035_v47 = vsel %vm5031_vm0, %v5015_v3, %v5018_v61  ;;  %v5040_v53 = vsel %vm5034_vm5, %v5027_v16, 920167782 }
 0x4f2   : > { %6167 = vsinq.f32 %v4879_v52  ;;  %v5727_v4 = vadd.s32 4294967294, %v4963_v49  ;;  %v5043_v45 = vsel %vm5031_vm0, %v5021_v7, %v5024_v50  ;;  %v5037_v34 = vsel %vm5033_vm3, %v5021_v7, %v5036_v43 }
 0x4f3   : > { %v5041_v6 = vsel %vm5033_vm3, %v5024_v50, %v5040_v53  ;;  %v5044_v36 = vsel %vm5034_vm5, %v5030_v12, 1326507024  ;;  %vm5114_vm6 = vcmp.gt.s32.totalorder %v5113_v46, 0  ;;  %v4984_v18 = vsel %vm10241_vm14, 0, %v4982_v59 }
 0x4f4   : > { %vm5728_vm7 = vcmp.lt.s32.totalorder %v5727_v4, 0  ;;  %v5042_v39 = vsel %vm5032_vm1, %v5039_v11, %v5041_v6  ;;  %v5045_v21 = vsel %vm5033_vm3, %v5027_v16, %v5044_v36  ;;  %vm4887_vm4 = vcmp.eq.s32.totalorder %v10218_v31, 0 }
 0x4f5   : > { %v4966_v60 = vsel %vm5728_vm7, 0, %v5727_v4  ;;  %v5046_v55 = vsel %vm5032_vm1, %v5043_v45, %v5045_v21  ;;  %v10266_v2 = vmul.u32.u64.low %v10222_v30, %v5042_v39  ;;  %v10267_v10 = vmul.u32.u64.high %v10222_v30, %v5042_v39, %v10266_v2 }
 0x4f6   : > { %vm4886_vm9 = vcmp.lt.s32.totalorder %v10218_v31, 2  ;;  %v4967_v44 = vsub.s32 32, %v4966_v60  ;;  %v4971_v58 = vsub.s32 4294967266, %v4966_v60  ;;  %v5038_v8 = vsel %vm5032_vm1, %v5035_v47, %v5037_v34 }
 0x4f7   : > { %v5115_v56 = vsel %vm5114_vm6, %v5113_v46, 0  ;;  %vm4883_vm12 = vweird.f32 %v10804_v24  ;;  %vm4890_vm8 = vcmp.eq.s32.totalorder %v10218_v31, 2  ;;  %v4968_v57 = vshll.u32 %v10235_v28, %v4966_v60 }
 0x4f8   : > { %v10275_v9 = vmul.u32.u64.low %v10222_v30, %v5046_v55  ;;  %v10276_v29 = vmul.u32.u64.high %v10222_v30, %v5046_v55, %v10275_v9  ;;  %v5117_v0 = vand.u32 31, %v5115_v56  ;;  %v4969_v32 = vshrl.u32 %v10230_v14, %v4967_v44 }
 0x4f9   : > { %v4972_v17 = vadd.s32 127, %v4971_v58  ;;  %v5111_v1 = vor.u32 8388608, %v10226_v33  ;;  %v4988_v42 = vadd.s32 3, %v4984_v18  ;;  %v5054_v40 = vmul.u32 %v10222_v30, %v5038_v8 }
 0x4fa   : > { %v5057_v46 = vadd.s32 1, %v10267_v10  ;;  %v5118_v41 = vsub.s32 32, %v5117_v0  ;;  %v4970_v61 = vor.u32 %v4969_v32, %v4968_v57  ;;  %v10283_v7 = vshrl.u32 %v5115_v56, 5 }
 0x4fb   : > { %v6166_v20 = vpop.eup %6165  ;;  %v4973_v5 = vshll.u32 %v4972_v17, 23  ;;  %v5120_v50 = vshll.u32 %v10691_v37, %v5117_v0  ;;  %vm5056_vm10 = vc.u32 %v10276_v29, %v10266_v2  ;;  %v5123_v33 = vshll.u32 %v10684_v15, %v5117_v0 }
 0x4fc   : > { %v6168_v22 = vpop.eup %6167  ;;  %v4891_v28 = vxor.u32 2147483648, %v6166_v20  ;;  %v5129_v14 = vshll.u32 %v10694_v25, %v5117_v0  ;;  %v4977_v13 = vcvt.s32.f32 %v4970_v61  ;;  %v5058_v19 = vsel %vm5056_vm10, %v5057_v46, %v10267_v10 }
 0x4fd   : > { %v4888_v30 = vxor.u32 2147483648, %v6168_v22  ;;  %v4974_v63 = vor.u32 4788187, %v4973_v5  ;;  %v5059_v16 = vadd.s32 %v5058_v19, %v5054_v40  ;;  %v5121_v52 = vshrl.u32 %v10684_v15, %v5118_v41 }
 0x4fe   : > { %v4892_v3 = vsel %vm4890_vm8, %v4891_v28, %v6168_v22  ;;  %v5124_v59 = vshrl.u32 %v10693_v23, %v5118_v41  ;;  %v5127_v43 = vshrl.u32 %v10694_v25, %v5118_v41  ;;  %v5130_v11 = vshrl.u32 %v10695_v35, %v5118_v41 }
 0x4ff   : > { %v4889_v12 = vsel %vm4887_vm4, %v6166_v20, %v4888_v30  ;;  %v4975_v49 = vand.u32 2147483647, %v4974_v63  ;;  %v5060_v47 = vadd.s32 536870912, %v5059_v16  ;;  %v5122_v53 = vor.u32 %v5121_v52, %v5120_v50 }
 0x500   : > { %v4893_v4 = vsel %vm4886_vm9, %v4889_v12, %v4892_v3  ;;  %v5126_v45 = vshll.u32 %v10693_v23, %v5117_v0  ;;  %v5125_v36 = vor.u32 %v5124_v59, %v5123_v33  ;;  %v5131_v18 = vor.u32 %v5130_v11, %v5129_v14  ;;  %v10816_v14 = vld [vmem:[#allocation30_spill] sm:$0xff] }
 0x501   : > { %v4894_v34 = vsel %vm4883_vm12, nan, %v4893_v4  ;;  %v4978_v6 = vmul.f32 %v4977_v13, %v4975_v49  ;;  %v5061_v39 = vshrl.u32 %v5060_v47, 30  ;;  %v5133_v21 = vshrl.u32 %v10696_v38, %v5118_v41 }
 0x502   : > { %5457 = vst [vmem:[%s6771_s9 + $0x150] sm:$0xff] %v4894_v34  ;;  %v5128_v55 = vor.u32 %v5127_v43, %v5126_v45  ;;  %v5132_v10 = vshll.u32 %v10695_v35, %v5117_v0  ;;  %v10307_v31 = vshll.u32 %v5111_v1, 8  ;;  %v10309_v44 = vand.u32 3, %v4988_v42 }
 0x503   : > { %v4979_v60 = vxor.u32 2147483648, %v4978_v6  ;;  %v5062_v58 = vshll.u32 %v5061_v39, 30  ;;  %vm5135_vm13 = vcmp.lt.s32.totalorder %v10283_v7, 1  ;;  %vm5138_vm11 = vcmp.lt.s32.totalorder %v10283_v7, 4 }
 0x504   : > { %v5134_v8 = vor.u32 %v5133_v21, %v5132_v10  ;;  %v5143_v56 = vsel %vm5135_vm13, %v5122_v53, %v5125_v36  ;;  %v5144_v9 = vsel %vm5138_vm11, %v5131_v18, 920167782  ;;  %v5119_v32 = vshrl.u32 %v10691_v37, %v5118_v41 }
 0x505   : > { %v4980_v24 = vsel %vm4897_vm2, %v4979_v60, %v4978_v6  ;;  %v10322_v57 = vsub.s32 %v5059_v16, %v5062_v58  ;;  %vm5137_vm15 = vcmp.lt.s32.totalorder %v10283_v7, 3  ;;  %vm5136_vm2 = vcmp.lt.s32.totalorder %v10283_v7, 2 }
 0x506   : > { %v4983_v0 = vsel %vm10241_vm14, %v10807_v26, %v4980_v24  ;;  %v5140_v17 = vsel %vm5138_vm11, %v5128_v55, 2102212464  ;;  %v5145_v1 = vsel %vm5137_vm15, %v5128_v55, %v5144_v9  ;;  %v5085_v40 = vsub.s32 4, %v5061_v39 }
 0x507   : > { %6169 = vcosq.f32 %v4983_v0  ;;  %v5065_v42 = vsub.s32 0, %v10322_v57  ;;  %v5146_v62 = vsel %vm5136_vm2, %v5143_v56, %v5145_v1  ;;  %v5147_v46 = vsel %vm5135_vm13, %v5125_v36, %v5128_v55 }
 0x508   : > { %6171 = vsinq.f32 %v4983_v0  ;;  %v5148_v41 = vsel %vm5138_vm11, %v5134_v8, 1326507024  ;;  %v10337_v20 = vmul.u32.u64.low %v10307_v31, %v5146_v62  ;;  %v10338_v61 = vmul.u32.u64.high %v10307_v31, %v5146_v62, %v10337_v20 }
 0x509   : > { %v5730_v5 = vmin.u32 %v5065_v42, %v10322_v57  ;;  %v5139_v50 = vsel %vm5135_vm13, %v5119_v32, %v5122_v53  ;;  %v5141_v22 = vsel %vm5137_vm15, %v5125_v36, %v5140_v17  ;;  %v5149_v28 = vsel %vm5137_vm15, %v5131_v18, %v5148_v41 }
 0x50a   : > { %vm5001_vm14 = vcmp.lt.s32.totalorder %v10810_v48, 0  ;;  %v5150_v33 = vsel %vm5136_vm2, %v5147_v46, %v5149_v28  ;;  %v5210_v30 = vand.u32 2139095040, %v10816_v14  ;;  %v5207_v19 = vand.u32 2147483647, %v10816_v14 }
 0x50b   : > { %v5067_v63 = vclz %v5730_v5  ;;  %v5086_v13 = vsel %vm5001_vm14, %v5085_v40, %v5061_v39  ;;  %v5142_v3 = vsel %vm5136_vm2, %v5139_v50, %v5141_v22  ;;  %vm4987_vm0 = vweird.f32 %v10807_v26 }
 0x50c   : > { %v10354_v16 = vmul.u32.u64.low %v10307_v31, %v5150_v33  ;;  %v10355_v52 = vmul.u32.u64.high %v10307_v31, %v5150_v33, %v10354_v16  ;;  %v5211_v59 = vshrl.u32 %v5210_v30, 23  ;;  %vm4990_vm1 = vcmp.lt.s32.totalorder %v10309_v44, 2 }
 0x50d   : > { %vm10361_vm5 = vcmp.le.f32.partialorder %v4999_v27, 0.7853982  ;;  %v5731_v49 = vadd.s32 4294967294, %v5067_v63  ;;  %vm4991_vm3 = vcmp.eq.s32.totalorder %v10309_v44, 0  ;;  %vm4994_vm6 = vcmp.eq.s32.totalorder %v10309_v44, 2 }
 0x50e   : > { %v5161_v7 = vadd.s32 1, %v10338_v61  ;;  %v5737_v43 = vadd.s32 4294967169, %v5211_v59  ;;  %v5055_v11 = vadd.s32 %v10266_v2, %v10276_v29  ;;  %v5088_v4 = vsel %vm10361_vm5, 0, %v5086_v13  ;;  %v10819_v2 = vld [vmem:[#allocation31_spill] sm:$0xff] }
 0x50f   : > { %vm5732_vm7 = vcmp.lt.s32.totalorder %v5731_v49, 0  ;;  %v5158_v27 = vmul.u32 %v10307_v31, %v5142_v3  ;;  %vm5160_vm4 = vc.u32 %v10355_v52, %v10337_v20  ;;  %v5214_v45 = vand.u32 8388607, %v5207_v19 }
 0x510   : > { %v5070_v53 = vsel %vm5732_vm7, 0, %v5731_v49  ;;  %v5217_v34 = vadd.s32 1, %v5737_v43  ;;  %v5314_v29 = vand.u32 2139095040, %v10819_v2  ;;  %v5162_v55 = vsel %vm5160_vm4, %v5161_v7, %v10338_v61 }
 0x511   : > { %v6170_v47 = vpop.eup %6169  ;;  %v5071_v18 = vsub.s32 32, %v5070_v53  ;;  %v5075_v39 = vsub.s32 4294967266, %v5070_v53  ;;  %v5072_v60 = vshll.u32 %v10322_v57, %v5070_v53  ;;  %v5163_v24 = vadd.s32 %v5162_v55, %v5158_v27 }
 0x512   : > { %v6172_v6 = vpop.eup %6171  ;;  %v4995_v36 = vxor.u32 2147483648, %v6170_v47  ;;  %vm5218_vm9 = vcmp.gt.s32.totalorder %v5217_v34, 0  ;;  %v5092_v56 = vadd.s32 3, %v5088_v4  ;;  %v5215_v9 = vor.u32 8388608, %v5214_v45 }
 0x513   : > { %v4992_v21 = vxor.u32 2147483648, %v6172_v6  ;;  %v5073_v31 = vshrl.u32 %v5055_v11, %v5071_v18  ;;  %v5076_v58 = vadd.s32 127, %v5075_v39  ;;  %v5219_v0 = vsel %vm5218_vm9, %v5217_v34, 0 }
 0x514   : > { %v4996_v10 = vsel %vm4994_vm6, %v4995_v36, %v6172_v6  ;;  %v5164_v1 = vadd.s32 536870912, %v5163_v24  ;;  %v5221_v40 = vand.u32 31, %v5219_v0  ;;  %v5315_v62 = vshrl.u32 %v5314_v29, 23 }
 0x515   : > { %v4993_v8 = vsel %vm4991_vm3, %v6170_v47, %v4992_v21  ;;  %v5074_v57 = vor.u32 %v5073_v31, %v5072_v60  ;;  %v5077_v17 = vshll.u32 %v5076_v58, 23  ;;  %v10391_v61 = vand.u32 3, %v5092_v56 }
 0x516   : > { %v4997_v32 = vsel %vm4990_vm1, %v4993_v8, %v4996_v10  ;;  %v10388_v41 = vshrl.u32 %v5164_v1, 30  ;;  %v5222_v5 = vsub.s32 32, %v5221_v40  ;;  %v5311_v50 = vand.u32 2147483647, %v10819_v2 }
 0x517   : > { %v4998_v42 = vsel %vm4987_vm0, nan, %v4997_v32  ;;  %v5078_v46 = vor.u32 4788187, %v5077_v17  ;;  %v5081_v44 = vcvt.s32.f32 %v5074_v57  ;;  %v10395_v33 = vshll.u32 %v5215_v9, 8 }
 0x518   : > { %5458 = vst [vmem:[%s6771_s9 + $0x158] sm:$0xff] %v4998_v42  ;;  %v5166_v28 = vshll.u32 %v10388_v41, 30  ;;  %v5225_v26 = vshrl.u32 %v10684_v15, %v5222_v5  ;;  %v5228_v30 = vshrl.u32 %v10693_v23, %v5222_v5  ;;  %v5231_v63 = vshrl.u32 %v10694_v25, %v5222_v5 }
 0x519   : > { %v5079_v22 = vand.u32 2147483647, %v5078_v46  ;;  %v5741_v13 = vadd.s32 4294967169, %v5315_v62  ;;  %v5224_v59 = vshll.u32 %v10691_v37, %v5221_v40  ;;  %v5234_v49 = vshrl.u32 %v10695_v35, %v5222_v5 }
 0x51a   : > { %v10400_v16 = vsub.s32 %v5163_v24, %v5166_v28  ;;  %v5159_v7 = vadd.s32 %v10337_v20, %v10355_v52  ;;  %v5220_v43 = vshrl.u32 %v5219_v0, 5  ;;  %v5227_v11 = vshll.u32 %v10684_v15, %v5221_v40 }
 0x51b   : > { %v5082_v3 = vmul.f32 %v5081_v44, %v5079_v22  ;;  %v5230_v4 = vshll.u32 %v10693_v23, %v5221_v40  ;;  %v5226_v53 = vor.u32 %v5225_v26, %v5224_v59  ;;  %v5233_v45 = vshll.u32 %v10694_v25, %v5221_v40 }
 0x51c   : > { %v5169_v47 = vsub.s32 0, %v10400_v16  ;;  %v5229_v34 = vor.u32 %v5228_v30, %v5227_v11  ;;  %v5236_v36 = vshll.u32 %v10695_v35, %v5221_v40  ;;  %v5237_v18 = vshrl.u32 %v10696_v38, %v5222_v5 }
 0x51d   : > { %v5083_v27 = vxor.u32 2147483648, %v5082_v3  ;;  %v5232_v6 = vor.u32 %v5231_v63, %v5230_v4  ;;  %v5235_v39 = vor.u32 %v5234_v49, %v5233_v45  ;;  %v5321_v29 = vadd.s32 1, %v5741_v13 }
 0x51e   : > { %v5734_v52 = vmin.u32 %v5169_v47, %v10400_v16  ;;  %v5223_v60 = vshrl.u32 %v10691_v37, %v5222_v5  ;;  %v5238_v55 = vor.u32 %v5237_v18, %v5236_v36  ;;  %vm5239_vm12 = vcmp.lt.s32.totalorder %v5220_v43, 1 }
 0x51f   : > { %v5084_v20 = vsel %vm5001_vm14, %v5083_v27, %v5082_v3  ;;  %vm5105_vm8 = vcmp.lt.s32.totalorder %v10813_v54, 0  ;;  %vm5240_vm10 = vcmp.lt.s32.totalorder %v5220_v43, 2  ;;  %vm5242_vm13 = vcmp.lt.s32.totalorder %v5220_v43, 4 }
 0x520   : > { %v5087_v21 = vsel %vm10361_vm5, %v10810_v48, %v5084_v20  ;;  %v5171_v10 = vclz %v5734_v52  ;;  %vm5241_vm11 = vcmp.lt.s32.totalorder %v5220_v43, 3  ;;  %v5244_v31 = vsel %vm5242_vm13, %v5232_v6, 2102212464 }
 0x521   : > { %6173 = vcosq.f32 %v5087_v21  ;;  %v5247_v58 = vsel %vm5239_vm12, %v5226_v53, %v5229_v34  ;;  %v5243_v8 = vsel %vm5239_vm12, %v5223_v60, %v5226_v53  ;;  %v5248_v56 = vsel %vm5242_vm13, %v5235_v39, 920167782 }
 0x522   : > { %6175 = vsinq.f32 %v5087_v21  ;;  %v5735_v24 = vadd.s32 4294967294, %v5171_v10  ;;  %v5251_v9 = vsel %vm5239_vm12, %v5229_v34, %v5232_v6  ;;  %v5245_v12 = vsel %vm5241_vm11, %v5229_v34, %v5244_v31 }
 0x523   : > { %v5249_v0 = vsel %vm5241_vm11, %v5232_v6, %v5248_v56  ;;  %v5252_v32 = vsel %vm5242_vm13, %v5238_v55, 1326507024  ;;  %vm5322_vm15 = vcmp.gt.s32.totalorder %v5321_v29, 0  ;;  %v5189_v57 = vsub.s32 4, %v10388_v41 }
 0x524   : > { %vm5736_vm2 = vcmp.lt.s32.totalorder %v5735_v24, 0  ;;  %v5250_v17 = vsel %vm5240_vm10, %v5247_v58, %v5249_v0  ;;  %v5253_v1 = vsel %vm5241_vm11, %v5235_v39, %v5252_v32  ;;  %vm5095_vm14 = vcmp.eq.s32.totalorder %v10391_v61, 0 }
 0x525   : > { %v5174_v42 = vsel %vm5736_vm2, 0, %v5735_v24  ;;  %v5254_v40 = vsel %vm5240_vm10, %v5251_v9, %v5253_v1  ;;  %v10425_v62 = vmul.u32.u64.low %v10395_v33, %v5250_v17  ;;  %v10426_v46 = vmul.u32.u64.high %v10395_v33, %v5250_v17, %v10425_v62 }
 0x526   : > { %vm5094_vm0 = vcmp.lt.s32.totalorder %v10391_v61, 2  ;;  %v5175_v5 = vsub.s32 32, %v5174_v42  ;;  %v5179_v22 = vsub.s32 4294967266, %v5174_v42  ;;  %v5246_v44 = vsel %vm5240_vm10, %v5243_v8, %v5245_v12 }
 0x527   : > { %v5323_v28 = vsel %vm5322_vm15, %v5321_v29, 0  ;;  %vm5091_vm1 = vweird.f32 %v10810_v48  ;;  %vm5098_vm5 = vcmp.eq.s32.totalorder %v10391_v61, 2  ;;  %v5176_v13 = vshll.u32 %v10400_v16, %v5174_v42 }
 0x528   : > { %v10434_v26 = vmul.u32.u64.low %v10395_v33, %v5254_v40  ;;  %v10435_v30 = vmul.u32.u64.high %v10395_v33, %v5254_v40, %v10434_v26  ;;  %v5325_v63 = vand.u32 31, %v5323_v28  ;;  %v5177_v3 = vshrl.u32 %v5159_v7, %v5175_v5 }
 0x529   : > { %v5180_v59 = vadd.s32 127, %v5179_v22  ;;  %v5318_v49 = vand.u32 8388607, %v5311_v50  ;;  %v5190_v43 = vsel %vm5105_vm8, %v5189_v57, %v10388_v41  ;;  %v5262_v11 = vmul.u32 %v10395_v33, %v5246_v44 }
 0x52a   : > { %v5265_v4 = vadd.s32 1, %v10426_v46  ;;  %v10445_v27 = vsub.s32 32, %v5325_v63  ;;  %v5178_v53 = vor.u32 %v5177_v3, %v5176_v13  ;;  %v10447_v34 = vshrl.u32 %v5323_v28, 5 }
 0x52b   : > { %v6174_v47 = vpop.eup %6173  ;;  %v5181_v45 = vshll.u32 %v5180_v59, 23  ;;  %v5328_v16 = vshll.u32 %v10691_v37, %v5325_v63  ;;  %vm5264_vm3 = vc.u32 %v10435_v30, %v10425_v62  ;;  %v5331_v41 = vshll.u32 %v10684_v15, %v5325_v63 }
 0x52c   : > { %v6176_v7 = vpop.eup %6175  ;;  %v5099_v6 = vxor.u32 2147483648, %v6174_v47  ;;  %v5337_v33 = vshll.u32 %v10694_v25, %v5325_v63  ;;  %v5185_v20 = vcvt.s32.f32 %v5178_v53  ;;  %v5266_v52 = vsel %vm5264_vm3, %v5265_v4, %v10426_v46 }
 0x52d   : > { %v5096_v36 = vxor.u32 2147483648, %v6176_v7  ;;  %v5182_v18 = vor.u32 4788187, %v5181_v45  ;;  %v5267_v29 = vadd.s32 %v5266_v52, %v5262_v11  ;;  %v5329_v21 = vshrl.u32 %v10684_v15, %v10445_v27 }
 0x52e   : > { %v5100_v39 = vsel %vm5098_vm5, %v5099_v6, %v6176_v7  ;;  %v5332_v60 = vshrl.u32 %v10693_v23, %v10445_v27  ;;  %v5335_v31 = vshrl.u32 %v10694_v25, %v10445_v27  ;;  %v5338_v58 = vshrl.u32 %v10695_v35, %v10445_v27 }
 0x52f   : > { %v5097_v55 = vsel %vm5095_vm14, %v6174_v47, %v5096_v36  ;;  %v5183_v10 = vand.u32 2147483647, %v5182_v18  ;;  %v5268_v8 = vadd.s32 536870912, %v5267_v29  ;;  %v5330_v56 = vor.u32 %v5329_v21, %v5328_v16 }
 0x530   : > { %v5101_v24 = vsel %vm5094_vm0, %v5097_v55, %v5100_v39  ;;  %v5334_v15 = vshll.u32 %v10693_v23, %v5325_v63  ;;  %v5333_v0 = vor.u32 %v5332_v60, %v5331_v41  ;;  %v5339_v32 = vor.u32 %v5338_v58, %v5337_v33 }
 0x531   : > { %v5102_v9 = vsel %vm5091_vm1, nan, %v5101_v24  ;;  %v5186_v12 = vmul.f32 %v5185_v20, %v5183_v10  ;;  %v10472_v57 = vshrl.u32 %v5268_v8, 30  ;;  %v5319_v17 = vor.u32 8388608, %v5318_v49 }
 0x532   : > { %v5341_v25 = vshrl.u32 %v10696_v38, %v10445_v27  ;;  %5459 = vst [vmem:[%s6771_s9 + $0x160] sm:$0xff] %v5102_v9  ;;  %vm10479_vm6 = vcmp.le.f32.partialorder %v5103_v51, 0.7853982  ;;  %v5336_v1 = vor.u32 %v5335_v31, %v5334_v15  ;;  %v5340_v48 = vshll.u32 %v10695_v35, %v5325_v63 }
 0x533   : > { %v5187_v23 = vxor.u32 2147483648, %v5186_v12  ;;  %v5192_v42 = vsel %vm10479_vm6, 0, %v5190_v43  ;;  %v5270_v40 = vshll.u32 %v10472_v57, 30  ;;  %vm5343_vm7 = vcmp.lt.s32.totalorder %v10447_v34, 1 }
 0x534   : > { %vm5346_vm4 = vcmp.lt.s32.totalorder %v10447_v34, 4  ;;  %v5342_v51 = vor.u32 %v5341_v25, %v5340_v48  ;;  %v5351_v46 = vsel %vm5343_vm7, %v5330_v56, %v5333_v0  ;;  %vm5345_vm9 = vcmp.lt.s32.totalorder %v10447_v34, 3 }
 0x535   : > { %v5188_v38 = vsel %vm5105_vm8, %v5187_v23, %v5186_v12  ;;  %v5352_v5 = vsel %vm5346_vm4, %v5339_v32, 920167782  ;;  %v5271_v22 = vsub.s32 %v5267_v29, %v5270_v40  ;;  %v5359_v44 = vshll.u32 %v5319_v17, 8 }
 0x536   : > { %v5191_v35 = vsel %vm10479_vm6, %v10813_v54, %v5188_v38  ;;  %v5196_v28 = vadd.s32 3, %v5192_v42  ;;  %vm5344_vm12 = vcmp.lt.s32.totalorder %v10447_v34, 2  ;;  %v5353_v26 = vsel %vm5345_vm9, %v5336_v1, %v5352_v5 }
 0x537   : > { %6177 = vcosq.f32 %v5191_v35  ;;  %v5273_v63 = vsub.s32 0, %v5271_v22  ;;  %v5348_v13 = vsel %vm5346_vm4, %v5336_v1, 2102212464  ;;  %v5354_v3 = vsel %vm5344_vm12, %v5351_v46, %v5353_v26 }
 0x538   : > { %6179 = vsinq.f32 %v5191_v35  ;;  %v5355_v59 = vsel %vm5343_vm7, %v5333_v0, %v5336_v1  ;;  %v5356_v49 = vsel %vm5346_vm4, %v5342_v51, 1326507024  ;;  %v5327_v47 = vshrl.u32 %v10691_v37, %v10445_v27 }
 0x539   : > { %v10510_v43 = vmul.u32.u64.low %v5359_v44, %v5354_v3  ;;  %v10511_v11 = vmul.u32.u64.high %v5359_v44, %v5354_v3, %v10510_v43  ;;  %v5738_v4 = vmin.u32 %v5273_v63, %v5271_v22  ;;  %v5357_v53 = vsel %vm5345_vm9, %v5339_v32, %v5356_v49 }
 0x53a   : > { %v5358_v45 = vsel %vm5344_vm12, %v5355_v59, %v5357_v53  ;;  %v5347_v7 = vsel %vm5343_vm7, %v5327_v47, %v5330_v56  ;;  %v5349_v6 = vsel %vm5345_vm9, %v5333_v0, %v5348_v13  ;;  %v5197_v41 = vand.u32 3, %v5196_v28 }
 0x53b   : > { %v5275_v16 = vclz %v5738_v4  ;;  %v10524_v33 = vmul.u32.u64.low %v5359_v44, %v5358_v45  ;;  %v10525_v36 = vmul.u32.u64.high %v5359_v44, %v5358_v45, %v10524_v33  ;;  %v5350_v37 = vsel %vm5344_vm12, %v5347_v7, %v5349_v6 }
 0x53c   : > { %v5369_v27 = vadd.s32 1, %v10511_v11  ;;  %vm5199_vm10 = vcmp.eq.s32.totalorder %v5197_v41, 0  ;;  %v5263_v52 = vadd.s32 %v10425_v62, %v10435_v30  ;;  %v5366_v10 = vmul.u32 %v5359_v44, %v5350_v37 }
 0x53d   : > { %v5739_v18 = vadd.s32 4294967294, %v5275_v16  ;;  %vm5368_vm13 = vc.u32 %v10525_v36, %v10510_v43  ;;  %vm5202_vm11 = vcmp.eq.s32.totalorder %v5197_v41, 2  ;;  %vm5195_vm15 = vweird.f32 %v10813_v54 }
 0x53e   : > { %v5370_v58 = vsel %vm5368_vm13, %v5369_v27, %v10511_v11  ;;  %vm5198_vm2 = vcmp.lt.s32.totalorder %v5197_v41, 2  ;;  %v5293_v42 = vsub.s32 4, %v10472_v57  ;;  %vm5209_vm14 = vcmp.lt.s32.totalorder %v10816_v14, 0 }
 0x53f   : > { %vm5740_vm8 = vcmp.lt.s32.totalorder %v5739_v18, 0  ;;  %v5371_v15 = vadd.s32 %v5370_v58, %v5366_v10  ;;  %vm5208_vm0 = vcmp.le.f32.partialorder %v5207_v19, 0.7853982  ;;  %v5367_v13 = vadd.s32 %v10510_v43, %v10525_v36 }
 0x540   : > { %v5278_v39 = vsel %vm5740_vm8, 0, %v5739_v18  ;;  %v5294_v46 = vsel %vm5209_vm14, %v5293_v42, %v10472_v57  ;;  %vm5299_vm7 = vweird.f32 %v10816_v14  ;;  %vm5313_vm4 = vcmp.lt.s32.totalorder %v10819_v2, 0 }
 0x541   : > { %v6178_v20 = vpop.eup %6177  ;;  %v5279_v60 = vsub.s32 32, %v5278_v39  ;;  %v5283_v55 = vsub.s32 4294967266, %v5278_v39  ;;  %v5280_v34 = vshll.u32 %v5271_v22, %v5278_v39  ;;  %v5372_v0 = vadd.s32 536870912, %v5371_v15 }
 0x542   : > { %v6180_v29 = vpop.eup %6179  ;;  %v5203_v21 = vxor.u32 2147483648, %v6178_v20  ;;  %v5296_v44 = vsel %vm5208_vm0, 0, %v5294_v46  ;;  %vm5312_vm9 = vcmp.le.f32.partialorder %v5311_v50, 0.7853982  ;;  %vm5403_vm13 = vweird.f32 %v10819_v2 }
 0x543   : > { %v5200_v31 = vxor.u32 2147483648, %v6180_v29  ;;  %v5281_v8 = vshrl.u32 %v5263_v52, %v5279_v60  ;;  %v5284_v56 = vadd.s32 127, %v5283_v55  ;;  %v5373_v25 = vshrl.u32 %v5372_v0, 30 }
 0x544   : > { %v5204_v24 = vsel %vm5202_vm11, %v5203_v21, %v6180_v29  ;;  %v5300_v26 = vadd.s32 3, %v5296_v44 }
 0x545   : > { %v5201_v62 = vsel %vm5199_vm10, %v6178_v20, %v5200_v31  ;;  %v5282_v9 = vor.u32 %v5281_v8, %v5280_v34  ;;  %v5285_v12 = vshll.u32 %v5284_v56, 23  ;;  %v5374_v1 = vshll.u32 %v5373_v25, 30 }
 0x546   : > { %v5205_v30 = vsel %vm5198_vm2, %v5201_v62, %v5204_v24  ;;  %v5301_v19 = vand.u32 3, %v5300_v26  ;;  %v5397_v20 = vsub.s32 4, %v5373_v25 }
 0x547   : > { %v5206_v32 = vsel %vm5195_vm15, nan, %v5205_v30  ;;  %v5286_v17 = vor.u32 4788187, %v5285_v12  ;;  %v5289_v23 = vcvt.s32.f32 %v5282_v9  ;;  %v5375_v40 = vsub.s32 %v5371_v15, %v5374_v1 }
 0x548   : > { %5460 = vst [vmem:[%s6771_s9 + $0x168] sm:$0xff] %v5206_v32  ;;  %vm5306_vm5 = vcmp.eq.s32.totalorder %v5301_v19, 2  ;;  %vm5303_vm3 = vcmp.eq.s32.totalorder %v5301_v19, 0  ;;  %vm5302_vm6 = vcmp.lt.s32.totalorder %v5301_v19, 2  ;;  %v5398_v29 = vsel %vm5313_vm4, %v5397_v20, %v5373_v25 }
 0x549   : > { %v5287_v61 = vand.u32 2147483647, %v5286_v17  ;;  %v5377_v54 = vsub.s32 0, %v5375_v40  ;;  %v5400_v60 = vsel %vm5312_vm9, 0, %v5398_v29 }
 0x54b   : > { %v5290_v48 = vmul.f32 %v5289_v23, %v5287_v61  ;;  %v5742_v5 = vmin.u32 %v5377_v54, %v5375_v40 }
 0x54d   : > { %v5291_v38 = vxor.u32 2147483648, %v5290_v48  ;;  %v5379_v22 = vclz %v5742_v5 }
 0x54f   : > { %v5292_v51 = vsel %vm5209_vm14, %v5291_v38, %v5290_v48  ;;  %v5743_v28 = vadd.s32 4294967294, %v5379_v22 }
 0x550   : > { %v5295_v35 = vsel %vm5208_vm0, %v10816_v14, %v5292_v51  ;;  %v5404_v14 = vadd.s32 3, %v5400_v60 }
 0x551   : > { %6181 = vcosq.f32 %v5295_v35  ;;  %vm5744_vm1 = vcmp.lt.s32.totalorder %v5743_v28, 0 }
 0x552   : > { %6183 = vsinq.f32 %v5295_v35  ;;  %v5382_v63 = vsel %vm5744_vm1, 0, %v5743_v28  ;;  %v5405_v55 = vand.u32 3, %v5404_v14 }
 0x553   : > { %v5383_v3 = vsub.s32 32, %v5382_v63  ;;  %v5387_v59 = vsub.s32 4294967266, %v5382_v63  ;;  %v5384_v49 = vshll.u32 %v5375_v40, %v5382_v63 }
 0x554   : > { %vm5410_vm12 = vcmp.eq.s32.totalorder %v5405_v55, 2  ;;  %vm5407_vm8 = vcmp.eq.s32.totalorder %v5405_v55, 0  ;;  %vm5406_vm10 = vcmp.lt.s32.totalorder %v5405_v55, 2 }
 0x555   : > { %v5385_v11 = vshrl.u32 %v5367_v13, %v5383_v3  ;;  %v5388_v57 = vadd.s32 127, %v5387_v59 }
 0x557   : > { %v5386_v47 = vor.u32 %v5385_v11, %v5384_v49  ;;  %v5389_v53 = vshll.u32 %v5388_v57, 23 }
 0x559   : > { %v5390_v6 = vor.u32 4788187, %v5389_v53  ;;  %v5393_v36 = vcvt.s32.f32 %v5386_v47 }
 0x55b   : > { %v6182_v4 = vpop.eup %6181  ;;  %v5391_v43 = vand.u32 2147483647, %v5390_v6 }
 0x55c   : > { %v6184_v45 = vpop.eup %6183  ;;  %v5307_v16 = vxor.u32 2147483648, %v6182_v4 }
 0x55d   : > { %v5304_v7 = vxor.u32 2147483648, %v6184_v45  ;;  %v5394_v27 = vmul.f32 %v5393_v36, %v5391_v43 }
 0x55e   : > { %v5308_v41 = vsel %vm5306_vm5, %v5307_v16, %v6184_v45 }
 0x55f   : > { %v5305_v33 = vsel %vm5303_vm3, %v6182_v4, %v5304_v7  ;;  %v5395_v52 = vxor.u32 2147483648, %v5394_v27 }
 0x560   : > { %v5309_v18 = vsel %vm5302_vm6, %v5305_v33, %v5308_v41 }
 0x561   : > { %v5310_v37 = vsel %vm5299_vm7, nan, %v5309_v18  ;;  %v5396_v39 = vsel %vm5313_vm4, %v5395_v52, %v5394_v27 }
 0x562   : > { %5461 = vst [vmem:[%s6771_s9 + $0x170] sm:$0xff] %v5310_v37  ;;  %v5399_v21 = vsel %vm5312_vm9, %v10819_v2, %v5396_v39 }
 0x563   : > { %6185 = vcosq.f32 %v5399_v21 }
 0x564   : > { %6187 = vsinq.f32 %v5399_v21 }
 0x56d   : > { %v6186_v10 = vpop.eup %6185 }
 0x56e   : > { %v6188_v31 = vpop.eup %6187  ;;  %v5411_v34 = vxor.u32 2147483648, %v6186_v10  ;;  %5470 = sbr.rel (!%p6321_p5) target bundleno = 1426 (0x592), region = 36 }
 0x56f   : > { %v5408_v58 = vxor.u32 2147483648, %v6188_v31 }
 0x570   : > { %v5412_v24 = vsel %vm5410_vm12, %v5411_v34, %v6188_v31 }
 0x571   : > { %v5409_v50 = vsel %vm5407_vm8, %v6186_v10, %v5408_v58 }
 0x572   : > { %v5413_v8 = vsel %vm5406_vm10, %v5409_v50, %v5412_v24 }
 0x573   : > { %v5414_v56 = vsel %vm5403_vm13, nan, %v5413_v8 }
 0x574   : > { %5462 = vst [vmem:[%s6771_s9 + $0x178] sm:$0xff] %v5414_v56 }
 0x575   : > { %s10827_s11 = smov (!%p5473_p11, %s5472_s11), 16 }
 0x576   : > { %s10561_s17 = smul.u32 384, %s10827_s11 }
 0x578   : > { %s5478_s19 = ssub.s32 6144, %s10561_s17 }
 0x579   : > { %5479 = vsyncadd %s10556_s10, %s5478_s19  ;;  %p5748_p12 = scmp.ne.s32.totalorder %s10561_s17, 0  ;;  %s5947_s20 = smul.u32 6144, %s6304_s16 }
 0x57a   : > { %s5485_s25 = sshll.u32 %s6771_s9, 4  ;;  %s6260_s28 = smov [#allocation2]   ;;  %s10573_s25 = int_to_ptr.vmem [resolvable:$true] %s5485_s25 }
 0x57b   : > { %s10571_s27 = scalar_lea.hbm %s10620_s3, %s5947_s20  ;;  %s6189_s24 = scalar_lea.vmem %s10573_s25, %s10561_s17 }
 0x57c   : > { %p6190_p13 = scmp.ne.s32.totalorder %s10573_s25, %s6189_s24  ;;  %s6193_s29 = sshll.u32 %s6260_s28, 4  ;;  %s6194_s29 = int_to_ptr.vmem [resolvable:$false] %s6193_s29 }
 0x57d   : > { %s6195_s16 = scalar_lea.vmem %s6194_s29, 12288  ;;  %p6196_p2 = scmp.lt.s32.totalorder %s10573_s25, %s6194_s29 }
 0x57e   : > { %p6191_p0 = pnand %p6190_p13, %p5748_p12  ;;  %p6197_p3 = scmp.lt.s32.totalorder %s6195_s16, %s6189_s24 }
 0x580   : > { %p6192_p1 = pneg %p6191_p0  ;;  %p6198_p4 = por %p6197_p3, %p6196_p2 }
 0x582   : > { %p6199_p5 = pnand %p6198_p4, %p6192_p1 }
 0x584   : > { %6202 = shalt.err (!%p6199_p5)
}
 0x585   : > { %s6203_s30 = scalar_lea.hbm %s10571_s27, %s10561_s17  ;;  %s6207_s6 = scalar_lea.hbm %s10620_s3, 14592 }
 0x586   : > { %p6204_p7 = scmp.ne.s32.totalorder %s10571_s27, %s6203_s30  ;;  %p6208_p10 = scmp.lt.u32.totalorder %s10571_s27, %s10620_s3 }
 0x587   : > { %p6209_p11 = scmp.lt.u32.totalorder %s6207_s6, %s6203_s30  ;;  %p6211_p0 = scmp.lt.u32.totalorder %s6203_s30, %s10571_s27 }
 0x588   : > { %p6205_p8 = pnand %p6204_p7, %p5748_p12 }
 0x589   : > { %p6210_p13 = por %p6209_p11, %p6208_p10 }
 0x58a   : > { %p6206_p9 = pneg %p6205_p8 }
 0x58b   : > { %p6212_p1 = por %p6211_p0, %p6210_p13 }
 0x58d   : > { %p6213_p2 = pnand %p6212_p1, %p6206_p9 }
 0x58f   : > { %6216 = shalt.err (!%p6213_p2)
}
 0x590   : > { %s6261_s9 = smov 384   ;;  %s6262_s11 = smov 24  }
 0x591   : > { %5491 = dma.vmem_to_hbm [thread:$0]  (%p5748_p12), %s10573_s25, %s10561_s17, %s10571_s27, %s10556_s10, %s6261_s9, %s6261_s9, %s6262_s11  }
 0x592 PF: > { %p5953_p3 = scmp.ge.s32.totalorder %s6251_s15, 2  ;;  %s5500_s19 = sand.u32 1, %s6239_s12  }
 0x593   : > { %s5501_s20 = scalar_lea.sflag [#allocation3], %s5500_s19 }
 0x594   : > { %p5950_p4 = pnand %p5953_p3, %p6325_p6 }
 0x596   : > { %6234 = dma.done.wait (!%p5950_p4), %s5501_s20, 6144  }
 0x597   : > { %6236 = vsyncadd (!%p5950_p4), %s5501_s20, 4294961152  ;;  %p13_p5 = scmp.ge.s32.totalorder %s6308_s18, 5   ;;  %s10822_s12 = smov %s6243_s13 }
 0x598   : > { %s10823_s13 = smov %s6247_s14  ;;  %s10824_s14 = smov %s6319_s21 }
 0x599   : > { %s10825_s15 = smov %s6308_s18  ;;  %15 = sbr.rel (!%p13_p5) target bundleno = 3 (0x3), region = 67 }
 0x5a0   :  { %5506 = vsyncpa [#allocation3], 1 }
 0x5a1   :  { %5508 = vsyncpa [#allocation3 + $0x1], 1 }

</bundles_post_ra>
